<compile_context>
chip_gen: v5e
topology: v5e:2x2
jax: 0.10.0
libtpu: 0.0.40
codegen_flags: <defaults>
</compile_context>

<pallas_src>
import math
import jax
import jax.numpy as jnp
from jax.experimental import pallas as pl
from jax.experimental.pallas import tpu as pltpu


# ------------------------------ small helpers ------------------------------

def _full_spec(shape):
    nd = len(shape)
    return pl.BlockSpec(shape, lambda *_args, _nd=nd: (0,) * _nd)


def _row_tile(m, cap=512):
    """Row-block size for elementwise kernels (cdiv grid; partial blocks ok)."""
    return m if m <= cap else cap


def _row_tile_exact(m, cap=1024):
    """Row-block size that exactly divides m (needed for reductions)."""
    if m <= cap:
        return m
    for t in (cap, 512, 256, 128, 64, 32, 16, 8):
        if m % t == 0:
            return t
    return m


def _lane_fold(m, c):
    """Fold factor so (m, c) -> (m/f, c*f) presents >=128 dense lanes."""
    if c >= 128 or 128 % c != 0:
        return 1
    f = 128 // c
    while f > 1 and m % f != 0:
        f //= 2
    return f


# ----------------------------- Pallas kernels ------------------------------

def _matmul_bias_kernel(a_ref, b_ref, bias_ref, o_ref, acc_ref):
    k = pl.program_id(2)

    @pl.when(k == 0)
    def _():
        acc_ref[...] = jnp.zeros_like(acc_ref)

    acc_ref[...] += jnp.dot(a_ref[...], b_ref[...],
                            preferred_element_type=jnp.float32)

    @pl.when(k == pl.num_programs(2) - 1)
    def _():
        o_ref[...] = (acc_ref[...] + bias_ref[...]).astype(o_ref.dtype)


def _bn_stats_kernel(y_ref, sum_ref, sq_ref):
    i = pl.program_id(0)

    @pl.when(i == 0)
    def _():
        sum_ref[...] = jnp.zeros_like(sum_ref)
        sq_ref[...] = jnp.zeros_like(sq_ref)

    y = y_ref[...]
    sum_ref[...] += jnp.sum(y, axis=0, keepdims=True)
    sq_ref[...] += jnp.sum(y * y, axis=0, keepdims=True)


def _bn_relu_kernel(y_ref, scale_ref, shift_ref, o_ref):
    o_ref[...] = jnp.maximum(y_ref[...] * scale_ref[...] + shift_ref[...], 0.0)


def _bn_add_relu_kernel(y_ref, res_ref, scale_ref, shift_ref, o_ref):
    o_ref[...] = jnp.maximum(
        y_ref[...] * scale_ref[...] + shift_ref[...] + res_ref[...], 0.0)


def _max9_kernel(x0, x1, x2, x3, x4, x5, x6, x7, x8, o_ref):
    m = x0[...]
    for r in (x1, x2, x3, x4, x5, x6, x7, x8):
        m = jnp.maximum(m, r[...])
    o_ref[...] = m


def _avgpool_kernel(x_ref, o_ref):
    o_ref[...] = jnp.mean(x_ref[...], axis=1)


# ------------------------------- wrappers ----------------------------------

def matmul_bias(a, b, bias):
    """(M,K) @ (K,N) + bias[N] with bf16 operands and f32 accumulation.

    No padded copies: M/N use full-dim or 128/256 tiles with a cdiv grid
    (out-of-bounds rows/cols never feed valid outputs); K is tiled exactly.
    """
    M, K = a.shape
    _, N = b.shape

    TM = M if M <= 128 else 128
    if N <= 128:
        TN = N
    elif N % 256 == 0:
        TN = 256
    else:
        TN = 128
    TK = K
    for t in (512, 256, 128):
        if K % t == 0:
            TK = t
            break

    a16 = a.astype(jnp.bfloat16)
    b16 = b.astype(jnp.bfloat16)
    bias2 = bias.reshape(1, N).astype(jnp.float32)

    grid = (pl.cdiv(M, TM), pl.cdiv(N, TN), K // TK)
    out = pl.pallas_call(
        _matmul_bias_kernel,
        out_shape=jax.ShapeDtypeStruct((M, N), jnp.float32),
        grid=grid,
        in_specs=[pl.BlockSpec((TM, TK), lambda i, j, k: (i, k)),
                  pl.BlockSpec((TK, TN), lambda i, j, k: (k, j)),
                  pl.BlockSpec((1, TN), lambda i, j, k: (0, j))],
        out_specs=pl.BlockSpec((TM, TN), lambda i, j, k: (i, j)),
        scratch_shapes=[pltpu.VMEM((TM, TN), jnp.float32)],
        compiler_params=pltpu.CompilerParams(
            dimension_semantics=("parallel", "parallel", "arbitrary"),
            vmem_limit_bytes=32 * 1024 * 1024),
    )(a16, b16, bias2)
    return out


def conv2d(x, w, b, stride=1, padding=0):
    """x: (N,H,W,Cin) NHWC; w: (Cout,Cin,kh,kw) PyTorch layout; b: (Cout,).

    stride/padding must be static Python ints (they drive strided slicing).
    """
    N, H, W, C_in = x.shape
    C_out, _, kh, kw = w.shape
    H_out = (H + 2 * padding - kh) // stride + 1
    W_out = (W + 2 * padding - kw) // stride + 1
    x_pad = jnp.pad(x, ((0, 0), (padding, padding), (padding, padding), (0, 0)))
    # TODO(synk): fusing the kh*kw im2col taps into the matmul K grid (per-tap
    # accumulation from the strided activation) would remove this HBM-side
    # concat entirely; kept as JAX glue for now.
    patches = []
    for ky in range(kh):
        for kx in range(kw):
            patches.append(
                x_pad[:, ky:ky + stride * H_out:stride,
                      kx:kx + stride * W_out:stride, :])
    A = jnp.concatenate(patches, axis=-1).reshape(N * H_out * W_out,
                                                  kh * kw * C_in)
    # rows of B ordered (ky, kx, ci) to match the patch concat order
    B = jnp.transpose(w, (2, 3, 1, 0)).reshape(kh * kw * C_in, C_out)
    out = matmul_bias(A, B, b)
    return out.reshape(N, H_out, W_out, C_out)


def _bn_batch_stats(y):
    """Single-pass per-channel sum and sum-of-squares via a Pallas reduction."""
    M, C = y.shape
    TMS = _row_tile_exact(M)
    grid = (M // TMS,)
    csum, csq = pl.pallas_call(
        _bn_stats_kernel,
        out_shape=(jax.ShapeDtypeStruct((1, C), jnp.float32),
                   jax.ShapeDtypeStruct((1, C), jnp.float32)),
        grid=grid,
        in_specs=[pl.BlockSpec((TMS, C), lambda i: (i, 0))],
        out_specs=(pl.BlockSpec((1, C), lambda i: (0, 0)),
                   pl.BlockSpec((1, C), lambda i: (0, 0))),
        compiler_params=pltpu.CompilerParams(
            dimension_semantics=("arbitrary",)),
    )(y)
    return csum, csq


def _scale_shift_relu(y, scale, shift, residual=None):
    """Fused y*scale + shift (+ residual) -> ReLU, row-tiled and lane-dense."""
    M, C = y.shape
    f = _lane_fold(M, C)
    Mf, Cf = M // f, C * f
    yf = y.reshape(Mf, Cf)
    sc = jnp.tile(scale.reshape(1, C), (1, f))
    sh = jnp.tile(shift.reshape(1, C), (1, f))

    TMR = _row_tile(Mf)
    grid = (pl.cdiv(Mf, TMR),)
    row_spec = pl.BlockSpec((TMR, Cf), lambda i: (i, 0))
    vec_spec = pl.BlockSpec((1, Cf), lambda i: (0, 0))
    cparams = pltpu.CompilerParams(dimension_semantics=("parallel",),
                                   vmem_limit_bytes=32 * 1024 * 1024)
    if residual is None:
        out = pl.pallas_call(
            _bn_relu_kernel,
            out_shape=jax.ShapeDtypeStruct((Mf, Cf), jnp.float32),
            grid=grid,
            in_specs=[row_spec, vec_spec, vec_spec],
            out_specs=row_spec,
            compiler_params=cparams,
        )(yf, sc, sh)
    else:
        rf = residual.reshape(Mf, Cf)
        out = pl.pallas_call(
            _bn_add_relu_kernel,
            out_shape=jax.ShapeDtypeStruct((Mf, Cf), jnp.float32),
            grid=grid,
            in_specs=[row_spec, row_spec, vec_spec, vec_spec],
            out_specs=row_spec,
            compiler_params=cparams,
        )(yf, rf, sc, sh)
    return out.reshape(M, C)


def batchnorm_act(x, gamma, beta, residual=None, eps=1e-5):
    """Training-mode BatchNorm + ReLU (+ residual add)."""
    N, H, W, C = x.shape
    y = x.reshape(-1, C)
    M = y.shape[0]
    csum, csq = _bn_batch_stats(y)
    mean = csum / M
    var = jnp.maximum(csq / M - mean * mean, 0.0)   # biased var (PyTorch train)
    inv = gamma.reshape(1, C) * jax.lax.rsqrt(var + eps)
    scale = inv
    shift = beta.reshape(1, C) - mean * inv
    res2 = None if residual is None else residual.reshape(M, C)
    out = _scale_shift_relu(y, scale, shift, res2)
    return out.reshape(N, H, W, C)


def maxpool_3x3_s2_p1(x):
    N, H, W, C = x.shape
    H_out = (H + 2 - 3) // 2 + 1
    W_out = (W + 2 - 3) // 2 + 1
    x_pad = jnp.pad(x, ((0, 0), (1, 1), (1, 1), (0, 0)),
                    constant_values=-jnp.inf)
    M = N * H_out * W_out
    wins = []
    for ky in range(3):
        for kx in range(3):
            wins.append(
                x_pad[:, ky:ky + 2 * H_out:2, kx:kx + 2 * W_out:2, :]
                .reshape(M, C))
    f = _lane_fold(M, C)
    Mf, Cf = M // f, C * f
    wins = [w.reshape(Mf, Cf) for w in wins]
    TMR = _row_tile(Mf)
    grid = (pl.cdiv(Mf, TMR),)
    spec = pl.BlockSpec((TMR, Cf), lambda i: (i, 0))
    out = pl.pallas_call(
        _max9_kernel,
        out_shape=jax.ShapeDtypeStruct((Mf, Cf), jnp.float32),
        grid=grid,
        in_specs=[spec] * 9,
        out_specs=spec,
        compiler_params=pltpu.CompilerParams(
            dimension_semantics=("parallel",),
            vmem_limit_bytes=32 * 1024 * 1024),
    )(*wins)
    return out.reshape(N, H_out, W_out, C)


def global_avgpool(x):
    N, H, W, C = x.shape
    x3 = x.reshape(N, H * W, C)
    return pl.pallas_call(
        _avgpool_kernel,
        out_shape=jax.ShapeDtypeStruct((N, C), jnp.float32),
        grid=(1,),
        in_specs=[_full_spec((N, H * W, C))],
        out_specs=_full_spec((N, C)),
    )(x3)


# --------------------------- parameters / model -----------------------------

_MODULE_CFG = [(64, 64, False), (64, 128, True),
               (128, 256, True), (256, 512, True)]


def _block_static_cfg():
    cfg = []
    for in_ch, out_ch, halve in _MODULE_CFG:
        for blk_idx in range(2):
            b_in = in_ch if blk_idx == 0 else out_ch
            stride = 2 if (halve and blk_idx == 0) else 1
            cfg.append((stride, out_ch != b_in))
    return cfg


_BLOCK_CFG = _block_static_cfg()   # static (stride, has_residual_conv) per block


def _init_conv(key, c_out, c_in, kh, kw):
    fan_in = c_in * kh * kw
    bound = 1.0 / math.sqrt(fan_in)
    k1, k2 = jax.random.split(key)
    w = jax.random.uniform(k1, (c_out, c_in, kh, kw), jnp.float32, -bound, bound)
    b = jax.random.uniform(k2, (c_out,), jnp.float32, -bound, bound)
    return w, b


def _init_linear(key, n_out, n_in):
    bound = 1.0 / math.sqrt(n_in)
    k1, k2 = jax.random.split(key)
    w = jax.random.uniform(k1, (n_out, n_in), jnp.float32, -bound, bound)
    b = jax.random.uniform(k2, (n_out,), jnp.float32, -bound, bound)
    return w, b


def init_resnet18_params(key, n_outputs):
    keys = iter(jax.random.split(key, 64))
    params = {}
    params["stem_w"], params["stem_b"] = _init_conv(next(keys), 64, 1, 7, 7)
    params["stem_gamma"] = jnp.ones((64,), jnp.float32)
    params["stem_beta"] = jnp.zeros((64,), jnp.float32)

    blocks = []
    for in_ch, out_ch, halve in _MODULE_CFG:
        for blk_idx in range(2):
            b_in = in_ch if blk_idx == 0 else out_ch
            stride = 2 if (halve and blk_idx == 0) else 1
            p = {}   # arrays only; stride / has_res live in _BLOCK_CFG (static)
            p["c1_w"], p["c1_b"] = _init_conv(next(keys), out_ch, b_in, 3, 3)
            p["bn1_g"] = jnp.ones((out_ch,), jnp.float32)
            p["bn1_b"] = jnp.zeros((out_ch,), jnp.float32)
            p["c2_w"], p["c2_b"] = _init_conv(next(keys), out_ch, out_ch, 3, 3)
            p["bn2_g"] = jnp.ones((out_ch,), jnp.float32)
            p["bn2_b"] = jnp.zeros((out_ch,), jnp.float32)
            if out_ch != b_in:
                p["res_w"], p["res_b"] = _init_conv(next(keys), out_ch, b_in, 1, 1)
            blocks.append(p)
            del stride
    params["blocks"] = blocks
    params["fc_w"], params["fc_b"] = _init_linear(next(keys), n_outputs, 512)
    return params


def conv_block(x, p, stride, has_res):
    y = conv2d(x, p["c1_w"], p["c1_b"], stride=stride, padding=1)
    y = batchnorm_act(y, p["bn1_g"], p["bn1_b"])
    y = conv2d(y, p["c2_w"], p["c2_b"], stride=1, padding=1)
    if has_res:
        res = conv2d(x, p["res_w"], p["res_b"], stride=stride, padding=0)
    else:
        res = x
    return batchnorm_act(y, p["bn2_g"], p["bn2_b"], residual=res)


def resnet18_forward(params, x_nchw):
    # TODO(synk): PyTorch's __call__ NaN-check only emits a warning; omitted.
    x = jnp.transpose(x_nchw, (0, 2, 3, 1)).astype(jnp.float32)  # NCHW -> NHWC
    y = conv2d(x, params["stem_w"], params["stem_b"], stride=2, padding=3)
    y = batchnorm_act(y, params["stem_gamma"], params["stem_beta"])
    y = maxpool_3x3_s2_p1(y)
    for p, (stride, has_res) in zip(params["blocks"], _BLOCK_CFG):
        y = conv_block(y, p, stride, has_res)
    feat = global_avgpool(y)                       # (N, 512)
    out = matmul_bias(feat, params["fc_w"].T, params["fc_b"])
    return out                                     # (N, n_outputs)


if __name__ == "__main__":
    key = jax.random.PRNGKey(0)
    k_param, k_input = jax.random.split(key)
    n_outputs = 10
    params = init_resnet18_params(k_param, n_outputs)
    x = jax.random.normal(k_input, (2, 1, 32, 32), jnp.float32)  # NCHW, 1-ch

    fwd = jax.jit(resnet18_forward)
    out = fwd(params, x)
    out = jax.block_until_ready(out)
    assert out.shape == (2, n_outputs)
    assert not bool(jnp.isnan(out).any())
    print("KERNEL_OK")
</pallas_src>

<mosaic_0001>
module attributes {stable_mosaic.version = 11 : i64} {
  func.func @_matmul_bias_kernel(%arg0: i32, %arg1: i32, %arg2: i32, %arg3: memref<128x49xbf16, #tpu.memory_space<vmem>>, %arg4: memref<49x64xbf16, #tpu.memory_space<vmem>>, %arg5: memref<1x64xf32, #tpu.memory_space<vmem>>, %arg6: memref<128x64xf32, #tpu.memory_space<vmem>>, %arg7: memref<128x64xf32, #tpu.memory_space<vmem>>) attributes {dimension_semantics = [#tpu.dimension_semantics<parallel>, #tpu.dimension_semantics<parallel>, #tpu.dimension_semantics<arbitrary>], iteration_bounds = array<i64: 4, 1, 1>, scalar_prefetch = 0 : i64, scratch_operands = 1 : i64, tpu.core_type = #tpu.core_type<tc>, window_params = [{transform_indices = @transform_0, window_bounds = array<i64: 128, 49>}, {transform_indices = @transform_1, window_bounds = array<i64: 49, 64>}, {transform_indices = @transform_2, window_bounds = array<i64: 1, 64>}, {transform_indices = @transform_3, window_bounds = array<i64: 128, 64>}]} {
    %c0_i32 = arith.constant 0 : i32
    %0 = arith.cmpi eq, %arg2, %c0_i32 : i32
    %1 = arith.extui %0 : i1 to i32
    %c0_i32_0 = arith.constant 0 : i32
    %2 = arith.cmpi ne, %1, %c0_i32_0 : i32
    scf.if %2 {
      %cst_10 = arith.constant 0.000000e+00 : f32
      %12 = vector.broadcast %cst_10 : f32 to vector<128x64xf32>
      %c0_11 = arith.constant 0 : index
      %c0_12 = arith.constant 0 : index
      %13 = vector.load %arg7[%c0_11, %c0_12] : memref<128x64xf32, #tpu.memory_space<vmem>>, vector<128x64xf32>
      tpu.vector_store %arg7[%c0_11, %c0_12], %12 {strides = array<i32>} : memref<128x64xf32, #tpu.memory_space<vmem>>, vector<128x64xf32>,
    } else {
    }
    %c0 = arith.constant 0 : index
    %c0_1 = arith.constant 0 : index
    %3 = vector.load %arg7[%c0, %c0_1] : memref<128x64xf32, #tpu.memory_space<vmem>>, vector<128x64xf32>
    %c0_2 = arith.constant 0 : index
    %c0_3 = arith.constant 0 : index
    %4 = vector.load %arg3[%c0_2, %c0_3] : memref<128x49xbf16, #tpu.memory_space<vmem>>, vector<128x49xbf16>
    %c0_4 = arith.constant 0 : index
    %c0_5 = arith.constant 0 : index
    %5 = vector.load %arg4[%c0_4, %c0_5] : memref<49x64xbf16, #tpu.memory_space<vmem>>, vector<49x64xbf16>
    %cst = arith.constant dense<0.000000e+00> : vector<128x64xf32>
    %6 = tpu.matmul %4, %5, %cst {dimension_numbers = #tpu.dot_dimension_numbers<[1], [0], [0], [1], [0, 0, 1, 1], [], []>} : vector<128x49xbf16>, vector<49x64xbf16>, vector<128x64xf32> -> vector<128x64xf32>
    %7 = arith.addf %3, %6 : vector<128x64xf32>
    %c0_6 = arith.constant 0 : index
    %c0_7 = arith.constant 0 : index
    %8 = vector.load %arg7[%c0_6, %c0_7] : memref<128x64xf32, #tpu.memory_space<vmem>>, vector<128x64xf32>
    tpu.vector_store %arg7[%c0_6, %c0_7], %7 {strides = array<i32>} : memref<128x64xf32, #tpu.memory_space<vmem>>, vector<128x64xf32>,
    %c0_i32_8 = arith.constant 0 : i32
    %9 = arith.cmpi eq, %arg2, %c0_i32_8 : i32
    %10 = arith.extui %9 : i1 to i32
    %c0_i32_9 = arith.constant 0 : i32
    %11 = arith.cmpi ne, %10, %c0_i32_9 : i32
    scf.if %11 {
      %c0_10 = arith.constant 0 : index
      %c0_11 = arith.constant 0 : index
      %12 = vector.load %arg7[%c0_10, %c0_11] : memref<128x64xf32, #tpu.memory_space<vmem>>, vector<128x64xf32>
      %c0_12 = arith.constant 0 : index
      %c0_13 = arith.constant 0 : index
      %13 = vector.load %arg5[%c0_12, %c0_13] : memref<1x64xf32, #tpu.memory_space<vmem>>, vector<1x64xf32>
      %14 = vector.broadcast %13 : vector<1x64xf32> to vector<128x64xf32>
      %15 = arith.addf %12, %14 : vector<128x64xf32>
      %c0_14 = arith.constant 0 : index
      %c0_15 = arith.constant 0 : index
      %16 = vector.load %arg6[%c0_14, %c0_15] : memref<128x64xf32, #tpu.memory_space<vmem>>, vector<128x64xf32>
      tpu.vector_store %arg6[%c0_14, %c0_15], %15 {strides = array<i32>} : memref<128x64xf32, #tpu.memory_space<vmem>>, vector<128x64xf32>,
    } else {
    }
    return
  }
  func.func @transform_0(%arg0: i32, %arg1: i32, %arg2: i32) -> (i32, i32) {
    %c0_i32 = arith.constant 0 : i32
    return %arg0, %arg2 : i32, i32
  }
  func.func @transform_1(%arg0: i32, %arg1: i32, %arg2: i32) -> (i32, i32) {
    %c0_i32 = arith.constant 0 : i32
    return %arg2, %arg1 : i32, i32
  }
  func.func @transform_2(%arg0: i32, %arg1: i32, %arg2: i32) -> (i32, i32) {
    %c0_i32 = arith.constant 0 : i32
    %c0_i32_0 = arith.constant 0 : i32
    return %c0_i32, %arg1 : i32, i32
  }
  func.func @transform_3(%arg0: i32, %arg1: i32, %arg2: i32) -> (i32, i32) {
    %c0_i32 = arith.constant 0 : i32
    return %arg0, %arg1 : i32, i32
  }
}

module attributes {stable_mosaic.version = 11 : i64} {
  func.func @_bn_stats_kernel(%arg0: i32, %arg1: memref<512x64xf32, #tpu.memory_space<vmem>>, %arg2: memref<1x64xf32, #tpu.memory_space<vmem>>, %arg3: memref<1x64xf32, #tpu.memory_space<vmem>>) attributes {dimension_semantics = [#tpu.dimension_semantics<arbitrary>], iteration_bounds = array<i64: 1>, scalar_prefetch = 0 : i64, scratch_operands = 0 : i64, tpu.core_type = #tpu.core_type<tc>, window_params = [{transform_indices = @transform_0, window_bounds = array<i64: 512, 64>}, {pipeline_mode = #tpu.pipeline_mode<synchronous>, transform_indices = @transform_1, window_bounds = array<i64: 1, 64>}, {pipeline_mode = #tpu.pipeline_mode<synchronous>, transform_indices = @transform_2, window_bounds = array<i64: 1, 64>}]} {
    %c0_i32 = arith.constant 0 : i32
    %0 = arith.cmpi eq, %arg0, %c0_i32 : i32
    %1 = arith.extui %0 : i1 to i32
    %c0_i32_0 = arith.constant 0 : i32
    %2 = arith.cmpi ne, %1, %c0_i32_0 : i32
    scf.if %2 {
      %cst_11 = arith.constant 0.000000e+00 : f32
      %15 = vector.broadcast %cst_11 : f32 to vector<1x64xf32>
      %c0_12 = arith.constant 0 : index
      %c0_13 = arith.constant 0 : index
      %16 = vector.load %arg2[%c0_12, %c0_13] : memref<1x64xf32, #tpu.memory_space<vmem>>, vector<1x64xf32>
      tpu.vector_store %arg2[%c0_12, %c0_13], %15 {strides = array<i32>} : memref<1x64xf32, #tpu.memory_space<vmem>>, vector<1x64xf32>,
      %cst_14 = arith.constant 0.000000e+00 : f32
      %17 = vector.broadcast %cst_14 : f32 to vector<1x64xf32>
      %c0_15 = arith.constant 0 : index
      %c0_16 = arith.constant 0 : index
      %18 = vector.load %arg3[%c0_15, %c0_16] : memref<1x64xf32, #tpu.memory_space<vmem>>, vector<1x64xf32>
      tpu.vector_store %arg3[%c0_15, %c0_16], %17 {strides = array<i32>} : memref<1x64xf32, #tpu.memory_space<vmem>>, vector<1x64xf32>,
    } else {
    }
    %c0 = arith.constant 0 : index
    %c0_1 = arith.constant 0 : index
    %3 = vector.load %arg1[%c0, %c0_1] : memref<512x64xf32, #tpu.memory_space<vmem>>, vector<512x64xf32>
    %c0_2 = arith.constant 0 : index
    %c0_3 = arith.constant 0 : index
    %4 = vector.load %arg2[%c0_2, %c0_3] : memref<1x64xf32, #tpu.memory_space<vmem>>, vector<1x64xf32>
    %cst = arith.constant dense<0.000000e+00> : vector<64xf32>
    %5 = vector.multi_reduction <add>, %3, %cst [0] : vector<512x64xf32> to vector<64xf32>
    %6 = vector.shape_cast %5 : vector<64xf32> to vector<1x64xf32>
    %7 = arith.addf %4, %6 : vector<1x64xf32>
    %c0_4 = arith.constant 0 : index
    %c0_5 = arith.constant 0 : index
    %8 = vector.load %arg2[%c0_4, %c0_5] : memref<1x64xf32, #tpu.memory_space<vmem>>, vector<1x64xf32>
    tpu.vector_store %arg2[%c0_4, %c0_5], %7 {strides = array<i32>} : memref<1x64xf32, #tpu.memory_space<vmem>>, vector<1x64xf32>,
    %c0_6 = arith.constant 0 : index
    %c0_7 = arith.constant 0 : index
    %9 = vector.load %arg3[%c0_6, %c0_7] : memref<1x64xf32, #tpu.memory_space<vmem>>, vector<1x64xf32>
    %10 = arith.mulf %3, %3 : vector<512x64xf32>
    %cst_8 = arith.constant dense<0.000000e+00> : vector<64xf32>
    %11 = vector.multi_reduction <add>, %10, %cst_8 [0] : vector<512x64xf32> to vector<64xf32>
    %12 = vector.shape_cast %11 : vector<64xf32> to vector<1x64xf32>
    %13 = arith.addf %9, %12 : vector<1x64xf32>
    %c0_9 = arith.constant 0 : index
    %c0_10 = arith.constant 0 : index
    %14 = vector.load %arg3[%c0_9, %c0_10] : memref<1x64xf32, #tpu.memory_space<vmem>>, vector<1x64xf32>
    tpu.vector_store %arg3[%c0_9, %c0_10], %13 {strides = array<i32>} : memref<1x64xf32, #tpu.memory_space<vmem>>, vector<1x64xf32>,
    return
  }
  func.func @transform_0(%arg0: i32) -> (i32, i32) {
    %c0_i32 = arith.constant 0 : i32
    %c0_i32_0 = arith.constant 0 : i32
    return %arg0, %c0_i32 : i32, i32
  }
  func.func @transform_1(%arg0: i32) -> (i32, i32) {
    %c0_i32 = arith.constant 0 : i32
    %c0_i32_0 = arith.constant 0 : i32
    %c0_i32_1 = arith.constant 0 : i32
    return %c0_i32, %c0_i32_0 : i32, i32
  }
  func.func @transform_2(%arg0: i32) -> (i32, i32) {
    %c0_i32 = arith.constant 0 : i32
    %c0_i32_0 = arith.constant 0 : i32
    %c0_i32_1 = arith.constant 0 : i32
    return %c0_i32, %c0_i32_0 : i32, i32
  }
}

module attributes {stable_mosaic.version = 11 : i64} {
  func.func @_bn_relu_kernel(%arg0: i32, %arg1: memref<256x128xf32, #tpu.memory_space<vmem>>, %arg2: memref<1x128xf32, #tpu.memory_space<vmem>>, %arg3: memref<1x128xf32, #tpu.memory_space<vmem>>, %arg4: memref<256x128xf32, #tpu.memory_space<vmem>>) attributes {dimension_semantics = [#tpu.dimension_semantics<parallel>], iteration_bounds = array<i64: 1>, scalar_prefetch = 0 : i64, scratch_operands = 0 : i64, tpu.core_type = #tpu.core_type<tc>, window_params = [{transform_indices = @transform_0, window_bounds = array<i64: 256, 128>}, {pipeline_mode = #tpu.pipeline_mode<synchronous>, transform_indices = @transform_1, window_bounds = array<i64: 1, 128>}, {pipeline_mode = #tpu.pipeline_mode<synchronous>, transform_indices = @transform_2, window_bounds = array<i64: 1, 128>}, {transform_indices = @transform_3, window_bounds = array<i64: 256, 128>}]} {
    %c0 = arith.constant 0 : index
    %c0_0 = arith.constant 0 : index
    %0 = vector.load %arg1[%c0, %c0_0] : memref<256x128xf32, #tpu.memory_space<vmem>>, vector<256x128xf32>
    %c0_1 = arith.constant 0 : index
    %c0_2 = arith.constant 0 : index
    %1 = vector.load %arg2[%c0_1, %c0_2] : memref<1x128xf32, #tpu.memory_space<vmem>>, vector<1x128xf32>
    %2 = vector.broadcast %1 : vector<1x128xf32> to vector<256x128xf32>
    %3 = arith.mulf %0, %2 : vector<256x128xf32>
    %c0_3 = arith.constant 0 : index
    %c0_4 = arith.constant 0 : index
    %4 = vector.load %arg3[%c0_3, %c0_4] : memref<1x128xf32, #tpu.memory_space<vmem>>, vector<1x128xf32>
    %5 = vector.broadcast %4 : vector<1x128xf32> to vector<256x128xf32>
    %6 = arith.addf %3, %5 : vector<256x128xf32>
    %cst = arith.constant 0.000000e+00 : f32
    %7 = vector.broadcast %cst : f32 to vector<256x128xf32>
    %8 = arith.maximumf %6, %7 : vector<256x128xf32>
    %c0_5 = arith.constant 0 : index
    %c0_6 = arith.constant 0 : index
    %9 = vector.load %arg4[%c0_5, %c0_6] : memref<256x128xf32, #tpu.memory_space<vmem>>, vector<256x128xf32>
    tpu.vector_store %arg4[%c0_5, %c0_6], %8 {strides = array<i32>} : memref<256x128xf32, #tpu.memory_space<vmem>>, vector<256x128xf32>,
    return
  }
  func.func @transform_0(%arg0: i32) -> (i32, i32) {
    %c0_i32 = arith.constant 0 : i32
    %c0_i32_0 = arith.constant 0 : i32
    return %arg0, %c0_i32 : i32, i32
  }
  func.func @transform_1(%arg0: i32) -> (i32, i32) {
    %c0_i32 = arith.constant 0 : i32
    %c0_i32_0 = arith.constant 0 : i32
    %c0_i32_1 = arith.constant 0 : i32
    return %c0_i32, %c0_i32_0 : i32, i32
  }
  func.func @transform_2(%arg0: i32) -> (i32, i32) {
    %c0_i32 = arith.constant 0 : i32
    %c0_i32_0 = arith.constant 0 : i32
    %c0_i32_1 = arith.constant 0 : i32
    return %c0_i32, %c0_i32_0 : i32, i32
  }
  func.func @transform_3(%arg0: i32) -> (i32, i32) {
    %c0_i32 = arith.constant 0 : i32
    %c0_i32_0 = arith.constant 0 : i32
    return %arg0, %c0_i32 : i32, i32
  }
}

module attributes {stable_mosaic.version = 11 : i64} {
  func.func @_max9_kernel(%arg0: i32, %arg1: memref<64x128xf32, #tpu.memory_space<vmem>>, %arg2: memref<64x128xf32, #tpu.memory_space<vmem>>, %arg3: memref<64x128xf32, #tpu.memory_space<vmem>>, %arg4: memref<64x128xf32, #tpu.memory_space<vmem>>, %arg5: memref<64x128xf32, #tpu.memory_space<vmem>>, %arg6: memref<64x128xf32, #tpu.memory_space<vmem>>, %arg7: memref<64x128xf32, #tpu.memory_space<vmem>>, %arg8: memref<64x128xf32, #tpu.memory_space<vmem>>, %arg9: memref<64x128xf32, #tpu.memory_space<vmem>>, %arg10: memref<64x128xf32, #tpu.memory_space<vmem>>) attributes {dimension_semantics = [#tpu.dimension_semantics<parallel>], iteration_bounds = array<i64: 1>, scalar_prefetch = 0 : i64, scratch_operands = 0 : i64, tpu.core_type = #tpu.core_type<tc>, window_params = [{transform_indices = @transform_0, window_bounds = array<i64: 64, 128>}, {transform_indices = @transform_1, window_bounds = array<i64: 64, 128>}, {transform_indices = @transform_2, window_bounds = array<i64: 64, 128>}, {transform_indices = @transform_3, window_bounds = array<i64: 64, 128>}, {transform_indices = @transform_4, window_bounds = array<i64: 64, 128>}, {transform_indices = @transform_5, window_bounds = array<i64: 64, 128>}, {transform_indices = @transform_6, window_bounds = array<i64: 64, 128>}, {transform_indices = @transform_7, window_bounds = array<i64: 64, 128>}, {transform_indices = @transform_8, window_bounds = array<i64: 64, 128>}, {transform_indices = @transform_9, window_bounds = array<i64: 64, 128>}]} {
    %c0 = arith.constant 0 : index
    %c0_0 = arith.constant 0 : index
    %0 = vector.load %arg1[%c0, %c0_0] : memref<64x128xf32, #tpu.memory_space<vmem>>, vector<64x128xf32>
    %c0_1 = arith.constant 0 : index
    %c0_2 = arith.constant 0 : index
    %1 = vector.load %arg2[%c0_1, %c0_2] : memref<64x128xf32, #tpu.memory_space<vmem>>, vector<64x128xf32>
    %2 = arith.maximumf %0, %1 : vector<64x128xf32>
    %c0_3 = arith.constant 0 : index
    %c0_4 = arith.constant 0 : index
    %3 = vector.load %arg3[%c0_3, %c0_4] : memref<64x128xf32, #tpu.memory_space<vmem>>, vector<64x128xf32>
    %4 = arith.maximumf %2, %3 : vector<64x128xf32>
    %c0_5 = arith.constant 0 : index
    %c0_6 = arith.constant 0 : index
    %5 = vector.load %arg4[%c0_5, %c0_6] : memref<64x128xf32, #tpu.memory_space<vmem>>, vector<64x128xf32>
    %6 = arith.maximumf %4, %5 : vector<64x128xf32>
    %c0_7 = arith.constant 0 : index
    %c0_8 = arith.constant 0 : index
    %7 = vector.load %arg5[%c0_7, %c0_8] : memref<64x128xf32, #tpu.memory_space<vmem>>, vector<64x128xf32>
    %8 = arith.maximumf %6, %7 : vector<64x128xf32>
    %c0_9 = arith.constant 0 : index
    %c0_10 = arith.constant 0 : index
    %9 = vector.load %arg6[%c0_9, %c0_10] : memref<64x128xf32, #tpu.memory_space<vmem>>, vector<64x128xf32>
    %10 = arith.maximumf %8, %9 : vector<64x128xf32>
    %c0_11 = arith.constant 0 : index
    %c0_12 = arith.constant 0 : index
    %11 = vector.load %arg7[%c0_11, %c0_12] : memref<64x128xf32, #tpu.memory_space<vmem>>, vector<64x128xf32>
    %12 = arith.maximumf %10, %11 : vector<64x128xf32>
    %c0_13 = arith.constant 0 : index
    %c0_14 = arith.constant 0 : index
    %13 = vector.load %arg8[%c0_13, %c0_14] : memref<64x128xf32, #tpu.memory_space<vmem>>, vector<64x128xf32>
    %14 = arith.maximumf %12, %13 : vector<64x128xf32>
    %c0_15 = arith.constant 0 : index
    %c0_16 = arith.constant 0 : index
    %15 = vector.load %arg9[%c0_15, %c0_16] : memref<64x128xf32, #tpu.memory_space<vmem>>, vector<64x128xf32>
    %16 = arith.maximumf %14, %15 : vector<64x128xf32>
    %c0_17 = arith.constant 0 : index
    %c0_18 = arith.constant 0 : index
    %17 = vector.load %arg10[%c0_17, %c0_18] : memref<64x128xf32, #tpu.memory_space<vmem>>, vector<64x128xf32>
    tpu.vector_store %arg10[%c0_17, %c0_18], %16 {strides = array<i32>} : memref<64x128xf32, #tpu.memory_space<vmem>>, vector<64x128xf32>,
    return
  }
  func.func @transform_0(%arg0: i32) -> (i32, i32) {
    %c0_i32 = arith.constant 0 : i32
    %c0_i32_0 = arith.constant 0 : i32
    return %arg0, %c0_i32 : i32, i32
  }
  func.func @transform_1(%arg0: i32) -> (i32, i32) {
    %c0_i32 = arith.constant 0 : i32
    %c0_i32_0 = arith.constant 0 : i32
    return %arg0, %c0_i32 : i32, i32
  }
  func.func @transform_2(%arg0: i32) -> (i32, i32) {
    %c0_i32 = arith.constant 0 : i32
    %c0_i32_0 = arith.constant 0 : i32
    return %arg0, %c0_i32 : i32, i32
  }
  func.func @transform_3(%arg0: i32) -> (i32, i32) {
    %c0_i32 = arith.constant 0 : i32
    %c0_i32_0 = arith.constant 0 : i32
    return %arg0, %c0_i32 : i32, i32
  }
  func.func @transform_4(%arg0: i32) -> (i32, i32) {
    %c0_i32 = arith.constant 0 : i32
    %c0_i32_0 = arith.constant 0 : i32
    return %arg0, %c0_i32 : i32, i32
  }
  func.func @transform_5(%arg0: i32) -> (i32, i32) {
    %c0_i32 = arith.constant 0 : i32
    %c0_i32_0 = arith.constant 0 : i32
    return %arg0, %c0_i32 : i32, i32
  }
  func.func @transform_6(%arg0: i32) -> (i32, i32) {
    %c0_i32 = arith.constant 0 : i32
    %c0_i32_0 = arith.constant 0 : i32
    return %arg0, %c0_i32 : i32, i32
  }
  func.func @transform_7(%arg0: i32) -> (i32, i32) {
    %c0_i32 = arith.constant 0 : i32
    %c0_i32_0 = arith.constant 0 : i32
    return %arg0, %c0_i32 : i32, i32
  }
  func.func @transform_8(%arg0: i32) -> (i32, i32) {
    %c0_i32 = arith.constant 0 : i32
    %c0_i32_0 = arith.constant 0 : i32
    return %arg0, %c0_i32 : i32, i32
  }
  func.func @transform_9(%arg0: i32) -> (i32, i32) {
    %c0_i32 = arith.constant 0 : i32
    %c0_i32_0 = arith.constant 0 : i32
    return %arg0, %c0_i32 : i32, i32
  }
}

module attributes {stable_mosaic.version = 11 : i64} {
  func.func @_matmul_bias_kernel(%arg0: i32, %arg1: i32, %arg2: i32, %arg3: memref<128x576xbf16, #tpu.memory_space<vmem>>, %arg4: memref<576x64xbf16, #tpu.memory_space<vmem>>, %arg5: memref<1x64xf32, #tpu.memory_space<vmem>>, %arg6: memref<128x64xf32, #tpu.memory_space<vmem>>, %arg7: memref<128x64xf32, #tpu.memory_space<vmem>>) attributes {dimension_semantics = [#tpu.dimension_semantics<parallel>, #tpu.dimension_semantics<parallel>, #tpu.dimension_semantics<arbitrary>], iteration_bounds = array<i64: 1, 1, 1>, scalar_prefetch = 0 : i64, scratch_operands = 1 : i64, tpu.core_type = #tpu.core_type<tc>, window_params = [{transform_indices = @transform_0, window_bounds = array<i64: 128, 576>}, {transform_indices = @transform_1, window_bounds = array<i64: 576, 64>}, {transform_indices = @transform_2, window_bounds = array<i64: 1, 64>}, {transform_indices = @transform_3, window_bounds = array<i64: 128, 64>}]} {
    %c0_i32 = arith.constant 0 : i32
    %0 = arith.cmpi eq, %arg2, %c0_i32 : i32
    %1 = arith.extui %0 : i1 to i32
    %c0_i32_0 = arith.constant 0 : i32
    %2 = arith.cmpi ne, %1, %c0_i32_0 : i32
    scf.if %2 {
      %cst_10 = arith.constant 0.000000e+00 : f32
      %12 = vector.broadcast %cst_10 : f32 to vector<128x64xf32>
      %c0_11 = arith.constant 0 : index
      %c0_12 = arith.constant 0 : index
      %13 = vector.load %arg7[%c0_11, %c0_12] : memref<128x64xf32, #tpu.memory_space<vmem>>, vector<128x64xf32>
      tpu.vector_store %arg7[%c0_11, %c0_12], %12 {strides = array<i32>} : memref<128x64xf32, #tpu.memory_space<vmem>>, vector<128x64xf32>,
    } else {
    }
    %c0 = arith.constant 0 : index
    %c0_1 = arith.constant 0 : index
    %3 = vector.load %arg7[%c0, %c0_1] : memref<128x64xf32, #tpu.memory_space<vmem>>, vector<128x64xf32>
    %c0_2 = arith.constant 0 : index
    %c0_3 = arith.constant 0 : index
    %4 = vector.load %arg3[%c0_2, %c0_3] : memref<128x576xbf16, #tpu.memory_space<vmem>>, vector<128x576xbf16>
    %c0_4 = arith.constant 0 : index
    %c0_5 = arith.constant 0 : index
    %5 = vector.load %arg4[%c0_4, %c0_5] : memref<576x64xbf16, #tpu.memory_space<vmem>>, vector<576x64xbf16>
    %cst = arith.constant dense<0.000000e+00> : vector<128x64xf32>
    %6 = tpu.matmul %4, %5, %cst {dimension_numbers = #tpu.dot_dimension_numbers<[1], [0], [0], [1], [0, 0, 1, 1], [], []>} : vector<128x576xbf16>, vector<576x64xbf16>, vector<128x64xf32> -> vector<128x64xf32>
    %7 = arith.addf %3, %6 : vector<128x64xf32>
    %c0_6 = arith.constant 0 : index
    %c0_7 = arith.constant 0 : index
    %8 = vector.load %arg7[%c0_6, %c0_7] : memref<128x64xf32, #tpu.memory_space<vmem>>, vector<128x64xf32>
    tpu.vector_store %arg7[%c0_6, %c0_7], %7 {strides = array<i32>} : memref<128x64xf32, #tpu.memory_space<vmem>>, vector<128x64xf32>,
    %c0_i32_8 = arith.constant 0 : i32
    %9 = arith.cmpi eq, %arg2, %c0_i32_8 : i32
    %10 = arith.extui %9 : i1 to i32
    %c0_i32_9 = arith.constant 0 : i32
    %11 = arith.cmpi ne, %10, %c0_i32_9 : i32
    scf.if %11 {
      %c0_10 = arith.constant 0 : index
      %c0_11 = arith.constant 0 : index
      %12 = vector.load %arg7[%c0_10, %c0_11] : memref<128x64xf32, #tpu.memory_space<vmem>>, vector<128x64xf32>
      %c0_12 = arith.constant 0 : index
      %c0_13 = arith.constant 0 : index
      %13 = vector.load %arg5[%c0_12, %c0_13] : memref<1x64xf32, #tpu.memory_space<vmem>>, vector<1x64xf32>
      %14 = vector.broadcast %13 : vector<1x64xf32> to vector<128x64xf32>
      %15 = arith.addf %12, %14 : vector<128x64xf32>
      %c0_14 = arith.constant 0 : index
      %c0_15 = arith.constant 0 : index
      %16 = vector.load %arg6[%c0_14, %c0_15] : memref<128x64xf32, #tpu.memory_space<vmem>>, vector<128x64xf32>
      tpu.vector_store %arg6[%c0_14, %c0_15], %15 {strides = array<i32>} : memref<128x64xf32, #tpu.memory_space<vmem>>, vector<128x64xf32>,
    } else {
    }
    return
  }
  func.func @transform_0(%arg0: i32, %arg1: i32, %arg2: i32) -> (i32, i32) {
    %c0_i32 = arith.constant 0 : i32
    return %arg0, %arg2 : i32, i32
  }
  func.func @transform_1(%arg0: i32, %arg1: i32, %arg2: i32) -> (i32, i32) {
    %c0_i32 = arith.constant 0 : i32
    return %arg2, %arg1 : i32, i32
  }
  func.func @transform_2(%arg0: i32, %arg1: i32, %arg2: i32) -> (i32, i32) {
    %c0_i32 = arith.constant 0 : i32
    %c0_i32_0 = arith.constant 0 : i32
    return %c0_i32, %arg1 : i32, i32
  }
  func.func @transform_3(%arg0: i32, %arg1: i32, %arg2: i32) -> (i32, i32) {
    %c0_i32 = arith.constant 0 : i32
    return %arg0, %arg1 : i32, i32
  }
}

module attributes {stable_mosaic.version = 11 : i64} {
  func.func @_bn_stats_kernel(%arg0: i32, %arg1: memref<128x64xf32, #tpu.memory_space<vmem>>, %arg2: memref<1x64xf32, #tpu.memory_space<vmem>>, %arg3: memref<1x64xf32, #tpu.memory_space<vmem>>) attributes {dimension_semantics = [#tpu.dimension_semantics<arbitrary>], iteration_bounds = array<i64: 1>, scalar_prefetch = 0 : i64, scratch_operands = 0 : i64, tpu.core_type = #tpu.core_type<tc>, window_params = [{transform_indices = @transform_0, window_bounds = array<i64: 128, 64>}, {pipeline_mode = #tpu.pipeline_mode<synchronous>, transform_indices = @transform_1, window_bounds = array<i64: 1, 64>}, {pipeline_mode = #tpu.pipeline_mode<synchronous>, transform_indices = @transform_2, window_bounds = array<i64: 1, 64>}]} {
    %c0_i32 = arith.constant 0 : i32
    %0 = arith.cmpi eq, %arg0, %c0_i32 : i32
    %1 = arith.extui %0 : i1 to i32
    %c0_i32_0 = arith.constant 0 : i32
    %2 = arith.cmpi ne, %1, %c0_i32_0 : i32
    scf.if %2 {
      %cst_11 = arith.constant 0.000000e+00 : f32
      %15 = vector.broadcast %cst_11 : f32 to vector<1x64xf32>
      %c0_12 = arith.constant 0 : index
      %c0_13 = arith.constant 0 : index
      %16 = vector.load %arg2[%c0_12, %c0_13] : memref<1x64xf32, #tpu.memory_space<vmem>>, vector<1x64xf32>
      tpu.vector_store %arg2[%c0_12, %c0_13], %15 {strides = array<i32>} : memref<1x64xf32, #tpu.memory_space<vmem>>, vector<1x64xf32>,
      %cst_14 = arith.constant 0.000000e+00 : f32
      %17 = vector.broadcast %cst_14 : f32 to vector<1x64xf32>
      %c0_15 = arith.constant 0 : index
      %c0_16 = arith.constant 0 : index
      %18 = vector.load %arg3[%c0_15, %c0_16] : memref<1x64xf32, #tpu.memory_space<vmem>>, vector<1x64xf32>
      tpu.vector_store %arg3[%c0_15, %c0_16], %17 {strides = array<i32>} : memref<1x64xf32, #tpu.memory_space<vmem>>, vector<1x64xf32>,
    } else {
    }
    %c0 = arith.constant 0 : index
    %c0_1 = arith.constant 0 : index
    %3 = vector.load %arg1[%c0, %c0_1] : memref<128x64xf32, #tpu.memory_space<vmem>>, vector<128x64xf32>
    %c0_2 = arith.constant 0 : index
    %c0_3 = arith.constant 0 : index
    %4 = vector.load %arg2[%c0_2, %c0_3] : memref<1x64xf32, #tpu.memory_space<vmem>>, vector<1x64xf32>
    %cst = arith.constant dense<0.000000e+00> : vector<64xf32>
    %5 = vector.multi_reduction <add>, %3, %cst [0] : vector<128x64xf32> to vector<64xf32>
    %6 = vector.shape_cast %5 : vector<64xf32> to vector<1x64xf32>
    %7 = arith.addf %4, %6 : vector<1x64xf32>
    %c0_4 = arith.constant 0 : index
    %c0_5 = arith.constant 0 : index
    %8 = vector.load %arg2[%c0_4, %c0_5] : memref<1x64xf32, #tpu.memory_space<vmem>>, vector<1x64xf32>
    tpu.vector_store %arg2[%c0_4, %c0_5], %7 {strides = array<i32>} : memref<1x64xf32, #tpu.memory_space<vmem>>, vector<1x64xf32>,
    %c0_6 = arith.constant 0 : index
    %c0_7 = arith.constant 0 : index
    %9 = vector.load %arg3[%c0_6, %c0_7] : memref<1x64xf32, #tpu.memory_space<vmem>>, vector<1x64xf32>
    %10 = arith.mulf %3, %3 : vector<128x64xf32>
    %cst_8 = arith.constant dense<0.000000e+00> : vector<64xf32>
    %11 = vector.multi_reduction <add>, %10, %cst_8 [0] : vector<128x64xf32> to vector<64xf32>
    %12 = vector.shape_cast %11 : vector<64xf32> to vector<1x64xf32>
    %13 = arith.addf %9, %12 : vector<1x64xf32>
    %c0_9 = arith.constant 0 : index
    %c0_10 = arith.constant 0 : index
    %14 = vector.load %arg3[%c0_9, %c0_10] : memref<1x64xf32, #tpu.memory_space<vmem>>, vector<1x64xf32>
    tpu.vector_store %arg3[%c0_9, %c0_10], %13 {strides = array<i32>} : memref<1x64xf32, #tpu.memory_space<vmem>>, vector<1x64xf32>,
    return
  }
  func.func @transform_0(%arg0: i32) -> (i32, i32) {
    %c0_i32 = arith.constant 0 : i32
    %c0_i32_0 = arith.constant 0 : i32
    return %arg0, %c0_i32 : i32, i32
  }
  func.func @transform_1(%arg0: i32) -> (i32, i32) {
    %c0_i32 = arith.constant 0 : i32
    %c0_i32_0 = arith.constant 0 : i32
    %c0_i32_1 = arith.constant 0 : i32
    return %c0_i32, %c0_i32_0 : i32, i32
  }
  func.func @transform_2(%arg0: i32) -> (i32, i32) {
    %c0_i32 = arith.constant 0 : i32
    %c0_i32_0 = arith.constant 0 : i32
    %c0_i32_1 = arith.constant 0 : i32
    return %c0_i32, %c0_i32_0 : i32, i32
  }
}

module attributes {stable_mosaic.version = 11 : i64} {
  func.func @_bn_relu_kernel(%arg0: i32, %arg1: memref<64x128xf32, #tpu.memory_space<vmem>>, %arg2: memref<1x128xf32, #tpu.memory_space<vmem>>, %arg3: memref<1x128xf32, #tpu.memory_space<vmem>>, %arg4: memref<64x128xf32, #tpu.memory_space<vmem>>) attributes {dimension_semantics = [#tpu.dimension_semantics<parallel>], iteration_bounds = array<i64: 1>, scalar_prefetch = 0 : i64, scratch_operands = 0 : i64, tpu.core_type = #tpu.core_type<tc>, window_params = [{transform_indices = @transform_0, window_bounds = array<i64: 64, 128>}, {pipeline_mode = #tpu.pipeline_mode<synchronous>, transform_indices = @transform_1, window_bounds = array<i64: 1, 128>}, {pipeline_mode = #tpu.pipeline_mode<synchronous>, transform_indices = @transform_2, window_bounds = array<i64: 1, 128>}, {transform_indices = @transform_3, window_bounds = array<i64: 64, 128>}]} {
    %c0 = arith.constant 0 : index
    %c0_0 = arith.constant 0 : index
    %0 = vector.load %arg1[%c0, %c0_0] : memref<64x128xf32, #tpu.memory_space<vmem>>, vector<64x128xf32>
    %c0_1 = arith.constant 0 : index
    %c0_2 = arith.constant 0 : index
    %1 = vector.load %arg2[%c0_1, %c0_2] : memref<1x128xf32, #tpu.memory_space<vmem>>, vector<1x128xf32>
    %2 = vector.broadcast %1 : vector<1x128xf32> to vector<64x128xf32>
    %3 = arith.mulf %0, %2 : vector<64x128xf32>
    %c0_3 = arith.constant 0 : index
    %c0_4 = arith.constant 0 : index
    %4 = vector.load %arg3[%c0_3, %c0_4] : memref<1x128xf32, #tpu.memory_space<vmem>>, vector<1x128xf32>
    %5 = vector.broadcast %4 : vector<1x128xf32> to vector<64x128xf32>
    %6 = arith.addf %3, %5 : vector<64x128xf32>
    %cst = arith.constant 0.000000e+00 : f32
    %7 = vector.broadcast %cst : f32 to vector<64x128xf32>
    %8 = arith.maximumf %6, %7 : vector<64x128xf32>
    %c0_5 = arith.constant 0 : index
    %c0_6 = arith.constant 0 : index
    %9 = vector.load %arg4[%c0_5, %c0_6] : memref<64x128xf32, #tpu.memory_space<vmem>>, vector<64x128xf32>
    tpu.vector_store %arg4[%c0_5, %c0_6], %8 {strides = array<i32>} : memref<64x128xf32, #tpu.memory_space<vmem>>, vector<64x128xf32>,
    return
  }
  func.func @transform_0(%arg0: i32) -> (i32, i32) {
    %c0_i32 = arith.constant 0 : i32
    %c0_i32_0 = arith.constant 0 : i32
    return %arg0, %c0_i32 : i32, i32
  }
  func.func @transform_1(%arg0: i32) -> (i32, i32) {
    %c0_i32 = arith.constant 0 : i32
    %c0_i32_0 = arith.constant 0 : i32
    %c0_i32_1 = arith.constant 0 : i32
    return %c0_i32, %c0_i32_0 : i32, i32
  }
  func.func @transform_2(%arg0: i32) -> (i32, i32) {
    %c0_i32 = arith.constant 0 : i32
    %c0_i32_0 = arith.constant 0 : i32
    %c0_i32_1 = arith.constant 0 : i32
    return %c0_i32, %c0_i32_0 : i32, i32
  }
  func.func @transform_3(%arg0: i32) -> (i32, i32) {
    %c0_i32 = arith.constant 0 : i32
    %c0_i32_0 = arith.constant 0 : i32
    return %arg0, %c0_i32 : i32, i32
  }
}

module attributes {stable_mosaic.version = 11 : i64} {
  func.func @_bn_add_relu_kernel(%arg0: i32, %arg1: memref<64x128xf32, #tpu.memory_space<vmem>>, %arg2: memref<64x128xf32, #tpu.memory_space<vmem>>, %arg3: memref<1x128xf32, #tpu.memory_space<vmem>>, %arg4: memref<1x128xf32, #tpu.memory_space<vmem>>, %arg5: memref<64x128xf32, #tpu.memory_space<vmem>>) attributes {dimension_semantics = [#tpu.dimension_semantics<parallel>], iteration_bounds = array<i64: 1>, scalar_prefetch = 0 : i64, scratch_operands = 0 : i64, tpu.core_type = #tpu.core_type<tc>, window_params = [{transform_indices = @transform_0, window_bounds = array<i64: 64, 128>}, {transform_indices = @transform_1, window_bounds = array<i64: 64, 128>}, {pipeline_mode = #tpu.pipeline_mode<synchronous>, transform_indices = @transform_2, window_bounds = array<i64: 1, 128>}, {pipeline_mode = #tpu.pipeline_mode<synchronous>, transform_indices = @transform_3, window_bounds = array<i64: 1, 128>}, {transform_indices = @transform_4, window_bounds = array<i64: 64, 128>}]} {
    %c0 = arith.constant 0 : index
    %c0_0 = arith.constant 0 : index
    %0 = vector.load %arg1[%c0, %c0_0] : memref<64x128xf32, #tpu.memory_space<vmem>>, vector<64x128xf32>
    %c0_1 = arith.constant 0 : index
    %c0_2 = arith.constant 0 : index
    %1 = vector.load %arg3[%c0_1, %c0_2] : memref<1x128xf32, #tpu.memory_space<vmem>>, vector<1x128xf32>
    %2 = vector.broadcast %1 : vector<1x128xf32> to vector<64x128xf32>
    %3 = arith.mulf %0, %2 : vector<64x128xf32>
    %c0_3 = arith.constant 0 : index
    %c0_4 = arith.constant 0 : index
    %4 = vector.load %arg4[%c0_3, %c0_4] : memref<1x128xf32, #tpu.memory_space<vmem>>, vector<1x128xf32>
    %5 = vector.broadcast %4 : vector<1x128xf32> to vector<64x128xf32>
    %6 = arith.addf %3, %5 : vector<64x128xf32>
    %c0_5 = arith.constant 0 : index
    %c0_6 = arith.constant 0 : index
    %7 = vector.load %arg2[%c0_5, %c0_6] : memref<64x128xf32, #tpu.memory_space<vmem>>, vector<64x128xf32>
    %8 = arith.addf %6, %7 : vector<64x128xf32>
    %cst = arith.constant 0.000000e+00 : f32
    %9 = vector.broadcast %cst : f32 to vector<64x128xf32>
    %10 = arith.maximumf %8, %9 : vector<64x128xf32>
    %c0_7 = arith.constant 0 : index
    %c0_8 = arith.constant 0 : index
    %11 = vector.load %arg5[%c0_7, %c0_8] : memref<64x128xf32, #tpu.memory_space<vmem>>, vector<64x128xf32>
    tpu.vector_store %arg5[%c0_7, %c0_8], %10 {strides = array<i32>} : memref<64x128xf32, #tpu.memory_space<vmem>>, vector<64x128xf32>,
    return
  }
  func.func @transform_0(%arg0: i32) -> (i32, i32) {
    %c0_i32 = arith.constant 0 : i32
    %c0_i32_0 = arith.constant 0 : i32
    return %arg0, %c0_i32 : i32, i32
  }
  func.func @transform_1(%arg0: i32) -> (i32, i32) {
    %c0_i32 = arith.constant 0 : i32
    %c0_i32_0 = arith.constant 0 : i32
    return %arg0, %c0_i32 : i32, i32
  }
  func.func @transform_2(%arg0: i32) -> (i32, i32) {
    %c0_i32 = arith.constant 0 : i32
    %c0_i32_0 = arith.constant 0 : i32
    %c0_i32_1 = arith.constant 0 : i32
    return %c0_i32, %c0_i32_0 : i32, i32
  }
  func.func @transform_3(%arg0: i32) -> (i32, i32) {
    %c0_i32 = arith.constant 0 : i32
    %c0_i32_0 = arith.constant 0 : i32
    %c0_i32_1 = arith.constant 0 : i32
    return %c0_i32, %c0_i32_0 : i32, i32
  }
  func.func @transform_4(%arg0: i32) -> (i32, i32) {
    %c0_i32 = arith.constant 0 : i32
    %c0_i32_0 = arith.constant 0 : i32
    return %arg0, %c0_i32 : i32, i32
  }
}

module attributes {stable_mosaic.version = 11 : i64} {
  func.func @_matmul_bias_kernel(%arg0: i32, %arg1: i32, %arg2: i32, %arg3: memref<32x576xbf16, #tpu.memory_space<vmem>>, %arg4: memref<576x128xbf16, #tpu.memory_space<vmem>>, %arg5: memref<1x128xf32, #tpu.memory_space<vmem>>, %arg6: memref<32x128xf32, #tpu.memory_space<vmem>>, %arg7: memref<32x128xf32, #tpu.memory_space<vmem>>) attributes {dimension_semantics = [#tpu.dimension_semantics<parallel>, #tpu.dimension_semantics<parallel>, #tpu.dimension_semantics<arbitrary>], iteration_bounds = array<i64: 1, 1, 1>, scalar_prefetch = 0 : i64, scratch_operands = 1 : i64, tpu.core_type = #tpu.core_type<tc>, window_params = [{transform_indices = @transform_0, window_bounds = array<i64: 32, 576>}, {transform_indices = @transform_1, window_bounds = array<i64: 576, 128>}, {transform_indices = @transform_2, window_bounds = array<i64: 1, 128>}, {transform_indices = @transform_3, window_bounds = array<i64: 32, 128>}]} {
    %c0_i32 = arith.constant 0 : i32
    %0 = arith.cmpi eq, %arg2, %c0_i32 : i32
    %1 = arith.extui %0 : i1 to i32
    %c0_i32_0 = arith.constant 0 : i32
    %2 = arith.cmpi ne, %1, %c0_i32_0 : i32
    scf.if %2 {
      %cst_10 = arith.constant 0.000000e+00 : f32
      %12 = vector.broadcast %cst_10 : f32 to vector<32x128xf32>
      %c0_11 = arith.constant 0 : index
      %c0_12 = arith.constant 0 : index
      %13 = vector.load %arg7[%c0_11, %c0_12] : memref<32x128xf32, #tpu.memory_space<vmem>>, vector<32x128xf32>
      tpu.vector_store %arg7[%c0_11, %c0_12], %12 {strides = array<i32>} : memref<32x128xf32, #tpu.memory_space<vmem>>, vector<32x128xf32>,
    } else {
    }
    %c0 = arith.constant 0 : index
    %c0_1 = arith.constant 0 : index
    %3 = vector.load %arg7[%c0, %c0_1] : memref<32x128xf32, #tpu.memory_space<vmem>>, vector<32x128xf32>
    %c0_2 = arith.constant 0 : index
    %c0_3 = arith.constant 0 : index
    %4 = vector.load %arg3[%c0_2, %c0_3] : memref<32x576xbf16, #tpu.memory_space<vmem>>, vector<32x576xbf16>
    %c0_4 = arith.constant 0 : index
    %c0_5 = arith.constant 0 : index
    %5 = vector.load %arg4[%c0_4, %c0_5] : memref<576x128xbf16, #tpu.memory_space<vmem>>, vector<576x128xbf16>
    %cst = arith.constant dense<0.000000e+00> : vector<32x128xf32>
    %6 = tpu.matmul %4, %5, %cst {dimension_numbers = #tpu.dot_dimension_numbers<[1], [0], [0], [1], [0, 0, 1, 1], [], []>} : vector<32x576xbf16>, vector<576x128xbf16>, vector<32x128xf32> -> vector<32x128xf32>
    %7 = arith.addf %3, %6 : vector<32x128xf32>
    %c0_6 = arith.constant 0 : index
    %c0_7 = arith.constant 0 : index
    %8 = vector.load %arg7[%c0_6, %c0_7] : memref<32x128xf32, #tpu.memory_space<vmem>>, vector<32x128xf32>
    tpu.vector_store %arg7[%c0_6, %c0_7], %7 {strides = array<i32>} : memref<32x128xf32, #tpu.memory_space<vmem>>, vector<32x128xf32>,
    %c0_i32_8 = arith.constant 0 : i32
    %9 = arith.cmpi eq, %arg2, %c0_i32_8 : i32
    %10 = arith.extui %9 : i1 to i32
    %c0_i32_9 = arith.constant 0 : i32
    %11 = arith.cmpi ne, %10, %c0_i32_9 : i32
    scf.if %11 {
      %c0_10 = arith.constant 0 : index
      %c0_11 = arith.constant 0 : index
      %12 = vector.load %arg7[%c0_10, %c0_11] : memref<32x128xf32, #tpu.memory_space<vmem>>, vector<32x128xf32>
      %c0_12 = arith.constant 0 : index
      %c0_13 = arith.constant 0 : index
      %13 = vector.load %arg5[%c0_12, %c0_13] : memref<1x128xf32, #tpu.memory_space<vmem>>, vector<1x128xf32>
      %14 = vector.broadcast %13 : vector<1x128xf32> to vector<32x128xf32>
      %15 = arith.addf %12, %14 : vector<32x128xf32>
      %c0_14 = arith.constant 0 : index
      %c0_15 = arith.constant 0 : index
      %16 = vector.load %arg6[%c0_14, %c0_15] : memref<32x128xf32, #tpu.memory_space<vmem>>, vector<32x128xf32>
      tpu.vector_store %arg6[%c0_14, %c0_15], %15 {strides = array<i32>} : memref<32x128xf32, #tpu.memory_space<vmem>>, vector<32x128xf32>,
    } else {
    }
    return
  }
  func.func @transform_0(%arg0: i32, %arg1: i32, %arg2: i32) -> (i32, i32) {
    %c0_i32 = arith.constant 0 : i32
    return %arg0, %arg2 : i32, i32
  }
  func.func @transform_1(%arg0: i32, %arg1: i32, %arg2: i32) -> (i32, i32) {
    %c0_i32 = arith.constant 0 : i32
    return %arg2, %arg1 : i32, i32
  }
  func.func @transform_2(%arg0: i32, %arg1: i32, %arg2: i32) -> (i32, i32) {
    %c0_i32 = arith.constant 0 : i32
    %c0_i32_0 = arith.constant 0 : i32
    return %c0_i32, %arg1 : i32, i32
  }
  func.func @transform_3(%arg0: i32, %arg1: i32, %arg2: i32) -> (i32, i32) {
    %c0_i32 = arith.constant 0 : i32
    return %arg0, %arg1 : i32, i32
  }
}

module attributes {stable_mosaic.version = 11 : i64} {
  func.func @_bn_stats_kernel(%arg0: i32, %arg1: memref<32x128xf32, #tpu.memory_space<vmem>>, %arg2: memref<1x128xf32, #tpu.memory_space<vmem>>, %arg3: memref<1x128xf32, #tpu.memory_space<vmem>>) attributes {dimension_semantics = [#tpu.dimension_semantics<arbitrary>], iteration_bounds = array<i64: 1>, scalar_prefetch = 0 : i64, scratch_operands = 0 : i64, tpu.core_type = #tpu.core_type<tc>, window_params = [{transform_indices = @transform_0, window_bounds = array<i64: 32, 128>}, {pipeline_mode = #tpu.pipeline_mode<synchronous>, transform_indices = @transform_1, window_bounds = array<i64: 1, 128>}, {pipeline_mode = #tpu.pipeline_mode<synchronous>, transform_indices = @transform_2, window_bounds = array<i64: 1, 128>}]} {
    %c0_i32 = arith.constant 0 : i32
    %0 = arith.cmpi eq, %arg0, %c0_i32 : i32
    %1 = arith.extui %0 : i1 to i32
    %c0_i32_0 = arith.constant 0 : i32
    %2 = arith.cmpi ne, %1, %c0_i32_0 : i32
    scf.if %2 {
      %cst_11 = arith.constant 0.000000e+00 : f32
      %15 = vector.broadcast %cst_11 : f32 to vector<1x128xf32>
      %c0_12 = arith.constant 0 : index
      %c0_13 = arith.constant 0 : index
      %16 = vector.load %arg2[%c0_12, %c0_13] : memref<1x128xf32, #tpu.memory_space<vmem>>, vector<1x128xf32>
      tpu.vector_store %arg2[%c0_12, %c0_13], %15 {strides = array<i32>} : memref<1x128xf32, #tpu.memory_space<vmem>>, vector<1x128xf32>,
      %cst_14 = arith.constant 0.000000e+00 : f32
      %17 = vector.broadcast %cst_14 : f32 to vector<1x128xf32>
      %c0_15 = arith.constant 0 : index
      %c0_16 = arith.constant 0 : index
      %18 = vector.load %arg3[%c0_15, %c0_16] : memref<1x128xf32, #tpu.memory_space<vmem>>, vector<1x128xf32>
      tpu.vector_store %arg3[%c0_15, %c0_16], %17 {strides = array<i32>} : memref<1x128xf32, #tpu.memory_space<vmem>>, vector<1x128xf32>,
    } else {
    }
    %c0 = arith.constant 0 : index
    %c0_1 = arith.constant 0 : index
    %3 = vector.load %arg1[%c0, %c0_1] : memref<32x128xf32, #tpu.memory_space<vmem>>, vector<32x128xf32>
    %c0_2 = arith.constant 0 : index
    %c0_3 = arith.constant 0 : index
    %4 = vector.load %arg2[%c0_2, %c0_3] : memref<1x128xf32, #tpu.memory_space<vmem>>, vector<1x128xf32>
    %cst = arith.constant dense<0.000000e+00> : vector<128xf32>
    %5 = vector.multi_reduction <add>, %3, %cst [0] : vector<32x128xf32> to vector<128xf32>
    %6 = vector.shape_cast %5 : vector<128xf32> to vector<1x128xf32>
    %7 = arith.addf %4, %6 : vector<1x128xf32>
    %c0_4 = arith.constant 0 : index
    %c0_5 = arith.constant 0 : index
    %8 = vector.load %arg2[%c0_4, %c0_5] : memref<1x128xf32, #tpu.memory_space<vmem>>, vector<1x128xf32>
    tpu.vector_store %arg2[%c0_4, %c0_5], %7 {strides = array<i32>} : memref<1x128xf32, #tpu.memory_space<vmem>>, vector<1x128xf32>,
    %c0_6 = arith.constant 0 : index
    %c0_7 = arith.constant 0 : index
    %9 = vector.load %arg3[%c0_6, %c0_7] : memref<1x128xf32, #tpu.memory_space<vmem>>, vector<1x128xf32>
    %10 = arith.mulf %3, %3 : vector<32x128xf32>
    %cst_8 = arith.constant dense<0.000000e+00> : vector<128xf32>
    %11 = vector.multi_reduction <add>, %10, %cst_8 [0] : vector<32x128xf32> to vector<128xf32>
    %12 = vector.shape_cast %11 : vector<128xf32> to vector<1x128xf32>
    %13 = arith.addf %9, %12 : vector<1x128xf32>
    %c0_9 = arith.constant 0 : index
    %c0_10 = arith.constant 0 : index
    %14 = vector.load %arg3[%c0_9, %c0_10] : memref<1x128xf32, #tpu.memory_space<vmem>>, vector<1x128xf32>
    tpu.vector_store %arg3[%c0_9, %c0_10], %13 {strides = array<i32>} : memref<1x128xf32, #tpu.memory_space<vmem>>, vector<1x128xf32>,
    return
  }
  func.func @transform_0(%arg0: i32) -> (i32, i32) {
    %c0_i32 = arith.constant 0 : i32
    %c0_i32_0 = arith.constant 0 : i32
    return %arg0, %c0_i32 : i32, i32
  }
  func.func @transform_1(%arg0: i32) -> (i32, i32) {
    %c0_i32 = arith.constant 0 : i32
    %c0_i32_0 = arith.constant 0 : i32
    %c0_i32_1 = arith.constant 0 : i32
    return %c0_i32, %c0_i32_0 : i32, i32
  }
  func.func @transform_2(%arg0: i32) -> (i32, i32) {
    %c0_i32 = arith.constant 0 : i32
    %c0_i32_0 = arith.constant 0 : i32
    %c0_i32_1 = arith.constant 0 : i32
    return %c0_i32, %c0_i32_0 : i32, i32
  }
}

module attributes {stable_mosaic.version = 11 : i64} {
  func.func @_bn_relu_kernel(%arg0: i32, %arg1: memref<32x128xf32, #tpu.memory_space<vmem>>, %arg2: memref<1x128xf32, #tpu.memory_space<vmem>>, %arg3: memref<1x128xf32, #tpu.memory_space<vmem>>, %arg4: memref<32x128xf32, #tpu.memory_space<vmem>>) attributes {dimension_semantics = [#tpu.dimension_semantics<parallel>], iteration_bounds = array<i64: 1>, scalar_prefetch = 0 : i64, scratch_operands = 0 : i64, tpu.core_type = #tpu.core_type<tc>, window_params = [{transform_indices = @transform_0, window_bounds = array<i64: 32, 128>}, {pipeline_mode = #tpu.pipeline_mode<synchronous>, transform_indices = @transform_1, window_bounds = array<i64: 1, 128>}, {pipeline_mode = #tpu.pipeline_mode<synchronous>, transform_indices = @transform_2, window_bounds = array<i64: 1, 128>}, {transform_indices = @transform_3, window_bounds = array<i64: 32, 128>}]} {
    %c0 = arith.constant 0 : index
    %c0_0 = arith.constant 0 : index
    %0 = vector.load %arg1[%c0, %c0_0] : memref<32x128xf32, #tpu.memory_space<vmem>>, vector<32x128xf32>
    %c0_1 = arith.constant 0 : index
    %c0_2 = arith.constant 0 : index
    %1 = vector.load %arg2[%c0_1, %c0_2] : memref<1x128xf32, #tpu.memory_space<vmem>>, vector<1x128xf32>
    %2 = vector.broadcast %1 : vector<1x128xf32> to vector<32x128xf32>
    %3 = arith.mulf %0, %2 : vector<32x128xf32>
    %c0_3 = arith.constant 0 : index
    %c0_4 = arith.constant 0 : index
    %4 = vector.load %arg3[%c0_3, %c0_4] : memref<1x128xf32, #tpu.memory_space<vmem>>, vector<1x128xf32>
    %5 = vector.broadcast %4 : vector<1x128xf32> to vector<32x128xf32>
    %6 = arith.addf %3, %5 : vector<32x128xf32>
    %cst = arith.constant 0.000000e+00 : f32
    %7 = vector.broadcast %cst : f32 to vector<32x128xf32>
    %8 = arith.maximumf %6, %7 : vector<32x128xf32>
    %c0_5 = arith.constant 0 : index
    %c0_6 = arith.constant 0 : index
    %9 = vector.load %arg4[%c0_5, %c0_6] : memref<32x128xf32, #tpu.memory_space<vmem>>, vector<32x128xf32>
    tpu.vector_store %arg4[%c0_5, %c0_6], %8 {strides = array<i32>} : memref<32x128xf32, #tpu.memory_space<vmem>>, vector<32x128xf32>,
    return
  }
  func.func @transform_0(%arg0: i32) -> (i32, i32) {
    %c0_i32 = arith.constant 0 : i32
    %c0_i32_0 = arith.constant 0 : i32
    return %arg0, %c0_i32 : i32, i32
  }
  func.func @transform_1(%arg0: i32) -> (i32, i32) {
    %c0_i32 = arith.constant 0 : i32
    %c0_i32_0 = arith.constant 0 : i32
    %c0_i32_1 = arith.constant 0 : i32
    return %c0_i32, %c0_i32_0 : i32, i32
  }
  func.func @transform_2(%arg0: i32) -> (i32, i32) {
    %c0_i32 = arith.constant 0 : i32
    %c0_i32_0 = arith.constant 0 : i32
    %c0_i32_1 = arith.constant 0 : i32
    return %c0_i32, %c0_i32_0 : i32, i32
  }
  func.func @transform_3(%arg0: i32) -> (i32, i32) {
    %c0_i32 = arith.constant 0 : i32
    %c0_i32_0 = arith.constant 0 : i32
    return %arg0, %c0_i32 : i32, i32
  }
}

module attributes {stable_mosaic.version = 11 : i64} {
  func.func @_matmul_bias_kernel(%arg0: i32, %arg1: i32, %arg2: i32, %arg3: memref<32x128xbf16, #tpu.memory_space<vmem>>, %arg4: memref<128x128xbf16, #tpu.memory_space<vmem>>, %arg5: memref<1x128xf32, #tpu.memory_space<vmem>>, %arg6: memref<32x128xf32, #tpu.memory_space<vmem>>, %arg7: memref<32x128xf32, #tpu.memory_space<vmem>>) attributes {dimension_semantics = [#tpu.dimension_semantics<parallel>, #tpu.dimension_semantics<parallel>, #tpu.dimension_semantics<arbitrary>], iteration_bounds = array<i64: 1, 1, 9>, scalar_prefetch = 0 : i64, scratch_operands = 1 : i64, tpu.core_type = #tpu.core_type<tc>, window_params = [{transform_indices = @transform_0, window_bounds = array<i64: 32, 128>}, {transform_indices = @transform_1, window_bounds = array<i64: 128, 128>}, {transform_indices = @transform_2, window_bounds = array<i64: 1, 128>}, {transform_indices = @transform_3, window_bounds = array<i64: 32, 128>}]} {
    %c0_i32 = arith.constant 0 : i32
    %0 = arith.cmpi eq, %arg2, %c0_i32 : i32
    %1 = arith.extui %0 : i1 to i32
    %c0_i32_0 = arith.constant 0 : i32
    %2 = arith.cmpi ne, %1, %c0_i32_0 : i32
    scf.if %2 {
      %cst_9 = arith.constant 0.000000e+00 : f32
      %12 = vector.broadcast %cst_9 : f32 to vector<32x128xf32>
      %c0_10 = arith.constant 0 : index
      %c0_11 = arith.constant 0 : index
      %13 = vector.load %arg7[%c0_10, %c0_11] : memref<32x128xf32, #tpu.memory_space<vmem>>, vector<32x128xf32>
      tpu.vector_store %arg7[%c0_10, %c0_11], %12 {strides = array<i32>} : memref<32x128xf32, #tpu.memory_space<vmem>>, vector<32x128xf32>,
    } else {
    }
    %c0 = arith.constant 0 : index
    %c0_1 = arith.constant 0 : index
    %3 = vector.load %arg7[%c0, %c0_1] : memref<32x128xf32, #tpu.memory_space<vmem>>, vector<32x128xf32>
    %c0_2 = arith.constant 0 : index
    %c0_3 = arith.constant 0 : index
    %4 = vector.load %arg3[%c0_2, %c0_3] : memref<32x128xbf16, #tpu.memory_space<vmem>>, vector<32x128xbf16>
    %c0_4 = arith.constant 0 : index
    %c0_5 = arith.constant 0 : index
    %5 = vector.load %arg4[%c0_4, %c0_5] : memref<128x128xbf16, #tpu.memory_space<vmem>>, vector<128x128xbf16>
    %cst = arith.constant dense<0.000000e+00> : vector<32x128xf32>
    %6 = tpu.matmul %4, %5, %cst {dimension_numbers = #tpu.dot_dimension_numbers<[1], [0], [0], [1], [0, 0, 1, 1], [], []>} : vector<32x128xbf16>, vector<128x128xbf16>, vector<32x128xf32> -> vector<32x128xf32>
    %7 = arith.addf %3, %6 : vector<32x128xf32>
    %c0_6 = arith.constant 0 : index
    %c0_7 = arith.constant 0 : index
    %8 = vector.load %arg7[%c0_6, %c0_7] : memref<32x128xf32, #tpu.memory_space<vmem>>, vector<32x128xf32>
    tpu.vector_store %arg7[%c0_6, %c0_7], %7 {strides = array<i32>} : memref<32x128xf32, #tpu.memory_space<vmem>>, vector<32x128xf32>,
    %c8_i32 = arith.constant 8 : i32
    %9 = arith.cmpi eq, %arg2, %c8_i32 : i32
    %10 = arith.extui %9 : i1 to i32
    %c0_i32_8 = arith.constant 0 : i32
    %11 = arith.cmpi ne, %10, %c0_i32_8 : i32
    scf.if %11 {
      %c0_9 = arith.constant 0 : index
      %c0_10 = arith.constant 0 : index
      %12 = vector.load %arg7[%c0_9, %c0_10] : memref<32x128xf32, #tpu.memory_space<vmem>>, vector<32x128xf32>
      %c0_11 = arith.constant 0 : index
      %c0_12 = arith.constant 0 : index
      %13 = vector.load %arg5[%c0_11, %c0_12] : memref<1x128xf32, #tpu.memory_space<vmem>>, vector<1x128xf32>
      %14 = vector.broadcast %13 : vector<1x128xf32> to vector<32x128xf32>
      %15 = arith.addf %12, %14 : vector<32x128xf32>
      %c0_13 = arith.constant 0 : index
      %c0_14 = arith.constant 0 : index
      %16 = vector.load %arg6[%c0_13, %c0_14] : memref<32x128xf32, #tpu.memory_space<vmem>>, vector<32x128xf32>
      tpu.vector_store %arg6[%c0_13, %c0_14], %15 {strides = array<i32>} : memref<32x128xf32, #tpu.memory_space<vmem>>, vector<32x128xf32>,
    } else {
    }
    return
  }
  func.func @transform_0(%arg0: i32, %arg1: i32, %arg2: i32) -> (i32, i32) {
    %c0_i32 = arith.constant 0 : i32
    return %arg0, %arg2 : i32, i32
  }
  func.func @transform_1(%arg0: i32, %arg1: i32, %arg2: i32) -> (i32, i32) {
    %c0_i32 = arith.constant 0 : i32
    return %arg2, %arg1 : i32, i32
  }
  func.func @transform_2(%arg0: i32, %arg1: i32, %arg2: i32) -> (i32, i32) {
    %c0_i32 = arith.constant 0 : i32
    %c0_i32_0 = arith.constant 0 : i32
    return %c0_i32, %arg1 : i32, i32
  }
  func.func @transform_3(%arg0: i32, %arg1: i32, %arg2: i32) -> (i32, i32) {
    %c0_i32 = arith.constant 0 : i32
    return %arg0, %arg1 : i32, i32
  }
}

module attributes {stable_mosaic.version = 11 : i64} {
  func.func @_bn_add_relu_kernel(%arg0: i32, %arg1: memref<32x128xf32, #tpu.memory_space<vmem>>, %arg2: memref<32x128xf32, #tpu.memory_space<vmem>>, %arg3: memref<1x128xf32, #tpu.memory_space<vmem>>, %arg4: memref<1x128xf32, #tpu.memory_space<vmem>>, %arg5: memref<32x128xf32, #tpu.memory_space<vmem>>) attributes {dimension_semantics = [#tpu.dimension_semantics<parallel>], iteration_bounds = array<i64: 1>, scalar_prefetch = 0 : i64, scratch_operands = 0 : i64, tpu.core_type = #tpu.core_type<tc>, window_params = [{transform_indices = @transform_0, window_bounds = array<i64: 32, 128>}, {transform_indices = @transform_1, window_bounds = array<i64: 32, 128>}, {pipeline_mode = #tpu.pipeline_mode<synchronous>, transform_indices = @transform_2, window_bounds = array<i64: 1, 128>}, {pipeline_mode = #tpu.pipeline_mode<synchronous>, transform_indices = @transform_3, window_bounds = array<i64: 1, 128>}, {transform_indices = @transform_4, window_bounds = array<i64: 32, 128>}]} {
    %c0 = arith.constant 0 : index
    %c0_0 = arith.constant 0 : index
    %0 = vector.load %arg1[%c0, %c0_0] : memref<32x128xf32, #tpu.memory_space<vmem>>, vector<32x128xf32>
    %c0_1 = arith.constant 0 : index
    %c0_2 = arith.constant 0 : index
    %1 = vector.load %arg3[%c0_1, %c0_2] : memref<1x128xf32, #tpu.memory_space<vmem>>, vector<1x128xf32>
    %2 = vector.broadcast %1 : vector<1x128xf32> to vector<32x128xf32>
    %3 = arith.mulf %0, %2 : vector<32x128xf32>
    %c0_3 = arith.constant 0 : index
    %c0_4 = arith.constant 0 : index
    %4 = vector.load %arg4[%c0_3, %c0_4] : memref<1x128xf32, #tpu.memory_space<vmem>>, vector<1x128xf32>
    %5 = vector.broadcast %4 : vector<1x128xf32> to vector<32x128xf32>
    %6 = arith.addf %3, %5 : vector<32x128xf32>
    %c0_5 = arith.constant 0 : index
    %c0_6 = arith.constant 0 : index
    %7 = vector.load %arg2[%c0_5, %c0_6] : memref<32x128xf32, #tpu.memory_space<vmem>>, vector<32x128xf32>
    %8 = arith.addf %6, %7 : vector<32x128xf32>
    %cst = arith.constant 0.000000e+00 : f32
    %9 = vector.broadcast %cst : f32 to vector<32x128xf32>
    %10 = arith.maximumf %8, %9 : vector<32x128xf32>
    %c0_7 = arith.constant 0 : index
    %c0_8 = arith.constant 0 : index
    %11 = vector.load %arg5[%c0_7, %c0_8] : memref<32x128xf32, #tpu.memory_space<vmem>>, vector<32x128xf32>
    tpu.vector_store %arg5[%c0_7, %c0_8], %10 {strides = array<i32>} : memref<32x128xf32, #tpu.memory_space<vmem>>, vector<32x128xf32>,
    return
  }
  func.func @transform_0(%arg0: i32) -> (i32, i32) {
    %c0_i32 = arith.constant 0 : i32
    %c0_i32_0 = arith.constant 0 : i32
    return %arg0, %c0_i32 : i32, i32
  }
  func.func @transform_1(%arg0: i32) -> (i32, i32) {
    %c0_i32 = arith.constant 0 : i32
    %c0_i32_0 = arith.constant 0 : i32
    return %arg0, %c0_i32 : i32, i32
  }
  func.func @transform_2(%arg0: i32) -> (i32, i32) {
    %c0_i32 = arith.constant 0 : i32
    %c0_i32_0 = arith.constant 0 : i32
    %c0_i32_1 = arith.constant 0 : i32
    return %c0_i32, %c0_i32_0 : i32, i32
  }
  func.func @transform_3(%arg0: i32) -> (i32, i32) {
    %c0_i32 = arith.constant 0 : i32
    %c0_i32_0 = arith.constant 0 : i32
    %c0_i32_1 = arith.constant 0 : i32
    return %c0_i32, %c0_i32_0 : i32, i32
  }
  func.func @transform_4(%arg0: i32) -> (i32, i32) {
    %c0_i32 = arith.constant 0 : i32
    %c0_i32_0 = arith.constant 0 : i32
    return %arg0, %c0_i32 : i32, i32
  }
}

module attributes {stable_mosaic.version = 11 : i64} {
  func.func @_matmul_bias_kernel(%arg0: i32, %arg1: i32, %arg2: i32, %arg3: memref<32x64xbf16, #tpu.memory_space<vmem>>, %arg4: memref<64x128xbf16, #tpu.memory_space<vmem>>, %arg5: memref<1x128xf32, #tpu.memory_space<vmem>>, %arg6: memref<32x128xf32, #tpu.memory_space<vmem>>, %arg7: memref<32x128xf32, #tpu.memory_space<vmem>>) attributes {dimension_semantics = [#tpu.dimension_semantics<parallel>, #tpu.dimension_semantics<parallel>, #tpu.dimension_semantics<arbitrary>], iteration_bounds = array<i64: 1, 1, 1>, scalar_prefetch = 0 : i64, scratch_operands = 1 : i64, tpu.core_type = #tpu.core_type<tc>, window_params = [{transform_indices = @transform_0, window_bounds = array<i64: 32, 64>}, {transform_indices = @transform_1, window_bounds = array<i64: 64, 128>}, {transform_indices = @transform_2, window_bounds = array<i64: 1, 128>}, {transform_indices = @transform_3, window_bounds = array<i64: 32, 128>}]} {
    %c0_i32 = arith.constant 0 : i32
    %0 = arith.cmpi eq, %arg2, %c0_i32 : i32
    %1 = arith.extui %0 : i1 to i32
    %c0_i32_0 = arith.constant 0 : i32
    %2 = arith.cmpi ne, %1, %c0_i32_0 : i32
    scf.if %2 {
      %cst_10 = arith.constant 0.000000e+00 : f32
      %12 = vector.broadcast %cst_10 : f32 to vector<32x128xf32>
      %c0_11 = arith.constant 0 : index
      %c0_12 = arith.constant 0 : index
      %13 = vector.load %arg7[%c0_11, %c0_12] : memref<32x128xf32, #tpu.memory_space<vmem>>, vector<32x128xf32>
      tpu.vector_store %arg7[%c0_11, %c0_12], %12 {strides = array<i32>} : memref<32x128xf32, #tpu.memory_space<vmem>>, vector<32x128xf32>,
    } else {
    }
    %c0 = arith.constant 0 : index
    %c0_1 = arith.constant 0 : index
    %3 = vector.load %arg7[%c0, %c0_1] : memref<32x128xf32, #tpu.memory_space<vmem>>, vector<32x128xf32>
    %c0_2 = arith.constant 0 : index
    %c0_3 = arith.constant 0 : index
    %4 = vector.load %arg3[%c0_2, %c0_3] : memref<32x64xbf16, #tpu.memory_space<vmem>>, vector<32x64xbf16>
    %c0_4 = arith.constant 0 : index
    %c0_5 = arith.constant 0 : index
    %5 = vector.load %arg4[%c0_4, %c0_5] : memref<64x128xbf16, #tpu.memory_space<vmem>>, vector<64x128xbf16>
    %cst = arith.constant dense<0.000000e+00> : vector<32x128xf32>
    %6 = tpu.matmul %4, %5, %cst {dimension_numbers = #tpu.dot_dimension_numbers<[1], [0], [0], [1], [0, 0, 1, 1], [], []>} : vector<32x64xbf16>, vector<64x128xbf16>, vector<32x128xf32> -> vector<32x128xf32>
    %7 = arith.addf %3, %6 : vector<32x128xf32>
    %c0_6 = arith.constant 0 : index
    %c0_7 = arith.constant 0 : index
    %8 = vector.load %arg7[%c0_6, %c0_7] : memref<32x128xf32, #tpu.memory_space<vmem>>, vector<32x128xf32>
    tpu.vector_store %arg7[%c0_6, %c0_7], %7 {strides = array<i32>} : memref<32x128xf32, #tpu.memory_space<vmem>>, vector<32x128xf32>,
    %c0_i32_8 = arith.constant 0 : i32
    %9 = arith.cmpi eq, %arg2, %c0_i32_8 : i32
    %10 = arith.extui %9 : i1 to i32
    %c0_i32_9 = arith.constant 0 : i32
    %11 = arith.cmpi ne, %10, %c0_i32_9 : i32
    scf.if %11 {
      %c0_10 = arith.constant 0 : index
      %c0_11 = arith.constant 0 : index
      %12 = vector.load %arg7[%c0_10, %c0_11] : memref<32x128xf32, #tpu.memory_space<vmem>>, vector<32x128xf32>
      %c0_12 = arith.constant 0 : index
      %c0_13 = arith.constant 0 : index
      %13 = vector.load %arg5[%c0_12, %c0_13] : memref<1x128xf32, #tpu.memory_space<vmem>>, vector<1x128xf32>
      %14 = vector.broadcast %13 : vector<1x128xf32> to vector<32x128xf32>
      %15 = arith.addf %12, %14 : vector<32x128xf32>
      %c0_14 = arith.constant 0 : index
      %c0_15 = arith.constant 0 : index
      %16 = vector.load %arg6[%c0_14, %c0_15] : memref<32x128xf32, #tpu.memory_space<vmem>>, vector<32x128xf32>
      tpu.vector_store %arg6[%c0_14, %c0_15], %15 {strides = array<i32>} : memref<32x128xf32, #tpu.memory_space<vmem>>, vector<32x128xf32>,
    } else {
    }
    return
  }
  func.func @transform_0(%arg0: i32, %arg1: i32, %arg2: i32) -> (i32, i32) {
    %c0_i32 = arith.constant 0 : i32
    return %arg0, %arg2 : i32, i32
  }
  func.func @transform_1(%arg0: i32, %arg1: i32, %arg2: i32) -> (i32, i32) {
    %c0_i32 = arith.constant 0 : i32
    return %arg2, %arg1 : i32, i32
  }
  func.func @transform_2(%arg0: i32, %arg1: i32, %arg2: i32) -> (i32, i32) {
    %c0_i32 = arith.constant 0 : i32
    %c0_i32_0 = arith.constant 0 : i32
    return %c0_i32, %arg1 : i32, i32
  }
  func.func @transform_3(%arg0: i32, %arg1: i32, %arg2: i32) -> (i32, i32) {
    %c0_i32 = arith.constant 0 : i32
    return %arg0, %arg1 : i32, i32
  }
}

module attributes {stable_mosaic.version = 11 : i64} {
  func.func @_matmul_bias_kernel(%arg0: i32, %arg1: i32, %arg2: i32, %arg3: memref<8x128xbf16, #tpu.memory_space<vmem>>, %arg4: memref<128x256xbf16, #tpu.memory_space<vmem>>, %arg5: memref<1x256xf32, #tpu.memory_space<vmem>>, %arg6: memref<8x256xf32, #tpu.memory_space<vmem>>, %arg7: memref<8x256xf32, #tpu.memory_space<vmem>>) attributes {dimension_semantics = [#tpu.dimension_semantics<parallel>, #tpu.dimension_semantics<parallel>, #tpu.dimension_semantics<arbitrary>], iteration_bounds = array<i64: 1, 1, 9>, scalar_prefetch = 0 : i64, scratch_operands = 1 : i64, tpu.core_type = #tpu.core_type<tc>, window_params = [{transform_indices = @transform_0, window_bounds = array<i64: 8, 128>}, {transform_indices = @transform_1, window_bounds = array<i64: 128, 256>}, {transform_indices = @transform_2, window_bounds = array<i64: 1, 256>}, {transform_indices = @transform_3, window_bounds = array<i64: 8, 256>}]} {
    %c0_i32 = arith.constant 0 : i32
    %0 = arith.cmpi eq, %arg2, %c0_i32 : i32
    %1 = arith.extui %0 : i1 to i32
    %c0_i32_0 = arith.constant 0 : i32
    %2 = arith.cmpi ne, %1, %c0_i32_0 : i32
    scf.if %2 {
      %cst_9 = arith.constant 0.000000e+00 : f32
      %12 = vector.broadcast %cst_9 : f32 to vector<8x256xf32>
      %c0_10 = arith.constant 0 : index
      %c0_11 = arith.constant 0 : index
      %13 = vector.load %arg7[%c0_10, %c0_11] : memref<8x256xf32, #tpu.memory_space<vmem>>, vector<8x256xf32>
      tpu.vector_store %arg7[%c0_10, %c0_11], %12 {strides = array<i32>} : memref<8x256xf32, #tpu.memory_space<vmem>>, vector<8x256xf32>,
    } else {
    }
    %c0 = arith.constant 0 : index
    %c0_1 = arith.constant 0 : index
    %3 = vector.load %arg7[%c0, %c0_1] : memref<8x256xf32, #tpu.memory_space<vmem>>, vector<8x256xf32>
    %c0_2 = arith.constant 0 : index
    %c0_3 = arith.constant 0 : index
    %4 = vector.load %arg3[%c0_2, %c0_3] : memref<8x128xbf16, #tpu.memory_space<vmem>>, vector<8x128xbf16>
    %c0_4 = arith.constant 0 : index
    %c0_5 = arith.constant 0 : index
    %5 = vector.load %arg4[%c0_4, %c0_5] : memref<128x256xbf16, #tpu.memory_space<vmem>>, vector<128x256xbf16>
    %cst = arith.constant dense<0.000000e+00> : vector<8x256xf32>
    %6 = tpu.matmul %4, %5, %cst {dimension_numbers = #tpu.dot_dimension_numbers<[1], [0], [0], [1], [0, 0, 1, 1], [], []>} : vector<8x128xbf16>, vector<128x256xbf16>, vector<8x256xf32> -> vector<8x256xf32>
    %7 = arith.addf %3, %6 : vector<8x256xf32>
    %c0_6 = arith.constant 0 : index
    %c0_7 = arith.constant 0 : index
    %8 = vector.load %arg7[%c0_6, %c0_7] : memref<8x256xf32, #tpu.memory_space<vmem>>, vector<8x256xf32>
    tpu.vector_store %arg7[%c0_6, %c0_7], %7 {strides = array<i32>} : memref<8x256xf32, #tpu.memory_space<vmem>>, vector<8x256xf32>,
    %c8_i32 = arith.constant 8 : i32
    %9 = arith.cmpi eq, %arg2, %c8_i32 : i32
    %10 = arith.extui %9 : i1 to i32
    %c0_i32_8 = arith.constant 0 : i32
    %11 = arith.cmpi ne, %10, %c0_i32_8 : i32
    scf.if %11 {
      %c0_9 = arith.constant 0 : index
      %c0_10 = arith.constant 0 : index
      %12 = vector.load %arg7[%c0_9, %c0_10] : memref<8x256xf32, #tpu.memory_space<vmem>>, vector<8x256xf32>
      %c0_11 = arith.constant 0 : index
      %c0_12 = arith.constant 0 : index
      %13 = vector.load %arg5[%c0_11, %c0_12] : memref<1x256xf32, #tpu.memory_space<vmem>>, vector<1x256xf32>
      %14 = vector.broadcast %13 : vector<1x256xf32> to vector<8x256xf32>
      %15 = arith.addf %12, %14 : vector<8x256xf32>
      %c0_13 = arith.constant 0 : index
      %c0_14 = arith.constant 0 : index
      %16 = vector.load %arg6[%c0_13, %c0_14] : memref<8x256xf32, #tpu.memory_space<vmem>>, vector<8x256xf32>
      tpu.vector_store %arg6[%c0_13, %c0_14], %15 {strides = array<i32>} : memref<8x256xf32, #tpu.memory_space<vmem>>, vector<8x256xf32>,
    } else {
    }
    return
  }
  func.func @transform_0(%arg0: i32, %arg1: i32, %arg2: i32) -> (i32, i32) {
    %c0_i32 = arith.constant 0 : i32
    return %arg0, %arg2 : i32, i32
  }
  func.func @transform_1(%arg0: i32, %arg1: i32, %arg2: i32) -> (i32, i32) {
    %c0_i32 = arith.constant 0 : i32
    return %arg2, %arg1 : i32, i32
  }
  func.func @transform_2(%arg0: i32, %arg1: i32, %arg2: i32) -> (i32, i32) {
    %c0_i32 = arith.constant 0 : i32
    %c0_i32_0 = arith.constant 0 : i32
    return %c0_i32, %arg1 : i32, i32
  }
  func.func @transform_3(%arg0: i32, %arg1: i32, %arg2: i32) -> (i32, i32) {
    %c0_i32 = arith.constant 0 : i32
    return %arg0, %arg1 : i32, i32
  }
}

module attributes {stable_mosaic.version = 11 : i64} {
  func.func @_bn_stats_kernel(%arg0: i32, %arg1: memref<8x256xf32, #tpu.memory_space<vmem>>, %arg2: memref<1x256xf32, #tpu.memory_space<vmem>>, %arg3: memref<1x256xf32, #tpu.memory_space<vmem>>) attributes {dimension_semantics = [#tpu.dimension_semantics<arbitrary>], iteration_bounds = array<i64: 1>, scalar_prefetch = 0 : i64, scratch_operands = 0 : i64, tpu.core_type = #tpu.core_type<tc>, window_params = [{transform_indices = @transform_0, window_bounds = array<i64: 8, 256>}, {pipeline_mode = #tpu.pipeline_mode<synchronous>, transform_indices = @transform_1, window_bounds = array<i64: 1, 256>}, {pipeline_mode = #tpu.pipeline_mode<synchronous>, transform_indices = @transform_2, window_bounds = array<i64: 1, 256>}]} {
    %c0_i32 = arith.constant 0 : i32
    %0 = arith.cmpi eq, %arg0, %c0_i32 : i32
    %1 = arith.extui %0 : i1 to i32
    %c0_i32_0 = arith.constant 0 : i32
    %2 = arith.cmpi ne, %1, %c0_i32_0 : i32
    scf.if %2 {
      %cst_11 = arith.constant 0.000000e+00 : f32
      %15 = vector.broadcast %cst_11 : f32 to vector<1x256xf32>
      %c0_12 = arith.constant 0 : index
      %c0_13 = arith.constant 0 : index
      %16 = vector.load %arg2[%c0_12, %c0_13] : memref<1x256xf32, #tpu.memory_space<vmem>>, vector<1x256xf32>
      tpu.vector_store %arg2[%c0_12, %c0_13], %15 {strides = array<i32>} : memref<1x256xf32, #tpu.memory_space<vmem>>, vector<1x256xf32>,
      %cst_14 = arith.constant 0.000000e+00 : f32
      %17 = vector.broadcast %cst_14 : f32 to vector<1x256xf32>
      %c0_15 = arith.constant 0 : index
      %c0_16 = arith.constant 0 : index
      %18 = vector.load %arg3[%c0_15, %c0_16] : memref<1x256xf32, #tpu.memory_space<vmem>>, vector<1x256xf32>
      tpu.vector_store %arg3[%c0_15, %c0_16], %17 {strides = array<i32>} : memref<1x256xf32, #tpu.memory_space<vmem>>, vector<1x256xf32>,
    } else {
    }
    %c0 = arith.constant 0 : index
    %c0_1 = arith.constant 0 : index
    %3 = vector.load %arg1[%c0, %c0_1] : memref<8x256xf32, #tpu.memory_space<vmem>>, vector<8x256xf32>
    %c0_2 = arith.constant 0 : index
    %c0_3 = arith.constant 0 : index
    %4 = vector.load %arg2[%c0_2, %c0_3] : memref<1x256xf32, #tpu.memory_space<vmem>>, vector<1x256xf32>
    %cst = arith.constant dense<0.000000e+00> : vector<256xf32>
    %5 = vector.multi_reduction <add>, %3, %cst [0] : vector<8x256xf32> to vector<256xf32>
    %6 = vector.shape_cast %5 : vector<256xf32> to vector<1x256xf32>
    %7 = arith.addf %4, %6 : vector<1x256xf32>
    %c0_4 = arith.constant 0 : index
    %c0_5 = arith.constant 0 : index
    %8 = vector.load %arg2[%c0_4, %c0_5] : memref<1x256xf32, #tpu.memory_space<vmem>>, vector<1x256xf32>
    tpu.vector_store %arg2[%c0_4, %c0_5], %7 {strides = array<i32>} : memref<1x256xf32, #tpu.memory_space<vmem>>, vector<1x256xf32>,
    %c0_6 = arith.constant 0 : index
    %c0_7 = arith.constant 0 : index
    %9 = vector.load %arg3[%c0_6, %c0_7] : memref<1x256xf32, #tpu.memory_space<vmem>>, vector<1x256xf32>
    %10 = arith.mulf %3, %3 : vector<8x256xf32>
    %cst_8 = arith.constant dense<0.000000e+00> : vector<256xf32>
    %11 = vector.multi_reduction <add>, %10, %cst_8 [0] : vector<8x256xf32> to vector<256xf32>
    %12 = vector.shape_cast %11 : vector<256xf32> to vector<1x256xf32>
    %13 = arith.addf %9, %12 : vector<1x256xf32>
    %c0_9 = arith.constant 0 : index
    %c0_10 = arith.constant 0 : index
    %14 = vector.load %arg3[%c0_9, %c0_10] : memref<1x256xf32, #tpu.memory_space<vmem>>, vector<1x256xf32>
    tpu.vector_store %arg3[%c0_9, %c0_10], %13 {strides = array<i32>} : memref<1x256xf32, #tpu.memory_space<vmem>>, vector<1x256xf32>,
    return
  }
  func.func @transform_0(%arg0: i32) -> (i32, i32) {
    %c0_i32 = arith.constant 0 : i32
    %c0_i32_0 = arith.constant 0 : i32
    return %arg0, %c0_i32 : i32, i32
  }
  func.func @transform_1(%arg0: i32) -> (i32, i32) {
    %c0_i32 = arith.constant 0 : i32
    %c0_i32_0 = arith.constant 0 : i32
    %c0_i32_1 = arith.constant 0 : i32
    return %c0_i32, %c0_i32_0 : i32, i32
  }
  func.func @transform_2(%arg0: i32) -> (i32, i32) {
    %c0_i32 = arith.constant 0 : i32
    %c0_i32_0 = arith.constant 0 : i32
    %c0_i32_1 = arith.constant 0 : i32
    return %c0_i32, %c0_i32_0 : i32, i32
  }
}

module attributes {stable_mosaic.version = 11 : i64} {
  func.func @_bn_relu_kernel(%arg0: i32, %arg1: memref<8x256xf32, #tpu.memory_space<vmem>>, %arg2: memref<1x256xf32, #tpu.memory_space<vmem>>, %arg3: memref<1x256xf32, #tpu.memory_space<vmem>>, %arg4: memref<8x256xf32, #tpu.memory_space<vmem>>) attributes {dimension_semantics = [#tpu.dimension_semantics<parallel>], iteration_bounds = array<i64: 1>, scalar_prefetch = 0 : i64, scratch_operands = 0 : i64, tpu.core_type = #tpu.core_type<tc>, window_params = [{transform_indices = @transform_0, window_bounds = array<i64: 8, 256>}, {pipeline_mode = #tpu.pipeline_mode<synchronous>, transform_indices = @transform_1, window_bounds = array<i64: 1, 256>}, {pipeline_mode = #tpu.pipeline_mode<synchronous>, transform_indices = @transform_2, window_bounds = array<i64: 1, 256>}, {transform_indices = @transform_3, window_bounds = array<i64: 8, 256>}]} {
    %c0 = arith.constant 0 : index
    %c0_0 = arith.constant 0 : index
    %0 = vector.load %arg1[%c0, %c0_0] : memref<8x256xf32, #tpu.memory_space<vmem>>, vector<8x256xf32>
    %c0_1 = arith.constant 0 : index
    %c0_2 = arith.constant 0 : index
    %1 = vector.load %arg2[%c0_1, %c0_2] : memref<1x256xf32, #tpu.memory_space<vmem>>, vector<1x256xf32>
    %2 = vector.broadcast %1 : vector<1x256xf32> to vector<8x256xf32>
    %3 = arith.mulf %0, %2 : vector<8x256xf32>
    %c0_3 = arith.constant 0 : index
    %c0_4 = arith.constant 0 : index
    %4 = vector.load %arg3[%c0_3, %c0_4] : memref<1x256xf32, #tpu.memory_space<vmem>>, vector<1x256xf32>
    %5 = vector.broadcast %4 : vector<1x256xf32> to vector<8x256xf32>
    %6 = arith.addf %3, %5 : vector<8x256xf32>
    %cst = arith.constant 0.000000e+00 : f32
    %7 = vector.broadcast %cst : f32 to vector<8x256xf32>
    %8 = arith.maximumf %6, %7 : vector<8x256xf32>
    %c0_5 = arith.constant 0 : index
    %c0_6 = arith.constant 0 : index
    %9 = vector.load %arg4[%c0_5, %c0_6] : memref<8x256xf32, #tpu.memory_space<vmem>>, vector<8x256xf32>
    tpu.vector_store %arg4[%c0_5, %c0_6], %8 {strides = array<i32>} : memref<8x256xf32, #tpu.memory_space<vmem>>, vector<8x256xf32>,
    return
  }
  func.func @transform_0(%arg0: i32) -> (i32, i32) {
    %c0_i32 = arith.constant 0 : i32
    %c0_i32_0 = arith.constant 0 : i32
    return %arg0, %c0_i32 : i32, i32
  }
  func.func @transform_1(%arg0: i32) -> (i32, i32) {
    %c0_i32 = arith.constant 0 : i32
    %c0_i32_0 = arith.constant 0 : i32
    %c0_i32_1 = arith.constant 0 : i32
    return %c0_i32, %c0_i32_0 : i32, i32
  }
  func.func @transform_2(%arg0: i32) -> (i32, i32) {
    %c0_i32 = arith.constant 0 : i32
    %c0_i32_0 = arith.constant 0 : i32
    %c0_i32_1 = arith.constant 0 : i32
    return %c0_i32, %c0_i32_0 : i32, i32
  }
  func.func @transform_3(%arg0: i32) -> (i32, i32) {
    %c0_i32 = arith.constant 0 : i32
    %c0_i32_0 = arith.constant 0 : i32
    return %arg0, %c0_i32 : i32, i32
  }
}

module attributes {stable_mosaic.version = 11 : i64} {
  func.func @_matmul_bias_kernel(%arg0: i32, %arg1: i32, %arg2: i32, %arg3: memref<8x256xbf16, #tpu.memory_space<vmem>>, %arg4: memref<256x256xbf16, #tpu.memory_space<vmem>>, %arg5: memref<1x256xf32, #tpu.memory_space<vmem>>, %arg6: memref<8x256xf32, #tpu.memory_space<vmem>>, %arg7: memref<8x256xf32, #tpu.memory_space<vmem>>) attributes {dimension_semantics = [#tpu.dimension_semantics<parallel>, #tpu.dimension_semantics<parallel>, #tpu.dimension_semantics<arbitrary>], iteration_bounds = array<i64: 1, 1, 9>, scalar_prefetch = 0 : i64, scratch_operands = 1 : i64, tpu.core_type = #tpu.core_type<tc>, window_params = [{transform_indices = @transform_0, window_bounds = array<i64: 8, 256>}, {transform_indices = @transform_1, window_bounds = array<i64: 256, 256>}, {transform_indices = @transform_2, window_bounds = array<i64: 1, 256>}, {transform_indices = @transform_3, window_bounds = array<i64: 8, 256>}]} {
    %c0_i32 = arith.constant 0 : i32
    %0 = arith.cmpi eq, %arg2, %c0_i32 : i32
    %1 = arith.extui %0 : i1 to i32
    %c0_i32_0 = arith.constant 0 : i32
    %2 = arith.cmpi ne, %1, %c0_i32_0 : i32
    scf.if %2 {
      %cst_9 = arith.constant 0.000000e+00 : f32
      %12 = vector.broadcast %cst_9 : f32 to vector<8x256xf32>
      %c0_10 = arith.constant 0 : index
      %c0_11 = arith.constant 0 : index
      %13 = vector.load %arg7[%c0_10, %c0_11] : memref<8x256xf32, #tpu.memory_space<vmem>>, vector<8x256xf32>
      tpu.vector_store %arg7[%c0_10, %c0_11], %12 {strides = array<i32>} : memref<8x256xf32, #tpu.memory_space<vmem>>, vector<8x256xf32>,
    } else {
    }
    %c0 = arith.constant 0 : index
    %c0_1 = arith.constant 0 : index
    %3 = vector.load %arg7[%c0, %c0_1] : memref<8x256xf32, #tpu.memory_space<vmem>>, vector<8x256xf32>
    %c0_2 = arith.constant 0 : index
    %c0_3 = arith.constant 0 : index
    %4 = vector.load %arg3[%c0_2, %c0_3] : memref<8x256xbf16, #tpu.memory_space<vmem>>, vector<8x256xbf16>
    %c0_4 = arith.constant 0 : index
    %c0_5 = arith.constant 0 : index
    %5 = vector.load %arg4[%c0_4, %c0_5] : memref<256x256xbf16, #tpu.memory_space<vmem>>, vector<256x256xbf16>
    %cst = arith.constant dense<0.000000e+00> : vector<8x256xf32>
    %6 = tpu.matmul %4, %5, %cst {dimension_numbers = #tpu.dot_dimension_numbers<[1], [0], [0], [1], [0, 0, 1, 1], [], []>} : vector<8x256xbf16>, vector<256x256xbf16>, vector<8x256xf32> -> vector<8x256xf32>
    %7 = arith.addf %3, %6 : vector<8x256xf32>
    %c0_6 = arith.constant 0 : index
    %c0_7 = arith.constant 0 : index
    %8 = vector.load %arg7[%c0_6, %c0_7] : memref<8x256xf32, #tpu.memory_space<vmem>>, vector<8x256xf32>
    tpu.vector_store %arg7[%c0_6, %c0_7], %7 {strides = array<i32>} : memref<8x256xf32, #tpu.memory_space<vmem>>, vector<8x256xf32>,
    %c8_i32 = arith.constant 8 : i32
    %9 = arith.cmpi eq, %arg2, %c8_i32 : i32
    %10 = arith.extui %9 : i1 to i32
    %c0_i32_8 = arith.constant 0 : i32
    %11 = arith.cmpi ne, %10, %c0_i32_8 : i32
    scf.if %11 {
      %c0_9 = arith.constant 0 : index
      %c0_10 = arith.constant 0 : index
      %12 = vector.load %arg7[%c0_9, %c0_10] : memref<8x256xf32, #tpu.memory_space<vmem>>, vector<8x256xf32>
      %c0_11 = arith.constant 0 : index
      %c0_12 = arith.constant 0 : index
      %13 = vector.load %arg5[%c0_11, %c0_12] : memref<1x256xf32, #tpu.memory_space<vmem>>, vector<1x256xf32>
      %14 = vector.broadcast %13 : vector<1x256xf32> to vector<8x256xf32>
      %15 = arith.addf %12, %14 : vector<8x256xf32>
      %c0_13 = arith.constant 0 : index
      %c0_14 = arith.constant 0 : index
      %16 = vector.load %arg6[%c0_13, %c0_14] : memref<8x256xf32, #tpu.memory_space<vmem>>, vector<8x256xf32>
      tpu.vector_store %arg6[%c0_13, %c0_14], %15 {strides = array<i32>} : memref<8x256xf32, #tpu.memory_space<vmem>>, vector<8x256xf32>,
    } else {
    }
    return
  }
  func.func @transform_0(%arg0: i32, %arg1: i32, %arg2: i32) -> (i32, i32) {
    %c0_i32 = arith.constant 0 : i32
    return %arg0, %arg2 : i32, i32
  }
  func.func @transform_1(%arg0: i32, %arg1: i32, %arg2: i32) -> (i32, i32) {
    %c0_i32 = arith.constant 0 : i32
    return %arg2, %arg1 : i32, i32
  }
  func.func @transform_2(%arg0: i32, %arg1: i32, %arg2: i32) -> (i32, i32) {
    %c0_i32 = arith.constant 0 : i32
    %c0_i32_0 = arith.constant 0 : i32
    return %c0_i32, %arg1 : i32, i32
  }
  func.func @transform_3(%arg0: i32, %arg1: i32, %arg2: i32) -> (i32, i32) {
    %c0_i32 = arith.constant 0 : i32
    return %arg0, %arg1 : i32, i32
  }
}

module attributes {stable_mosaic.version = 11 : i64} {
  func.func @_bn_add_relu_kernel(%arg0: i32, %arg1: memref<8x256xf32, #tpu.memory_space<vmem>>, %arg2: memref<8x256xf32, #tpu.memory_space<vmem>>, %arg3: memref<1x256xf32, #tpu.memory_space<vmem>>, %arg4: memref<1x256xf32, #tpu.memory_space<vmem>>, %arg5: memref<8x256xf32, #tpu.memory_space<vmem>>) attributes {dimension_semantics = [#tpu.dimension_semantics<parallel>], iteration_bounds = array<i64: 1>, scalar_prefetch = 0 : i64, scratch_operands = 0 : i64, tpu.core_type = #tpu.core_type<tc>, window_params = [{transform_indices = @transform_0, window_bounds = array<i64: 8, 256>}, {transform_indices = @transform_1, window_bounds = array<i64: 8, 256>}, {pipeline_mode = #tpu.pipeline_mode<synchronous>, transform_indices = @transform_2, window_bounds = array<i64: 1, 256>}, {pipeline_mode = #tpu.pipeline_mode<synchronous>, transform_indices = @transform_3, window_bounds = array<i64: 1, 256>}, {transform_indices = @transform_4, window_bounds = array<i64: 8, 256>}]} {
    %c0 = arith.constant 0 : index
    %c0_0 = arith.constant 0 : index
    %0 = vector.load %arg1[%c0, %c0_0] : memref<8x256xf32, #tpu.memory_space<vmem>>, vector<8x256xf32>
    %c0_1 = arith.constant 0 : index
    %c0_2 = arith.constant 0 : index
    %1 = vector.load %arg3[%c0_1, %c0_2] : memref<1x256xf32, #tpu.memory_space<vmem>>, vector<1x256xf32>
    %2 = vector.broadcast %1 : vector<1x256xf32> to vector<8x256xf32>
    %3 = arith.mulf %0, %2 : vector<8x256xf32>
    %c0_3 = arith.constant 0 : index
    %c0_4 = arith.constant 0 : index
    %4 = vector.load %arg4[%c0_3, %c0_4] : memref<1x256xf32, #tpu.memory_space<vmem>>, vector<1x256xf32>
    %5 = vector.broadcast %4 : vector<1x256xf32> to vector<8x256xf32>
    %6 = arith.addf %3, %5 : vector<8x256xf32>
    %c0_5 = arith.constant 0 : index
    %c0_6 = arith.constant 0 : index
    %7 = vector.load %arg2[%c0_5, %c0_6] : memref<8x256xf32, #tpu.memory_space<vmem>>, vector<8x256xf32>
    %8 = arith.addf %6, %7 : vector<8x256xf32>
    %cst = arith.constant 0.000000e+00 : f32
    %9 = vector.broadcast %cst : f32 to vector<8x256xf32>
    %10 = arith.maximumf %8, %9 : vector<8x256xf32>
    %c0_7 = arith.constant 0 : index
    %c0_8 = arith.constant 0 : index
    %11 = vector.load %arg5[%c0_7, %c0_8] : memref<8x256xf32, #tpu.memory_space<vmem>>, vector<8x256xf32>
    tpu.vector_store %arg5[%c0_7, %c0_8], %10 {strides = array<i32>} : memref<8x256xf32, #tpu.memory_space<vmem>>, vector<8x256xf32>,
    return
  }
  func.func @transform_0(%arg0: i32) -> (i32, i32) {
    %c0_i32 = arith.constant 0 : i32
    %c0_i32_0 = arith.constant 0 : i32
    return %arg0, %c0_i32 : i32, i32
  }
  func.func @transform_1(%arg0: i32) -> (i32, i32) {
    %c0_i32 = arith.constant 0 : i32
    %c0_i32_0 = arith.constant 0 : i32
    return %arg0, %c0_i32 : i32, i32
  }
  func.func @transform_2(%arg0: i32) -> (i32, i32) {
    %c0_i32 = arith.constant 0 : i32
    %c0_i32_0 = arith.constant 0 : i32
    %c0_i32_1 = arith.constant 0 : i32
    return %c0_i32, %c0_i32_0 : i32, i32
  }
  func.func @transform_3(%arg0: i32) -> (i32, i32) {
    %c0_i32 = arith.constant 0 : i32
    %c0_i32_0 = arith.constant 0 : i32
    %c0_i32_1 = arith.constant 0 : i32
    return %c0_i32, %c0_i32_0 : i32, i32
  }
  func.func @transform_4(%arg0: i32) -> (i32, i32) {
    %c0_i32 = arith.constant 0 : i32
    %c0_i32_0 = arith.constant 0 : i32
    return %arg0, %c0_i32 : i32, i32
  }
}

module attributes {stable_mosaic.version = 11 : i64} {
  func.func @_matmul_bias_kernel(%arg0: i32, %arg1: i32, %arg2: i32, %arg3: memref<8x128xbf16, #tpu.memory_space<vmem>>, %arg4: memref<128x256xbf16, #tpu.memory_space<vmem>>, %arg5: memref<1x256xf32, #tpu.memory_space<vmem>>, %arg6: memref<8x256xf32, #tpu.memory_space<vmem>>, %arg7: memref<8x256xf32, #tpu.memory_space<vmem>>) attributes {dimension_semantics = [#tpu.dimension_semantics<parallel>, #tpu.dimension_semantics<parallel>, #tpu.dimension_semantics<arbitrary>], iteration_bounds = array<i64: 1, 1, 1>, scalar_prefetch = 0 : i64, scratch_operands = 1 : i64, tpu.core_type = #tpu.core_type<tc>, window_params = [{transform_indices = @transform_0, window_bounds = array<i64: 8, 128>}, {transform_indices = @transform_1, window_bounds = array<i64: 128, 256>}, {transform_indices = @transform_2, window_bounds = array<i64: 1, 256>}, {transform_indices = @transform_3, window_bounds = array<i64: 8, 256>}]} {
    %c0_i32 = arith.constant 0 : i32
    %0 = arith.cmpi eq, %arg2, %c0_i32 : i32
    %1 = arith.extui %0 : i1 to i32
    %c0_i32_0 = arith.constant 0 : i32
    %2 = arith.cmpi ne, %1, %c0_i32_0 : i32
    scf.if %2 {
      %cst_10 = arith.constant 0.000000e+00 : f32
      %12 = vector.broadcast %cst_10 : f32 to vector<8x256xf32>
      %c0_11 = arith.constant 0 : index
      %c0_12 = arith.constant 0 : index
      %13 = vector.load %arg7[%c0_11, %c0_12] : memref<8x256xf32, #tpu.memory_space<vmem>>, vector<8x256xf32>
      tpu.vector_store %arg7[%c0_11, %c0_12], %12 {strides = array<i32>} : memref<8x256xf32, #tpu.memory_space<vmem>>, vector<8x256xf32>,
    } else {
    }
    %c0 = arith.constant 0 : index
    %c0_1 = arith.constant 0 : index
    %3 = vector.load %arg7[%c0, %c0_1] : memref<8x256xf32, #tpu.memory_space<vmem>>, vector<8x256xf32>
    %c0_2 = arith.constant 0 : index
    %c0_3 = arith.constant 0 : index
    %4 = vector.load %arg3[%c0_2, %c0_3] : memref<8x128xbf16, #tpu.memory_space<vmem>>, vector<8x128xbf16>
    %c0_4 = arith.constant 0 : index
    %c0_5 = arith.constant 0 : index
    %5 = vector.load %arg4[%c0_4, %c0_5] : memref<128x256xbf16, #tpu.memory_space<vmem>>, vector<128x256xbf16>
    %cst = arith.constant dense<0.000000e+00> : vector<8x256xf32>
    %6 = tpu.matmul %4, %5, %cst {dimension_numbers = #tpu.dot_dimension_numbers<[1], [0], [0], [1], [0, 0, 1, 1], [], []>} : vector<8x128xbf16>, vector<128x256xbf16>, vector<8x256xf32> -> vector<8x256xf32>
    %7 = arith.addf %3, %6 : vector<8x256xf32>
    %c0_6 = arith.constant 0 : index
    %c0_7 = arith.constant 0 : index
    %8 = vector.load %arg7[%c0_6, %c0_7] : memref<8x256xf32, #tpu.memory_space<vmem>>, vector<8x256xf32>
    tpu.vector_store %arg7[%c0_6, %c0_7], %7 {strides = array<i32>} : memref<8x256xf32, #tpu.memory_space<vmem>>, vector<8x256xf32>,
    %c0_i32_8 = arith.constant 0 : i32
    %9 = arith.cmpi eq, %arg2, %c0_i32_8 : i32
    %10 = arith.extui %9 : i1 to i32
    %c0_i32_9 = arith.constant 0 : i32
    %11 = arith.cmpi ne, %10, %c0_i32_9 : i32
    scf.if %11 {
      %c0_10 = arith.constant 0 : index
      %c0_11 = arith.constant 0 : index
      %12 = vector.load %arg7[%c0_10, %c0_11] : memref<8x256xf32, #tpu.memory_space<vmem>>, vector<8x256xf32>
      %c0_12 = arith.constant 0 : index
      %c0_13 = arith.constant 0 : index
      %13 = vector.load %arg5[%c0_12, %c0_13] : memref<1x256xf32, #tpu.memory_space<vmem>>, vector<1x256xf32>
      %14 = vector.broadcast %13 : vector<1x256xf32> to vector<8x256xf32>
      %15 = arith.addf %12, %14 : vector<8x256xf32>
      %c0_14 = arith.constant 0 : index
      %c0_15 = arith.constant 0 : index
      %16 = vector.load %arg6[%c0_14, %c0_15] : memref<8x256xf32, #tpu.memory_space<vmem>>, vector<8x256xf32>
      tpu.vector_store %arg6[%c0_14, %c0_15], %15 {strides = array<i32>} : memref<8x256xf32, #tpu.memory_space<vmem>>, vector<8x256xf32>,
    } else {
    }
    return
  }
  func.func @transform_0(%arg0: i32, %arg1: i32, %arg2: i32) -> (i32, i32) {
    %c0_i32 = arith.constant 0 : i32
    return %arg0, %arg2 : i32, i32
  }
  func.func @transform_1(%arg0: i32, %arg1: i32, %arg2: i32) -> (i32, i32) {
    %c0_i32 = arith.constant 0 : i32
    return %arg2, %arg1 : i32, i32
  }
  func.func @transform_2(%arg0: i32, %arg1: i32, %arg2: i32) -> (i32, i32) {
    %c0_i32 = arith.constant 0 : i32
    %c0_i32_0 = arith.constant 0 : i32
    return %c0_i32, %arg1 : i32, i32
  }
  func.func @transform_3(%arg0: i32, %arg1: i32, %arg2: i32) -> (i32, i32) {
    %c0_i32 = arith.constant 0 : i32
    return %arg0, %arg1 : i32, i32
  }
}

module attributes {stable_mosaic.version = 11 : i64} {
  func.func @_matmul_bias_kernel(%arg0: i32, %arg1: i32, %arg2: i32, %arg3: memref<2x256xbf16, #tpu.memory_space<vmem>>, %arg4: memref<256x256xbf16, #tpu.memory_space<vmem>>, %arg5: memref<1x256xf32, #tpu.memory_space<vmem>>, %arg6: memref<2x256xf32, #tpu.memory_space<vmem>>, %arg7: memref<2x256xf32, #tpu.memory_space<vmem>>) attributes {dimension_semantics = [#tpu.dimension_semantics<parallel>, #tpu.dimension_semantics<parallel>, #tpu.dimension_semantics<arbitrary>], iteration_bounds = array<i64: 1, 2, 9>, scalar_prefetch = 0 : i64, scratch_operands = 1 : i64, tpu.core_type = #tpu.core_type<tc>, window_params = [{transform_indices = @transform_0, window_bounds = array<i64: 2, 256>}, {transform_indices = @transform_1, window_bounds = array<i64: 256, 256>}, {transform_indices = @transform_2, window_bounds = array<i64: 1, 256>}, {transform_indices = @transform_3, window_bounds = array<i64: 2, 256>}]} {
    %c0_i32 = arith.constant 0 : i32
    %0 = arith.cmpi eq, %arg2, %c0_i32 : i32
    %1 = arith.extui %0 : i1 to i32
    %c0_i32_0 = arith.constant 0 : i32
    %2 = arith.cmpi ne, %1, %c0_i32_0 : i32
    scf.if %2 {
      %cst_9 = arith.constant 0.000000e+00 : f32
      %12 = vector.broadcast %cst_9 : f32 to vector<2x256xf32>
      %c0_10 = arith.constant 0 : index
      %c0_11 = arith.constant 0 : index
      %13 = vector.load %arg7[%c0_10, %c0_11] : memref<2x256xf32, #tpu.memory_space<vmem>>, vector<2x256xf32>
      tpu.vector_store %arg7[%c0_10, %c0_11], %12 {strides = array<i32>} : memref<2x256xf32, #tpu.memory_space<vmem>>, vector<2x256xf32>,
    } else {
    }
    %c0 = arith.constant 0 : index
    %c0_1 = arith.constant 0 : index
    %3 = vector.load %arg7[%c0, %c0_1] : memref<2x256xf32, #tpu.memory_space<vmem>>, vector<2x256xf32>
    %c0_2 = arith.constant 0 : index
    %c0_3 = arith.constant 0 : index
    %4 = vector.load %arg3[%c0_2, %c0_3] : memref<2x256xbf16, #tpu.memory_space<vmem>>, vector<2x256xbf16>
    %c0_4 = arith.constant 0 : index
    %c0_5 = arith.constant 0 : index
    %5 = vector.load %arg4[%c0_4, %c0_5] : memref<256x256xbf16, #tpu.memory_space<vmem>>, vector<256x256xbf16>
    %cst = arith.constant dense<0.000000e+00> : vector<2x256xf32>
    %6 = tpu.matmul %4, %5, %cst {dimension_numbers = #tpu.dot_dimension_numbers<[1], [0], [0], [1], [0, 0, 1, 1], [], []>} : vector<2x256xbf16>, vector<256x256xbf16>, vector<2x256xf32> -> vector<2x256xf32>
    %7 = arith.addf %3, %6 : vector<2x256xf32>
    %c0_6 = arith.constant 0 : index
    %c0_7 = arith.constant 0 : index
    %8 = vector.load %arg7[%c0_6, %c0_7] : memref<2x256xf32, #tpu.memory_space<vmem>>, vector<2x256xf32>
    tpu.vector_store %arg7[%c0_6, %c0_7], %7 {strides = array<i32>} : memref<2x256xf32, #tpu.memory_space<vmem>>, vector<2x256xf32>,
    %c8_i32 = arith.constant 8 : i32
    %9 = arith.cmpi eq, %arg2, %c8_i32 : i32
    %10 = arith.extui %9 : i1 to i32
    %c0_i32_8 = arith.constant 0 : i32
    %11 = arith.cmpi ne, %10, %c0_i32_8 : i32
    scf.if %11 {
      %c0_9 = arith.constant 0 : index
      %c0_10 = arith.constant 0 : index
      %12 = vector.load %arg7[%c0_9, %c0_10] : memref<2x256xf32, #tpu.memory_space<vmem>>, vector<2x256xf32>
      %c0_11 = arith.constant 0 : index
      %c0_12 = arith.constant 0 : index
      %13 = vector.load %arg5[%c0_11, %c0_12] : memref<1x256xf32, #tpu.memory_space<vmem>>, vector<1x256xf32>
      %14 = vector.broadcast %13 : vector<1x256xf32> to vector<2x256xf32>
      %15 = arith.addf %12, %14 : vector<2x256xf32>
      %c0_13 = arith.constant 0 : index
      %c0_14 = arith.constant 0 : index
      %16 = vector.load %arg6[%c0_13, %c0_14] : memref<2x256xf32, #tpu.memory_space<vmem>>, vector<2x256xf32>
      tpu.vector_store %arg6[%c0_13, %c0_14], %15 {strides = array<i32>} : memref<2x256xf32, #tpu.memory_space<vmem>>, vector<2x256xf32>,
    } else {
    }
    return
  }
  func.func @transform_0(%arg0: i32, %arg1: i32, %arg2: i32) -> (i32, i32) {
    %c0_i32 = arith.constant 0 : i32
    return %arg0, %arg2 : i32, i32
  }
  func.func @transform_1(%arg0: i32, %arg1: i32, %arg2: i32) -> (i32, i32) {
    %c0_i32 = arith.constant 0 : i32
    return %arg2, %arg1 : i32, i32
  }
  func.func @transform_2(%arg0: i32, %arg1: i32, %arg2: i32) -> (i32, i32) {
    %c0_i32 = arith.constant 0 : i32
    %c0_i32_0 = arith.constant 0 : i32
    return %c0_i32, %arg1 : i32, i32
  }
  func.func @transform_3(%arg0: i32, %arg1: i32, %arg2: i32) -> (i32, i32) {
    %c0_i32 = arith.constant 0 : i32
    return %arg0, %arg1 : i32, i32
  }
}

module attributes {stable_mosaic.version = 11 : i64} {
  func.func @_bn_stats_kernel(%arg0: i32, %arg1: memref<2x512xf32, #tpu.memory_space<vmem>>, %arg2: memref<1x512xf32, #tpu.memory_space<vmem>>, %arg3: memref<1x512xf32, #tpu.memory_space<vmem>>) attributes {dimension_semantics = [#tpu.dimension_semantics<arbitrary>], iteration_bounds = array<i64: 1>, scalar_prefetch = 0 : i64, scratch_operands = 0 : i64, tpu.core_type = #tpu.core_type<tc>, window_params = [{transform_indices = @transform_0, window_bounds = array<i64: 2, 512>}, {pipeline_mode = #tpu.pipeline_mode<synchronous>, transform_indices = @transform_1, window_bounds = array<i64: 1, 512>}, {pipeline_mode = #tpu.pipeline_mode<synchronous>, transform_indices = @transform_2, window_bounds = array<i64: 1, 512>}]} {
    %c0_i32 = arith.constant 0 : i32
    %0 = arith.cmpi eq, %arg0, %c0_i32 : i32
    %1 = arith.extui %0 : i1 to i32
    %c0_i32_0 = arith.constant 0 : i32
    %2 = arith.cmpi ne, %1, %c0_i32_0 : i32
    scf.if %2 {
      %cst_11 = arith.constant 0.000000e+00 : f32
      %15 = vector.broadcast %cst_11 : f32 to vector<1x512xf32>
      %c0_12 = arith.constant 0 : index
      %c0_13 = arith.constant 0 : index
      %16 = vector.load %arg2[%c0_12, %c0_13] : memref<1x512xf32, #tpu.memory_space<vmem>>, vector<1x512xf32>
      tpu.vector_store %arg2[%c0_12, %c0_13], %15 {strides = array<i32>} : memref<1x512xf32, #tpu.memory_space<vmem>>, vector<1x512xf32>,
      %cst_14 = arith.constant 0.000000e+00 : f32
      %17 = vector.broadcast %cst_14 : f32 to vector<1x512xf32>
      %c0_15 = arith.constant 0 : index
      %c0_16 = arith.constant 0 : index
      %18 = vector.load %arg3[%c0_15, %c0_16] : memref<1x512xf32, #tpu.memory_space<vmem>>, vector<1x512xf32>
      tpu.vector_store %arg3[%c0_15, %c0_16], %17 {strides = array<i32>} : memref<1x512xf32, #tpu.memory_space<vmem>>, vector<1x512xf32>,
    } else {
    }
    %c0 = arith.constant 0 : index
    %c0_1 = arith.constant 0 : index
    %3 = vector.load %arg1[%c0, %c0_1] : memref<2x512xf32, #tpu.memory_space<vmem>>, vector<2x512xf32>
    %c0_2 = arith.constant 0 : index
    %c0_3 = arith.constant 0 : index
    %4 = vector.load %arg2[%c0_2, %c0_3] : memref<1x512xf32, #tpu.memory_space<vmem>>, vector<1x512xf32>
    %cst = arith.constant dense<0.000000e+00> : vector<512xf32>
    %5 = vector.multi_reduction <add>, %3, %cst [0] : vector<2x512xf32> to vector<512xf32>
    %6 = vector.shape_cast %5 : vector<512xf32> to vector<1x512xf32>
    %7 = arith.addf %4, %6 : vector<1x512xf32>
    %c0_4 = arith.constant 0 : index
    %c0_5 = arith.constant 0 : index
    %8 = vector.load %arg2[%c0_4, %c0_5] : memref<1x512xf32, #tpu.memory_space<vmem>>, vector<1x512xf32>
    tpu.vector_store %arg2[%c0_4, %c0_5], %7 {strides = array<i32>} : memref<1x512xf32, #tpu.memory_space<vmem>>, vector<1x512xf32>,
    %c0_6 = arith.constant 0 : index
    %c0_7 = arith.constant 0 : index
    %9 = vector.load %arg3[%c0_6, %c0_7] : memref<1x512xf32, #tpu.memory_space<vmem>>, vector<1x512xf32>
    %10 = arith.mulf %3, %3 : vector<2x512xf32>
    %cst_8 = arith.constant dense<0.000000e+00> : vector<512xf32>
    %11 = vector.multi_reduction <add>, %10, %cst_8 [0] : vector<2x512xf32> to vector<512xf32>
    %12 = vector.shape_cast %11 : vector<512xf32> to vector<1x512xf32>
    %13 = arith.addf %9, %12 : vector<1x512xf32>
    %c0_9 = arith.constant 0 : index
    %c0_10 = arith.constant 0 : index
    %14 = vector.load %arg3[%c0_9, %c0_10] : memref<1x512xf32, #tpu.memory_space<vmem>>, vector<1x512xf32>
    tpu.vector_store %arg3[%c0_9, %c0_10], %13 {strides = array<i32>} : memref<1x512xf32, #tpu.memory_space<vmem>>, vector<1x512xf32>,
    return
  }
  func.func @transform_0(%arg0: i32) -> (i32, i32) {
    %c0_i32 = arith.constant 0 : i32
    %c0_i32_0 = arith.constant 0 : i32
    return %arg0, %c0_i32 : i32, i32
  }
  func.func @transform_1(%arg0: i32) -> (i32, i32) {
    %c0_i32 = arith.constant 0 : i32
    %c0_i32_0 = arith.constant 0 : i32
    %c0_i32_1 = arith.constant 0 : i32
    return %c0_i32, %c0_i32_0 : i32, i32
  }
  func.func @transform_2(%arg0: i32) -> (i32, i32) {
    %c0_i32 = arith.constant 0 : i32
    %c0_i32_0 = arith.constant 0 : i32
    %c0_i32_1 = arith.constant 0 : i32
    return %c0_i32, %c0_i32_0 : i32, i32
  }
}

module attributes {stable_mosaic.version = 11 : i64} {
  func.func @_bn_relu_kernel(%arg0: i32, %arg1: memref<2x512xf32, #tpu.memory_space<vmem>>, %arg2: memref<1x512xf32, #tpu.memory_space<vmem>>, %arg3: memref<1x512xf32, #tpu.memory_space<vmem>>, %arg4: memref<2x512xf32, #tpu.memory_space<vmem>>) attributes {dimension_semantics = [#tpu.dimension_semantics<parallel>], iteration_bounds = array<i64: 1>, scalar_prefetch = 0 : i64, scratch_operands = 0 : i64, tpu.core_type = #tpu.core_type<tc>, window_params = [{transform_indices = @transform_0, window_bounds = array<i64: 2, 512>}, {pipeline_mode = #tpu.pipeline_mode<synchronous>, transform_indices = @transform_1, window_bounds = array<i64: 1, 512>}, {pipeline_mode = #tpu.pipeline_mode<synchronous>, transform_indices = @transform_2, window_bounds = array<i64: 1, 512>}, {transform_indices = @transform_3, window_bounds = array<i64: 2, 512>}]} {
    %c0 = arith.constant 0 : index
    %c0_0 = arith.constant 0 : index
    %0 = vector.load %arg1[%c0, %c0_0] : memref<2x512xf32, #tpu.memory_space<vmem>>, vector<2x512xf32>
    %c0_1 = arith.constant 0 : index
    %c0_2 = arith.constant 0 : index
    %1 = vector.load %arg2[%c0_1, %c0_2] : memref<1x512xf32, #tpu.memory_space<vmem>>, vector<1x512xf32>
    %2 = vector.broadcast %1 : vector<1x512xf32> to vector<2x512xf32>
    %3 = arith.mulf %0, %2 : vector<2x512xf32>
    %c0_3 = arith.constant 0 : index
    %c0_4 = arith.constant 0 : index
    %4 = vector.load %arg3[%c0_3, %c0_4] : memref<1x512xf32, #tpu.memory_space<vmem>>, vector<1x512xf32>
    %5 = vector.broadcast %4 : vector<1x512xf32> to vector<2x512xf32>
    %6 = arith.addf %3, %5 : vector<2x512xf32>
    %cst = arith.constant 0.000000e+00 : f32
    %7 = vector.broadcast %cst : f32 to vector<2x512xf32>
    %8 = arith.maximumf %6, %7 : vector<2x512xf32>
    %c0_5 = arith.constant 0 : index
    %c0_6 = arith.constant 0 : index
    %9 = vector.load %arg4[%c0_5, %c0_6] : memref<2x512xf32, #tpu.memory_space<vmem>>, vector<2x512xf32>
    tpu.vector_store %arg4[%c0_5, %c0_6], %8 {strides = array<i32>} : memref<2x512xf32, #tpu.memory_space<vmem>>, vector<2x512xf32>,
    return
  }
  func.func @transform_0(%arg0: i32) -> (i32, i32) {
    %c0_i32 = arith.constant 0 : i32
    %c0_i32_0 = arith.constant 0 : i32
    return %arg0, %c0_i32 : i32, i32
  }
  func.func @transform_1(%arg0: i32) -> (i32, i32) {
    %c0_i32 = arith.constant 0 : i32
    %c0_i32_0 = arith.constant 0 : i32
    %c0_i32_1 = arith.constant 0 : i32
    return %c0_i32, %c0_i32_0 : i32, i32
  }
  func.func @transform_2(%arg0: i32) -> (i32, i32) {
    %c0_i32 = arith.constant 0 : i32
    %c0_i32_0 = arith.constant 0 : i32
    %c0_i32_1 = arith.constant 0 : i32
    return %c0_i32, %c0_i32_0 : i32, i32
  }
  func.func @transform_3(%arg0: i32) -> (i32, i32) {
    %c0_i32 = arith.constant 0 : i32
    %c0_i32_0 = arith.constant 0 : i32
    return %arg0, %c0_i32 : i32, i32
  }
}

module attributes {stable_mosaic.version = 11 : i64} {
  func.func @_matmul_bias_kernel(%arg0: i32, %arg1: i32, %arg2: i32, %arg3: memref<2x512xbf16, #tpu.memory_space<vmem>>, %arg4: memref<512x256xbf16, #tpu.memory_space<vmem>>, %arg5: memref<1x256xf32, #tpu.memory_space<vmem>>, %arg6: memref<2x256xf32, #tpu.memory_space<vmem>>, %arg7: memref<2x256xf32, #tpu.memory_space<vmem>>) attributes {dimension_semantics = [#tpu.dimension_semantics<parallel>, #tpu.dimension_semantics<parallel>, #tpu.dimension_semantics<arbitrary>], iteration_bounds = array<i64: 1, 2, 9>, scalar_prefetch = 0 : i64, scratch_operands = 1 : i64, tpu.core_type = #tpu.core_type<tc>, window_params = [{transform_indices = @transform_0, window_bounds = array<i64: 2, 512>}, {transform_indices = @transform_1, window_bounds = array<i64: 512, 256>}, {transform_indices = @transform_2, window_bounds = array<i64: 1, 256>}, {transform_indices = @transform_3, window_bounds = array<i64: 2, 256>}]} {
    %c0_i32 = arith.constant 0 : i32
    %0 = arith.cmpi eq, %arg2, %c0_i32 : i32
    %1 = arith.extui %0 : i1 to i32
    %c0_i32_0 = arith.constant 0 : i32
    %2 = arith.cmpi ne, %1, %c0_i32_0 : i32
    scf.if %2 {
      %cst_9 = arith.constant 0.000000e+00 : f32
      %12 = vector.broadcast %cst_9 : f32 to vector<2x256xf32>
      %c0_10 = arith.constant 0 : index
      %c0_11 = arith.constant 0 : index
      %13 = vector.load %arg7[%c0_10, %c0_11] : memref<2x256xf32, #tpu.memory_space<vmem>>, vector<2x256xf32>
      tpu.vector_store %arg7[%c0_10, %c0_11], %12 {strides = array<i32>} : memref<2x256xf32, #tpu.memory_space<vmem>>, vector<2x256xf32>,
    } else {
    }
    %c0 = arith.constant 0 : index
    %c0_1 = arith.constant 0 : index
    %3 = vector.load %arg7[%c0, %c0_1] : memref<2x256xf32, #tpu.memory_space<vmem>>, vector<2x256xf32>
    %c0_2 = arith.constant 0 : index
    %c0_3 = arith.constant 0 : index
    %4 = vector.load %arg3[%c0_2, %c0_3] : memref<2x512xbf16, #tpu.memory_space<vmem>>, vector<2x512xbf16>
    %c0_4 = arith.constant 0 : index
    %c0_5 = arith.constant 0 : index
    %5 = vector.load %arg4[%c0_4, %c0_5] : memref<512x256xbf16, #tpu.memory_space<vmem>>, vector<512x256xbf16>
    %cst = arith.constant dense<0.000000e+00> : vector<2x256xf32>
    %6 = tpu.matmul %4, %5, %cst {dimension_numbers = #tpu.dot_dimension_numbers<[1], [0], [0], [1], [0, 0, 1, 1], [], []>} : vector<2x512xbf16>, vector<512x256xbf16>, vector<2x256xf32> -> vector<2x256xf32>
    %7 = arith.addf %3, %6 : vector<2x256xf32>
    %c0_6 = arith.constant 0 : index
    %c0_7 = arith.constant 0 : index
    %8 = vector.load %arg7[%c0_6, %c0_7] : memref<2x256xf32, #tpu.memory_space<vmem>>, vector<2x256xf32>
    tpu.vector_store %arg7[%c0_6, %c0_7], %7 {strides = array<i32>} : memref<2x256xf32, #tpu.memory_space<vmem>>, vector<2x256xf32>,
    %c8_i32 = arith.constant 8 : i32
    %9 = arith.cmpi eq, %arg2, %c8_i32 : i32
    %10 = arith.extui %9 : i1 to i32
    %c0_i32_8 = arith.constant 0 : i32
    %11 = arith.cmpi ne, %10, %c0_i32_8 : i32
    scf.if %11 {
      %c0_9 = arith.constant 0 : index
      %c0_10 = arith.constant 0 : index
      %12 = vector.load %arg7[%c0_9, %c0_10] : memref<2x256xf32, #tpu.memory_space<vmem>>, vector<2x256xf32>
      %c0_11 = arith.constant 0 : index
      %c0_12 = arith.constant 0 : index
      %13 = vector.load %arg5[%c0_11, %c0_12] : memref<1x256xf32, #tpu.memory_space<vmem>>, vector<1x256xf32>
      %14 = vector.broadcast %13 : vector<1x256xf32> to vector<2x256xf32>
      %15 = arith.addf %12, %14 : vector<2x256xf32>
      %c0_13 = arith.constant 0 : index
      %c0_14 = arith.constant 0 : index
      %16 = vector.load %arg6[%c0_13, %c0_14] : memref<2x256xf32, #tpu.memory_space<vmem>>, vector<2x256xf32>
      tpu.vector_store %arg6[%c0_13, %c0_14], %15 {strides = array<i32>} : memref<2x256xf32, #tpu.memory_space<vmem>>, vector<2x256xf32>,
    } else {
    }
    return
  }
  func.func @transform_0(%arg0: i32, %arg1: i32, %arg2: i32) -> (i32, i32) {
    %c0_i32 = arith.constant 0 : i32
    return %arg0, %arg2 : i32, i32
  }
  func.func @transform_1(%arg0: i32, %arg1: i32, %arg2: i32) -> (i32, i32) {
    %c0_i32 = arith.constant 0 : i32
    return %arg2, %arg1 : i32, i32
  }
  func.func @transform_2(%arg0: i32, %arg1: i32, %arg2: i32) -> (i32, i32) {
    %c0_i32 = arith.constant 0 : i32
    %c0_i32_0 = arith.constant 0 : i32
    return %c0_i32, %arg1 : i32, i32
  }
  func.func @transform_3(%arg0: i32, %arg1: i32, %arg2: i32) -> (i32, i32) {
    %c0_i32 = arith.constant 0 : i32
    return %arg0, %arg1 : i32, i32
  }
}

module attributes {stable_mosaic.version = 11 : i64} {
  func.func @_matmul_bias_kernel(%arg0: i32, %arg1: i32, %arg2: i32, %arg3: memref<2x256xbf16, #tpu.memory_space<vmem>>, %arg4: memref<256x256xbf16, #tpu.memory_space<vmem>>, %arg5: memref<1x256xf32, #tpu.memory_space<vmem>>, %arg6: memref<2x256xf32, #tpu.memory_space<vmem>>, %arg7: memref<2x256xf32, #tpu.memory_space<vmem>>) attributes {dimension_semantics = [#tpu.dimension_semantics<parallel>, #tpu.dimension_semantics<parallel>, #tpu.dimension_semantics<arbitrary>], iteration_bounds = array<i64: 1, 2, 1>, scalar_prefetch = 0 : i64, scratch_operands = 1 : i64, tpu.core_type = #tpu.core_type<tc>, window_params = [{transform_indices = @transform_0, window_bounds = array<i64: 2, 256>}, {transform_indices = @transform_1, window_bounds = array<i64: 256, 256>}, {transform_indices = @transform_2, window_bounds = array<i64: 1, 256>}, {transform_indices = @transform_3, window_bounds = array<i64: 2, 256>}]} {
    %c0_i32 = arith.constant 0 : i32
    %0 = arith.cmpi eq, %arg2, %c0_i32 : i32
    %1 = arith.extui %0 : i1 to i32
    %c0_i32_0 = arith.constant 0 : i32
    %2 = arith.cmpi ne, %1, %c0_i32_0 : i32
    scf.if %2 {
      %cst_10 = arith.constant 0.000000e+00 : f32
      %12 = vector.broadcast %cst_10 : f32 to vector<2x256xf32>
      %c0_11 = arith.constant 0 : index
      %c0_12 = arith.constant 0 : index
      %13 = vector.load %arg7[%c0_11, %c0_12] : memref<2x256xf32, #tpu.memory_space<vmem>>, vector<2x256xf32>
      tpu.vector_store %arg7[%c0_11, %c0_12], %12 {strides = array<i32>} : memref<2x256xf32, #tpu.memory_space<vmem>>, vector<2x256xf32>,
    } else {
    }
    %c0 = arith.constant 0 : index
    %c0_1 = arith.constant 0 : index
    %3 = vector.load %arg7[%c0, %c0_1] : memref<2x256xf32, #tpu.memory_space<vmem>>, vector<2x256xf32>
    %c0_2 = arith.constant 0 : index
    %c0_3 = arith.constant 0 : index
    %4 = vector.load %arg3[%c0_2, %c0_3] : memref<2x256xbf16, #tpu.memory_space<vmem>>, vector<2x256xbf16>
    %c0_4 = arith.constant 0 : index
    %c0_5 = arith.constant 0 : index
    %5 = vector.load %arg4[%c0_4, %c0_5] : memref<256x256xbf16, #tpu.memory_space<vmem>>, vector<256x256xbf16>
    %cst = arith.constant dense<0.000000e+00> : vector<2x256xf32>
    %6 = tpu.matmul %4, %5, %cst {dimension_numbers = #tpu.dot_dimension_numbers<[1], [0], [0], [1], [0, 0, 1, 1], [], []>} : vector<2x256xbf16>, vector<256x256xbf16>, vector<2x256xf32> -> vector<2x256xf32>
    %7 = arith.addf %3, %6 : vector<2x256xf32>
    %c0_6 = arith.constant 0 : index
    %c0_7 = arith.constant 0 : index
    %8 = vector.load %arg7[%c0_6, %c0_7] : memref<2x256xf32, #tpu.memory_space<vmem>>, vector<2x256xf32>
    tpu.vector_store %arg7[%c0_6, %c0_7], %7 {strides = array<i32>} : memref<2x256xf32, #tpu.memory_space<vmem>>, vector<2x256xf32>,
    %c0_i32_8 = arith.constant 0 : i32
    %9 = arith.cmpi eq, %arg2, %c0_i32_8 : i32
    %10 = arith.extui %9 : i1 to i32
    %c0_i32_9 = arith.constant 0 : i32
    %11 = arith.cmpi ne, %10, %c0_i32_9 : i32
    scf.if %11 {
      %c0_10 = arith.constant 0 : index
      %c0_11 = arith.constant 0 : index
      %12 = vector.load %arg7[%c0_10, %c0_11] : memref<2x256xf32, #tpu.memory_space<vmem>>, vector<2x256xf32>
      %c0_12 = arith.constant 0 : index
      %c0_13 = arith.constant 0 : index
      %13 = vector.load %arg5[%c0_12, %c0_13] : memref<1x256xf32, #tpu.memory_space<vmem>>, vector<1x256xf32>
      %14 = vector.broadcast %13 : vector<1x256xf32> to vector<2x256xf32>
      %15 = arith.addf %12, %14 : vector<2x256xf32>
      %c0_14 = arith.constant 0 : index
      %c0_15 = arith.constant 0 : index
      %16 = vector.load %arg6[%c0_14, %c0_15] : memref<2x256xf32, #tpu.memory_space<vmem>>, vector<2x256xf32>
      tpu.vector_store %arg6[%c0_14, %c0_15], %15 {strides = array<i32>} : memref<2x256xf32, #tpu.memory_space<vmem>>, vector<2x256xf32>,
    } else {
    }
    return
  }
  func.func @transform_0(%arg0: i32, %arg1: i32, %arg2: i32) -> (i32, i32) {
    %c0_i32 = arith.constant 0 : i32
    return %arg0, %arg2 : i32, i32
  }
  func.func @transform_1(%arg0: i32, %arg1: i32, %arg2: i32) -> (i32, i32) {
    %c0_i32 = arith.constant 0 : i32
    return %arg2, %arg1 : i32, i32
  }
  func.func @transform_2(%arg0: i32, %arg1: i32, %arg2: i32) -> (i32, i32) {
    %c0_i32 = arith.constant 0 : i32
    %c0_i32_0 = arith.constant 0 : i32
    return %c0_i32, %arg1 : i32, i32
  }
  func.func @transform_3(%arg0: i32, %arg1: i32, %arg2: i32) -> (i32, i32) {
    %c0_i32 = arith.constant 0 : i32
    return %arg0, %arg1 : i32, i32
  }
}

module attributes {stable_mosaic.version = 11 : i64} {
  func.func @_bn_add_relu_kernel(%arg0: i32, %arg1: memref<2x512xf32, #tpu.memory_space<vmem>>, %arg2: memref<2x512xf32, #tpu.memory_space<vmem>>, %arg3: memref<1x512xf32, #tpu.memory_space<vmem>>, %arg4: memref<1x512xf32, #tpu.memory_space<vmem>>, %arg5: memref<2x512xf32, #tpu.memory_space<vmem>>) attributes {dimension_semantics = [#tpu.dimension_semantics<parallel>], iteration_bounds = array<i64: 1>, scalar_prefetch = 0 : i64, scratch_operands = 0 : i64, tpu.core_type = #tpu.core_type<tc>, window_params = [{transform_indices = @transform_0, window_bounds = array<i64: 2, 512>}, {transform_indices = @transform_1, window_bounds = array<i64: 2, 512>}, {pipeline_mode = #tpu.pipeline_mode<synchronous>, transform_indices = @transform_2, window_bounds = array<i64: 1, 512>}, {pipeline_mode = #tpu.pipeline_mode<synchronous>, transform_indices = @transform_3, window_bounds = array<i64: 1, 512>}, {transform_indices = @transform_4, window_bounds = array<i64: 2, 512>}]} {
    %c0 = arith.constant 0 : index
    %c0_0 = arith.constant 0 : index
    %0 = vector.load %arg1[%c0, %c0_0] : memref<2x512xf32, #tpu.memory_space<vmem>>, vector<2x512xf32>
    %c0_1 = arith.constant 0 : index
    %c0_2 = arith.constant 0 : index
    %1 = vector.load %arg3[%c0_1, %c0_2] : memref<1x512xf32, #tpu.memory_space<vmem>>, vector<1x512xf32>
    %2 = vector.broadcast %1 : vector<1x512xf32> to vector<2x512xf32>
    %3 = arith.mulf %0, %2 : vector<2x512xf32>
    %c0_3 = arith.constant 0 : index
    %c0_4 = arith.constant 0 : index
    %4 = vector.load %arg4[%c0_3, %c0_4] : memref<1x512xf32, #tpu.memory_space<vmem>>, vector<1x512xf32>
    %5 = vector.broadcast %4 : vector<1x512xf32> to vector<2x512xf32>
    %6 = arith.addf %3, %5 : vector<2x512xf32>
    %c0_5 = arith.constant 0 : index
    %c0_6 = arith.constant 0 : index
    %7 = vector.load %arg2[%c0_5, %c0_6] : memref<2x512xf32, #tpu.memory_space<vmem>>, vector<2x512xf32>
    %8 = arith.addf %6, %7 : vector<2x512xf32>
    %cst = arith.constant 0.000000e+00 : f32
    %9 = vector.broadcast %cst : f32 to vector<2x512xf32>
    %10 = arith.maximumf %8, %9 : vector<2x512xf32>
    %c0_7 = arith.constant 0 : index
    %c0_8 = arith.constant 0 : index
    %11 = vector.load %arg5[%c0_7, %c0_8] : memref<2x512xf32, #tpu.memory_space<vmem>>, vector<2x512xf32>
    tpu.vector_store %arg5[%c0_7, %c0_8], %10 {strides = array<i32>} : memref<2x512xf32, #tpu.memory_space<vmem>>, vector<2x512xf32>,
    return
  }
  func.func @transform_0(%arg0: i32) -> (i32, i32) {
    %c0_i32 = arith.constant 0 : i32
    %c0_i32_0 = arith.constant 0 : i32
    return %arg0, %c0_i32 : i32, i32
  }
  func.func @transform_1(%arg0: i32) -> (i32, i32) {
    %c0_i32 = arith.constant 0 : i32
    %c0_i32_0 = arith.constant 0 : i32
    return %arg0, %c0_i32 : i32, i32
  }
  func.func @transform_2(%arg0: i32) -> (i32, i32) {
    %c0_i32 = arith.constant 0 : i32
    %c0_i32_0 = arith.constant 0 : i32
    %c0_i32_1 = arith.constant 0 : i32
    return %c0_i32, %c0_i32_0 : i32, i32
  }
  func.func @transform_3(%arg0: i32) -> (i32, i32) {
    %c0_i32 = arith.constant 0 : i32
    %c0_i32_0 = arith.constant 0 : i32
    %c0_i32_1 = arith.constant 0 : i32
    return %c0_i32, %c0_i32_0 : i32, i32
  }
  func.func @transform_4(%arg0: i32) -> (i32, i32) {
    %c0_i32 = arith.constant 0 : i32
    %c0_i32_0 = arith.constant 0 : i32
    return %arg0, %c0_i32 : i32, i32
  }
}

module attributes {stable_mosaic.version = 11 : i64} {
  func.func @_avgpool_kernel(%arg0: i32, %arg1: memref<2x1x512xf32, #tpu.memory_space<vmem>>, %arg2: memref<2x512xf32, #tpu.memory_space<vmem>>) attributes {dimension_semantics = [#tpu.dimension_semantics<arbitrary>], iteration_bounds = array<i64: 1>, scalar_prefetch = 0 : i64, scratch_operands = 0 : i64, tpu.core_type = #tpu.core_type<tc>, window_params = [{pipeline_mode = #tpu.pipeline_mode<synchronous>, transform_indices = @transform_0, window_bounds = array<i64: 2, 1, 512>}, {pipeline_mode = #tpu.pipeline_mode<synchronous>, transform_indices = @transform_1, window_bounds = array<i64: 2, 512>}]} {
    %c0 = arith.constant 0 : index
    %c0_0 = arith.constant 0 : index
    %c0_1 = arith.constant 0 : index
    %0 = vector.load %arg1[%c0, %c0_0, %c0_1] : memref<2x1x512xf32, #tpu.memory_space<vmem>>, vector<2x1x512xf32>
    %cst = arith.constant dense<0.000000e+00> : vector<2x512xf32>
    %1 = vector.multi_reduction <add>, %0, %cst [1] : vector<2x1x512xf32> to vector<2x512xf32>
    %cst_2 = arith.constant 1.000000e+00 : f32
    %2 = vector.broadcast %cst_2 : f32 to vector<2x512xf32>
    %3 = arith.divf %1, %2 : vector<2x512xf32>
    %c0_3 = arith.constant 0 : index
    %c0_4 = arith.constant 0 : index
    %4 = vector.load %arg2[%c0_3, %c0_4] : memref<2x512xf32, #tpu.memory_space<vmem>>, vector<2x512xf32>
    tpu.vector_store %arg2[%c0_3, %c0_4], %3 {strides = array<i32>} : memref<2x512xf32, #tpu.memory_space<vmem>>, vector<2x512xf32>,
    return
  }
  func.func @transform_0(%arg0: i32) -> (i32, i32, i32) {
    %c0_i32 = arith.constant 0 : i32
    %c0_i32_0 = arith.constant 0 : i32
    %c0_i32_1 = arith.constant 0 : i32
    %c0_i32_2 = arith.constant 0 : i32
    return %c0_i32, %c0_i32_0, %c0_i32_1 : i32, i32, i32
  }
  func.func @transform_1(%arg0: i32) -> (i32, i32) {
    %c0_i32 = arith.constant 0 : i32
    %c0_i32_0 = arith.constant 0 : i32
    %c0_i32_1 = arith.constant 0 : i32
    return %c0_i32, %c0_i32_0 : i32, i32
  }
}

module attributes {stable_mosaic.version = 11 : i64} {
  func.func @_matmul_bias_kernel(%arg0: i32, %arg1: i32, %arg2: i32, %arg3: memref<2x512xbf16, #tpu.memory_space<vmem>>, %arg4: memref<512x10xbf16, #tpu.memory_space<vmem>>, %arg5: memref<1x10xf32, #tpu.memory_space<vmem>>, %arg6: memref<2x10xf32, #tpu.memory_space<vmem>>, %arg7: memref<2x10xf32, #tpu.memory_space<vmem>>) attributes {dimension_semantics = [#tpu.dimension_semantics<parallel>, #tpu.dimension_semantics<parallel>, #tpu.dimension_semantics<arbitrary>], iteration_bounds = array<i64: 1, 1, 1>, scalar_prefetch = 0 : i64, scratch_operands = 1 : i64, tpu.core_type = #tpu.core_type<tc>, window_params = [{transform_indices = @transform_0, window_bounds = array<i64: 2, 512>}, {transform_indices = @transform_1, window_bounds = array<i64: 512, 10>}, {transform_indices = @transform_2, window_bounds = array<i64: 1, 10>}, {transform_indices = @transform_3, window_bounds = array<i64: 2, 10>}]} {
    %c0_i32 = arith.constant 0 : i32
    %0 = arith.cmpi eq, %arg2, %c0_i32 : i32
    %1 = arith.extui %0 : i1 to i32
    %c0_i32_0 = arith.constant 0 : i32
    %2 = arith.cmpi ne, %1, %c0_i32_0 : i32
    scf.if %2 {
      %cst_10 = arith.constant 0.000000e+00 : f32
      %12 = vector.broadcast %cst_10 : f32 to vector<2x10xf32>
      %c0_11 = arith.constant 0 : index
      %c0_12 = arith.constant 0 : index
      %13 = vector.load %arg7[%c0_11, %c0_12] : memref<2x10xf32, #tpu.memory_space<vmem>>, vector<2x10xf32>
      tpu.vector_store %arg7[%c0_11, %c0_12], %12 {strides = array<i32>} : memref<2x10xf32, #tpu.memory_space<vmem>>, vector<2x10xf32>,
    } else {
    }
    %c0 = arith.constant 0 : index
    %c0_1 = arith.constant 0 : index
    %3 = vector.load %arg7[%c0, %c0_1] : memref<2x10xf32, #tpu.memory_space<vmem>>, vector<2x10xf32>
    %c0_2 = arith.constant 0 : index
    %c0_3 = arith.constant 0 : index
    %4 = vector.load %arg3[%c0_2, %c0_3] : memref<2x512xbf16, #tpu.memory_space<vmem>>, vector<2x512xbf16>
    %c0_4 = arith.constant 0 : index
    %c0_5 = arith.constant 0 : index
    %5 = vector.load %arg4[%c0_4, %c0_5] : memref<512x10xbf16, #tpu.memory_space<vmem>>, vector<512x10xbf16>
    %cst = arith.constant dense<0.000000e+00> : vector<2x10xf32>
    %6 = tpu.matmul %4, %5, %cst {dimension_numbers = #tpu.dot_dimension_numbers<[1], [0], [0], [1], [0, 0, 1, 1], [], []>} : vector<2x512xbf16>, vector<512x10xbf16>, vector<2x10xf32> -> vector<2x10xf32>
    %7 = arith.addf %3, %6 : vector<2x10xf32>
    %c0_6 = arith.constant 0 : index
    %c0_7 = arith.constant 0 : index
    %8 = vector.load %arg7[%c0_6, %c0_7] : memref<2x10xf32, #tpu.memory_space<vmem>>, vector<2x10xf32>
    tpu.vector_store %arg7[%c0_6, %c0_7], %7 {strides = array<i32>} : memref<2x10xf32, #tpu.memory_space<vmem>>, vector<2x10xf32>,
    %c0_i32_8 = arith.constant 0 : i32
    %9 = arith.cmpi eq, %arg2, %c0_i32_8 : i32
    %10 = arith.extui %9 : i1 to i32
    %c0_i32_9 = arith.constant 0 : i32
    %11 = arith.cmpi ne, %10, %c0_i32_9 : i32
    scf.if %11 {
      %c0_10 = arith.constant 0 : index
      %c0_11 = arith.constant 0 : index
      %12 = vector.load %arg7[%c0_10, %c0_11] : memref<2x10xf32, #tpu.memory_space<vmem>>, vector<2x10xf32>
      %c0_12 = arith.constant 0 : index
      %c0_13 = arith.constant 0 : index
      %13 = vector.load %arg5[%c0_12, %c0_13] : memref<1x10xf32, #tpu.memory_space<vmem>>, vector<1x10xf32>
      %14 = vector.broadcast %13 : vector<1x10xf32> to vector<2x10xf32>
      %15 = arith.addf %12, %14 : vector<2x10xf32>
      %c0_14 = arith.constant 0 : index
      %c0_15 = arith.constant 0 : index
      %16 = vector.load %arg6[%c0_14, %c0_15] : memref<2x10xf32, #tpu.memory_space<vmem>>, vector<2x10xf32>
      tpu.vector_store %arg6[%c0_14, %c0_15], %15 {strides = array<i32>} : memref<2x10xf32, #tpu.memory_space<vmem>>, vector<2x10xf32>,
    } else {
    }
    return
  }
  func.func @transform_0(%arg0: i32, %arg1: i32, %arg2: i32) -> (i32, i32) {
    %c0_i32 = arith.constant 0 : i32
    return %arg0, %arg2 : i32, i32
  }
  func.func @transform_1(%arg0: i32, %arg1: i32, %arg2: i32) -> (i32, i32) {
    %c0_i32 = arith.constant 0 : i32
    return %arg2, %arg1 : i32, i32
  }
  func.func @transform_2(%arg0: i32, %arg1: i32, %arg2: i32) -> (i32, i32) {
    %c0_i32 = arith.constant 0 : i32
    %c0_i32_0 = arith.constant 0 : i32
    return %c0_i32, %arg1 : i32, i32
  }
  func.func @transform_3(%arg0: i32, %arg1: i32, %arg2: i32) -> (i32, i32) {
    %c0_i32 = arith.constant 0 : i32
    return %arg0, %arg1 : i32, i32
  }
}

</mosaic_0001>

<bundles_post_ra>
// kernel: resnet18_forward.58
= control target key start
LH: loop header
LB: loop body
LE: loop exit
PB: predicated region body
PF: predicated region fallthrough
CT: control target
= control target key end

     0   :  { %vm14_vm0 = vcmask 516096   ;;  %vm82_vm1 = vcmask 523264   ;;  %v428_v0 = vmov 0.0   ;;  %s786_s0 = inlined_call_operand.vmem [shape: f32[512,64], index: 0, kind: input, shape index: {}]   ;;  %s787_s1 = inlined_call_operand.vmem [shape: f32[1,64], index: 1, kind: output, shape index: {0}]   ;;  %s788_s2 = inlined_call_operand.vmem [shape: f32[1,64], index: 2, kind: output, shape index: {1}]  }
   0x1   :  { %15 = vst.msk [vmem:[%s787_s1] sm:$0x1] %vm14_vm0, %v428_v0  ;;  %v17_v1 = vld [vmem:[%s786_s0] sm:$0xff]  ;;  %v18_v2 = vld [vmem:[%s786_s0 + $0x8] sm:$0xff]  ;;  %v19_v3 = vld [vmem:[%s786_s0 + $0x10] sm:$0xff] }
   0x2   :  { %16 = vst.msk [vmem:[%s788_s2] sm:$0x1] %vm14_vm0, %v428_v0  ;;  %v83_v4 = vsel %vm82_vm1, %v17_v1, 0.0  ;;  %v84_v5 = vsel %vm82_vm1, %v18_v2, 0.0  ;;  %v86_v6 = vsel %vm82_vm1, %v19_v3, 0.0  ;;  %v20_v7 = vld [vmem:[%s786_s0 + $0x18] sm:$0xff]  ;;  %v220_v19 = vmul.f32 %v17_v1, %v17_v1 }
   0x3   :  { %v85_v8 = vadd.f32 %v84_v5, %v83_v4  ;;  %v88_v9 = vsel %vm82_vm1, %v20_v7, 0.0  ;;  %v21_v10 = vld [vmem:[%s786_s0 + $0x20] sm:$0xff]  ;;  %v22_v13 = vld [vmem:[%s786_s0 + $0x28] sm:$0xff]  ;;  %v23_v16 = vld [vmem:[%s786_s0 + $0x30] sm:$0xff]  ;;  %v221_v20 = vmul.f32 %v18_v2, %v18_v2  ;;  %v222_v24 = vmul.f32 %v19_v3, %v19_v3 }
   0x4   :  { %v90_v12 = vsel %vm82_vm1, %v21_v10, 0.0  ;;  %v92_v15 = vsel %vm82_vm1, %v22_v13, 0.0  ;;  %v94_v18 = vsel %vm82_vm1, %v23_v16, 0.0  ;;  %v24_v21 = vld [vmem:[%s786_s0 + $0x38] sm:$0xff]  ;;  %v223_v25 = vmul.f32 %v20_v7, %v20_v7  ;;  %v25_v26 = vld [vmem:[%s786_s0 + $0x40] sm:$0xff]  ;;  %v26_v32 = vld [vmem:[%s786_s0 + $0x48] sm:$0xff] }
   0x5   :  { %v87_v11 = vadd.f32 %v86_v6, %v85_v8  ;;  %v96_v23 = vsel %vm82_vm1, %v24_v21, 0.0  ;;  %v98_v28 = vsel %vm82_vm1, %v25_v26, 0.0  ;;  %v224_v29 = vmul.f32 %v21_v10, %v21_v10  ;;  %v27_v39 = vld [vmem:[%s786_s0 + $0x50] sm:$0xff]  ;;  %v28_v45 = vld [vmem:[%s786_s0 + $0x58] sm:$0xff]  ;;  %v29_v51 = vld [vmem:[%s786_s0 + $0x60] sm:$0xff] }
   0x6   :  { %v284_v30 = vsel %vm82_vm1, %v220_v19, 0.0  ;;  %v285_v31 = vsel %vm82_vm1, %v221_v20, 0.0  ;;  %v100_v35 = vsel %vm82_vm1, %v26_v32, 0.0  ;;  %v225_v36 = vmul.f32 %v22_v13, %v22_v13  ;;  %v30_v57 = vld [vmem:[%s786_s0 + $0x68] sm:$0xff]  ;;  %v31_v63 = vld [vmem:[%s786_s0 + $0x70] sm:$0xff]  ;;  %v32_v5 = vld [vmem:[%s786_s0 + $0x78] sm:$0xff] }
   0x7   :  { %v89_v14 = vadd.f32 %v88_v9, %v87_v11  ;;  %v286_v34 = vadd.f32 %v285_v31, %v284_v30  ;;  %v287_v37 = vsel %vm82_vm1, %v222_v24, 0.0  ;;  %v289_v38 = vsel %vm82_vm1, %v223_v25, 0.0  ;;  %v33_v11 = vld [vmem:[%s786_s0 + $0x80] sm:$0xff] }
   0x8   :  { %v102_v42 = vsel %vm82_vm1, %v27_v39, 0.0  ;;  %v226_v43 = vmul.f32 %v23_v16, %v23_v16  ;;  %v291_v44 = vsel %vm82_vm1, %v224_v29, 0.0  ;;  %v104_v48 = vsel %vm82_vm1, %v28_v45, 0.0  ;;  %v36_v29 = vld [vmem:[%s786_s0 + $0x98] sm:$0xff] }
   0x9   :  { %v91_v17 = vadd.f32 %v90_v12, %v89_v14  ;;  %v288_v41 = vadd.f32 %v287_v37, %v286_v34  ;;  %v227_v49 = vmul.f32 %v24_v21, %v24_v21  ;;  %v293_v50 = vsel %vm82_vm1, %v225_v36, 0.0 }
   0xa   :  { %v106_v54 = vsel %vm82_vm1, %v29_v51, 0.0  ;;  %v228_v55 = vmul.f32 %v25_v26, %v25_v26  ;;  %v295_v56 = vsel %vm82_vm1, %v226_v43, 0.0  ;;  %v108_v60 = vsel %vm82_vm1, %v30_v57, 0.0 }
   0xb   :  { %v93_v22 = vadd.f32 %v92_v15, %v91_v17  ;;  %v290_v47 = vadd.f32 %v289_v38, %v288_v41  ;;  %v229_v61 = vmul.f32 %v26_v32, %v26_v32  ;;  %v297_v62 = vsel %vm82_vm1, %v227_v49, 0.0  ;;  %v34_v17 = vld [vmem:[%s786_s0 + $0x88] sm:$0xff] }
   0xc   :  { %v110_v2 = vsel %vm82_vm1, %v31_v63, 0.0  ;;  %v230_v3 = vmul.f32 %v27_v39, %v27_v39  ;;  %v299_v4 = vsel %vm82_vm1, %v228_v55, 0.0  ;;  %v112_v8 = vsel %vm82_vm1, %v32_v5, 0.0  ;;  %v38_v41 = vld [vmem:[%s786_s0 + $0xa8] sm:$0xff] }
   0xd   :  { %v95_v27 = vadd.f32 %v94_v18, %v93_v22  ;;  %v292_v53 = vadd.f32 %v291_v44, %v290_v47  ;;  %v231_v9 = vmul.f32 %v28_v45, %v28_v45  ;;  %v301_v10 = vsel %vm82_vm1, %v229_v61, 0.0  ;;  %v39_v47 = vld [vmem:[%s786_s0 + $0xb0] sm:$0xff] }
   0xe   :  { %v114_v14 = vsel %vm82_vm1, %v33_v11, 0.0  ;;  %v232_v15 = vmul.f32 %v29_v51, %v29_v51  ;;  %v303_v16 = vsel %vm82_vm1, %v230_v3, 0.0  ;;  %v116_v20 = vsel %vm82_vm1, %v34_v17, 0.0 }
   0xf   :  { %v97_v33 = vadd.f32 %v96_v23, %v95_v27  ;;  %v294_v59 = vadd.f32 %v293_v50, %v292_v53  ;;  %v233_v21 = vmul.f32 %v30_v57, %v30_v57  ;;  %v305_v22 = vsel %vm82_vm1, %v231_v9, 0.0  ;;  %v35_v23 = vld [vmem:[%s786_s0 + $0x90] sm:$0xff]  ;;  %v40_v53 = vld [vmem:[%s786_s0 + $0xb8] sm:$0xff] }
  0x10   :  { %v118_v26 = vsel %vm82_vm1, %v35_v23, 0.0  ;;  %v234_v27 = vmul.f32 %v31_v63, %v31_v63  ;;  %v120_v32 = vsel %vm82_vm1, %v36_v29, 0.0  ;;  %v236_v39 = vmul.f32 %v33_v11, %v33_v11 }
  0x11   :  { %v99_v40 = vadd.f32 %v98_v28, %v97_v33  ;;  %v296_v1 = vadd.f32 %v295_v56, %v294_v59  ;;  %v307_v28 = vsel %vm82_vm1, %v232_v15, 0.0  ;;  %v235_v33 = vmul.f32 %v32_v5, %v32_v5  ;;  %v41_v59 = vld [vmem:[%s786_s0 + $0xc0] sm:$0xff] }
  0x12   :  { %v309_v34 = vsel %vm82_vm1, %v233_v21, 0.0  ;;  %v124_v44 = vsel %vm82_vm1, %v38_v41, 0.0  ;;  %v237_v45 = vmul.f32 %v34_v17, %v34_v17  ;;  %v126_v50 = vsel %vm82_vm1, %v39_v47, 0.0 }
  0x13   :  { %v101_v46 = vadd.f32 %v100_v35, %v99_v40  ;;  %v298_v7 = vadd.f32 %v297_v62, %v296_v1  ;;  %v37_v35 = vld [vmem:[%s786_s0 + $0xa0] sm:$0xff]  ;;  %v311_v40 = vsel %vm82_vm1, %v234_v27, 0.0  ;;  %v238_v51 = vmul.f32 %v35_v23, %v35_v23  ;;  %v42_v1 = vld [vmem:[%s786_s0 + $0xc8] sm:$0xff] }
  0x14   :  { %v122_v38 = vsel %vm82_vm1, %v37_v35, 0.0  ;;  %v128_v56 = vsel %vm82_vm1, %v40_v53, 0.0  ;;  %v239_v57 = vmul.f32 %v36_v29, %v36_v29  ;;  %v130_v62 = vsel %vm82_vm1, %v41_v59, 0.0 }
  0x15   :  { %v103_v52 = vadd.f32 %v102_v42, %v101_v46  ;;  %v300_v13 = vadd.f32 %v299_v4, %v298_v7  ;;  %v313_v46 = vsel %vm82_vm1, %v235_v33, 0.0  ;;  %v240_v63 = vmul.f32 %v37_v35, %v37_v35  ;;  %v43_v7 = vld [vmem:[%s786_s0 + $0xd0] sm:$0xff] }
  0x16   :  { %v132_v4 = vsel %vm82_vm1, %v42_v1, 0.0  ;;  %v241_v5 = vmul.f32 %v38_v41, %v38_v41  ;;  %v242_v11 = vmul.f32 %v39_v47, %v39_v47  ;;  %v243_v17 = vmul.f32 %v40_v53, %v40_v53 }
  0x17   :  { %v105_v58 = vadd.f32 %v104_v48, %v103_v52  ;;  %v302_v19 = vadd.f32 %v301_v10, %v300_v13  ;;  %v315_v52 = vsel %vm82_vm1, %v236_v39, 0.0  ;;  %v134_v10 = vsel %vm82_vm1, %v43_v7, 0.0  ;;  %v44_v13 = vld [vmem:[%s786_s0 + $0xd8] sm:$0xff] }
  0x18   :  { %v244_v23 = vmul.f32 %v41_v59, %v41_v59  ;;  %v245_v29 = vmul.f32 %v42_v1, %v42_v1  ;;  %v246_v35 = vmul.f32 %v43_v7, %v43_v7  ;;  %v247_v41 = vmul.f32 %v44_v13, %v44_v13 }
  0x19   :  { %v107_v0 = vadd.f32 %v106_v54, %v105_v58  ;;  %v304_v25 = vadd.f32 %v303_v16, %v302_v19  ;;  %v317_v58 = vsel %vm82_vm1, %v237_v45, 0.0  ;;  %v136_v16 = vsel %vm82_vm1, %v44_v13, 0.0  ;;  %v45_v19 = vld [vmem:[%s786_s0 + $0xe0] sm:$0xff] }
  0x1a   :  { %v248_v47 = vmul.f32 %v45_v19, %v45_v19 }
  0x1b   :  { %v109_v6 = vadd.f32 %v108_v60, %v107_v0  ;;  %v306_v31 = vadd.f32 %v305_v22, %v304_v25  ;;  %v319_v0 = vsel %vm82_vm1, %v238_v51, 0.0  ;;  %v138_v22 = vsel %vm82_vm1, %v45_v19, 0.0  ;;  %v46_v25 = vld [vmem:[%s786_s0 + $0xe8] sm:$0xff] }
  0x1c   :  { %v249_v53 = vmul.f32 %v46_v25, %v46_v25 }
  0x1d   :  { %v111_v12 = vadd.f32 %v110_v2, %v109_v6  ;;  %v308_v37 = vadd.f32 %v307_v28, %v306_v31  ;;  %v321_v6 = vsel %vm82_vm1, %v239_v57, 0.0  ;;  %v140_v28 = vsel %vm82_vm1, %v46_v25, 0.0  ;;  %v47_v31 = vld [vmem:[%s786_s0 + $0xf0] sm:$0xff] }
  0x1e   :  { %v250_v59 = vmul.f32 %v47_v31, %v47_v31 }
  0x1f   :  { %v113_v18 = vadd.f32 %v112_v8, %v111_v12  ;;  %v310_v43 = vadd.f32 %v309_v34, %v308_v37  ;;  %v323_v12 = vsel %vm82_vm1, %v240_v63, 0.0  ;;  %v142_v34 = vsel %vm82_vm1, %v47_v31, 0.0  ;;  %v48_v37 = vld [vmem:[%s786_s0 + $0xf8] sm:$0xff] }
  0x20   :  { %v251_v1 = vmul.f32 %v48_v37, %v48_v37 }
  0x21   :  { %v115_v24 = vadd.f32 %v114_v14, %v113_v18  ;;  %v312_v49 = vadd.f32 %v311_v40, %v310_v43  ;;  %v325_v18 = vsel %vm82_vm1, %v241_v5, 0.0  ;;  %v144_v40 = vsel %vm82_vm1, %v48_v37, 0.0  ;;  %v49_v43 = vld [vmem:[%s786_s0 + $0x100] sm:$0xff] }
  0x22   :  { %v252_v7 = vmul.f32 %v49_v43, %v49_v43 }
  0x23   :  { %v117_v30 = vadd.f32 %v116_v20, %v115_v24  ;;  %v314_v55 = vadd.f32 %v313_v46, %v312_v49  ;;  %v327_v24 = vsel %vm82_vm1, %v242_v11, 0.0  ;;  %v146_v46 = vsel %vm82_vm1, %v49_v43, 0.0  ;;  %v50_v49 = vld [vmem:[%s786_s0 + $0x108] sm:$0xff] }
  0x24   :  { %v253_v13 = vmul.f32 %v50_v49, %v50_v49 }
  0x25   :  { %v119_v36 = vadd.f32 %v118_v26, %v117_v30  ;;  %v316_v61 = vadd.f32 %v315_v52, %v314_v55  ;;  %v329_v30 = vsel %vm82_vm1, %v243_v17, 0.0  ;;  %v148_v52 = vsel %vm82_vm1, %v50_v49, 0.0  ;;  %v51_v55 = vld [vmem:[%s786_s0 + $0x110] sm:$0xff] }
  0x26   :  { %v254_v19 = vmul.f32 %v51_v55, %v51_v55 }
  0x27   :  { %v121_v42 = vadd.f32 %v120_v32, %v119_v36  ;;  %v318_v3 = vadd.f32 %v317_v58, %v316_v61  ;;  %v331_v36 = vsel %vm82_vm1, %v244_v23, 0.0  ;;  %v150_v58 = vsel %vm82_vm1, %v51_v55, 0.0  ;;  %v52_v61 = vld [vmem:[%s786_s0 + $0x118] sm:$0xff] }
  0x28   :  { %v255_v25 = vmul.f32 %v52_v61, %v52_v61 }
  0x29   :  { %v123_v48 = vadd.f32 %v122_v38, %v121_v42  ;;  %v320_v9 = vadd.f32 %v319_v0, %v318_v3  ;;  %v333_v42 = vsel %vm82_vm1, %v245_v29, 0.0  ;;  %v152_v0 = vsel %vm82_vm1, %v52_v61, 0.0  ;;  %v53_v3 = vld [vmem:[%s786_s0 + $0x120] sm:$0xff] }
  0x2a   :  { %v256_v31 = vmul.f32 %v53_v3, %v53_v3 }
  0x2b   :  { %v125_v54 = vadd.f32 %v124_v44, %v123_v48  ;;  %v322_v15 = vadd.f32 %v321_v6, %v320_v9  ;;  %v335_v48 = vsel %vm82_vm1, %v246_v35, 0.0  ;;  %v154_v6 = vsel %vm82_vm1, %v53_v3, 0.0  ;;  %v54_v9 = vld [vmem:[%s786_s0 + $0x128] sm:$0xff] }
  0x2c   :  { %v257_v37 = vmul.f32 %v54_v9, %v54_v9 }
  0x2d   :  { %v127_v60 = vadd.f32 %v126_v50, %v125_v54  ;;  %v324_v21 = vadd.f32 %v323_v12, %v322_v15  ;;  %v337_v54 = vsel %vm82_vm1, %v247_v41, 0.0  ;;  %v156_v12 = vsel %vm82_vm1, %v54_v9, 0.0  ;;  %v55_v15 = vld [vmem:[%s786_s0 + $0x130] sm:$0xff] }
  0x2e   :  { %v258_v43 = vmul.f32 %v55_v15, %v55_v15 }
  0x2f   :  { %v129_v2 = vadd.f32 %v128_v56, %v127_v60  ;;  %v326_v27 = vadd.f32 %v325_v18, %v324_v21  ;;  %v339_v60 = vsel %vm82_vm1, %v248_v47, 0.0  ;;  %v158_v18 = vsel %vm82_vm1, %v55_v15, 0.0  ;;  %v56_v21 = vld [vmem:[%s786_s0 + $0x138] sm:$0xff] }
  0x30   :  { %v259_v49 = vmul.f32 %v56_v21, %v56_v21 }
  0x31   :  { %v131_v8 = vadd.f32 %v130_v62, %v129_v2  ;;  %v328_v33 = vadd.f32 %v327_v24, %v326_v27  ;;  %v341_v2 = vsel %vm82_vm1, %v249_v53, 0.0  ;;  %v160_v24 = vsel %vm82_vm1, %v56_v21, 0.0  ;;  %v57_v27 = vld [vmem:[%s786_s0 + $0x140] sm:$0xff] }
  0x32   :  { %v260_v55 = vmul.f32 %v57_v27, %v57_v27 }
  0x33   :  { %v133_v14 = vadd.f32 %v132_v4, %v131_v8  ;;  %v330_v39 = vadd.f32 %v329_v30, %v328_v33  ;;  %v343_v8 = vsel %vm82_vm1, %v250_v59, 0.0  ;;  %v162_v30 = vsel %vm82_vm1, %v57_v27, 0.0  ;;  %v58_v33 = vld [vmem:[%s786_s0 + $0x148] sm:$0xff] }
  0x34   :  { %v261_v61 = vmul.f32 %v58_v33, %v58_v33 }
  0x35   :  { %v135_v20 = vadd.f32 %v134_v10, %v133_v14  ;;  %v332_v45 = vadd.f32 %v331_v36, %v330_v39  ;;  %v345_v14 = vsel %vm82_vm1, %v251_v1, 0.0  ;;  %v164_v36 = vsel %vm82_vm1, %v58_v33, 0.0  ;;  %v59_v39 = vld [vmem:[%s786_s0 + $0x150] sm:$0xff] }
  0x36   :  { %v262_v3 = vmul.f32 %v59_v39, %v59_v39 }
  0x37   :  { %v137_v26 = vadd.f32 %v136_v16, %v135_v20  ;;  %v334_v51 = vadd.f32 %v333_v42, %v332_v45  ;;  %v347_v20 = vsel %vm82_vm1, %v252_v7, 0.0  ;;  %v166_v42 = vsel %vm82_vm1, %v59_v39, 0.0  ;;  %v60_v45 = vld [vmem:[%s786_s0 + $0x158] sm:$0xff] }
  0x38   :  { %v263_v9 = vmul.f32 %v60_v45, %v60_v45 }
  0x39   :  { %v139_v32 = vadd.f32 %v138_v22, %v137_v26  ;;  %v336_v57 = vadd.f32 %v335_v48, %v334_v51  ;;  %v349_v26 = vsel %vm82_vm1, %v253_v13, 0.0  ;;  %v168_v48 = vsel %vm82_vm1, %v60_v45, 0.0  ;;  %v61_v51 = vld [vmem:[%s786_s0 + $0x160] sm:$0xff] }
  0x3a   :  { %v264_v15 = vmul.f32 %v61_v51, %v61_v51 }
  0x3b   :  { %v141_v38 = vadd.f32 %v140_v28, %v139_v32  ;;  %v338_v63 = vadd.f32 %v337_v54, %v336_v57  ;;  %v351_v32 = vsel %vm82_vm1, %v254_v19, 0.0  ;;  %v170_v54 = vsel %vm82_vm1, %v61_v51, 0.0  ;;  %v62_v57 = vld [vmem:[%s786_s0 + $0x168] sm:$0xff] }
  0x3c   :  { %v265_v21 = vmul.f32 %v62_v57, %v62_v57 }
  0x3d   :  { %v143_v44 = vadd.f32 %v142_v34, %v141_v38  ;;  %v340_v5 = vadd.f32 %v339_v60, %v338_v63  ;;  %v353_v38 = vsel %vm82_vm1, %v255_v25, 0.0  ;;  %v172_v60 = vsel %vm82_vm1, %v62_v57, 0.0  ;;  %v63_v63 = vld [vmem:[%s786_s0 + $0x170] sm:$0xff] }
  0x3e   :  { %v266_v27 = vmul.f32 %v63_v63, %v63_v63 }
  0x3f   :  { %v145_v50 = vadd.f32 %v144_v40, %v143_v44  ;;  %v342_v11 = vadd.f32 %v341_v2, %v340_v5  ;;  %v355_v44 = vsel %vm82_vm1, %v256_v31, 0.0  ;;  %v174_v2 = vsel %vm82_vm1, %v63_v63, 0.0  ;;  %v64_v5 = vld [vmem:[%s786_s0 + $0x178] sm:$0xff] }
  0x40   :  { %v267_v33 = vmul.f32 %v64_v5, %v64_v5 }
  0x41   :  { %v147_v56 = vadd.f32 %v146_v46, %v145_v50  ;;  %v344_v17 = vadd.f32 %v343_v8, %v342_v11  ;;  %v357_v50 = vsel %vm82_vm1, %v257_v37, 0.0  ;;  %v176_v8 = vsel %vm82_vm1, %v64_v5, 0.0  ;;  %v65_v11 = vld [vmem:[%s786_s0 + $0x180] sm:$0xff] }
  0x42   :  { %v268_v39 = vmul.f32 %v65_v11, %v65_v11 }
  0x43   :  { %v149_v62 = vadd.f32 %v148_v52, %v147_v56  ;;  %v346_v23 = vadd.f32 %v345_v14, %v344_v17  ;;  %v359_v56 = vsel %vm82_vm1, %v258_v43, 0.0  ;;  %v178_v14 = vsel %vm82_vm1, %v65_v11, 0.0  ;;  %v66_v17 = vld [vmem:[%s786_s0 + $0x188] sm:$0xff] }
  0x44   :  { %v269_v45 = vmul.f32 %v66_v17, %v66_v17 }
  0x45   :  { %v151_v4 = vadd.f32 %v150_v58, %v149_v62  ;;  %v348_v29 = vadd.f32 %v347_v20, %v346_v23  ;;  %v361_v62 = vsel %vm82_vm1, %v259_v49, 0.0  ;;  %v180_v20 = vsel %vm82_vm1, %v66_v17, 0.0  ;;  %v67_v23 = vld [vmem:[%s786_s0 + $0x190] sm:$0xff] }
  0x46   :  { %v270_v51 = vmul.f32 %v67_v23, %v67_v23 }
  0x47   :  { %v153_v10 = vadd.f32 %v152_v0, %v151_v4  ;;  %v350_v35 = vadd.f32 %v349_v26, %v348_v29  ;;  %v363_v4 = vsel %vm82_vm1, %v260_v55, 0.0  ;;  %v182_v26 = vsel %vm82_vm1, %v67_v23, 0.0  ;;  %v68_v29 = vld [vmem:[%s786_s0 + $0x198] sm:$0xff] }
  0x48   :  { %v271_v57 = vmul.f32 %v68_v29, %v68_v29 }
  0x49   :  { %v155_v16 = vadd.f32 %v154_v6, %v153_v10  ;;  %v352_v41 = vadd.f32 %v351_v32, %v350_v35  ;;  %v365_v10 = vsel %vm82_vm1, %v261_v61, 0.0  ;;  %v184_v32 = vsel %vm82_vm1, %v68_v29, 0.0  ;;  %v69_v35 = vld [vmem:[%s786_s0 + $0x1a0] sm:$0xff] }
  0x4a   :  { %v272_v63 = vmul.f32 %v69_v35, %v69_v35 }
  0x4b   :  { %v157_v22 = vadd.f32 %v156_v12, %v155_v16  ;;  %v354_v47 = vadd.f32 %v353_v38, %v352_v41  ;;  %v367_v16 = vsel %vm82_vm1, %v262_v3, 0.0  ;;  %v186_v38 = vsel %vm82_vm1, %v69_v35, 0.0  ;;  %v70_v41 = vld [vmem:[%s786_s0 + $0x1a8] sm:$0xff] }
  0x4c   :  { %v273_v5 = vmul.f32 %v70_v41, %v70_v41 }
  0x4d   :  { %v159_v28 = vadd.f32 %v158_v18, %v157_v22  ;;  %v356_v53 = vadd.f32 %v355_v44, %v354_v47  ;;  %v369_v22 = vsel %vm82_vm1, %v263_v9, 0.0  ;;  %v188_v44 = vsel %vm82_vm1, %v70_v41, 0.0  ;;  %v71_v47 = vld [vmem:[%s786_s0 + $0x1b0] sm:$0xff] }
  0x4e   :  { %v274_v11 = vmul.f32 %v71_v47, %v71_v47 }
  0x4f   :  { %v161_v34 = vadd.f32 %v160_v24, %v159_v28  ;;  %v358_v59 = vadd.f32 %v357_v50, %v356_v53  ;;  %v371_v28 = vsel %vm82_vm1, %v264_v15, 0.0  ;;  %v190_v50 = vsel %vm82_vm1, %v71_v47, 0.0  ;;  %v72_v53 = vld [vmem:[%s786_s0 + $0x1b8] sm:$0xff] }
  0x50   :  { %v275_v17 = vmul.f32 %v72_v53, %v72_v53 }
  0x51   :  { %v163_v40 = vadd.f32 %v162_v30, %v161_v34  ;;  %v360_v1 = vadd.f32 %v359_v56, %v358_v59  ;;  %v373_v34 = vsel %vm82_vm1, %v265_v21, 0.0  ;;  %v192_v56 = vsel %vm82_vm1, %v72_v53, 0.0  ;;  %v73_v59 = vld [vmem:[%s786_s0 + $0x1c0] sm:$0xff] }
  0x52   :  { %v276_v23 = vmul.f32 %v73_v59, %v73_v59 }
  0x53   :  { %v165_v46 = vadd.f32 %v164_v36, %v163_v40  ;;  %v362_v7 = vadd.f32 %v361_v62, %v360_v1  ;;  %v375_v40 = vsel %vm82_vm1, %v266_v27, 0.0  ;;  %v194_v62 = vsel %vm82_vm1, %v73_v59, 0.0  ;;  %v74_v1 = vld [vmem:[%s786_s0 + $0x1c8] sm:$0xff] }
  0x54   :  { %v277_v29 = vmul.f32 %v74_v1, %v74_v1 }
  0x55   :  { %v167_v52 = vadd.f32 %v166_v42, %v165_v46  ;;  %v364_v13 = vadd.f32 %v363_v4, %v362_v7  ;;  %v377_v46 = vsel %vm82_vm1, %v267_v33, 0.0  ;;  %v196_v4 = vsel %vm82_vm1, %v74_v1, 0.0  ;;  %v75_v7 = vld [vmem:[%s786_s0 + $0x1d0] sm:$0xff] }
  0x56   :  { %v278_v35 = vmul.f32 %v75_v7, %v75_v7 }
  0x57   :  { %v169_v58 = vadd.f32 %v168_v48, %v167_v52  ;;  %v366_v19 = vadd.f32 %v365_v10, %v364_v13  ;;  %v379_v52 = vsel %vm82_vm1, %v268_v39, 0.0  ;;  %v198_v10 = vsel %vm82_vm1, %v75_v7, 0.0  ;;  %v76_v13 = vld [vmem:[%s786_s0 + $0x1d8] sm:$0xff] }
  0x58   :  { %v279_v41 = vmul.f32 %v76_v13, %v76_v13 }
  0x59   :  { %v171_v0 = vadd.f32 %v170_v54, %v169_v58  ;;  %v368_v25 = vadd.f32 %v367_v16, %v366_v19  ;;  %v381_v58 = vsel %vm82_vm1, %v269_v45, 0.0  ;;  %v200_v16 = vsel %vm82_vm1, %v76_v13, 0.0  ;;  %v77_v19 = vld [vmem:[%s786_s0 + $0x1e0] sm:$0xff] }
  0x5a   :  { %v280_v45 = vmul.f32 %v77_v19, %v77_v19 }
  0x5b   :  { %v173_v6 = vadd.f32 %v172_v60, %v171_v0  ;;  %v370_v31 = vadd.f32 %v369_v22, %v368_v25  ;;  %v383_v0 = vsel %vm82_vm1, %v270_v51, 0.0  ;;  %v202_v22 = vsel %vm82_vm1, %v77_v19, 0.0  ;;  %v78_v25 = vld [vmem:[%s786_s0 + $0x1e8] sm:$0xff] }
  0x5d   :  { %v175_v12 = vadd.f32 %v174_v2, %v173_v6  ;;  %v372_v37 = vadd.f32 %v371_v28, %v370_v31  ;;  %v385_v6 = vsel %vm82_vm1, %v271_v57, 0.0  ;;  %v204_v28 = vsel %vm82_vm1, %v78_v25, 0.0  ;;  %v79_v31 = vld [vmem:[%s786_s0 + $0x1f0] sm:$0xff] }
  0x5e   :  { %v282_v53 = vmul.f32 %v79_v31, %v79_v31 }
  0x5f   :  { %v177_v18 = vadd.f32 %v176_v8, %v175_v12  ;;  %v374_v43 = vadd.f32 %v373_v34, %v372_v37  ;;  %v387_v12 = vsel %vm82_vm1, %v272_v63, 0.0  ;;  %v206_v34 = vsel %vm82_vm1, %v79_v31, 0.0  ;;  %v80_v37 = vld [vmem:[%s786_s0 + $0x1f8] sm:$0xff] }
  0x60   :  { %v283_v57 = vmul.f32 %v80_v37, %v80_v37 }
  0x61   :  { %v179_v24 = vadd.f32 %v178_v14, %v177_v18  ;;  %v376_v49 = vadd.f32 %v375_v40, %v374_v43  ;;  %v389_v18 = vsel %vm82_vm1, %v273_v5, 0.0  ;;  %v208_v40 = vsel %vm82_vm1, %v80_v37, 0.0 }
  0x63   :  { %v181_v30 = vadd.f32 %v180_v20, %v179_v24  ;;  %v378_v55 = vadd.f32 %v377_v46, %v376_v49  ;;  %v391_v24 = vsel %vm82_vm1, %v274_v11, 0.0  ;;  %v399_v46 = vsel %vm82_vm1, %v278_v35, 0.0 }
  0x64   :  { %v281_v49 = vmul.f32 %v78_v25, %v78_v25 }
  0x65   :  { %v183_v36 = vadd.f32 %v182_v26, %v181_v30  ;;  %v380_v61 = vadd.f32 %v379_v52, %v378_v55  ;;  %v393_v30 = vsel %vm82_vm1, %v275_v17, 0.0 }
  0x67   :  { %v185_v42 = vadd.f32 %v184_v32, %v183_v36  ;;  %v382_v3 = vadd.f32 %v381_v58, %v380_v61  ;;  %v395_v36 = vsel %vm82_vm1, %v276_v23, 0.0  ;;  %v405_v58 = vsel %vm82_vm1, %v281_v49, 0.0 }
  0x68   :  { %v407_v61 = vsel %vm82_vm1, %v282_v53, 0.0 }
  0x69   :  { %v187_v48 = vadd.f32 %v186_v38, %v185_v42  ;;  %v384_v9 = vadd.f32 %v383_v0, %v382_v3  ;;  %v397_v42 = vsel %vm82_vm1, %v277_v29, 0.0  ;;  %v409_v0 = vsel %vm82_vm1, %v283_v57, 0.0  ;;  %v81_v3 = vld [vmem:[%s787_s1] sm:$0x1] }
  0x6b   :  { %v189_v54 = vadd.f32 %v188_v44, %v187_v48  ;;  %v386_v15 = vadd.f32 %v385_v6, %v384_v9 }
  0x6d   :  { %v191_v60 = vadd.f32 %v190_v50, %v189_v54  ;;  %v388_v21 = vadd.f32 %v387_v12, %v386_v15  ;;  %v401_v50 = vsel %vm82_vm1, %v279_v41, 0.0  ;;  %v403_v54 = vsel %vm82_vm1, %v280_v45, 0.0  ;;  %v219_v12 = vld [vmem:[%s788_s2] sm:$0x1] }
  0x6f   :  { %v193_v2 = vadd.f32 %v192_v56, %v191_v60  ;;  %v390_v27 = vadd.f32 %v389_v18, %v388_v21 }
  0x71   :  { %v195_v8 = vadd.f32 %v194_v62, %v193_v2  ;;  %v392_v33 = vadd.f32 %v391_v24, %v390_v27 }
  0x73   :  { %v197_v14 = vadd.f32 %v196_v4, %v195_v8  ;;  %v394_v39 = vadd.f32 %v393_v30, %v392_v33 }
  0x75   :  { %v199_v20 = vadd.f32 %v198_v10, %v197_v14  ;;  %v396_v44 = vadd.f32 %v395_v36, %v394_v39 }
  0x77   :  { %v201_v26 = vadd.f32 %v200_v16, %v199_v20  ;;  %v398_v48 = vadd.f32 %v397_v42, %v396_v44 }
  0x79   :  { %v203_v32 = vadd.f32 %v202_v22, %v201_v26  ;;  %v400_v52 = vadd.f32 %v399_v46, %v398_v48 }
  0x7b   :  { %v205_v38 = vadd.f32 %v204_v28, %v203_v32  ;;  %v402_v56 = vadd.f32 %v401_v50, %v400_v52 }
  0x7d   :  { %v207_v43 = vadd.f32 %v206_v34, %v205_v38  ;;  %v404_v60 = vadd.f32 %v403_v54, %v402_v56 }
  0x7f   :  { %v209_v47 = vadd.f32 %v208_v40, %v207_v43  ;;  %v406_v63 = vadd.f32 %v405_v58, %v404_v60 }
  0x81   :  { %v210_v51 = vrot.slane %v209_v47, 4  ;;  %v408_v2 = vadd.f32 %v407_v61, %v406_v63 }
  0x83   :  { %v211_v55 = vadd.f32 %v210_v51, %v209_v47  ;;  %v410_v5 = vadd.f32 %v409_v0, %v408_v2 }
  0x85   :  { %v212_v59 = vrot.slane %v211_v55, 2  ;;  %v411_v7 = vrot.slane %v410_v5, 4 }
  0x87   :  { %v213_v62 = vadd.f32 %v212_v59, %v211_v55  ;;  %v412_v8 = vadd.f32 %v411_v7, %v410_v5 }
  0x89   :  { %v214_v1 = vrot.slane %v213_v62, 1  ;;  %v413_v9 = vrot.slane %v412_v8, 2 }
  0x8b   :  { %v215_v4 = vadd.f32 %v214_v1, %v213_v62  ;;  %v414_v10 = vadd.f32 %v413_v9, %v412_v8 }
  0x8d   :  { %v216_v6 = vadd.f32 %v215_v4, %v81_v3  ;;  %v415_v11 = vrot.slane %v414_v10, 1 }
  0x8f   :  { %218 = vst.msk [vmem:[%s787_s1] sm:$0x1] %vm14_vm0, %v216_v6  ;;  %v416_v13 = vadd.f32 %v415_v11, %v414_v10 }
  0x91   :  { %v417_v14 = vadd.f32 %v416_v13, %v219_v12 }
  0x93   :  { %418 = vst.msk [vmem:[%s788_s2] sm:$0x1] %vm14_vm0, %v417_v14 }

// kernel: resnet18_forward.59
= control target key start
LH: loop header
LB: loop body
LE: loop exit
PB: predicated region body
PF: predicated region fallthrough
CT: control target
= control target key end

     0   :  { %s474_s0 = inlined_call_operand.vmem [shape: f32[256,128], index: 0, kind: input, shape index: {}]   ;;  %s475_s1 = inlined_call_operand.vmem [shape: f32[1,128], index: 1, kind: input, shape index: {}]   ;;  %s476_s2 = inlined_call_operand.vmem [shape: f32[1,128], index: 2, kind: input, shape index: {}]   ;;  %s477_s3 = inlined_call_operand.vmem [shape: f32[256,128], index: 3, kind: output, shape index: {}]  }
   0x1   :  { %v14_v0 = vld [vmem:[%s474_s0] sm:$0xff]  ;;  %v15_v3 = vld [vmem:[%s474_s0 + $0x8] sm:$0xff]  ;;  %v16_v6 = vld [vmem:[%s474_s0 + $0x10] sm:$0xff] }
   0x2   :  { %v214_v1 = vld [vmem:[%s475_s1] ss:$0 sm:$0xff]  ;;  %v17_v7 = vld [vmem:[%s474_s0 + $0x18] sm:$0xff]  ;;  %v19_v12 = vld [vmem:[%s474_s0 + $0x28] sm:$0xff] }
   0x3   :  { %v219_v2 = vld [vmem:[%s476_s2] ss:$0 sm:$0xff]  ;;  %v50_v4 = vmul.f32 %v214_v1, %v14_v0  ;;  %v51_v5 = vmul.f32 %v214_v1, %v15_v3  ;;  %v52_v9 = vmul.f32 %v214_v1, %v16_v6  ;;  %v53_v10 = vmul.f32 %v214_v1, %v17_v7  ;;  %v20_v13 = vld [vmem:[%s474_s0 + $0x30] sm:$0xff]  ;;  %v21_v14 = vld [vmem:[%s474_s0 + $0x38] sm:$0xff] }
   0x4   :  { %v18_v8 = vld [vmem:[%s474_s0 + $0x20] sm:$0xff]  ;;  %v55_v17 = vmul.f32 %v214_v1, %v19_v12  ;;  %v56_v18 = vmul.f32 %v214_v1, %v20_v13  ;;  %v57_v22 = vmul.f32 %v214_v1, %v21_v14  ;;  %v23_v24 = vld [vmem:[%s474_s0 + $0x48] sm:$0xff]  ;;  %v24_v29 = vld [vmem:[%s474_s0 + $0x50] sm:$0xff] }
   0x5   :  { %v54_v11 = vmul.f32 %v214_v1, %v18_v8  ;;  %v86_v15 = vadd.f32 %v219_v2, %v50_v4  ;;  %v87_v16 = vadd.f32 %v219_v2, %v51_v5  ;;  %v88_v19 = vadd.f32 %v219_v2, %v52_v9  ;;  %v22_v23 = vld [vmem:[%s474_s0 + $0x40] sm:$0xff]  ;;  %v25_v30 = vld [vmem:[%s474_s0 + $0x58] sm:$0xff]  ;;  %v27_v35 = vld [vmem:[%s474_s0 + $0x68] sm:$0xff] }
   0x6   :  { %v89_v20 = vadd.f32 %v219_v2, %v53_v10  ;;  %v91_v27 = vadd.f32 %v219_v2, %v55_v17  ;;  %v92_v28 = vadd.f32 %v219_v2, %v56_v18  ;;  %v26_v31 = vld [vmem:[%s474_s0 + $0x60] sm:$0xff]  ;;  %v93_v34 = vadd.f32 %v219_v2, %v57_v22  ;;  %v28_v36 = vld [vmem:[%s474_s0 + $0x70] sm:$0xff]  ;;  %v29_v41 = vld [vmem:[%s474_s0 + $0x78] sm:$0xff] }
   0x7   :  { %v90_v21 = vadd.f32 %v219_v2, %v54_v11  ;;  %v118_v25 = vmax.f32 %v86_v15, 0.0  ;;  %v119_v26 = vmax.f32 %v87_v16, 0.0  ;;  %v120_v32 = vmax.f32 %v88_v19, 0.0  ;;  %v30_v54 = vld [vmem:[%s474_s0 + $0x80] sm:$0xff]  ;;  %v31_v55 = vld [vmem:[%s474_s0 + $0x88] sm:$0xff]  ;;  %v32_v58 = vld [vmem:[%s474_s0 + $0x90] sm:$0xff] }
   0x8   :  { %v121_v33 = vmax.f32 %v89_v20, 0.0  ;;  %v123_v38 = vmax.f32 %v91_v27, 0.0  ;;  %v58_v39 = vmul.f32 %v214_v1, %v22_v23  ;;  %v59_v40 = vmul.f32 %v214_v1, %v23_v24  ;;  %v33_v59 = vld [vmem:[%s474_s0 + $0x98] sm:$0xff]  ;;  %v34_v62 = vld [vmem:[%s474_s0 + $0xa0] sm:$0xff]  ;;  %v35_v5 = vld [vmem:[%s474_s0 + $0xa8] sm:$0xff] }
   0x9   :  { %150 = vst [vmem:[%s477_s3] sm:$0xff] %v118_v25  ;;  %v122_v37 = vmax.f32 %v90_v21, 0.0  ;;  %v124_v42 = vmax.f32 %v92_v28, 0.0  ;;  %v60_v43 = vmul.f32 %v214_v1, %v24_v29  ;;  %v61_v44 = vmul.f32 %v214_v1, %v25_v30  ;;  %v36_v10 = vld [vmem:[%s474_s0 + $0xb0] sm:$0xff]  ;;  %v37_v14 = vld [vmem:[%s474_s0 + $0xb8] sm:$0xff]  ;;  %v38_v18 = vld [vmem:[%s474_s0 + $0xc0] sm:$0xff] }
   0xa   :  { %151 = vst [vmem:[%s477_s3 + $0x8] sm:$0xff] %v119_v26  ;;  %v62_v45 = vmul.f32 %v214_v1, %v26_v31  ;;  %v94_v46 = vadd.f32 %v219_v2, %v58_v39  ;;  %v95_v47 = vadd.f32 %v219_v2, %v59_v40  ;;  %v63_v48 = vmul.f32 %v214_v1, %v27_v35  ;;  %v39_v22 = vld [vmem:[%s474_s0 + $0xc8] sm:$0xff]  ;;  %v40_v26 = vld [vmem:[%s474_s0 + $0xd0] sm:$0xff]  ;;  %v41_v30 = vld [vmem:[%s474_s0 + $0xd8] sm:$0xff] }
   0xb   :  { %152 = vst [vmem:[%s477_s3 + $0x10] sm:$0xff] %v120_v32  ;;  %v64_v49 = vmul.f32 %v214_v1, %v28_v36  ;;  %v125_v50 = vmax.f32 %v93_v34, 0.0  ;;  %v96_v51 = vadd.f32 %v219_v2, %v60_v43  ;;  %v97_v52 = vadd.f32 %v219_v2, %v61_v44  ;;  %v42_v34 = vld [vmem:[%s474_s0 + $0xe0] sm:$0xff] }
   0xc   :  { %153 = vst [vmem:[%s477_s3 + $0x18] sm:$0xff] %v121_v33  ;;  %v65_v53 = vmul.f32 %v214_v1, %v29_v41  ;;  %v126_v56 = vmax.f32 %v94_v46, 0.0  ;;  %v98_v57 = vadd.f32 %v219_v2, %v62_v45  ;;  %v127_v60 = vmax.f32 %v95_v47, 0.0  ;;  %v45_v46 = vld [vmem:[%s474_s0 + $0xf8] sm:$0xff] }
   0xd   :  { %154 = vst [vmem:[%s477_s3 + $0x20] sm:$0xff] %v122_v37  ;;  %v99_v61 = vadd.f32 %v219_v2, %v63_v48  ;;  %v128_v63 = vmax.f32 %v96_v51, 0.0  ;;  %v100_v0 = vadd.f32 %v219_v2, %v64_v49  ;;  %v66_v3 = vmul.f32 %v214_v1, %v30_v54 }
   0xe   :  { %155 = vst [vmem:[%s477_s3 + $0x28] sm:$0xff] %v123_v38  ;;  %v67_v4 = vmul.f32 %v214_v1, %v31_v55  ;;  %v129_v6 = vmax.f32 %v97_v52, 0.0  ;;  %v101_v7 = vadd.f32 %v219_v2, %v65_v53  ;;  %v68_v8 = vmul.f32 %v214_v1, %v32_v58  ;;  %v43_v38 = vld [vmem:[%s474_s0 + $0xe8] sm:$0xff] }
   0xf   :  { %156 = vst [vmem:[%s477_s3 + $0x30] sm:$0xff] %v124_v42  ;;  %v69_v9 = vmul.f32 %v214_v1, %v33_v59  ;;  %v130_v11 = vmax.f32 %v98_v57, 0.0  ;;  %v102_v12 = vadd.f32 %v219_v2, %v66_v3  ;;  %v70_v13 = vmul.f32 %v214_v1, %v34_v62  ;;  %v44_v42 = vld [vmem:[%s474_s0 + $0xf0] sm:$0xff] }
  0x10   :  { %157 = vst [vmem:[%s477_s3 + $0x38] sm:$0xff] %v125_v50  ;;  %v131_v15 = vmax.f32 %v99_v61, 0.0  ;;  %v103_v16 = vadd.f32 %v219_v2, %v67_v4  ;;  %v71_v17 = vmul.f32 %v214_v1, %v35_v5  ;;  %v132_v19 = vmax.f32 %v100_v0, 0.0 }
  0x11   :  { %158 = vst [vmem:[%s477_s3 + $0x40] sm:$0xff] %v126_v56  ;;  %v104_v20 = vadd.f32 %v219_v2, %v68_v8  ;;  %v72_v21 = vmul.f32 %v214_v1, %v36_v10  ;;  %v133_v23 = vmax.f32 %v101_v7, 0.0  ;;  %v105_v24 = vadd.f32 %v219_v2, %v69_v9 }
  0x12   :  { %159 = vst [vmem:[%s477_s3 + $0x48] sm:$0xff] %v127_v60  ;;  %v73_v25 = vmul.f32 %v214_v1, %v37_v14  ;;  %v134_v27 = vmax.f32 %v102_v12, 0.0  ;;  %v106_v28 = vadd.f32 %v219_v2, %v70_v13  ;;  %v74_v29 = vmul.f32 %v214_v1, %v38_v18 }
  0x13   :  { %160 = vst [vmem:[%s477_s3 + $0x50] sm:$0xff] %v128_v63  ;;  %v135_v31 = vmax.f32 %v103_v16, 0.0  ;;  %v107_v32 = vadd.f32 %v219_v2, %v71_v17  ;;  %v75_v33 = vmul.f32 %v214_v1, %v39_v22  ;;  %v136_v35 = vmax.f32 %v104_v20, 0.0 }
  0x14   :  { %161 = vst [vmem:[%s477_s3 + $0x58] sm:$0xff] %v129_v6  ;;  %v108_v36 = vadd.f32 %v219_v2, %v72_v21  ;;  %v76_v37 = vmul.f32 %v214_v1, %v40_v26  ;;  %v137_v39 = vmax.f32 %v105_v24, 0.0  ;;  %v109_v40 = vadd.f32 %v219_v2, %v73_v25 }
  0x15   :  { %162 = vst [vmem:[%s477_s3 + $0x60] sm:$0xff] %v130_v11  ;;  %v77_v41 = vmul.f32 %v214_v1, %v41_v30  ;;  %v138_v43 = vmax.f32 %v106_v28, 0.0  ;;  %v110_v44 = vadd.f32 %v219_v2, %v74_v29  ;;  %v78_v45 = vmul.f32 %v214_v1, %v42_v34 }
  0x16   :  { %163 = vst [vmem:[%s477_s3 + $0x68] sm:$0xff] %v131_v15  ;;  %v139_v47 = vmax.f32 %v107_v32, 0.0  ;;  %v111_v48 = vadd.f32 %v219_v2, %v75_v33  ;;  %v79_v49 = vmul.f32 %v214_v1, %v43_v38  ;;  %v140_v50 = vmax.f32 %v108_v36, 0.0 }
  0x17   :  { %164 = vst [vmem:[%s477_s3 + $0x70] sm:$0xff] %v132_v19  ;;  %v112_v51 = vadd.f32 %v219_v2, %v76_v37  ;;  %v80_v52 = vmul.f32 %v214_v1, %v44_v42  ;;  %v141_v53 = vmax.f32 %v109_v40, 0.0  ;;  %v113_v54 = vadd.f32 %v219_v2, %v77_v41 }
  0x18   :  { %165 = vst [vmem:[%s477_s3 + $0x78] sm:$0xff] %v133_v23  ;;  %v81_v55 = vmul.f32 %v214_v1, %v45_v46  ;;  %v142_v56 = vmax.f32 %v110_v44, 0.0  ;;  %v114_v57 = vadd.f32 %v219_v2, %v78_v45  ;;  %v143_v58 = vmax.f32 %v111_v48, 0.0 }
  0x19   :  { %166 = vst [vmem:[%s477_s3 + $0x80] sm:$0xff] %v134_v27  ;;  %v115_v59 = vadd.f32 %v219_v2, %v79_v49  ;;  %v144_v60 = vmax.f32 %v112_v51, 0.0  ;;  %v116_v1 = vadd.f32 %v219_v2, %v80_v52  ;;  %v145_v61 = vmax.f32 %v113_v54, 0.0 }
  0x1a   :  { %167 = vst [vmem:[%s477_s3 + $0x88] sm:$0xff] %v135_v31  ;;  %v117_v62 = vadd.f32 %v219_v2, %v81_v55  ;;  %v146_v63 = vmax.f32 %v114_v57, 0.0 }
  0x1b   :  { %168 = vst [vmem:[%s477_s3 + $0x90] sm:$0xff] %v136_v35  ;;  %v147_v0 = vmax.f32 %v115_v59, 0.0  ;;  %v148_v3 = vmax.f32 %v116_v1, 0.0 }
  0x1c   :  { %169 = vst [vmem:[%s477_s3 + $0x98] sm:$0xff] %v137_v39  ;;  %v149_v2 = vmax.f32 %v117_v62, 0.0 }
  0x1d   :  { %170 = vst [vmem:[%s477_s3 + $0xa0] sm:$0xff] %v138_v43 }
  0x1e   :  { %171 = vst [vmem:[%s477_s3 + $0xa8] sm:$0xff] %v139_v47 }
  0x1f   :  { %172 = vst [vmem:[%s477_s3 + $0xb0] sm:$0xff] %v140_v50 }
  0x20   :  { %173 = vst [vmem:[%s477_s3 + $0xb8] sm:$0xff] %v141_v53 }
  0x21   :  { %174 = vst [vmem:[%s477_s3 + $0xc0] sm:$0xff] %v142_v56 }
  0x22   :  { %175 = vst [vmem:[%s477_s3 + $0xc8] sm:$0xff] %v143_v58 }
  0x23   :  { %176 = vst [vmem:[%s477_s3 + $0xd0] sm:$0xff] %v144_v60 }
  0x24   :  { %177 = vst [vmem:[%s477_s3 + $0xd8] sm:$0xff] %v145_v61 }
  0x25   :  { %178 = vst [vmem:[%s477_s3 + $0xe0] sm:$0xff] %v146_v63 }
  0x26   :  { %179 = vst [vmem:[%s477_s3 + $0xe8] sm:$0xff] %v147_v0 }
  0x27   :  { %180 = vst [vmem:[%s477_s3 + $0xf0] sm:$0xff] %v148_v3 }
  0x28   :  { %181 = vst [vmem:[%s477_s3 + $0xf8] sm:$0xff] %v149_v2 }

// kernel: resnet18_forward.57
= control target key start
LH: loop header
LB: loop body
LE: loop exit
PB: predicated region body
PF: predicated region fallthrough
CT: control target
= control target key end

     0   :  { %s821_s12 = smov 0   ;;  %s823_s13 = smov 0   ;;  %s965_s0 = inlined_call_operand.vmem [shape: bf16[512,49], index: 0, kind: input, shape index: {}]   ;;  %s966_s1 = inlined_call_operand.vmem [shape: bf16[49,64], index: 1, kind: input, shape index: {}]   ;;  %s967_s2 = inlined_call_operand.vmem [shape: f32[1,64], index: 2, kind: input, shape index: {}]   ;;  %s968_s3 = inlined_call_operand.vmem [shape: f32[512,64], index: 3, kind: output, shape index: {}]  }
   0x1   :  { %s825_s14 = smov 0  }
   0x2 LB: > { %s32_s15 = sadd.s32 1, %s793_s13  ;;  %p666_p0 = scmp.ge.s32.totalorder %s797_s14, 1  ;;  %s797_s14 = sphi %s825_s14, %s13_s14   ;;  %s793_s13 = sphi %s823_s13, %s970_s13   ;;  %s789_s12 = sphi %s821_s12, %s969_s12  }
   0x3   : > { %p34_p1 = scmp.ge.s32.totalorder %s32_s15, 4  ;;  %p188_p2 = scmp.lt.s32.totalorder %s797_s14, 5 }
   0x5   : > { %s972_s15 = smov (%p34_p1, %s32_s15), 0  ;;  %p189_p3 = pnand %p666_p0, %p188_p2 }
   0x6   : > { %s667_s18 = sshll.u32 (!%p189_p3), %s789_s12, 4 }
   0x7   : > { %192 = sbr.rel (%p189_p3) target bundleno = 208 (0xd0), region = 32  ;;  %p230_p4 = scmp.lt.s32.totalorder (!%p189_p3), %s667_s18, 63 }
   0xc   : > { %v319_v0 = vld [vmem:[%s966_s1 + $0x18] sm:$0x1]  ;;  %vm406_vm0 = vcmask 1040384   ;;  %v799_v2 = vmov 0   ;;  %v735_v6 = vld [vmem:[%s966_s1 + $0x10] sm:$0xff]  ;;  %vm264_vm1 = vcmask 523264  }
   0xd   : > { %v373_v1 = vunpack.c.l.b16 %v319_v0  ;;  %v408_v3 = vsel %vm406_vm0, 65535, %v799_v2  ;;  %s974_s18 = smov (!%p230_p4, %s667_s18), 63  ;;  %v800_v7 = vmov 0.0   ;;  %v734_v8 = vld [vmem:[%s966_s1 + $0x8] sm:$0xff]  ;;  %v733_v9 = vld [vmem:[%s966_s1] sm:$0xff]  ;;  %vm381_vm2 = vcmask 400384  }
   0xe   : > { %265 = vst.msk [vmem:[#allocation2] sm:$0xff] %vm264_vm1, %v800_v7  ;;  %s668_s23 = sshll.u32 %s974_s18, 2  ;;  %s670_s29 = sshll.u32 %s974_s18, 3  ;;  %v887_v27 = vld [vmem:[%s967_s2] ss:$0 sm:$0xff] }
   0xf   : > { %v377_v4 = vpack.c.b16 %v373_v1, %v373_v1  ;;  %266 = vst.msk [vmem:[#allocation2 + $0x8] sm:$0xff] %vm264_vm1, %v800_v7  ;;  %s236_s28 = scalar_lea.vmem %s965_s0, %s668_s23  ;;  %s892_s7 = scalar_lea.vmem %s968_s3, %s670_s29 }
  0x10   : > { %267 = vst.msk [vmem:[#allocation2 + $0x10] sm:$0xff] %vm264_vm1, %v800_v7  ;;  %v725_v10 = vld [vmem:[%s236_s28] sm:$0xff]  ;;  %v727_v11 = vld [vmem:[%s236_s28 + $0x10] sm:$0xff]  ;;  %v726_v14 = vld [vmem:[%s236_s28 + $0x8] sm:$0xff] }
  0x11   : > { %v410_v5 = vand.u32 %v408_v3, %v377_v4  ;;  %268 = vst.msk [vmem:[#allocation2 + $0x18] sm:$0xff] %vm264_vm1, %v800_v7  ;;  %v729_v12 = vld [vmem:[%s236_s28 + $0x20] sm:$0xff]  ;;  %v731_v13 = vld [vmem:[%s236_s28 + $0x30] sm:$0xff]  ;;  %v728_v15 = vld [vmem:[%s236_s28 + $0x18] sm:$0xff] }
  0x12   : > { %269 = vst.msk [vmem:[#allocation2 + $0x20] sm:$0xff] %vm264_vm1, %v800_v7  ;;  %v730_v16 = vld [vmem:[%s236_s28 + $0x28] sm:$0xff]  ;;  %v732_v17 = vld [vmem:[%s236_s28 + $0x38] sm:$0xff] }
  0x13   : > { %416 = vmatpush.bf16.msra.mxu0 %v410_v5  ;;  %736 = vmatpush.bf16.msra.mxu1 %v410_v5  ;;  %270 = vst.msk [vmem:[#allocation2 + $0x28] sm:$0xff] %vm264_vm1, %v800_v7 }
  0x14   : > { %737 = vmatpush.bf16.msra.mxu2 %v410_v5  ;;  %738 = vmatpush.bf16.msra.mxu3 %v410_v5  ;;  %271 = vst.msk [vmem:[#allocation2 + $0x30] sm:$0xff] %vm264_vm1, %v800_v7 }
  0x15   : > { %272 = vst.msk [vmem:[#allocation2 + $0x38] sm:$0xff] %vm264_vm1, %v800_v7  ;;  %v281_v18 = vld [vmem:[#allocation2] sm:$0xff] }
  0x16   : > { %273 = vst.msk [vmem:[#allocation2 + $0x40] sm:$0xff] %vm264_vm1, %v800_v7  ;;  %v282_v26 = vld [vmem:[#allocation2 + $0x8] sm:$0xff] }
  0x17   : > { %417 = vmatpush.bf16.msra.mxu0 %v735_v6  ;;  %739 = vmatpush.bf16.msra.mxu1 %v735_v6  ;;  %274 = vst.msk [vmem:[#allocation2 + $0x48] sm:$0xff] %vm264_vm1, %v800_v7  ;;  %v283_v47 = vld [vmem:[#allocation2 + $0x10] sm:$0xff] }
  0x18   : > { %740 = vmatpush.bf16.msra.mxu2 %v735_v6  ;;  %741 = vmatpush.bf16.msra.mxu3 %v735_v6  ;;  %275 = vst.msk [vmem:[#allocation2 + $0x50] sm:$0xff] %vm264_vm1, %v800_v7  ;;  %v284_v1 = vld [vmem:[#allocation2 + $0x18] sm:$0xff] }
  0x19   : > { %276 = vst.msk [vmem:[#allocation2 + $0x58] sm:$0xff] %vm264_vm1, %v800_v7  ;;  %v285_v19 = vld [vmem:[#allocation2 + $0x20] sm:$0xff] }
  0x1a   : > { %277 = vst.msk [vmem:[#allocation2 + $0x60] sm:$0xff] %vm264_vm1, %v800_v7  ;;  %v286_v33 = vld [vmem:[#allocation2 + $0x28] sm:$0xff] }
  0x1b   : > { %418 = vmatpush.bf16.msra.mxu0 %v734_v8  ;;  %742 = vmatpush.bf16.msra.mxu1 %v734_v8  ;;  %278 = vst.msk [vmem:[#allocation2 + $0x68] sm:$0xff] %vm264_vm1, %v800_v7  ;;  %v287_v51 = vld [vmem:[#allocation2 + $0x30] sm:$0xff] }
  0x1c   : > { %743 = vmatpush.bf16.msra.mxu2 %v734_v8  ;;  %744 = vmatpush.bf16.msra.mxu3 %v734_v8  ;;  %279 = vst.msk [vmem:[#allocation2 + $0x70] sm:$0xff] %vm264_vm1, %v800_v7  ;;  %v288_v5 = vld [vmem:[#allocation2 + $0x38] sm:$0xff] }
  0x1d   : > { %280 = vst.msk [vmem:[#allocation2 + $0x78] sm:$0xff] %vm264_vm1, %v800_v7  ;;  %v289_v24 = vld [vmem:[#allocation2 + $0x40] sm:$0xff] }
  0x1e   : > { %v290_v41 = vld [vmem:[#allocation2 + $0x48] sm:$0xff] }
  0x1f   : > { %419 = vmatpush.bf16.msra.mxu0 %v733_v9  ;;  %745 = vmatpush.bf16.msra.mxu1 %v733_v9  ;;  %v291_v59 = vld [vmem:[#allocation2 + $0x50] sm:$0xff] }
  0x20   : > { %746 = vmatpush.bf16.msra.mxu2 %v733_v9  ;;  %747 = vmatpush.bf16.msra.mxu3 %v733_v9 }
  0x21   : > { %v293_v25 = vld [vmem:[#allocation2 + $0x60] sm:$0xff] }
  0x22   : > { %715 = vmatmul.msk.bf16.vlgmr.msra.gmra.mxu0 %vm381_vm2, %v725_v10  ;;  %717 = vmatmul.msk.bf16.vlgmr.msra.gmra.mxu1 %vm381_vm2, %v727_v11  ;;  %v294_v42 = vld [vmem:[#allocation2 + $0x68] sm:$0xff] }
  0x23   : > { %719 = vmatmul.msk.bf16.vlgmr.msra.gmra.mxu2 %vm381_vm2, %v729_v12  ;;  %721 = vmatmul.msk.bf16.vlgmr.msra.gmra.mxu3 %vm381_vm2, %v731_v13  ;;  %v295_v60 = vld [vmem:[#allocation2 + $0x70] sm:$0xff]  ;;  %v292_v13 = vld [vmem:[#allocation2 + $0x58] sm:$0xff] }
  0x32   : > { %716 = vmatmul.msk.bf16.gmra.mxu0 %vm381_vm2, %v726_v14  ;;  %718 = vmatmul.msk.bf16.gmra.mxu1 %vm381_vm2, %v728_v15 }
  0x33   : > { %720 = vmatmul.msk.bf16.gmra.mxu2 %vm381_vm2, %v730_v16  ;;  %722 = vmatmul.msk.bf16.gmra.mxu3 %vm381_vm2, %v732_v17 }
  0x9f   : > { %v421_v20 = vpop.f32.mrf.mxu0  ;;  %v431_v21 = vpop.f32.mrf.mxu1 }
  0xa0   : > { %v461_v22 = vadd.f32 %v421_v20, %v281_v18  ;;  %v465_v23 = vadd.f32 %v431_v21, %v285_v19  ;;  %v296_v18 = vld [vmem:[#allocation2 + $0x78] sm:$0xff] }
  0xa2   : > { %478 = vst.msk [vmem:[#allocation2] sm:$0xff] %vm264_vm1, %v461_v22 }
  0xa3   : > { %482 = vst.msk [vmem:[#allocation2 + $0x20] sm:$0xff] %vm264_vm1, %v465_v23 }
  0xa6   : > { %v441_v28 = vpop.f32.mrf.mxu2  ;;  %v451_v29 = vpop.f32.mrf.mxu3 }
  0xa7   : > { %v469_v30 = vadd.f32 %v441_v28, %v289_v24  ;;  %v473_v31 = vadd.f32 %v451_v29, %v293_v25  ;;  %v423_v32 = vpop.f32.mrf.mxu0  ;;  %v433_v34 = vpop.f32.mrf.mxu1 }
  0xa8   : > { %v462_v35 = vadd.f32 %v423_v32, %v282_v26  ;;  %v466_v39 = vadd.f32 %v433_v34, %v286_v33 }
  0xa9   : > { %v497_v36 = vld [vmem:[#allocation2] sm:$0xff]  ;;  %486 = vst.msk [vmem:[#allocation2 + $0x40] sm:$0xff] %vm264_vm1, %v469_v30 }
  0xaa   : > { %v517_v37 = vadd.f32 %v887_v27, %v497_v36  ;;  %v501_v38 = vld [vmem:[#allocation2 + $0x20] sm:$0xff]  ;;  %490 = vst.msk [vmem:[#allocation2 + $0x60] sm:$0xff] %vm264_vm1, %v473_v31 }
  0xab   : > { %v521_v40 = vadd.f32 %v887_v27, %v501_v38  ;;  %479 = vst.msk [vmem:[#allocation2 + $0x8] sm:$0xff] %vm264_vm1, %v462_v35 }
  0xac   : > { %533 = vst.msk [vmem:[%s892_s7] sm:$0xff] %vm264_vm1, %v517_v37 }
  0xad   : > { %537 = vst.msk [vmem:[%s892_s7 + $0x20] sm:$0xff] %vm264_vm1, %v521_v40 }
  0xae   : > { %483 = vst.msk [vmem:[#allocation2 + $0x28] sm:$0xff] %vm264_vm1, %v466_v39  ;;  %v443_v43 = vpop.f32.mrf.mxu2  ;;  %v453_v44 = vpop.f32.mrf.mxu3 }
  0xaf   : > { %v470_v45 = vadd.f32 %v443_v43, %v290_v41  ;;  %v474_v46 = vadd.f32 %v453_v44, %v294_v42  ;;  %v426_v48 = vpop.f32.mrf.mxu0  ;;  %v436_v49 = vpop.f32.mrf.mxu1 }
  0xb0   : > { %v505_v50 = vld [vmem:[#allocation2 + $0x40] sm:$0xff]  ;;  %v463_v56 = vadd.f32 %v426_v48, %v283_v47  ;;  %v467_v58 = vadd.f32 %v436_v49, %v287_v51 }
  0xb1   : > { %v525_v52 = vadd.f32 %v887_v27, %v505_v50  ;;  %v509_v53 = vld [vmem:[#allocation2 + $0x60] sm:$0xff]  ;;  %487 = vst.msk [vmem:[#allocation2 + $0x48] sm:$0xff] %vm264_vm1, %v470_v45 }
  0xb2   : > { %v529_v54 = vadd.f32 %v887_v27, %v509_v53  ;;  %v498_v55 = vld [vmem:[#allocation2 + $0x8] sm:$0xff]  ;;  %491 = vst.msk [vmem:[#allocation2 + $0x68] sm:$0xff] %vm264_vm1, %v474_v46 }
  0xb3   : > { %541 = vst.msk [vmem:[%s892_s7 + $0x40] sm:$0xff] %vm264_vm1, %v525_v52  ;;  %v518_v57 = vadd.f32 %v887_v27, %v498_v55 }
  0xb4   : > { %545 = vst.msk [vmem:[%s892_s7 + $0x60] sm:$0xff] %vm264_vm1, %v529_v54 }
  0xb5   : > { %534 = vst.msk [vmem:[%s892_s7 + $0x8] sm:$0xff] %vm264_vm1, %v518_v57  ;;  %v502_v61 = vld [vmem:[#allocation2 + $0x28] sm:$0xff] }
  0xb6   : > { %v522_v62 = vadd.f32 %v887_v27, %v502_v61  ;;  %480 = vst.msk [vmem:[#allocation2 + $0x10] sm:$0xff] %vm264_vm1, %v463_v56  ;;  %v446_v63 = vpop.f32.mrf.mxu2  ;;  %v456_v0 = vpop.f32.mrf.mxu3 }
  0xb7   : > { %484 = vst.msk [vmem:[#allocation2 + $0x30] sm:$0xff] %vm264_vm1, %v467_v58  ;;  %v471_v2 = vadd.f32 %v446_v63, %v291_v59  ;;  %v475_v3 = vadd.f32 %v456_v0, %v295_v60  ;;  %v428_v4 = vpop.f32.mrf.mxu0  ;;  %v438_v6 = vpop.f32.mrf.mxu1 }
  0xb8   : > { %538 = vst.msk [vmem:[%s892_s7 + $0x28] sm:$0xff] %vm264_vm1, %v522_v62  ;;  %v506_v7 = vld [vmem:[#allocation2 + $0x48] sm:$0xff]  ;;  %v464_v10 = vadd.f32 %v428_v4, %v284_v1  ;;  %v468_v12 = vadd.f32 %v438_v6, %v288_v5 }
  0xb9   : > { %v526_v8 = vadd.f32 %v887_v27, %v506_v7  ;;  %v510_v9 = vld [vmem:[#allocation2 + $0x68] sm:$0xff]  ;;  %488 = vst.msk [vmem:[#allocation2 + $0x50] sm:$0xff] %vm264_vm1, %v471_v2 }
  0xba   : > { %v530_v11 = vadd.f32 %v887_v27, %v510_v9  ;;  %492 = vst.msk [vmem:[#allocation2 + $0x70] sm:$0xff] %vm264_vm1, %v475_v3 }
  0xbb   : > { %542 = vst.msk [vmem:[%s892_s7 + $0x48] sm:$0xff] %vm264_vm1, %v526_v8 }
  0xbc   : > { %546 = vst.msk [vmem:[%s892_s7 + $0x68] sm:$0xff] %vm264_vm1, %v530_v11 }
  0xbd   : > { %v499_v14 = vld [vmem:[#allocation2 + $0x10] sm:$0xff]  ;;  %481 = vst.msk [vmem:[#allocation2 + $0x18] sm:$0xff] %vm264_vm1, %v464_v10 }
  0xbe   : > { %v519_v15 = vadd.f32 %v887_v27, %v499_v14  ;;  %v503_v16 = vld [vmem:[#allocation2 + $0x30] sm:$0xff]  ;;  %485 = vst.msk [vmem:[#allocation2 + $0x38] sm:$0xff] %vm264_vm1, %v468_v12  ;;  %v448_v17 = vpop.f32.mrf.mxu2  ;;  %v458_v19 = vpop.f32.mrf.mxu3 }
  0xbf   : > { %v523_v20 = vadd.f32 %v887_v27, %v503_v16  ;;  %v472_v21 = vadd.f32 %v448_v17, %v292_v13  ;;  %v476_v25 = vadd.f32 %v458_v19, %v296_v18 }
  0xc0   : > { %535 = vst.msk [vmem:[%s892_s7 + $0x10] sm:$0xff] %vm264_vm1, %v519_v15  ;;  %v507_v22 = vld [vmem:[#allocation2 + $0x50] sm:$0xff] }
  0xc1   : > { %539 = vst.msk [vmem:[%s892_s7 + $0x30] sm:$0xff] %vm264_vm1, %v523_v20  ;;  %v527_v23 = vadd.f32 %v887_v27, %v507_v22  ;;  %v511_v24 = vld [vmem:[#allocation2 + $0x70] sm:$0xff] }
  0xc2   : > { %v531_v26 = vadd.f32 %v887_v27, %v511_v24  ;;  %489 = vst.msk [vmem:[#allocation2 + $0x58] sm:$0xff] %vm264_vm1, %v472_v21 }
  0xc3   : > { %543 = vst.msk [vmem:[%s892_s7 + $0x50] sm:$0xff] %vm264_vm1, %v527_v23 }
  0xc4   : > { %547 = vst.msk [vmem:[%s892_s7 + $0x70] sm:$0xff] %vm264_vm1, %v531_v26  ;;  %v500_v28 = vld [vmem:[#allocation2 + $0x18] sm:$0xff] }
  0xc5   : > { %v520_v29 = vadd.f32 %v887_v27, %v500_v28  ;;  %v504_v30 = vld [vmem:[#allocation2 + $0x38] sm:$0xff]  ;;  %493 = vst.msk [vmem:[#allocation2 + $0x78] sm:$0xff] %vm264_vm1, %v476_v25 }
  0xc6   : > { %v524_v31 = vadd.f32 %v887_v27, %v504_v30 }
  0xc7   : > { %536 = vst.msk [vmem:[%s892_s7 + $0x18] sm:$0xff] %vm264_vm1, %v520_v29 }
  0xc8   : > { %540 = vst.msk [vmem:[%s892_s7 + $0x38] sm:$0xff] %vm264_vm1, %v524_v31 }
  0xc9   : > { %v508_v32 = vld [vmem:[#allocation2 + $0x58] sm:$0xff] }
  0xca   : > { %v528_v33 = vadd.f32 %v887_v27, %v508_v32 }
  0xcc   : > { %544 = vst.msk [vmem:[%s892_s7 + $0x58] sm:$0xff] %vm264_vm1, %v528_v33  ;;  %v512_v34 = vld [vmem:[#allocation2 + $0x78] sm:$0xff] }
  0xcd   : > { %v532_v35 = vadd.f32 %v887_v27, %v512_v34 }
  0xcf   : > { %548 = vst.msk [vmem:[%s892_s7 + $0x78] sm:$0xff] %vm264_vm1, %v532_v35 }
  0xd0 PF: > { %s13_s14 = sadd.s32 1, %s797_s14   ;;  %s969_s12 = smov %s793_s13 }
  0xd1   : > { %p10_p5 = scmp.ge.s32.totalorder %s13_s14, 6   ;;  %s970_s13 = smov %s972_s15 }
  0xd3   :  { %12 = sbr.rel (!%p10_p5) target bundleno = 2 (0x2), region = 76 }

// kernel: resnet18_forward.60
= control target key start
LH: loop header
LB: loop body
LE: loop exit
PB: predicated region body
PF: predicated region fallthrough
CT: control target
= control target key end

     0   :  { %s470_s0 = inlined_call_operand.vmem [shape: f32[64,128], index: 0, kind: input, shape index: {}]   ;;  %s471_s1 = inlined_call_operand.vmem [shape: f32[64,128], index: 1, kind: input, shape index: {}]   ;;  %s472_s2 = inlined_call_operand.vmem [shape: f32[64,128], index: 2, kind: input, shape index: {}]   ;;  %s473_s3 = inlined_call_operand.vmem [shape: f32[64,128], index: 3, kind: input, shape index: {}]   ;;  %s474_s4 = inlined_call_operand.vmem [shape: f32[64,128], index: 4, kind: input, shape index: {}]   ;;  %s475_s5 = inlined_call_operand.vmem [shape: f32[64,128], index: 5, kind: input, shape index: {}]   ;;  %s476_s6 = inlined_call_operand.vmem [shape: f32[64,128], index: 6, kind: input, shape index: {}]   ;;  %s477_s7 = inlined_call_operand.vmem [shape: f32[64,128], index: 7, kind: input, shape index: {}]   ;;  %s478_s8 = inlined_call_operand.vmem [shape: f32[64,128], index: 8, kind: input, shape index: {}]   ;;  %s479_s9 = inlined_call_operand.vmem [shape: f32[64,128], index: 9, kind: output, shape index: {}]  }
   0x1   :  { %v32_v0 = vld [vmem:[%s470_s0] sm:$0xff]  ;;  %v33_v6 = vld [vmem:[%s470_s0 + $0x8] sm:$0xff]  ;;  %v34_v15 = vld [vmem:[%s470_s0 + $0x10] sm:$0xff] }
   0x2   :  { %v40_v1 = vld [vmem:[%s471_s1] sm:$0xff]  ;;  %v41_v7 = vld [vmem:[%s471_s1 + $0x8] sm:$0xff]  ;;  %v42_v16 = vld [vmem:[%s471_s1 + $0x10] sm:$0xff] }
   0x3   :  { %v56_v2 = vld [vmem:[%s472_s2] sm:$0xff]  ;;  %v48_v3 = vmax.f32 %v32_v0, %v40_v1  ;;  %v57_v8 = vld [vmem:[%s472_s2 + $0x8] sm:$0xff]  ;;  %v49_v10 = vmax.f32 %v33_v6, %v41_v7  ;;  %v58_v17 = vld [vmem:[%s472_s2 + $0x10] sm:$0xff]  ;;  %v50_v20 = vmax.f32 %v34_v15, %v42_v16 }
   0x4   :  { %v72_v4 = vld [vmem:[%s473_s3] sm:$0xff]  ;;  %v73_v13 = vld [vmem:[%s473_s3 + $0x8] sm:$0xff]  ;;  %v74_v24 = vld [vmem:[%s473_s3 + $0x10] sm:$0xff] }
   0x5   :  { %v64_v5 = vmax.f32 %v48_v3, %v56_v2  ;;  %v88_v9 = vld [vmem:[%s474_s4] sm:$0xff]  ;;  %v65_v14 = vmax.f32 %v49_v10, %v57_v8  ;;  %v89_v19 = vld [vmem:[%s474_s4 + $0x8] sm:$0xff]  ;;  %v66_v26 = vmax.f32 %v50_v20, %v58_v17  ;;  %v35_v27 = vld [vmem:[%s470_s0 + $0x18] sm:$0xff] }
   0x6   :  { %v104_v12 = vld [vmem:[%s475_s5] sm:$0xff]  ;;  %v105_v23 = vld [vmem:[%s475_s5 + $0x8] sm:$0xff]  ;;  %v43_v28 = vld [vmem:[%s471_s1 + $0x18] sm:$0xff] }
   0x7   :  { %v80_v11 = vmax.f32 %v64_v5, %v72_v4  ;;  %v120_v21 = vld [vmem:[%s476_s6] sm:$0xff]  ;;  %v81_v22 = vmax.f32 %v65_v14, %v73_v13  ;;  %v59_v29 = vld [vmem:[%s472_s2 + $0x18] sm:$0xff]  ;;  %v90_v33 = vld [vmem:[%s474_s4 + $0x10] sm:$0xff]  ;;  %v51_v34 = vmax.f32 %v35_v27, %v43_v28  ;;  %v82_v37 = vmax.f32 %v66_v26, %v74_v24 }
   0x8   :  { %v136_v30 = vld [vmem:[%s477_s7] sm:$0xff]  ;;  %v121_v36 = vld [vmem:[%s476_s6 + $0x8] sm:$0xff]  ;;  %v106_v38 = vld [vmem:[%s475_s5 + $0x10] sm:$0xff] }
   0x9   :  { %v96_v18 = vmax.f32 %v80_v11, %v88_v9  ;;  %v152_v31 = vld [vmem:[%s478_s8] sm:$0xff]  ;;  %v97_v32 = vmax.f32 %v81_v22, %v89_v19  ;;  %v75_v39 = vld [vmem:[%s473_s3 + $0x18] sm:$0xff]  ;;  %v67_v41 = vmax.f32 %v51_v34, %v59_v29  ;;  %v137_v46 = vld [vmem:[%s477_s7 + $0x8] sm:$0xff]  ;;  %v98_v48 = vmax.f32 %v82_v37, %v90_v33 }
   0xa   :  { %v36_v42 = vld [vmem:[%s470_s0 + $0x20] sm:$0xff]  ;;  %v153_v47 = vld [vmem:[%s478_s8 + $0x8] sm:$0xff]  ;;  %v91_v49 = vld [vmem:[%s474_s4 + $0x18] sm:$0xff] }
   0xb   :  { %v112_v25 = vmax.f32 %v96_v18, %v104_v12  ;;  %v113_v40 = vmax.f32 %v97_v32, %v105_v23  ;;  %v44_v43 = vld [vmem:[%s471_s1 + $0x20] sm:$0xff]  ;;  %v122_v52 = vld [vmem:[%s476_s6 + $0x10] sm:$0xff]  ;;  %v83_v53 = vmax.f32 %v67_v41, %v75_v39  ;;  %v107_v54 = vld [vmem:[%s475_s5 + $0x18] sm:$0xff]  ;;  %v114_v57 = vmax.f32 %v98_v48, %v106_v38 }
   0xc   :  { %v60_v44 = vld [vmem:[%s472_s2 + $0x20] sm:$0xff]  ;;  %v52_v50 = vmax.f32 %v36_v42, %v44_v43  ;;  %v37_v59 = vld [vmem:[%s470_s0 + $0x28] sm:$0xff]  ;;  %v138_v63 = vld [vmem:[%s477_s7 + $0x10] sm:$0xff] }
   0xd   :  { %v128_v35 = vmax.f32 %v112_v25, %v120_v21  ;;  %v129_v51 = vmax.f32 %v113_v40, %v121_v36  ;;  %v76_v55 = vld [vmem:[%s473_s3 + $0x20] sm:$0xff]  ;;  %v45_v60 = vld [vmem:[%s471_s1 + $0x28] sm:$0xff]  ;;  %v154_v0 = vld [vmem:[%s478_s8 + $0x10] sm:$0xff]  ;;  %v99_v1 = vmax.f32 %v83_v53, %v91_v49  ;;  %v130_v4 = vmax.f32 %v114_v57, %v122_v52 }
   0xe   :  { %v68_v58 = vmax.f32 %v52_v50, %v60_v44  ;;  %v61_v61 = vld [vmem:[%s472_s2 + $0x28] sm:$0xff]  ;;  %v92_v2 = vld [vmem:[%s474_s4 + $0x20] sm:$0xff]  ;;  %v53_v3 = vmax.f32 %v37_v59, %v45_v60  ;;  %v123_v5 = vld [vmem:[%s476_s6 + $0x18] sm:$0xff] }
   0xf   :  { %v144_v45 = vmax.f32 %v128_v35, %v136_v30  ;;  %v145_v62 = vmax.f32 %v129_v51, %v137_v46  ;;  %v108_v7 = vld [vmem:[%s475_s5 + $0x20] sm:$0xff]  ;;  %v77_v8 = vld [vmem:[%s473_s3 + $0x28] sm:$0xff]  ;;  %v115_v10 = vmax.f32 %v99_v1, %v107_v54  ;;  %v38_v12 = vld [vmem:[%s470_s0 + $0x30] sm:$0xff]  ;;  %v146_v15 = vmax.f32 %v130_v4, %v138_v63 }
  0x10   :  { %v84_v6 = vmax.f32 %v68_v58, %v76_v55  ;;  %v69_v11 = vmax.f32 %v53_v3, %v61_v61  ;;  %v46_v13 = vld [vmem:[%s471_s1 + $0x30] sm:$0xff]  ;;  %v139_v16 = vld [vmem:[%s477_s7 + $0x18] sm:$0xff]  ;;  %v93_v19 = vld [vmem:[%s474_s4 + $0x28] sm:$0xff] }
  0x11   :  { %v160_v56 = vmax.f32 %v144_v45, %v152_v31  ;;  %v161_v9 = vmax.f32 %v145_v62, %v153_v47  ;;  %v62_v14 = vld [vmem:[%s472_s2 + $0x30] sm:$0xff]  ;;  %v155_v17 = vld [vmem:[%s478_s8 + $0x18] sm:$0xff]  ;;  %v54_v20 = vmax.f32 %v38_v12, %v46_v13  ;;  %v131_v21 = vmax.f32 %v115_v10, %v123_v5  ;;  %v124_v22 = vld [vmem:[%s476_s6 + $0x20] sm:$0xff] }
  0x12   :  { %v100_v18 = vmax.f32 %v84_v6, %v92_v2  ;;  %v85_v23 = vmax.f32 %v69_v11, %v77_v8  ;;  %v109_v24 = vld [vmem:[%s475_s5 + $0x28] sm:$0xff]  ;;  %v78_v25 = vld [vmem:[%s473_s3 + $0x30] sm:$0xff]  ;;  %v162_v26 = vmax.f32 %v146_v15, %v154_v0  ;;  %v39_v29 = vld [vmem:[%s470_s0 + $0x38] sm:$0xff] }
  0x13   :  { %168 = vst [vmem:[%s479_s9] sm:$0xff] %v160_v56  ;;  %v70_v28 = vmax.f32 %v54_v20, %v62_v14  ;;  %v47_v30 = vld [vmem:[%s471_s1 + $0x38] sm:$0xff]  ;;  %v147_v32 = vmax.f32 %v131_v21, %v139_v16  ;;  %v140_v33 = vld [vmem:[%s477_s7 + $0x20] sm:$0xff]  ;;  %v94_v35 = vld [vmem:[%s474_s4 + $0x30] sm:$0xff] }
  0x14   :  { %169 = vst [vmem:[%s479_s9 + $0x8] sm:$0xff] %v161_v9  ;;  %v116_v27 = vmax.f32 %v100_v18, %v108_v7  ;;  %v63_v31 = vld [vmem:[%s472_s2 + $0x38] sm:$0xff]  ;;  %v101_v34 = vmax.f32 %v85_v23, %v93_v19  ;;  %v55_v36 = vmax.f32 %v39_v29, %v47_v30  ;;  %v125_v38 = vld [vmem:[%s476_s6 + $0x28] sm:$0xff]  ;;  %v156_v42 = vld [vmem:[%s478_s8 + $0x20] sm:$0xff] }
  0x15   :  { %170 = vst [vmem:[%s479_s9 + $0x10] sm:$0xff] %v162_v26  ;;  %v86_v39 = vmax.f32 %v70_v28, %v78_v25  ;;  %v79_v40 = vld [vmem:[%s473_s3 + $0x38] sm:$0xff]  ;;  %v163_v41 = vmax.f32 %v147_v32, %v155_v17  ;;  %v110_v44 = vld [vmem:[%s475_s5 + $0x30] sm:$0xff]  ;;  %v141_v47 = vld [vmem:[%s477_s7 + $0x28] sm:$0xff] }
  0x16   :  { %v132_v37 = vmax.f32 %v116_v27, %v124_v22  ;;  %v117_v43 = vmax.f32 %v101_v34, %v109_v24  ;;  %v71_v45 = vmax.f32 %v55_v36, %v63_v31  ;;  %v95_v49 = vld [vmem:[%s474_s4 + $0x38] sm:$0xff]  ;;  %v126_v51 = vld [vmem:[%s476_s6 + $0x30] sm:$0xff]  ;;  %v157_v54 = vld [vmem:[%s478_s8 + $0x28] sm:$0xff] }
  0x17   :  { %v102_v48 = vmax.f32 %v86_v39, %v94_v35  ;;  %171 = vst [vmem:[%s479_s9 + $0x18] sm:$0xff] %v163_v41  ;;  %v111_v56 = vld [vmem:[%s475_s5 + $0x38] sm:$0xff]  ;;  %v142_v58 = vld [vmem:[%s477_s7 + $0x30] sm:$0xff] }
  0x18   :  { %v148_v46 = vmax.f32 %v132_v37, %v140_v33  ;;  %v133_v50 = vmax.f32 %v117_v43, %v125_v38  ;;  %v87_v52 = vmax.f32 %v71_v45, %v79_v40  ;;  %v127_v61 = vld [vmem:[%s476_s6 + $0x38] sm:$0xff]  ;;  %v158_v63 = vld [vmem:[%s478_s8 + $0x30] sm:$0xff] }
  0x19   :  { %v118_v55 = vmax.f32 %v102_v48, %v110_v44  ;;  %v143_v2 = vld [vmem:[%s477_s7 + $0x38] sm:$0xff] }
  0x1a   :  { %v164_v53 = vmax.f32 %v148_v46, %v156_v42  ;;  %v149_v57 = vmax.f32 %v133_v50, %v141_v47  ;;  %v103_v59 = vmax.f32 %v87_v52, %v95_v49  ;;  %v159_v5 = vld [vmem:[%s478_s8 + $0x38] sm:$0xff] }
  0x1b   :  { %v134_v60 = vmax.f32 %v118_v55, %v126_v51 }
  0x1c   :  { %172 = vst [vmem:[%s479_s9 + $0x20] sm:$0xff] %v164_v53  ;;  %v165_v62 = vmax.f32 %v149_v57, %v157_v54  ;;  %v119_v0 = vmax.f32 %v103_v59, %v111_v56 }
  0x1d   :  { %v150_v1 = vmax.f32 %v134_v60, %v142_v58 }
  0x1e   :  { %173 = vst [vmem:[%s479_s9 + $0x28] sm:$0xff] %v165_v62  ;;  %v135_v3 = vmax.f32 %v119_v0, %v127_v61 }
  0x1f   :  { %v166_v4 = vmax.f32 %v150_v1, %v158_v63 }
  0x20   :  { %v151_v6 = vmax.f32 %v135_v3, %v143_v2 }
  0x21   :  { %174 = vst [vmem:[%s479_s9 + $0x30] sm:$0xff] %v166_v4 }
  0x22   :  { %v167_v7 = vmax.f32 %v151_v6, %v159_v5 }
  0x24   :  { %175 = vst [vmem:[%s479_s9 + $0x38] sm:$0xff] %v167_v7 }

// kernel: resnet18_forward.62
= control target key start
LH: loop header
LB: loop body
LE: loop exit
PB: predicated region body
PF: predicated region fallthrough
CT: control target
= control target key end

     0   :  { %vm14_vm0 = vcmask 516096   ;;  %vm34_vm1 = vcmask 523264   ;;  %v140_v0 = vmov 0.0   ;;  %s258_s0 = inlined_call_operand.vmem [shape: f32[128,64], index: 0, kind: input, shape index: {}]   ;;  %s259_s1 = inlined_call_operand.vmem [shape: f32[1,64], index: 1, kind: output, shape index: {0}]   ;;  %s260_s2 = inlined_call_operand.vmem [shape: f32[1,64], index: 2, kind: output, shape index: {1}]  }
   0x1   :  { %15 = vst.msk [vmem:[%s259_s1] sm:$0x1] %vm14_vm0, %v140_v0  ;;  %v17_v1 = vld [vmem:[%s258_s0] sm:$0xff]  ;;  %v18_v2 = vld [vmem:[%s258_s0 + $0x8] sm:$0xff]  ;;  %v19_v3 = vld [vmem:[%s258_s0 + $0x10] sm:$0xff] }
   0x2   :  { %v35_v4 = vsel %vm34_vm1, %v17_v1, 0.0  ;;  %v36_v5 = vsel %vm34_vm1, %v18_v2, 0.0  ;;  %v38_v6 = vsel %vm34_vm1, %v19_v3, 0.0  ;;  %v20_v7 = vld [vmem:[%s258_s0 + $0x18] sm:$0xff]  ;;  %v21_v10 = vld [vmem:[%s258_s0 + $0x20] sm:$0xff]  ;;  %v22_v13 = vld [vmem:[%s258_s0 + $0x28] sm:$0xff]  ;;  %v76_v15 = vmul.f32 %v17_v1, %v17_v1 }
   0x3   :  { %v37_v8 = vadd.f32 %v36_v5, %v35_v4  ;;  %v40_v9 = vsel %vm34_vm1, %v20_v7, 0.0  ;;  %v42_v12 = vsel %vm34_vm1, %v21_v10, 0.0  ;;  %16 = vst.msk [vmem:[%s260_s2] sm:$0x1] %vm14_vm0, %v140_v0  ;;  %v77_v16 = vmul.f32 %v18_v2, %v18_v2  ;;  %v23_v19 = vld [vmem:[%s258_s0 + $0x30] sm:$0xff]  ;;  %v24_v24 = vld [vmem:[%s258_s0 + $0x38] sm:$0xff] }
   0x4   :  { %v78_v17 = vmul.f32 %v19_v3, %v19_v3  ;;  %v44_v18 = vsel %vm34_vm1, %v22_v13, 0.0  ;;  %v79_v21 = vmul.f32 %v20_v7, %v20_v7  ;;  %v46_v22 = vsel %vm34_vm1, %v23_v19, 0.0  ;;  %v25_v31 = vld [vmem:[%s258_s0 + $0x40] sm:$0xff]  ;;  %v26_v37 = vld [vmem:[%s258_s0 + $0x48] sm:$0xff]  ;;  %v27_v43 = vld [vmem:[%s258_s0 + $0x50] sm:$0xff] }
   0x5   :  { %v39_v11 = vadd.f32 %v38_v6, %v37_v8  ;;  %v80_v23 = vmul.f32 %v21_v10, %v21_v10  ;;  %v92_v26 = vsel %vm34_vm1, %v76_v15, 0.0  ;;  %v93_v27 = vsel %vm34_vm1, %v77_v16, 0.0  ;;  %v28_v49 = vld [vmem:[%s258_s0 + $0x58] sm:$0xff]  ;;  %v29_v55 = vld [vmem:[%s258_s0 + $0x60] sm:$0xff]  ;;  %v30_v61 = vld [vmem:[%s258_s0 + $0x68] sm:$0xff] }
   0x6   :  { %v95_v28 = vsel %vm34_vm1, %v78_v17, 0.0  ;;  %v48_v29 = vsel %vm34_vm1, %v24_v24, 0.0  ;;  %v94_v30 = vadd.f32 %v93_v27, %v92_v26  ;;  %v81_v33 = vmul.f32 %v22_v13, %v22_v13  ;;  %v31_v3 = vld [vmem:[%s258_s0 + $0x70] sm:$0xff] }
   0x7   :  { %v41_v14 = vadd.f32 %v40_v9, %v39_v11  ;;  %v97_v34 = vsel %vm34_vm1, %v79_v21, 0.0  ;;  %v50_v35 = vsel %vm34_vm1, %v25_v31, 0.0  ;;  %v82_v39 = vmul.f32 %v23_v19, %v23_v19  ;;  %v32_v9 = vld [vmem:[%s258_s0 + $0x78] sm:$0xff] }
   0x8   :  { %v96_v36 = vadd.f32 %v95_v28, %v94_v30  ;;  %v99_v40 = vsel %vm34_vm1, %v80_v23, 0.0  ;;  %v52_v41 = vsel %vm34_vm1, %v26_v37, 0.0  ;;  %v83_v45 = vmul.f32 %v24_v24, %v24_v24 }
   0x9   :  { %v43_v20 = vadd.f32 %v42_v12, %v41_v14  ;;  %v101_v46 = vsel %vm34_vm1, %v81_v33, 0.0  ;;  %v54_v47 = vsel %vm34_vm1, %v27_v43, 0.0  ;;  %v84_v51 = vmul.f32 %v25_v31, %v25_v31 }
   0xa   :  { %v98_v42 = vadd.f32 %v97_v34, %v96_v36  ;;  %v103_v52 = vsel %vm34_vm1, %v82_v39, 0.0  ;;  %v56_v53 = vsel %vm34_vm1, %v28_v49, 0.0  ;;  %v85_v57 = vmul.f32 %v26_v37, %v26_v37  ;;  %v33_v36 = vld [vmem:[%s259_s1] sm:$0x1] }
   0xb   :  { %v45_v25 = vadd.f32 %v44_v18, %v43_v20  ;;  %v105_v58 = vsel %vm34_vm1, %v83_v45, 0.0  ;;  %v58_v59 = vsel %vm34_vm1, %v29_v55, 0.0  ;;  %v86_v63 = vmul.f32 %v27_v43, %v27_v43 }
   0xc   :  { %v100_v48 = vadd.f32 %v99_v40, %v98_v42  ;;  %v107_v0 = vsel %vm34_vm1, %v84_v51, 0.0  ;;  %v60_v1 = vsel %vm34_vm1, %v30_v61, 0.0  ;;  %v87_v5 = vmul.f32 %v28_v49, %v28_v49 }
   0xd   :  { %v47_v32 = vadd.f32 %v46_v22, %v45_v25  ;;  %v109_v6 = vsel %vm34_vm1, %v85_v57, 0.0  ;;  %v62_v7 = vsel %vm34_vm1, %v31_v3, 0.0  ;;  %v88_v11 = vmul.f32 %v29_v55, %v29_v55 }
   0xe   :  { %v102_v54 = vadd.f32 %v101_v46, %v100_v48  ;;  %v111_v12 = vsel %vm34_vm1, %v86_v63, 0.0  ;;  %v64_v13 = vsel %vm34_vm1, %v32_v9, 0.0  ;;  %v89_v16 = vmul.f32 %v30_v61, %v30_v61 }
   0xf   :  { %v49_v38 = vadd.f32 %v48_v29, %v47_v32  ;;  %v113_v17 = vsel %vm34_vm1, %v87_v5, 0.0  ;;  %v90_v20 = vmul.f32 %v31_v3, %v31_v3  ;;  %v115_v21 = vsel %vm34_vm1, %v88_v11, 0.0 }
  0x10   :  { %v104_v60 = vadd.f32 %v103_v52, %v102_v54  ;;  %v91_v24 = vmul.f32 %v32_v9, %v32_v9  ;;  %v117_v25 = vsel %vm34_vm1, %v89_v16, 0.0 }
  0x11   :  { %v51_v44 = vadd.f32 %v50_v35, %v49_v38  ;;  %v119_v28 = vsel %vm34_vm1, %v90_v20, 0.0 }
  0x12   :  { %v106_v2 = vadd.f32 %v105_v58, %v104_v60  ;;  %v121_v31 = vsel %vm34_vm1, %v91_v24, 0.0 }
  0x13   :  { %v53_v50 = vadd.f32 %v52_v41, %v51_v44  ;;  %v75_v44 = vld [vmem:[%s260_s2] sm:$0x1] }
  0x14   :  { %v108_v8 = vadd.f32 %v107_v0, %v106_v2 }
  0x15   :  { %v55_v56 = vadd.f32 %v54_v47, %v53_v50 }
  0x16   :  { %v110_v14 = vadd.f32 %v109_v6, %v108_v8 }
  0x17   :  { %v57_v62 = vadd.f32 %v56_v53, %v55_v56 }
  0x18   :  { %v112_v18 = vadd.f32 %v111_v12, %v110_v14 }
  0x19   :  { %v59_v4 = vadd.f32 %v58_v59, %v57_v62 }
  0x1a   :  { %v114_v22 = vadd.f32 %v113_v17, %v112_v18 }
  0x1b   :  { %v61_v10 = vadd.f32 %v60_v1, %v59_v4 }
  0x1c   :  { %v116_v26 = vadd.f32 %v115_v21, %v114_v22 }
  0x1d   :  { %v63_v15 = vadd.f32 %v62_v7, %v61_v10 }
  0x1e   :  { %v118_v29 = vadd.f32 %v117_v25, %v116_v26 }
  0x1f   :  { %v65_v19 = vadd.f32 %v64_v13, %v63_v15 }
  0x20   :  { %v120_v32 = vadd.f32 %v119_v28, %v118_v29 }
  0x21   :  { %v66_v23 = vrot.slane %v65_v19, 4 }
  0x22   :  { %v122_v34 = vadd.f32 %v121_v31, %v120_v32 }
  0x23   :  { %v67_v27 = vadd.f32 %v66_v23, %v65_v19 }
  0x24   :  { %v123_v37 = vrot.slane %v122_v34, 4 }
  0x25   :  { %v68_v30 = vrot.slane %v67_v27, 2 }
  0x26   :  { %v124_v39 = vadd.f32 %v123_v37, %v122_v34 }
  0x27   :  { %v69_v33 = vadd.f32 %v68_v30, %v67_v27 }
  0x28   :  { %v125_v41 = vrot.slane %v124_v39, 2 }
  0x29   :  { %v70_v35 = vrot.slane %v69_v33, 1 }
  0x2a   :  { %v126_v42 = vadd.f32 %v125_v41, %v124_v39 }
  0x2b   :  { %v71_v38 = vadd.f32 %v70_v35, %v69_v33 }
  0x2c   :  { %v127_v43 = vrot.slane %v126_v42, 1 }
  0x2d   :  { %v72_v40 = vadd.f32 %v71_v38, %v33_v36 }
  0x2e   :  { %v128_v45 = vadd.f32 %v127_v43, %v126_v42 }
  0x2f   :  { %74 = vst.msk [vmem:[%s259_s1] sm:$0x1] %vm14_vm0, %v72_v40 }
  0x30   :  { %v129_v46 = vadd.f32 %v128_v45, %v75_v44 }
  0x32   :  { %130 = vst.msk [vmem:[%s260_s2] sm:$0x1] %vm14_vm0, %v129_v46 }

// kernel: resnet18_forward.63
= control target key start
LH: loop header
LB: loop body
LE: loop exit
PB: predicated region body
PF: predicated region fallthrough
CT: control target
= control target key end

     0   :  { %s142_s0 = inlined_call_operand.vmem [shape: f32[64,128], index: 0, kind: input, shape index: {}]   ;;  %s143_s1 = inlined_call_operand.vmem [shape: f32[1,128], index: 1, kind: input, shape index: {}]   ;;  %s144_s2 = inlined_call_operand.vmem [shape: f32[1,128], index: 2, kind: input, shape index: {}]   ;;  %s145_s3 = inlined_call_operand.vmem [shape: f32[64,128], index: 3, kind: output, shape index: {}]  }
   0x1   :  { %v14_v0 = vld [vmem:[%s142_s0] sm:$0xff]  ;;  %v15_v3 = vld [vmem:[%s142_s0 + $0x8] sm:$0xff]  ;;  %v16_v6 = vld [vmem:[%s142_s0 + $0x10] sm:$0xff] }
   0x2   :  { %v66_v1 = vld [vmem:[%s143_s1] ss:$0 sm:$0xff]  ;;  %v17_v7 = vld [vmem:[%s142_s0 + $0x18] sm:$0xff]  ;;  %v19_v12 = vld [vmem:[%s142_s0 + $0x28] sm:$0xff] }
   0x3   :  { %v67_v2 = vld [vmem:[%s144_s2] ss:$0 sm:$0xff]  ;;  %v26_v4 = vmul.f32 %v66_v1, %v14_v0  ;;  %v27_v5 = vmul.f32 %v66_v1, %v15_v3  ;;  %v28_v9 = vmul.f32 %v66_v1, %v16_v6  ;;  %v29_v10 = vmul.f32 %v66_v1, %v17_v7  ;;  %v20_v13 = vld [vmem:[%s142_s0 + $0x30] sm:$0xff]  ;;  %v21_v14 = vld [vmem:[%s142_s0 + $0x38] sm:$0xff] }
   0x4   :  { %v18_v8 = vld [vmem:[%s142_s0 + $0x20] sm:$0xff]  ;;  %v31_v17 = vmul.f32 %v66_v1, %v19_v12  ;;  %v32_v18 = vmul.f32 %v66_v1, %v20_v13  ;;  %v33_v22 = vmul.f32 %v66_v1, %v21_v14 }
   0x5   :  { %v30_v11 = vmul.f32 %v66_v1, %v18_v8  ;;  %v38_v15 = vadd.f32 %v67_v2, %v26_v4  ;;  %v39_v16 = vadd.f32 %v67_v2, %v27_v5  ;;  %v40_v19 = vadd.f32 %v67_v2, %v28_v9 }
   0x6   :  { %v41_v20 = vadd.f32 %v67_v2, %v29_v10  ;;  %v43_v25 = vadd.f32 %v67_v2, %v31_v17  ;;  %v44_v26 = vadd.f32 %v67_v2, %v32_v18  ;;  %v45_v29 = vadd.f32 %v67_v2, %v33_v22 }
   0x7   :  { %v42_v21 = vadd.f32 %v67_v2, %v30_v11  ;;  %v46_v23 = vmax.f32 %v38_v15, 0.0  ;;  %v47_v24 = vmax.f32 %v39_v16, 0.0  ;;  %v48_v27 = vmax.f32 %v40_v19, 0.0 }
   0x8   :  { %v49_v28 = vmax.f32 %v41_v20, 0.0  ;;  %v51_v31 = vmax.f32 %v43_v25, 0.0  ;;  %v52_v32 = vmax.f32 %v44_v26, 0.0  ;;  %v53_v33 = vmax.f32 %v45_v29, 0.0 }
   0x9   :  { %54 = vst [vmem:[%s145_s3] sm:$0xff] %v46_v23  ;;  %v50_v30 = vmax.f32 %v42_v21, 0.0 }
   0xa   :  { %55 = vst [vmem:[%s145_s3 + $0x8] sm:$0xff] %v47_v24 }
   0xb   :  { %56 = vst [vmem:[%s145_s3 + $0x10] sm:$0xff] %v48_v27 }
   0xc   :  { %57 = vst [vmem:[%s145_s3 + $0x18] sm:$0xff] %v49_v28 }
   0xd   :  { %58 = vst [vmem:[%s145_s3 + $0x20] sm:$0xff] %v50_v30 }
   0xe   :  { %59 = vst [vmem:[%s145_s3 + $0x28] sm:$0xff] %v51_v31 }
   0xf   :  { %60 = vst [vmem:[%s145_s3 + $0x30] sm:$0xff] %v52_v32 }
  0x10   :  { %61 = vst [vmem:[%s145_s3 + $0x38] sm:$0xff] %v53_v33 }

// kernel: resnet18_forward.66
= control target key start
LH: loop header
LB: loop body
LE: loop exit
PB: predicated region body
PF: predicated region fallthrough
CT: control target
= control target key end

     0   :  { %s190_s0 = inlined_call_operand.vmem [shape: f32[64,128], index: 0, kind: input, shape index: {}]   ;;  %s191_s2 = inlined_call_operand.vmem [shape: f32[1,128], index: 2, kind: input, shape index: {}]   ;;  %s192_s3 = inlined_call_operand.vmem [shape: f32[1,128], index: 3, kind: input, shape index: {}]   ;;  %s193_s1 = inlined_call_operand.vmem [shape: f32[64,128], index: 1, kind: input, shape index: {}]   ;;  %s194_s4 = inlined_call_operand.vmem [shape: f32[64,128], index: 4, kind: output, shape index: {}]  }
   0x1   :  { %v17_v0 = vld [vmem:[%s190_s0] sm:$0xff]  ;;  %v18_v4 = vld [vmem:[%s190_s0 + $0x8] sm:$0xff]  ;;  %v19_v5 = vld [vmem:[%s190_s0 + $0x10] sm:$0xff] }
   0x2   :  { %v85_v1 = vld [vmem:[%s191_s2] ss:$0 sm:$0xff]  ;;  %v50_v8 = vld [vmem:[%s193_s1 + $0x8] sm:$0xff]  ;;  %v20_v10 = vld [vmem:[%s190_s0 + $0x18] sm:$0xff] }
   0x3   :  { %v86_v2 = vld [vmem:[%s192_s3] ss:$0 sm:$0xff]  ;;  %v29_v3 = vmul.f32 %v85_v1, %v17_v0  ;;  %v30_v7 = vmul.f32 %v85_v1, %v18_v4  ;;  %v31_v9 = vmul.f32 %v85_v1, %v19_v5  ;;  %v51_v12 = vld [vmem:[%s193_s1 + $0x10] sm:$0xff]  ;;  %v32_v13 = vmul.f32 %v85_v1, %v20_v10  ;;  %v22_v15 = vld [vmem:[%s190_s0 + $0x28] sm:$0xff] }
   0x4   :  { %v49_v6 = vld [vmem:[%s193_s1] sm:$0xff]  ;;  %v52_v18 = vld [vmem:[%s193_s1 + $0x18] sm:$0xff]  ;;  %v34_v20 = vmul.f32 %v85_v1, %v22_v15  ;;  %v23_v21 = vld [vmem:[%s190_s0 + $0x30] sm:$0xff] }
   0x5   :  { %v41_v11 = vadd.f32 %v86_v2, %v29_v3  ;;  %v21_v14 = vld [vmem:[%s190_s0 + $0x20] sm:$0xff]  ;;  %v42_v16 = vadd.f32 %v86_v2, %v30_v7  ;;  %v43_v17 = vadd.f32 %v86_v2, %v31_v9  ;;  %v44_v23 = vadd.f32 %v86_v2, %v32_v13  ;;  %v54_v25 = vld [vmem:[%s193_s1 + $0x28] sm:$0xff]  ;;  %v24_v27 = vld [vmem:[%s190_s0 + $0x38] sm:$0xff] }
   0x6   :  { %v33_v19 = vmul.f32 %v85_v1, %v21_v14  ;;  %v53_v24 = vld [vmem:[%s193_s1 + $0x20] sm:$0xff]  ;;  %v35_v26 = vmul.f32 %v85_v1, %v23_v21  ;;  %v46_v31 = vadd.f32 %v86_v2, %v34_v20  ;;  %v55_v32 = vld [vmem:[%s193_s1 + $0x30] sm:$0xff]  ;;  %v36_v36 = vmul.f32 %v85_v1, %v24_v27  ;;  %v56_v41 = vld [vmem:[%s193_s1 + $0x38] sm:$0xff] }
   0x7   :  { %v57_v22 = vadd.f32 %v49_v6, %v41_v11  ;;  %v58_v28 = vadd.f32 %v50_v8, %v42_v16  ;;  %v59_v29 = vadd.f32 %v51_v12, %v43_v17  ;;  %v60_v34 = vadd.f32 %v52_v18, %v44_v23 }
   0x8   :  { %v45_v30 = vadd.f32 %v86_v2, %v33_v19  ;;  %v47_v35 = vadd.f32 %v86_v2, %v35_v26  ;;  %v62_v40 = vadd.f32 %v54_v25, %v46_v31  ;;  %v48_v44 = vadd.f32 %v86_v2, %v36_v36 }
   0x9   :  { %v65_v33 = vmax.f32 %v57_v22, 0.0  ;;  %v66_v37 = vmax.f32 %v58_v28, 0.0  ;;  %v67_v38 = vmax.f32 %v59_v29, 0.0  ;;  %v68_v42 = vmax.f32 %v60_v34, 0.0 }
   0xa   :  { %v61_v39 = vadd.f32 %v53_v24, %v45_v30  ;;  %v63_v43 = vadd.f32 %v55_v32, %v47_v35  ;;  %v70_v46 = vmax.f32 %v62_v40, 0.0  ;;  %v64_v48 = vadd.f32 %v56_v41, %v48_v44 }
   0xb   :  { %73 = vst [vmem:[%s194_s4] sm:$0xff] %v65_v33 }
   0xc   :  { %74 = vst [vmem:[%s194_s4 + $0x8] sm:$0xff] %v66_v37  ;;  %v69_v45 = vmax.f32 %v61_v39, 0.0  ;;  %v71_v47 = vmax.f32 %v63_v43, 0.0  ;;  %v72_v49 = vmax.f32 %v64_v48, 0.0 }
   0xd   :  { %75 = vst [vmem:[%s194_s4 + $0x10] sm:$0xff] %v67_v38 }
   0xe   :  { %76 = vst [vmem:[%s194_s4 + $0x18] sm:$0xff] %v68_v42 }
   0xf   :  { %77 = vst [vmem:[%s194_s4 + $0x20] sm:$0xff] %v69_v45 }
  0x10   :  { %78 = vst [vmem:[%s194_s4 + $0x28] sm:$0xff] %v70_v46 }
  0x11   :  { %79 = vst [vmem:[%s194_s4 + $0x30] sm:$0xff] %v71_v47 }
  0x12   :  { %80 = vst [vmem:[%s194_s4 + $0x38] sm:$0xff] %v72_v49 }

// kernel: resnet18_forward.61
= control target key start
LH: loop header
LB: loop body
LE: loop exit
PB: predicated region body
PF: predicated region fallthrough
CT: control target
= control target key end

     0   :  { %vm19_vm0 = vcmask 523264   ;;  %s1893_s1 = inlined_call_operand.vmem [shape: bf16[576,64], index: 1, kind: input, shape index: {}]   ;;  %s1894_s0 = inlined_call_operand.vmem [shape: bf16[128,576], index: 0, kind: input, shape index: {}]   ;;  %s1895_s2 = inlined_call_operand.vmem [shape: f32[1,64], index: 2, kind: input, shape index: {}]   ;;  %s1896_s3 = inlined_call_operand.vmem [shape: f32[128,64], index: 3, kind: output, shape index: {}]  }
   0x1   :  { %v1308_v0 = vld [vmem:[%s1893_s1 + $0x38] sm:$0xff]  ;;  %v1307_v1 = vld [vmem:[%s1893_s1 + $0x30] sm:$0xff]  ;;  %v1306_v2 = vld [vmem:[%s1893_s1 + $0x28] sm:$0xff] }
   0x2   :  { %1337 = vmatpush.bf16.msra.mxu1 %v1308_v0  ;;  %1338 = vmatpush.bf16.msra.mxu2 %v1308_v0  ;;  %v1305_v3 = vld [vmem:[%s1893_s1 + $0x20] sm:$0xff]  ;;  %v1304_v4 = vld [vmem:[%s1893_s1 + $0x18] sm:$0xff]  ;;  %v1303_v5 = vld [vmem:[%s1893_s1 + $0x10] sm:$0xff] }
   0x3   :  { %1339 = vmatpush.bf16.msra.mxu3 %v1308_v0  ;;  %613 = vmatpush.bf16.msra.mxu0 %v1308_v0  ;;  %v1302_v6 = vld [vmem:[%s1893_s1 + $0x8] sm:$0xff]  ;;  %v1301_v7 = vld [vmem:[%s1893_s1] sm:$0xff]  ;;  %v991_v8 = vld [vmem:[%s1894_s0 + $0x50] sm:$0xf] }
   0x4   :  { %v1273_v9 = vld [vmem:[%s1894_s0 + $0x60] sm:$0xf0]  ;;  %v1031_v10 = vld [vmem:[%s1894_s0 + $0xa0] sm:$0xf]  ;;  %v1283_v11 = vld [vmem:[%s1894_s0 + $0xb0] sm:$0xf0] }
   0x5   :  { %v1071_v12 = vld [vmem:[%s1894_s0 + $0xf0] sm:$0xf]  ;;  %v1293_v13 = vld [vmem:[%s1894_s0 + $0x100] sm:$0xf0]  ;;  %v951_v14 = vld [vmem:[%s1894_s0] sm:$0xf]  ;;  %v992_v18 = vor.u32 %v1273_v9, %v991_v8  ;;  %v1032_v19 = vor.u32 %v1283_v11, %v1031_v10 }
   0x6   :  { %1340 = vmatpush.bf16.msra.mxu1 %v1307_v1  ;;  %1341 = vmatpush.bf16.msra.mxu2 %v1307_v1  ;;  %v1263_v15 = vld [vmem:[%s1894_s0 + $0x10] sm:$0xf0]  ;;  %v1324_v16 = vld [vmem:[%s1893_s1 + $0xb8] sm:$0xff]  ;;  %v1072_v20 = vor.u32 %v1293_v13, %v1071_v12  ;;  %v1322_v28 = vld [vmem:[%s1893_s1 + $0xa8] sm:$0xff] }
   0x7   :  { %1342 = vmatpush.bf16.msra.mxu3 %v1307_v1  ;;  %614 = vmatpush.bf16.msra.mxu0 %v1307_v1  ;;  %v1316_v17 = vld [vmem:[%s1893_s1 + $0x78] sm:$0xff]  ;;  %v952_v21 = vor.u32 %v1263_v15, %v951_v14  ;;  %v1323_v24 = vld [vmem:[%s1893_s1 + $0xb0] sm:$0xff]  ;;  %v1314_v29 = vld [vmem:[%s1893_s1 + $0x68] sm:$0xff] }
   0x8   :  { %v1332_v22 = vld [vmem:[%s1893_s1 + $0xf8] sm:$0xff]  ;;  %v1315_v25 = vld [vmem:[%s1893_s1 + $0x70] sm:$0xff]  ;;  %v1330_v30 = vld [vmem:[%s1893_s1 + $0xe8] sm:$0xff] }
   0x9   :  { %v1336_v23 = vld [vmem:[%s1893_s1 + $0x118] sm:$0xff]  ;;  %v1331_v26 = vld [vmem:[%s1893_s1 + $0xf0] sm:$0xff]  ;;  %v1334_v31 = vld [vmem:[%s1893_s1 + $0x108] sm:$0xff] }
   0xa   :  { %1343 = vmatpush.bf16.msra.mxu1 %v1306_v2  ;;  %1344 = vmatpush.bf16.msra.mxu2 %v1306_v2  ;;  %v1335_v27 = vld [vmem:[%s1893_s1 + $0x110] sm:$0xff]  ;;  %v1321_v32 = vld [vmem:[%s1893_s1 + $0xa0] sm:$0xff]  ;;  %v1011_v35 = vld [vmem:[%s1894_s0 + $0x78] sm:$0xf] }
   0xb   :  { %1345 = vmatpush.bf16.msra.mxu3 %v1306_v2  ;;  %615 = vmatpush.bf16.msra.mxu0 %v1306_v2  ;;  %v1313_v33 = vld [vmem:[%s1893_s1 + $0x60] sm:$0xff]  ;;  %v1278_v36 = vld [vmem:[%s1894_s0 + $0x88] sm:$0xf0]  ;;  %v1051_v37 = vld [vmem:[%s1894_s0 + $0xc8] sm:$0xf] }
   0xc   :  { %v1329_v34 = vld [vmem:[%s1893_s1 + $0xe0] sm:$0xff]  ;;  %v1288_v38 = vld [vmem:[%s1894_s0 + $0xd8] sm:$0xf0]  ;;  %v1091_v39 = vld [vmem:[%s1894_s0 + $0x118] sm:$0xf]  ;;  %v1012_v46 = vor.u32 %v1278_v36, %v1011_v35 }
   0xd   :  { %v1298_v40 = vld [vmem:[%s1894_s0 + $0x128] sm:$0xf0]  ;;  %v971_v41 = vld [vmem:[%s1894_s0 + $0x28] sm:$0xf]  ;;  %v1268_v42 = vld [vmem:[%s1894_s0 + $0x38] sm:$0xf0]  ;;  %v1052_v47 = vor.u32 %v1288_v38, %v1051_v37 }
   0xe   :  { %1346 = vmatpush.bf16.msra.mxu1 %v1305_v3  ;;  %1347 = vmatpush.bf16.msra.mxu2 %v1305_v3  ;;  %v1333_v43 = vld [vmem:[%s1893_s1 + $0x100] sm:$0xff]  ;;  %v1320_v44 = vld [vmem:[%s1893_s1 + $0x98] sm:$0xff]  ;;  %v1092_v48 = vor.u32 %v1298_v40, %v1091_v39  ;;  %v972_v49 = vor.u32 %v1268_v42, %v971_v41  ;;  %v1319_v51 = vld [vmem:[%s1893_s1 + $0x90] sm:$0xff] }
   0xf   :  { %1348 = vmatpush.bf16.msra.mxu3 %v1305_v3  ;;  %616 = vmatpush.bf16.msra.mxu0 %v1305_v3  ;;  %v1312_v45 = vld [vmem:[%s1893_s1 + $0x58] sm:$0xff]  ;;  %v1311_v52 = vld [vmem:[%s1893_s1 + $0x50] sm:$0xff]  ;;  %v1318_v54 = vld [vmem:[%s1893_s1 + $0x88] sm:$0xff] }
  0x10   :  { %v1328_v50 = vld [vmem:[%s1893_s1 + $0xd8] sm:$0xff]  ;;  %v1327_v53 = vld [vmem:[%s1893_s1 + $0xd0] sm:$0xff]  ;;  %v1310_v55 = vld [vmem:[%s1893_s1 + $0x48] sm:$0xff] }
  0x11   :  { %v1326_v56 = vld [vmem:[%s1893_s1 + $0xc8] sm:$0xff]  ;;  %v1317_v57 = vld [vmem:[%s1893_s1 + $0x80] sm:$0xff]  ;;  %v953_v61 = vld [vmem:[%s1894_s0 + $0x14] sm:$0xf0] }
  0x12   :  { %1349 = vmatpush.bf16.msra.mxu1 %v1304_v4  ;;  %1350 = vmatpush.bf16.msra.mxu2 %v1304_v4  ;;  %v1309_v58 = vld [vmem:[%s1893_s1 + $0x40] sm:$0xff]  ;;  %v959_v62 = vld [vmem:[%s1894_s0 + $0x8] sm:$0xf]  ;;  %v1264_v63 = vld [vmem:[%s1894_s0 + $0x18] sm:$0xf0] }
  0x13   :  { %1351 = vmatpush.bf16.msra.mxu3 %v1304_v4  ;;  %617 = vmatpush.bf16.msra.mxu0 %v1304_v4  ;;  %v1325_v59 = vld [vmem:[%s1893_s1 + $0xc0] sm:$0xff]  ;;  %v1262_v0 = vld [vmem:[%s1894_s0 + $0xc] sm:$0xf]  ;;  %v967_v2 = vld [vmem:[%s1894_s0 + $0x10] sm:$0xf] }
  0x14   :  { %v1261_v60 = vld [vmem:[%s1894_s0 + $0x4] sm:$0xf]  ;;  %v961_v1 = vld [vmem:[%s1894_s0 + $0x1c] sm:$0xf0]  ;;  %v1266_v8 = vld [vmem:[%s1894_s0 + $0x2c] sm:$0xf] }
  0x15   :  { %v1265_v3 = vld [vmem:[%s1894_s0 + $0x20] sm:$0xf0]  ;;  %v956_v4 = vor.u32 %v1261_v60, %v953_v61  ;;  %v973_v9 = vld [vmem:[%s1894_s0 + $0x3c] sm:$0xf0]  ;;  %v979_v10 = vld [vmem:[%s1894_s0 + $0x30] sm:$0xf] }
  0x16   :  { %1352 = vmatpush.bf16.msra.mxu1 %v1303_v5  ;;  %1353 = vmatpush.bf16.msra.mxu2 %v1303_v5  ;;  %v1269_v11 = vld [vmem:[%s1894_s0 + $0x40] sm:$0xf0]  ;;  %v1267_v12 = vld [vmem:[%s1894_s0 + $0x34] sm:$0xf]  ;;  %v981_v13 = vld [vmem:[%s1894_s0 + $0x44] sm:$0xf0] }
  0x17   :  { %1354 = vmatpush.bf16.msra.mxu3 %v1303_v5  ;;  %618 = vmatpush.bf16.msra.mxu0 %v1303_v5  ;;  %v960_v5 = vor.u32 %v1264_v63, %v959_v62  ;;  %v987_v14 = vld [vmem:[%s1894_s0 + $0x38] sm:$0xf]  ;;  %v1270_v15 = vld [vmem:[%s1894_s0 + $0x48] sm:$0xf0]  ;;  %v1279_v35 = vld [vmem:[%s1894_s0 + $0x90] sm:$0xf0] }
  0x18   :  { %v1277_v36 = vld [vmem:[%s1894_s0 + $0x84] sm:$0xf]  ;;  %v1021_v37 = vld [vmem:[%s1894_s0 + $0x94] sm:$0xf0]  ;;  %v1027_v38 = vld [vmem:[%s1894_s0 + $0x88] sm:$0xf] }
  0x19   :  { %v1280_v39 = vld [vmem:[%s1894_s0 + $0x98] sm:$0xf0]  ;;  %v1024_v42 = vor.u32 %v1277_v36, %v1021_v37  ;;  %v1287_v60 = vld [vmem:[%s1894_s0 + $0xd4] sm:$0xf]  ;;  %v1061_v61 = vld [vmem:[%s1894_s0 + $0xe4] sm:$0xf0] }
  0x1a   :  { %1355 = vmatpush.bf16.msra.mxu1 %v1302_v6  ;;  %1356 = vmatpush.bf16.msra.mxu2 %v1302_v6  ;;  %v1067_v62 = vld [vmem:[%s1894_s0 + $0xd8] sm:$0xf]  ;;  %v1290_v63 = vld [vmem:[%s1894_s0 + $0xe8] sm:$0xf0] }
  0x1b   :  { %1357 = vmatpush.bf16.msra.mxu3 %v1302_v6  ;;  %619 = vmatpush.bf16.msra.mxu0 %v1302_v6  ;;  %v964_v6 = vor.u32 %v1262_v0, %v961_v1 }
  0x1e   :  { %1358 = vmatpush.bf16.msra.mxu1 %v1301_v7  ;;  %1359 = vmatpush.bf16.msra.mxu2 %v1301_v7 }
  0x1f   :  { %1360 = vmatpush.bf16.msra.mxu3 %v1301_v7  ;;  %620 = vmatpush.bf16.msra.mxu0 %v1301_v7  ;;  %v968_v7 = vor.u32 %v1265_v3, %v967_v2  ;;  %v1064_v2 = vor.u32 %v1287_v60, %v1061_v61  ;;  %v1068_v3 = vor.u32 %v1290_v63, %v1067_v62 }
  0x21   :  { %631 = vmatmul.bf16.vlgmr.msra.gmra.mxu1 %v992_v18  ;;  %641 = vmatmul.bf16.vlgmr.msra.gmra.mxu2 %v1032_v19  ;;  %v984_v18 = vor.u32 %v1267_v12, %v981_v13  ;;  %v988_v19 = vor.u32 %v1270_v15, %v987_v14 }
  0x22   :  { %711 = vmatpush.bf16.msrb.mxu2 %v1324_v16  ;;  %662 = vmatpush.bf16.msrb.mxu1 %v1316_v17  ;;  %v976_v16 = vor.u32 %v1266_v8, %v973_v9  ;;  %v980_v17 = vor.u32 %v1269_v11, %v979_v10  ;;  %v1292_v8 = vld [vmem:[%s1894_s0 + $0xfc] sm:$0xf]  ;;  %v1081_v9 = vld [vmem:[%s1894_s0 + $0x10c] sm:$0xf0]  ;;  %v1087_v10 = vld [vmem:[%s1894_s0 + $0x100] sm:$0xf] }
  0x23   :  { %651 = vmatmul.bf16.vlgmr.msra.gmra.mxu3 %v1072_v20  ;;  %621 = vmatmul.bf16.vlgmr.msra.gmra.mxu0 %v952_v21  ;;  %v1271_v20 = vld [vmem:[%s1894_s0 + $0x54] sm:$0xf]  ;;  %v993_v21 = vld [vmem:[%s1894_s0 + $0x64] sm:$0xf0]  ;;  %v1084_v15 = vor.u32 %v1292_v8, %v1081_v9 }
  0x24   :  { %760 = vmatpush.bf16.msrb.mxu3 %v1332_v22  ;;  %813 = vmatpush.bf16.msrb.mxu0 %v1336_v23  ;;  %v999_v22 = vld [vmem:[%s1894_s0 + $0x58] sm:$0xf]  ;;  %v1274_v23 = vld [vmem:[%s1894_s0 + $0x68] sm:$0xf0]  ;;  %v1295_v11 = vld [vmem:[%s1894_s0 + $0x110] sm:$0xf0] }
  0x26   :  { %712 = vmatpush.bf16.msrb.mxu2 %v1323_v24  ;;  %663 = vmatpush.bf16.msrb.mxu1 %v1315_v25  ;;  %v1272_v24 = vld [vmem:[%s1894_s0 + $0x5c] sm:$0xf]  ;;  %v1001_v25 = vld [vmem:[%s1894_s0 + $0x6c] sm:$0xf0] }
  0x28   :  { %761 = vmatpush.bf16.msrb.mxu3 %v1331_v26  ;;  %814 = vmatpush.bf16.msrb.mxu0 %v1335_v27  ;;  %v1007_v26 = vld [vmem:[%s1894_s0 + $0x60] sm:$0xf]  ;;  %v1275_v27 = vld [vmem:[%s1894_s0 + $0x70] sm:$0xf0] }
  0x2a   :  { %713 = vmatpush.bf16.msrb.mxu2 %v1322_v28  ;;  %664 = vmatpush.bf16.msrb.mxu1 %v1314_v29  ;;  %v996_v28 = vor.u32 %v1271_v20, %v993_v21  ;;  %v1000_v29 = vor.u32 %v1274_v23, %v999_v22  ;;  %v1296_v23 = vld [vmem:[%s1894_s0 + $0x11c] sm:$0xf] }
  0x2c   :  { %762 = vmatpush.bf16.msrb.mxu3 %v1330_v30  ;;  %815 = vmatpush.bf16.msrb.mxu0 %v1334_v31  ;;  %v1004_v30 = vor.u32 %v1272_v24, %v1001_v25  ;;  %v1008_v31 = vor.u32 %v1275_v27, %v1007_v26  ;;  %v1093_v24 = vld [vmem:[%s1894_s0 + $0x12c] sm:$0xf0]  ;;  %v1099_v25 = vld [vmem:[%s1894_s0 + $0x120] sm:$0xf]  ;;  %v1299_v26 = vld [vmem:[%s1894_s0 + $0x130] sm:$0xf0] }
  0x2d   :  { %v1297_v27 = vld [vmem:[%s1894_s0 + $0x124] sm:$0xf] }
  0x2e   :  { %714 = vmatpush.bf16.msrb.mxu2 %v1321_v32  ;;  %665 = vmatpush.bf16.msrb.mxu1 %v1313_v33  ;;  %v1276_v32 = vld [vmem:[%s1894_s0 + $0x7c] sm:$0xf]  ;;  %v1013_v33 = vld [vmem:[%s1894_s0 + $0x8c] sm:$0xf0] }
  0x2f   :  { %v1016_v40 = vor.u32 %v1276_v32, %v1013_v33  ;;  %v1096_v33 = vor.u32 %v1296_v23, %v1093_v24 }
  0x30   :  { %763 = vmatpush.bf16.msrb.mxu3 %v1329_v34  ;;  %816 = vmatpush.bf16.msrb.mxu0 %v1333_v43  ;;  %v1019_v34 = vld [vmem:[%s1894_s0 + $0x80] sm:$0xf]  ;;  %v1028_v43 = vor.u32 %v1280_v39, %v1027_v38 }
  0x31   :  { %636 = vmatmul.bf16.gmra.mxu1 %v1012_v46  ;;  %646 = vmatmul.bf16.gmra.mxu2 %v1052_v47  ;;  %v1020_v41 = vor.u32 %v1279_v35, %v1019_v34  ;;  %v1039_v46 = vld [vmem:[%s1894_s0 + $0xa8] sm:$0xf]  ;;  %v1284_v47 = vld [vmem:[%s1894_s0 + $0xb8] sm:$0xf0]  ;;  %v1100_v34 = vor.u32 %v1299_v26, %v1099_v25 }
  0x32   :  { %715 = vmatpush.bf16.msrb.mxu2 %v1320_v44  ;;  %666 = vmatpush.bf16.msrb.mxu1 %v1312_v45  ;;  %v1281_v44 = vld [vmem:[%s1894_s0 + $0xa4] sm:$0xf]  ;;  %v1033_v45 = vld [vmem:[%s1894_s0 + $0xb4] sm:$0xf0] }
  0x33   :  { %656 = vmatmul.bf16.gmra.mxu3 %v1092_v48  ;;  %626 = vmatmul.bf16.gmra.mxu0 %v972_v49  ;;  %v1282_v48 = vld [vmem:[%s1894_s0 + $0xac] sm:$0xf]  ;;  %v1041_v49 = vld [vmem:[%s1894_s0 + $0xbc] sm:$0xf0] }
  0x34   :  { %764 = vmatpush.bf16.msrb.mxu3 %v1328_v50  ;;  %v1047_v50 = vld [vmem:[%s1894_s0 + $0xb0] sm:$0xf] }
  0x36   :  { %716 = vmatpush.bf16.msrb.mxu2 %v1319_v51  ;;  %667 = vmatpush.bf16.msrb.mxu1 %v1311_v52  ;;  %v1285_v51 = vld [vmem:[%s1894_s0 + $0xc0] sm:$0xf0]  ;;  %v1036_v52 = vor.u32 %v1281_v44, %v1033_v45 }
  0x38   :  { %765 = vmatpush.bf16.msrb.mxu3 %v1327_v53  ;;  %v1040_v53 = vor.u32 %v1284_v47, %v1039_v46 }
  0x3a   :  { %717 = vmatpush.bf16.msrb.mxu2 %v1318_v54  ;;  %668 = vmatpush.bf16.msrb.mxu1 %v1310_v55  ;;  %v1044_v54 = vor.u32 %v1282_v48, %v1041_v49  ;;  %v1048_v55 = vor.u32 %v1285_v51, %v1047_v50 }
  0x3c   :  { %766 = vmatpush.bf16.msrb.mxu3 %v1326_v56  ;;  %v1286_v56 = vld [vmem:[%s1894_s0 + $0xcc] sm:$0xf] }
  0x3e   :  { %718 = vmatpush.bf16.msrb.mxu2 %v1317_v57  ;;  %669 = vmatpush.bf16.msrb.mxu1 %v1309_v58  ;;  %v1053_v57 = vld [vmem:[%s1894_s0 + $0xdc] sm:$0xf0]  ;;  %v1059_v58 = vld [vmem:[%s1894_s0 + $0xd0] sm:$0xf] }
  0x3f   :  { %v1056_v0 = vor.u32 %v1286_v56, %v1053_v57 }
  0x40   :  { %767 = vmatpush.bf16.msrb.mxu3 %v1325_v59  ;;  %v1289_v59 = vld [vmem:[%s1894_s0 + $0xe0] sm:$0xf0] }
  0x41   :  { %670 = vmatmul.bf16.vlgmr.msrb.gmra.mxu1 %v956_v4  ;;  %719 = vmatmul.bf16.vlgmr.msrb.gmra.mxu2 %v960_v5  ;;  %v1060_v1 = vor.u32 %v1289_v59, %v1059_v58  ;;  %v1291_v4 = vld [vmem:[%s1894_s0 + $0xf4] sm:$0xf]  ;;  %v1073_v5 = vld [vmem:[%s1894_s0 + $0x104] sm:$0xf0] }
  0x42   :  { %v1076_v12 = vor.u32 %v1291_v4, %v1073_v5 }
  0x43   :  { %768 = vmatmul.bf16.vlgmr.msrb.gmra.mxu3 %v964_v6  ;;  %1253 = vmatmul.msk.bf16.vlgmr.msrb.gmra.mxu0 %vm19_vm0, %v968_v7  ;;  %v1079_v6 = vld [vmem:[%s1894_s0 + $0xf8] sm:$0xf]  ;;  %v1294_v7 = vld [vmem:[%s1894_s0 + $0x108] sm:$0xf0] }
  0x44   :  { %v1080_v13 = vor.u32 %v1294_v7, %v1079_v6 }
  0x51   :  { %675 = vmatmul.bf16.gmra.mxu1 %v976_v16  ;;  %724 = vmatmul.bf16.gmra.mxu2 %v980_v17  ;;  %v1088_v16 = vor.u32 %v1295_v11, %v1087_v10 }
  0x53   :  { %773 = vmatmul.bf16.gmra.mxu3 %v984_v18  ;;  %1254 = vmatmul.msk.bf16.gmra.mxu0 %vm19_vm0, %v988_v19  ;;  %v1363_v19 = vmov 0.0  }
  0x54   :  { %20 = vst.msk [vmem:[#allocation2] sm:$0xff] %vm19_vm0, %v1363_v19 }
  0x55   :  { %21 = vst.msk [vmem:[#allocation2 + $0x8] sm:$0xff] %vm19_vm0, %v1363_v19 }
  0x56   :  { %22 = vst.msk [vmem:[#allocation2 + $0x10] sm:$0xff] %vm19_vm0, %v1363_v19 }
  0x57   :  { %23 = vst.msk [vmem:[#allocation2 + $0x18] sm:$0xff] %vm19_vm0, %v1363_v19 }
  0x58   :  { %24 = vst.msk [vmem:[#allocation2 + $0x20] sm:$0xff] %vm19_vm0, %v1363_v19 }
  0x59   :  { %25 = vst.msk [vmem:[#allocation2 + $0x28] sm:$0xff] %vm19_vm0, %v1363_v19 }
  0x5a   :  { %26 = vst.msk [vmem:[#allocation2 + $0x30] sm:$0xff] %vm19_vm0, %v1363_v19 }
  0x5b   :  { %27 = vst.msk [vmem:[#allocation2 + $0x38] sm:$0xff] %vm19_vm0, %v1363_v19 }
  0x5c   :  { %28 = vst.msk [vmem:[#allocation2 + $0x40] sm:$0xff] %vm19_vm0, %v1363_v19 }
  0x5d   :  { %29 = vst.msk [vmem:[#allocation2 + $0x48] sm:$0xff] %vm19_vm0, %v1363_v19 }
  0x5e   :  { %30 = vst.msk [vmem:[#allocation2 + $0x50] sm:$0xff] %vm19_vm0, %v1363_v19 }
  0x5f   :  { %31 = vst.msk [vmem:[#allocation2 + $0x58] sm:$0xff] %vm19_vm0, %v1363_v19 }
  0x60   :  { %32 = vst.msk [vmem:[#allocation2 + $0x60] sm:$0xff] %vm19_vm0, %v1363_v19 }
  0x61   :  { %680 = vmatmul.bf16.gmra.mxu1 %v996_v28  ;;  %729 = vmatmul.bf16.gmra.mxu2 %v1000_v29  ;;  %v1101_v28 = vld [vmem:[%s1894_s0 + $0x134] sm:$0xf0]  ;;  %v1107_v29 = vld [vmem:[%s1894_s0 + $0x128] sm:$0xf]  ;;  %33 = vst.msk [vmem:[#allocation2 + $0x68] sm:$0xff] %vm19_vm0, %v1363_v19 }
  0x62   :  { %v1104_v36 = vor.u32 %v1297_v27, %v1101_v28  ;;  %34 = vst.msk [vmem:[#allocation2 + $0x70] sm:$0xff] %vm19_vm0, %v1363_v19 }
  0x63   :  { %778 = vmatmul.bf16.gmra.mxu3 %v1004_v30  ;;  %1255 = vmatmul.msk.bf16.gmra.mxu0 %vm19_vm0, %v1008_v31  ;;  %v1300_v30 = vld [vmem:[%s1894_s0 + $0x138] sm:$0xf0]  ;;  %35 = vst.msk [vmem:[#allocation2 + $0x78] sm:$0xff] %vm19_vm0, %v1363_v19 }
  0x64   :  { %v1108_v37 = vor.u32 %v1300_v30, %v1107_v29  ;;  %v39_v29 = vld [vmem:[#allocation2 + $0x18] sm:$0xff] }
  0x71   :  { %685 = vmatmul.bf16.gmra.mxu1 %v1016_v40  ;;  %734 = vmatmul.bf16.gmra.mxu2 %v1020_v41 }
  0x73   :  { %783 = vmatmul.bf16.gmra.mxu3 %v1024_v42  ;;  %1256 = vmatmul.msk.bf16.gmra.mxu0 %vm19_vm0, %v1028_v43 }
  0x81   :  { %690 = vmatmul.bf16.gmra.mxu1 %v1036_v52  ;;  %739 = vmatmul.bf16.gmra.mxu2 %v1040_v53 }
  0x83   :  { %788 = vmatmul.bf16.gmra.mxu3 %v1044_v54  ;;  %1257 = vmatmul.msk.bf16.gmra.mxu0 %vm19_vm0, %v1048_v55  ;;  %v36_v54 = vld [vmem:[#allocation2] sm:$0xff] }
  0x91   :  { %695 = vmatmul.bf16.gmra.mxu1 %v1056_v0  ;;  %744 = vmatmul.bf16.gmra.mxu2 %v1060_v1  ;;  %v37_v0 = vld [vmem:[#allocation2 + $0x8] sm:$0xff]  ;;  %v1784_v1 = vld [vmem:[%s1895_s2] ss:$0 sm:$0xff] }
  0x93   :  { %793 = vmatmul.bf16.gmra.mxu3 %v1064_v2  ;;  %1258 = vmatmul.msk.bf16.gmra.mxu0 %vm19_vm0, %v1068_v3 }
  0x9e   :  { %v1714_v14 = vpop.f32.mrf.mxu1 }
  0xa0   :  { %v622_v17 = vpop.f32.mrf.mxu0 }
  0xa1   :  { %700 = vmatmul.bf16.gmra.mxu1 %v1076_v12  ;;  %749 = vmatmul.bf16.gmra.mxu2 %v1080_v13  ;;  %v38_v13 = vld [vmem:[#allocation2 + $0x10] sm:$0xff] }
  0xa3   :  { %798 = vmatmul.bf16.gmra.mxu3 %v1084_v15  ;;  %1259 = vmatmul.msk.bf16.gmra.mxu0 %vm19_vm0, %v1088_v16 }
  0xa4   :  { %v1717_v18 = vpop.f32.mrf.mxu2 }
  0xa6   :  { %v1720_v20 = vpop.f32.mrf.mxu3  ;;  %v1723_v21 = vpop.f32.mrf.mxu1 }
  0xa8   :  { %v624_v22 = vpop.f32.mrf.mxu0 }
  0xac   :  { %v1755_v31 = vpop.f32.mrf.mxu2 }
  0xae   :  { %v1758_v32 = vpop.f32.mrf.mxu3  ;;  %v1761_v35 = vpop.f32.mrf.mxu1 }
  0xb0   :  { %v627_v38 = vpop.f32.mrf.mxu0 }
  0xb1   :  { %705 = vmatmul.bf16.gmra.mxu1 %v1096_v33  ;;  %754 = vmatmul.bf16.gmra.mxu2 %v1100_v34 }
  0xb3   :  { %803 = vmatmul.bf16.gmra.mxu3 %v1104_v36  ;;  %1260 = vmatmul.msk.bf16.gmra.mxu0 %vm19_vm0, %v1108_v37 }
  0xb4   :  { %v1770_v39 = vpop.f32.mrf.mxu2 }
  0xb6   :  { %v1772_v40 = vpop.f32.mrf.mxu3  ;;  %v1774_v41 = vpop.f32.mrf.mxu1 }
  0xb8   :  { %v629_v42 = vpop.f32.mrf.mxu0 }
  0xbc   :  { %v1776_v43 = vpop.f32.mrf.mxu2 }
  0xbe   :  { %v1778_v44 = vpop.f32.mrf.mxu3  ;;  %v671_v45 = vpop.f32.mrf.mxu1 }
  0xbf   :  { %v672_v47 = vadd.f32 %v671_v45, %v622_v17 }
  0xc0   :  { %v818_v46 = vpop.f32.mrf.mxu0 }
  0xc4   :  { %v720_v48 = vpop.f32.mrf.mxu2 }
  0xc5   :  { %v721_v49 = vadd.f32 %v720_v48, %v672_v47 }
  0xc6   :  { %v769_v50 = vpop.f32.mrf.mxu3  ;;  %v673_v51 = vpop.f32.mrf.mxu1 }
  0xc7   :  { %v770_v52 = vadd.f32 %v769_v50, %v721_v49  ;;  %v674_v57 = vadd.f32 %v673_v51, %v624_v22  ;;  %v40_v49 = vld [vmem:[#allocation2 + $0x20] sm:$0xff] }
  0xc8   :  { %v820_v53 = vpop.f32.mrf.mxu0 }
  0xc9   :  { %v819_v55 = vadd.f32 %v818_v46, %v770_v52 }
  0xcb   :  { %v858_v56 = vadd.f32 %v819_v55, %v36_v54 }
  0xcc   :  { %v722_v58 = vpop.f32.mrf.mxu2 }
  0xcd   :  { %874 = vst.msk [vmem:[#allocation2] sm:$0xff] %vm19_vm0, %v858_v56  ;;  %v723_v59 = vadd.f32 %v722_v58, %v674_v57 }
  0xce   :  { %v771_v60 = vpop.f32.mrf.mxu3  ;;  %v676_v61 = vpop.f32.mrf.mxu1 }
  0xcf   :  { %v772_v62 = vadd.f32 %v771_v60, %v723_v59  ;;  %v677_v4 = vadd.f32 %v676_v61, %v627_v38  ;;  %v41_v60 = vld [vmem:[#allocation2 + $0x28] sm:$0xff] }
  0xd0   :  { %v823_v63 = vpop.f32.mrf.mxu0 }
  0xd1   :  { %v821_v2 = vadd.f32 %v820_v53, %v772_v62 }
  0xd3   :  { %v859_v3 = vadd.f32 %v821_v2, %v37_v0 }
  0xd4   :  { %v893_v5 = vld [vmem:[#allocation2] sm:$0xff]  ;;  %v725_v6 = vpop.f32.mrf.mxu2 }
  0xd5   :  { %v913_v7 = vadd.f32 %v1784_v1, %v893_v5  ;;  %875 = vst.msk [vmem:[#allocation2 + $0x8] sm:$0xff] %vm19_vm0, %v859_v3  ;;  %v726_v8 = vadd.f32 %v725_v6, %v677_v4 }
  0xd6   :  { %v774_v9 = vpop.f32.mrf.mxu3  ;;  %v678_v10 = vpop.f32.mrf.mxu1 }
  0xd7   :  { %929 = vst.msk [vmem:[%s1896_s3] sm:$0xff] %vm19_vm0, %v913_v7  ;;  %v775_v11 = vadd.f32 %v774_v9, %v726_v8  ;;  %v679_v17 = vadd.f32 %v678_v10, %v629_v42  ;;  %v42_v8 = vld [vmem:[#allocation2 + $0x30] sm:$0xff] }
  0xd8   :  { %v825_v12 = vpop.f32.mrf.mxu0 }
  0xd9   :  { %v824_v15 = vadd.f32 %v823_v63, %v775_v11 }
  0xdb   :  { %v860_v16 = vadd.f32 %v824_v15, %v38_v13 }
  0xdc   :  { %v894_v19 = vld [vmem:[#allocation2 + $0x8] sm:$0xff]  ;;  %v727_v22 = vpop.f32.mrf.mxu2 }
  0xdd   :  { %v914_v23 = vadd.f32 %v1784_v1, %v894_v19  ;;  %876 = vst.msk [vmem:[#allocation2 + $0x10] sm:$0xff] %vm19_vm0, %v860_v16  ;;  %v728_v24 = vadd.f32 %v727_v22, %v679_v17 }
  0xde   :  { %v776_v25 = vpop.f32.mrf.mxu3  ;;  %v681_v26 = vpop.f32.mrf.mxu1 }
  0xdf   :  { %930 = vst.msk [vmem:[%s1896_s3 + $0x8] sm:$0xff] %vm19_vm0, %v914_v23  ;;  %v777_v27 = vadd.f32 %v776_v25, %v728_v24  ;;  %v682_v34 = vadd.f32 %v681_v26, %v1714_v14  ;;  %v43_v23 = vld [vmem:[#allocation2 + $0x38] sm:$0xff] }
  0xe0   :  { %v828_v28 = vpop.f32.mrf.mxu0 }
  0xe1   :  { %v826_v30 = vadd.f32 %v825_v12, %v777_v27 }
  0xe3   :  { %v861_v33 = vadd.f32 %v826_v30, %v39_v29 }
  0xe4   :  { %v895_v36 = vld [vmem:[#allocation2 + $0x10] sm:$0xff]  ;;  %v730_v37 = vpop.f32.mrf.mxu2 }
  0xe5   :  { %v915_v38 = vadd.f32 %v1784_v1, %v895_v36  ;;  %877 = vst.msk [vmem:[#allocation2 + $0x18] sm:$0xff] %vm19_vm0, %v861_v33  ;;  %v731_v42 = vadd.f32 %v730_v37, %v682_v34  ;;  %v44_v37 = vld [vmem:[#allocation2 + $0x40] sm:$0xff] }
  0xe6   :  { %v779_v45 = vpop.f32.mrf.mxu3  ;;  %v683_v46 = vpop.f32.mrf.mxu1 }
  0xe7   :  { %931 = vst.msk [vmem:[%s1896_s3 + $0x10] sm:$0xff] %vm19_vm0, %v915_v38  ;;  %v780_v47 = vadd.f32 %v779_v45, %v731_v42  ;;  %v684_v14 = vadd.f32 %v683_v46, %v1723_v21 }
  0xe8   :  { %v830_v48 = vpop.f32.mrf.mxu0 }
  0xe9   :  { %v829_v50 = vadd.f32 %v828_v28, %v780_v47 }
  0xeb   :  { %v862_v51 = vadd.f32 %v829_v50, %v40_v49 }
  0xec   :  { %v896_v52 = vld [vmem:[#allocation2 + $0x18] sm:$0xff]  ;;  %v732_v53 = vpop.f32.mrf.mxu2 }
  0xed   :  { %v916_v54 = vadd.f32 %v1784_v1, %v896_v52  ;;  %878 = vst.msk [vmem:[#allocation2 + $0x20] sm:$0xff] %vm19_vm0, %v862_v51  ;;  %v733_v55 = vadd.f32 %v732_v53, %v684_v14  ;;  %v45_v52 = vld [vmem:[#allocation2 + $0x48] sm:$0xff] }
  0xee   :  { %v781_v56 = vpop.f32.mrf.mxu3  ;;  %v686_v57 = vpop.f32.mrf.mxu1 }
  0xef   :  { %932 = vst.msk [vmem:[%s1896_s3 + $0x18] sm:$0xff] %vm19_vm0, %v916_v54  ;;  %v782_v58 = vadd.f32 %v781_v56, %v733_v55  ;;  %v687_v21 = vadd.f32 %v686_v57, %v1761_v35 }
  0xf0   :  { %v833_v59 = vpop.f32.mrf.mxu0 }
  0xf1   :  { %v831_v61 = vadd.f32 %v830_v48, %v782_v58 }
  0xf3   :  { %v863_v62 = vadd.f32 %v831_v61, %v41_v60 }
  0xf4   :  { %v897_v63 = vld [vmem:[#allocation2 + $0x20] sm:$0xff]  ;;  %v735_v0 = vpop.f32.mrf.mxu2 }
  0xf5   :  { %v917_v2 = vadd.f32 %v1784_v1, %v897_v63  ;;  %879 = vst.msk [vmem:[#allocation2 + $0x28] sm:$0xff] %vm19_vm0, %v863_v62  ;;  %v736_v3 = vadd.f32 %v735_v0, %v687_v21  ;;  %v46_v62 = vld [vmem:[#allocation2 + $0x50] sm:$0xff] }
  0xf6   :  { %v784_v4 = vpop.f32.mrf.mxu3  ;;  %v688_v5 = vpop.f32.mrf.mxu1 }
  0xf7   :  { %933 = vst.msk [vmem:[%s1896_s3 + $0x20] sm:$0xff] %vm19_vm0, %v917_v2  ;;  %v785_v6 = vadd.f32 %v784_v4, %v736_v3  ;;  %v689_v35 = vadd.f32 %v688_v5, %v1774_v41 }
  0xf8   :  { %v835_v7 = vpop.f32.mrf.mxu0 }
  0xf9   :  { %v834_v9 = vadd.f32 %v833_v59, %v785_v6 }
  0xfb   :  { %v864_v10 = vadd.f32 %v834_v9, %v42_v8  ;;  %v47_v9 = vld [vmem:[#allocation2 + $0x58] sm:$0xff] }
  0xfc   :  { %v898_v11 = vld [vmem:[#allocation2 + $0x28] sm:$0xff]  ;;  %v737_v12 = vpop.f32.mrf.mxu2 }
  0xfd   :  { %v918_v13 = vadd.f32 %v1784_v1, %v898_v11  ;;  %880 = vst.msk [vmem:[#allocation2 + $0x30] sm:$0xff] %vm19_vm0, %v864_v10  ;;  %v738_v15 = vadd.f32 %v737_v12, %v689_v35 }
  0xfe   :  { %v786_v16 = vpop.f32.mrf.mxu3  ;;  %v691_v17 = vpop.f32.mrf.mxu1 }
  0xff   :  { %934 = vst.msk [vmem:[%s1896_s3 + $0x28] sm:$0xff] %vm19_vm0, %v918_v13  ;;  %v787_v19 = vadd.f32 %v786_v16, %v738_v15  ;;  %v692_v41 = vadd.f32 %v691_v17, %v1717_v18 }
 0x100   :  { %v838_v22 = vpop.f32.mrf.mxu0 }
 0x101   :  { %v836_v24 = vadd.f32 %v835_v7, %v787_v19 }
 0x103   :  { %v865_v25 = vadd.f32 %v836_v24, %v43_v23  ;;  %v48_v23 = vld [vmem:[#allocation2 + $0x60] sm:$0xff] }
 0x104   :  { %v899_v26 = vld [vmem:[#allocation2 + $0x30] sm:$0xff]  ;;  %v740_v27 = vpop.f32.mrf.mxu2 }
 0x105   :  { %v919_v28 = vadd.f32 %v1784_v1, %v899_v26  ;;  %881 = vst.msk [vmem:[#allocation2 + $0x38] sm:$0xff] %vm19_vm0, %v865_v25  ;;  %v741_v29 = vadd.f32 %v740_v27, %v692_v41 }
 0x106   :  { %v789_v30 = vpop.f32.mrf.mxu3  ;;  %v693_v33 = vpop.f32.mrf.mxu1 }
 0x107   :  { %935 = vst.msk [vmem:[%s1896_s3 + $0x30] sm:$0xff] %vm19_vm0, %v919_v28  ;;  %v790_v34 = vadd.f32 %v789_v30, %v741_v29  ;;  %v694_v18 = vadd.f32 %v693_v33, %v1755_v31 }
 0x108   :  { %v840_v36 = vpop.f32.mrf.mxu0 }
 0x109   :  { %v839_v38 = vadd.f32 %v838_v22, %v790_v34 }
 0x10b   :  { %v866_v42 = vadd.f32 %v839_v38, %v44_v37 }
 0x10c   :  { %v900_v45 = vld [vmem:[#allocation2 + $0x38] sm:$0xff]  ;;  %v742_v46 = vpop.f32.mrf.mxu2 }
 0x10d   :  { %v920_v47 = vadd.f32 %v1784_v1, %v900_v45  ;;  %882 = vst.msk [vmem:[#allocation2 + $0x40] sm:$0xff] %vm19_vm0, %v866_v42  ;;  %v743_v48 = vadd.f32 %v742_v46, %v694_v18 }
 0x10e   :  { %v791_v49 = vpop.f32.mrf.mxu3  ;;  %v696_v50 = vpop.f32.mrf.mxu1 }
 0x10f   :  { %936 = vst.msk [vmem:[%s1896_s3 + $0x38] sm:$0xff] %vm19_vm0, %v920_v47  ;;  %v792_v51 = vadd.f32 %v791_v49, %v743_v48  ;;  %v697_v31 = vadd.f32 %v696_v50, %v1770_v39  ;;  %v50_v50 = vld [vmem:[#allocation2 + $0x70] sm:$0xff] }
 0x110   :  { %v843_v14 = vpop.f32.mrf.mxu0 }
 0x111   :  { %v841_v53 = vadd.f32 %v840_v36, %v792_v51  ;;  %v49_v36 = vld [vmem:[#allocation2 + $0x68] sm:$0xff] }
 0x113   :  { %v867_v54 = vadd.f32 %v841_v53, %v45_v52 }
 0x114   :  { %v901_v55 = vld [vmem:[#allocation2 + $0x40] sm:$0xff]  ;;  %v745_v56 = vpop.f32.mrf.mxu2 }
 0x115   :  { %v921_v57 = vadd.f32 %v1784_v1, %v901_v55  ;;  %883 = vst.msk [vmem:[#allocation2 + $0x48] sm:$0xff] %vm19_vm0, %v867_v54  ;;  %v746_v58 = vadd.f32 %v745_v56, %v697_v31 }
 0x116   :  { %v794_v59 = vpop.f32.mrf.mxu3  ;;  %v698_v60 = vpop.f32.mrf.mxu1 }
 0x117   :  { %937 = vst.msk [vmem:[%s1896_s3 + $0x40] sm:$0xff] %vm19_vm0, %v921_v57  ;;  %v795_v61 = vadd.f32 %v794_v59, %v746_v58  ;;  %v699_v39 = vadd.f32 %v698_v60, %v1776_v43  ;;  %v51_v59 = vld [vmem:[#allocation2 + $0x78] sm:$0xff] }
 0x118   :  { %v845_v21 = vpop.f32.mrf.mxu0 }
 0x119   :  { %v844_v63 = vadd.f32 %v843_v14, %v795_v61 }
 0x11b   :  { %v868_v0 = vadd.f32 %v844_v63, %v46_v62 }
 0x11c   :  { %v902_v2 = vld [vmem:[#allocation2 + $0x48] sm:$0xff]  ;;  %v747_v3 = vpop.f32.mrf.mxu2 }
 0x11d   :  { %v922_v4 = vadd.f32 %v1784_v1, %v902_v2  ;;  %884 = vst.msk [vmem:[#allocation2 + $0x50] sm:$0xff] %vm19_vm0, %v868_v0  ;;  %v748_v5 = vadd.f32 %v747_v3, %v699_v39 }
 0x11e   :  { %v796_v6 = vpop.f32.mrf.mxu3  ;;  %v701_v7 = vpop.f32.mrf.mxu1 }
 0x11f   :  { %938 = vst.msk [vmem:[%s1896_s3 + $0x48] sm:$0xff] %vm19_vm0, %v922_v4  ;;  %v797_v8 = vadd.f32 %v796_v6, %v748_v5  ;;  %v702_v43 = vadd.f32 %v701_v7, %v1720_v20 }
 0x120   :  { %v848_v35 = vpop.f32.mrf.mxu0 }
 0x121   :  { %v846_v10 = vadd.f32 %v845_v21, %v797_v8 }
 0x123   :  { %v869_v11 = vadd.f32 %v846_v10, %v47_v9 }
 0x124   :  { %v903_v12 = vld [vmem:[#allocation2 + $0x50] sm:$0xff]  ;;  %v750_v13 = vpop.f32.mrf.mxu2 }
 0x125   :  { %v923_v15 = vadd.f32 %v1784_v1, %v903_v12  ;;  %885 = vst.msk [vmem:[#allocation2 + $0x58] sm:$0xff] %vm19_vm0, %v869_v11  ;;  %v751_v16 = vadd.f32 %v750_v13, %v702_v43 }
 0x126   :  { %v799_v17 = vpop.f32.mrf.mxu3  ;;  %v703_v19 = vpop.f32.mrf.mxu1 }
 0x127   :  { %939 = vst.msk [vmem:[%s1896_s3 + $0x50] sm:$0xff] %vm19_vm0, %v923_v15  ;;  %v800_v22 = vadd.f32 %v799_v17, %v751_v16  ;;  %v704_v20 = vadd.f32 %v703_v19, %v1758_v32 }
 0x128   :  { %v850_v26 = vpop.f32.mrf.mxu0 }
 0x129   :  { %v849_v24 = vadd.f32 %v848_v35, %v800_v22 }
 0x12b   :  { %v870_v25 = vadd.f32 %v849_v24, %v48_v23 }
 0x12c   :  { %v904_v41 = vld [vmem:[#allocation2 + $0x58] sm:$0xff]  ;;  %v752_v27 = vpop.f32.mrf.mxu2 }
 0x12d   :  { %v924_v28 = vadd.f32 %v1784_v1, %v904_v41  ;;  %886 = vst.msk [vmem:[#allocation2 + $0x60] sm:$0xff] %vm19_vm0, %v870_v25  ;;  %v753_v29 = vadd.f32 %v752_v27, %v704_v20 }
 0x12e   :  { %v801_v30 = vpop.f32.mrf.mxu3  ;;  %v706_v33 = vpop.f32.mrf.mxu1 }
 0x12f   :  { %940 = vst.msk [vmem:[%s1896_s3 + $0x58] sm:$0xff] %vm19_vm0, %v924_v28  ;;  %v802_v34 = vadd.f32 %v801_v30, %v753_v29  ;;  %v707_v32 = vadd.f32 %v706_v33, %v1772_v40 }
 0x130   :  { %v853_v48 = vpop.f32.mrf.mxu0 }
 0x131   :  { %v851_v37 = vadd.f32 %v850_v26, %v802_v34 }
 0x133   :  { %v871_v38 = vadd.f32 %v851_v37, %v49_v36 }
 0x134   :  { %v905_v42 = vld [vmem:[#allocation2 + $0x60] sm:$0xff]  ;;  %v755_v18 = vpop.f32.mrf.mxu2 }
 0x135   :  { %v925_v45 = vadd.f32 %v1784_v1, %v905_v42  ;;  %887 = vst.msk [vmem:[#allocation2 + $0x68] sm:$0xff] %vm19_vm0, %v871_v38  ;;  %v756_v46 = vadd.f32 %v755_v18, %v707_v32 }
 0x136   :  { %v804_v47 = vpop.f32.mrf.mxu3  ;;  %v708_v51 = vpop.f32.mrf.mxu1 }
 0x137   :  { %941 = vst.msk [vmem:[%s1896_s3 + $0x60] sm:$0xff] %vm19_vm0, %v925_v45  ;;  %v805_v49 = vadd.f32 %v804_v47, %v756_v46  ;;  %v709_v40 = vadd.f32 %v708_v51, %v1778_v44 }
 0x138   :  { %v855_v58 = vpop.f32.mrf.mxu0 }
 0x139   :  { %v854_v14 = vadd.f32 %v853_v48, %v805_v49 }
 0x13b   :  { %v872_v52 = vadd.f32 %v854_v14, %v50_v50 }
 0x13c   :  { %v906_v53 = vld [vmem:[#allocation2 + $0x68] sm:$0xff]  ;;  %v757_v54 = vpop.f32.mrf.mxu2 }
 0x13d   :  { %v926_v31 = vadd.f32 %v1784_v1, %v906_v53  ;;  %888 = vst.msk [vmem:[#allocation2 + $0x70] sm:$0xff] %vm19_vm0, %v872_v52  ;;  %v758_v55 = vadd.f32 %v757_v54, %v709_v40 }
 0x13e   :  { %v806_v56 = vpop.f32.mrf.mxu3 }
 0x13f   :  { %942 = vst.msk [vmem:[%s1896_s3 + $0x68] sm:$0xff] %vm19_vm0, %v926_v31  ;;  %v807_v57 = vadd.f32 %v806_v56, %v758_v55 }
 0x141   :  { %v856_v60 = vadd.f32 %v855_v58, %v807_v57 }
 0x143   :  { %v873_v61 = vadd.f32 %v856_v60, %v51_v59 }
 0x144   :  { %v907_v62 = vld [vmem:[#allocation2 + $0x70] sm:$0xff] }
 0x145   :  { %v927_v44 = vadd.f32 %v1784_v1, %v907_v62  ;;  %889 = vst.msk [vmem:[#allocation2 + $0x78] sm:$0xff] %vm19_vm0, %v873_v61 }
 0x147   :  { %943 = vst.msk [vmem:[%s1896_s3 + $0x70] sm:$0xff] %vm19_vm0, %v927_v44 }
 0x14c   :  { %v908_v21 = vld [vmem:[#allocation2 + $0x78] sm:$0xff] }
 0x14d   :  { %v928_v63 = vadd.f32 %v1784_v1, %v908_v21 }
 0x14f   :  { %944 = vst.msk [vmem:[%s1896_s3 + $0x78] sm:$0xff] %vm19_vm0, %v928_v63 }

// kernel: resnet18_forward.73
= control target key start
LH: loop header
LB: loop body
LE: loop exit
PB: predicated region body
PF: predicated region fallthrough
CT: control target
= control target key end

     0   :  { %vm377_vm0 = vcmask 523264   ;;  %s950_s1 = inlined_call_operand.vmem [shape: bf16[576,128], index: 1, kind: input, shape index: {}]   ;;  %s951_s0 = inlined_call_operand.vmem [shape: bf16[32,576], index: 0, kind: input, shape index: {}]   ;;  %s952_s2 = inlined_call_operand.vmem [shape: f32[1,128], index: 2, kind: input, shape index: {}]   ;;  %s953_s3 = inlined_call_operand.vmem [shape: f32[32,128], index: 3, kind: output, shape index: {}]  }
   0x1   :  { %v713_v0 = vld [vmem:[%s950_s1 + $0x38] sm:$0xff]  ;;  %v712_v4 = vld [vmem:[%s950_s1 + $0x30] sm:$0xff]  ;;  %v711_v8 = vld [vmem:[%s950_s1 + $0x28] sm:$0xff] }
   0x2   :  { %v721_v1 = vld [vmem:[%s950_s1 + $0x78] sm:$0xff]  ;;  %384 = vmatpush.bf16.msra.mxu0 %v713_v0  ;;  %v720_v5 = vld [vmem:[%s950_s1 + $0x70] sm:$0xff]  ;;  %v719_v9 = vld [vmem:[%s950_s1 + $0x68] sm:$0xff] }
   0x3   :  { %v729_v2 = vld [vmem:[%s950_s1 + $0xb8] sm:$0xff]  ;;  %403 = vmatpush.bf16.msra.mxu1 %v721_v1  ;;  %v728_v6 = vld [vmem:[%s950_s1 + $0xb0] sm:$0xff]  ;;  %v727_v10 = vld [vmem:[%s950_s1 + $0xa8] sm:$0xff] }
   0x4   :  { %v737_v3 = vld [vmem:[%s950_s1 + $0xf8] sm:$0xff]  ;;  %422 = vmatpush.bf16.msra.mxu2 %v729_v2  ;;  %v736_v7 = vld [vmem:[%s950_s1 + $0xf0] sm:$0xff]  ;;  %v735_v11 = vld [vmem:[%s950_s1 + $0xe8] sm:$0xff] }
   0x5   :  { %441 = vmatpush.bf16.msra.mxu3 %v737_v3  ;;  %v710_v12 = vld [vmem:[%s950_s1 + $0x20] sm:$0xff]  ;;  %v709_v16 = vld [vmem:[%s950_s1 + $0x18] sm:$0xff]  ;;  %v708_v20 = vld [vmem:[%s950_s1 + $0x10] sm:$0xff] }
   0x6   :  { %385 = vmatpush.bf16.msra.mxu0 %v712_v4  ;;  %v718_v13 = vld [vmem:[%s950_s1 + $0x60] sm:$0xff]  ;;  %v717_v17 = vld [vmem:[%s950_s1 + $0x58] sm:$0xff]  ;;  %v716_v21 = vld [vmem:[%s950_s1 + $0x50] sm:$0xff] }
   0x7   :  { %404 = vmatpush.bf16.msra.mxu1 %v720_v5  ;;  %v726_v14 = vld [vmem:[%s950_s1 + $0xa0] sm:$0xff]  ;;  %v725_v18 = vld [vmem:[%s950_s1 + $0x98] sm:$0xff]  ;;  %v724_v22 = vld [vmem:[%s950_s1 + $0x90] sm:$0xff] }
   0x8   :  { %423 = vmatpush.bf16.msra.mxu2 %v728_v6  ;;  %v734_v15 = vld [vmem:[%s950_s1 + $0xe0] sm:$0xff]  ;;  %v733_v19 = vld [vmem:[%s950_s1 + $0xd8] sm:$0xff]  ;;  %v732_v23 = vld [vmem:[%s950_s1 + $0xd0] sm:$0xff] }
   0x9   :  { %442 = vmatpush.bf16.msra.mxu3 %v736_v7  ;;  %v707_v24 = vld [vmem:[%s950_s1 + $0x8] sm:$0xff]  ;;  %v706_v28 = vld [vmem:[%s950_s1] sm:$0xff]  ;;  %v698_v33 = vld [vmem:[%s951_s0 + $0x10] sm:$0xf0] }
   0xa   :  { %386 = vmatpush.bf16.msra.mxu0 %v711_v8  ;;  %v715_v25 = vld [vmem:[%s950_s1 + $0x48] sm:$0xff]  ;;  %v714_v29 = vld [vmem:[%s950_s1 + $0x40] sm:$0xff]  ;;  %v514_v35 = vld [vmem:[%s951_s0 + $0x14] sm:$0xf0] }
   0xb   :  { %405 = vmatpush.bf16.msra.mxu1 %v719_v9  ;;  %v723_v26 = vld [vmem:[%s950_s1 + $0x88] sm:$0xff]  ;;  %v722_v30 = vld [vmem:[%s950_s1 + $0x80] sm:$0xff]  ;;  %v699_v37 = vld [vmem:[%s951_s0 + $0x18] sm:$0xf0] }
   0xc   :  { %424 = vmatpush.bf16.msra.mxu2 %v727_v10  ;;  %v731_v27 = vld [vmem:[%s950_s1 + $0xc8] sm:$0xff]  ;;  %v730_v31 = vld [vmem:[%s950_s1 + $0xc0] sm:$0xff]  ;;  %v741_v40 = vld [vmem:[%s950_s1 + $0x118] sm:$0xff] }
   0xd   :  { %443 = vmatpush.bf16.msra.mxu3 %v735_v11  ;;  %v512_v32 = vld [vmem:[%s951_s0] sm:$0xf]  ;;  %v696_v34 = vld [vmem:[%s951_s0 + $0x4] sm:$0xf]  ;;  %v520_v36 = vld [vmem:[%s951_s0 + $0x8] sm:$0xf] }
   0xe   :  { %387 = vmatpush.bf16.msra.mxu0 %v710_v12  ;;  %v697_v38 = vld [vmem:[%s951_s0 + $0xc] sm:$0xf]  ;;  %v522_v39 = vld [vmem:[%s951_s0 + $0x1c] sm:$0xf0]  ;;  %v513_v41 = vor.u32 %v698_v33, %v512_v32  ;;  %v517_v42 = vor.u32 %v696_v34, %v514_v35  ;;  %v521_v43 = vor.u32 %v699_v37, %v520_v36  ;;  %v740_v45 = vld [vmem:[%s950_s1 + $0x110] sm:$0xff] }
   0xf   :  { %406 = vmatpush.bf16.msra.mxu1 %v718_v13  ;;  %v525_v44 = vor.u32 %v697_v38, %v522_v39  ;;  %v739_v46 = vld [vmem:[%s950_s1 + $0x108] sm:$0xff]  ;;  %v738_v47 = vld [vmem:[%s950_s1 + $0x100] sm:$0xff]  ;;  %v703_v49 = vld [vmem:[%s951_s0 + $0x38] sm:$0xf0] }
  0x10   :  { %425 = vmatpush.bf16.msra.mxu2 %v726_v14  ;;  %v532_v48 = vld [vmem:[%s951_s0 + $0x28] sm:$0xf]  ;;  %v701_v50 = vld [vmem:[%s951_s0 + $0x2c] sm:$0xf]  ;;  %v534_v51 = vld [vmem:[%s951_s0 + $0x3c] sm:$0xf0] }
  0x11   :  { %444 = vmatpush.bf16.msra.mxu3 %v734_v15  ;;  %v540_v52 = vld [vmem:[%s951_s0 + $0x30] sm:$0xf]  ;;  %v704_v53 = vld [vmem:[%s951_s0 + $0x40] sm:$0xf0]  ;;  %v702_v54 = vld [vmem:[%s951_s0 + $0x34] sm:$0xf]  ;;  %v533_v56 = vor.u32 %v703_v49, %v532_v48  ;;  %v537_v57 = vor.u32 %v701_v50, %v534_v51 }
  0x12   :  { %388 = vmatpush.bf16.msra.mxu0 %v709_v16  ;;  %v542_v55 = vld [vmem:[%s951_s0 + $0x44] sm:$0xf0]  ;;  %v541_v58 = vor.u32 %v704_v53, %v540_v52  ;;  %v528_v60 = vld [vmem:[%s951_s0 + $0x10] sm:$0xf]  ;;  %v700_v61 = vld [vmem:[%s951_s0 + $0x20] sm:$0xf0] }
  0x13   :  { %407 = vmatpush.bf16.msra.mxu1 %v717_v17  ;;  %v545_v59 = vor.u32 %v702_v54, %v542_v55  ;;  %v548_v62 = vld [vmem:[%s951_s0 + $0x38] sm:$0xf]  ;;  %v705_v63 = vld [vmem:[%s951_s0 + $0x48] sm:$0xf0]  ;;  %v529_v0 = vor.u32 %v700_v61, %v528_v60 }
  0x14   :  { %426 = vmatpush.bf16.msra.mxu2 %v725_v18  ;;  %v549_v1 = vor.u32 %v705_v63, %v548_v62 }
  0x15   :  { %445 = vmatpush.bf16.msra.mxu3 %v733_v19 }
  0x16   :  { %389 = vmatpush.bf16.msra.mxu0 %v708_v20 }
  0x17   :  { %408 = vmatpush.bf16.msra.mxu1 %v716_v21 }
  0x18   :  { %427 = vmatpush.bf16.msra.mxu2 %v724_v22 }
  0x19   :  { %446 = vmatpush.bf16.msra.mxu3 %v732_v23  ;;  %v746_v23 = vld [vmem:[%s952_s2] ss:$0 sm:$0xff] }
  0x1a   :  { %390 = vmatpush.bf16.msra.mxu0 %v707_v24 }
  0x1b   :  { %409 = vmatpush.bf16.msra.mxu1 %v715_v25 }
  0x1c   :  { %428 = vmatpush.bf16.msra.mxu2 %v723_v26 }
  0x1d   :  { %447 = vmatpush.bf16.msra.mxu3 %v731_v27 }
  0x1e   :  { %391 = vmatpush.bf16.msra.mxu0 %v706_v28 }
  0x1f   :  { %410 = vmatpush.bf16.msra.mxu1 %v714_v29 }
  0x20   :  { %429 = vmatpush.bf16.msra.mxu2 %v722_v30 }
  0x21   :  { %448 = vmatpush.bf16.msra.mxu3 %v730_v31  ;;  %392 = vmatmul.bf16.vlgmr.msra.gmra.mxu0 %v513_v41 }
  0x22   :  { %464 = vmatpush.bf16.msrb.mxu0 %v741_v40  ;;  %411 = vmatmul.bf16.vlgmr.msra.gmra.mxu1 %v517_v42 }
  0x23   :  { %742 = vmatpush.bf16.msrb.mxu1 %v741_v40  ;;  %430 = vmatmul.bf16.vlgmr.msra.gmra.mxu2 %v521_v43 }
  0x24   :  { %449 = vmatmul.bf16.vlgmr.msra.gmra.mxu3 %v525_v44 }
  0x26   :  { %465 = vmatpush.bf16.msrb.mxu0 %v740_v45 }
  0x27   :  { %743 = vmatpush.bf16.msrb.mxu1 %v740_v45 }
  0x2a   :  { %466 = vmatpush.bf16.msrb.mxu0 %v739_v46 }
  0x2b   :  { %744 = vmatpush.bf16.msrb.mxu1 %v739_v46 }
  0x2e   :  { %467 = vmatpush.bf16.msrb.mxu0 %v738_v47 }
  0x2f   :  { %745 = vmatpush.bf16.msrb.mxu1 %v738_v47 }
  0x31   :  { %397 = vmatmul.bf16.gmra.mxu0 %v533_v56 }
  0x32   :  { %416 = vmatmul.bf16.gmra.mxu1 %v537_v57 }
  0x33   :  { %435 = vmatmul.bf16.gmra.mxu2 %v541_v58 }
  0x34   :  { %454 = vmatmul.bf16.gmra.mxu3 %v545_v59 }
  0x41   :  { %694 = vmatmul.msk.bf16.vlgmr.msrb.gmra.mxu0 %vm377_vm0, %v529_v0 }
  0x42   :  { %695 = vmatmul.msk.bf16.vlgmr.msrb.gmra.mxu1 %vm377_vm0, %v549_v1 }
  0x9e   :  { %v393_v2 = vpop.f32.mrf.mxu0 }
  0x9f   :  { %v412_v3 = vpop.f32.mrf.mxu1 }
  0xa0   :  { %v413_v15 = vadd.f32 %v412_v3, %v393_v2 }
  0xa6   :  { %v431_v4 = vpop.f32.mrf.mxu2  ;;  %v395_v6 = vpop.f32.mrf.mxu0 }
  0xa7   :  { %v450_v5 = vpop.f32.mrf.mxu3  ;;  %v414_v7 = vpop.f32.mrf.mxu1  ;;  %v432_v17 = vadd.f32 %v431_v4, %v413_v15 }
  0xa8   :  { %v415_v26 = vadd.f32 %v414_v7, %v395_v6 }
  0xa9   :  { %v451_v20 = vadd.f32 %v450_v5, %v432_v17 }
  0xae   :  { %v433_v8 = vpop.f32.mrf.mxu2  ;;  %v398_v9 = vpop.f32.mrf.mxu0 }
  0xaf   :  { %v417_v10 = vpop.f32.mrf.mxu1  ;;  %v452_v11 = vpop.f32.mrf.mxu3  ;;  %v434_v30 = vadd.f32 %v433_v8, %v415_v26 }
  0xb0   :  { %v418_v16 = vadd.f32 %v417_v10, %v398_v9 }
  0xb1   :  { %v453_v35 = vadd.f32 %v452_v11, %v434_v30 }
  0xb6   :  { %v436_v12 = vpop.f32.mrf.mxu2  ;;  %v400_v13 = vpop.f32.mrf.mxu0 }
  0xb7   :  { %v419_v14 = vpop.f32.mrf.mxu1  ;;  %v437_v18 = vadd.f32 %v436_v12, %v418_v16  ;;  %v455_v19 = vpop.f32.mrf.mxu3 }
  0xb8   :  { %v420_v27 = vadd.f32 %v419_v14, %v400_v13 }
  0xb9   :  { %v456_v21 = vadd.f32 %v455_v19, %v437_v18 }
  0xbe   :  { %v438_v22 = vpop.f32.mrf.mxu2  ;;  %v469_v24 = vpop.f32.mrf.mxu0 }
  0xbf   :  { %v474_v25 = vpop.f32.mrf.mxu1  ;;  %v470_v28 = vadd.f32 %v469_v24, %v451_v20  ;;  %v439_v31 = vadd.f32 %v438_v22, %v420_v27  ;;  %v457_v34 = vpop.f32.mrf.mxu3 }
  0xc0   :  { %v475_v29 = vadd.f32 %v474_v25, %v456_v21 }
  0xc1   :  { %v498_v32 = vadd.f32 %v746_v23, %v470_v28  ;;  %v458_v36 = vadd.f32 %v457_v34, %v439_v31 }
  0xc2   :  { %v500_v33 = vadd.f32 %v746_v23, %v475_v29 }
  0xc3   :  { %502 = vst [vmem:[%s953_s3] sm:$0xff] %v498_v32 }
  0xc4   :  { %504 = vst [vmem:[%s953_s3 + $0x10] sm:$0xff] %v500_v33 }
  0xc6   :  { %v471_v37 = vpop.f32.mrf.mxu0 }
  0xc7   :  { %v476_v38 = vpop.f32.mrf.mxu1  ;;  %v472_v39 = vadd.f32 %v471_v37, %v453_v35 }
  0xc8   :  { %v477_v40 = vadd.f32 %v476_v38, %v458_v36 }
  0xc9   :  { %v499_v41 = vadd.f32 %v746_v23, %v472_v39 }
  0xca   :  { %v501_v42 = vadd.f32 %v746_v23, %v477_v40 }
  0xcb   :  { %503 = vst [vmem:[%s953_s3 + $0x8] sm:$0xff] %v499_v41 }
  0xcc   :  { %505 = vst [vmem:[%s953_s3 + $0x18] sm:$0xff] %v501_v42 }

// kernel: resnet18_forward.74
= control target key start
LH: loop header
LB: loop body
LE: loop exit
PB: predicated region body
PF: predicated region fallthrough
CT: control target
= control target key end

     0   :  { %v57_v0 = vmov 0.0   ;;  %s103_s1 = inlined_call_operand.vmem [shape: f32[1,128], index: 1, kind: output, shape index: {0}]   ;;  %s104_s2 = inlined_call_operand.vmem [shape: f32[1,128], index: 2, kind: output, shape index: {1}]   ;;  %s105_s0 = inlined_call_operand.vmem [shape: f32[32,128], index: 0, kind: input, shape index: {}]  }
   0x1   :  { %14 = vst [vmem:[%s103_s1] sm:$0x1] %v57_v0  ;;  %v16_v1 = vld [vmem:[%s105_s0] sm:$0xff]  ;;  %v17_v2 = vld [vmem:[%s105_s0 + $0x8] sm:$0xff]  ;;  %v18_v3 = vld [vmem:[%s105_s0 + $0x10] sm:$0xff] }
   0x2   :  { %15 = vst [vmem:[%s104_s2] sm:$0x1] %v57_v0  ;;  %v19_v4 = vld [vmem:[%s105_s0 + $0x18] sm:$0xff]  ;;  %v21_v5 = vadd.f32 %v17_v2, %v16_v1  ;;  %v33_v6 = vmul.f32 %v16_v1, %v16_v1  ;;  %v34_v7 = vmul.f32 %v17_v2, %v17_v2  ;;  %v35_v8 = vmul.f32 %v18_v3, %v18_v3 }
   0x3   :  { %v36_v10 = vmul.f32 %v19_v4, %v19_v4 }
   0x4   :  { %v22_v9 = vadd.f32 %v21_v5, %v18_v3  ;;  %v37_v11 = vadd.f32 %v34_v7, %v33_v6 }
   0x6   :  { %v23_v12 = vadd.f32 %v22_v9, %v19_v4  ;;  %v38_v13 = vadd.f32 %v37_v11, %v35_v8 }
   0x8   :  { %v24_v14 = vrot.slane %v23_v12, 4  ;;  %v39_v15 = vadd.f32 %v38_v13, %v36_v10  ;;  %v20_v24 = vld [vmem:[%s103_s1] sm:$0x1] }
   0x9   :  { %v32_v27 = vld [vmem:[%s104_s2] sm:$0x1] }
   0xa   :  { %v25_v16 = vadd.f32 %v24_v14, %v23_v12  ;;  %v40_v17 = vrot.slane %v39_v15, 4 }
   0xc   :  { %v26_v18 = vrot.slane %v25_v16, 2  ;;  %v41_v19 = vadd.f32 %v40_v17, %v39_v15 }
   0xe   :  { %v27_v20 = vadd.f32 %v26_v18, %v25_v16  ;;  %v42_v21 = vrot.slane %v41_v19, 2 }
  0x10   :  { %v28_v22 = vrot.slane %v27_v20, 1  ;;  %v43_v23 = vadd.f32 %v42_v21, %v41_v19 }
  0x12   :  { %v29_v25 = vadd.f32 %v28_v22, %v27_v20  ;;  %v44_v26 = vrot.slane %v43_v23, 1 }
  0x14   :  { %v30_v28 = vadd.f32 %v29_v25, %v20_v24  ;;  %v45_v29 = vadd.f32 %v44_v26, %v43_v23 }
  0x16   :  { %31 = vst [vmem:[%s103_s1] sm:$0x1] %v30_v28  ;;  %v46_v30 = vadd.f32 %v45_v29, %v32_v27 }
  0x18   :  { %47 = vst [vmem:[%s104_s2] sm:$0x1] %v46_v30 }

// kernel: resnet18_forward.75
= control target key start
LH: loop header
LB: loop body
LE: loop exit
PB: predicated region body
PF: predicated region fallthrough
CT: control target
= control target key end

     0   :  { %s98_s0 = inlined_call_operand.vmem [shape: f32[32,128], index: 0, kind: input, shape index: {}]   ;;  %s99_s1 = inlined_call_operand.vmem [shape: f32[1,128], index: 1, kind: input, shape index: {}]   ;;  %s100_s2 = inlined_call_operand.vmem [shape: f32[1,128], index: 2, kind: input, shape index: {}]   ;;  %s101_s3 = inlined_call_operand.vmem [shape: f32[32,128], index: 3, kind: output, shape index: {}]  }
   0x1   :  { %v14_v0 = vld [vmem:[%s98_s0] sm:$0xff]  ;;  %v15_v3 = vld [vmem:[%s98_s0 + $0x8] sm:$0xff]  ;;  %v16_v6 = vld [vmem:[%s98_s0 + $0x10] sm:$0xff] }
   0x2   :  { %v46_v1 = vld [vmem:[%s99_s1] ss:$0 sm:$0xff]  ;;  %v17_v7 = vld [vmem:[%s98_s0 + $0x18] sm:$0xff] }
   0x3   :  { %v47_v2 = vld [vmem:[%s100_s2] ss:$0 sm:$0xff]  ;;  %v22_v4 = vmul.f32 %v46_v1, %v14_v0  ;;  %v23_v5 = vmul.f32 %v46_v1, %v15_v3  ;;  %v24_v8 = vmul.f32 %v46_v1, %v16_v6  ;;  %v25_v9 = vmul.f32 %v46_v1, %v17_v7 }
   0x5   :  { %v30_v10 = vadd.f32 %v47_v2, %v22_v4  ;;  %v31_v11 = vadd.f32 %v47_v2, %v23_v5  ;;  %v32_v12 = vadd.f32 %v47_v2, %v24_v8  ;;  %v33_v13 = vadd.f32 %v47_v2, %v25_v9 }
   0x7   :  { %v34_v14 = vmax.f32 %v30_v10, 0.0  ;;  %v35_v15 = vmax.f32 %v31_v11, 0.0  ;;  %v36_v16 = vmax.f32 %v32_v12, 0.0  ;;  %v37_v17 = vmax.f32 %v33_v13, 0.0 }
   0x9   :  { %38 = vst [vmem:[%s101_s3] sm:$0xff] %v34_v14 }
   0xa   :  { %39 = vst [vmem:[%s101_s3 + $0x8] sm:$0xff] %v35_v15 }
   0xb   :  { %40 = vst [vmem:[%s101_s3 + $0x10] sm:$0xff] %v36_v16 }
   0xc   :  { %41 = vst [vmem:[%s101_s3 + $0x18] sm:$0xff] %v37_v17 }

// kernel: resnet18_forward.79
= control target key start
LH: loop header
LB: loop body
LE: loop exit
PB: predicated region body
PF: predicated region fallthrough
CT: control target
= control target key end

     0   :  { %s126_s0 = inlined_call_operand.vmem [shape: f32[32,128], index: 0, kind: input, shape index: {}]   ;;  %s127_s2 = inlined_call_operand.vmem [shape: f32[1,128], index: 2, kind: input, shape index: {}]   ;;  %s128_s3 = inlined_call_operand.vmem [shape: f32[1,128], index: 3, kind: input, shape index: {}]   ;;  %s129_s1 = inlined_call_operand.vmem [shape: f32[32,128], index: 1, kind: input, shape index: {}]   ;;  %s130_s4 = inlined_call_operand.vmem [shape: f32[32,128], index: 4, kind: output, shape index: {}]  }
   0x1   :  { %v17_v0 = vld [vmem:[%s126_s0] sm:$0xff]  ;;  %v18_v4 = vld [vmem:[%s126_s0 + $0x8] sm:$0xff]  ;;  %v19_v5 = vld [vmem:[%s126_s0 + $0x10] sm:$0xff] }
   0x2   :  { %v57_v1 = vld [vmem:[%s127_s2] ss:$0 sm:$0xff]  ;;  %v20_v9 = vld [vmem:[%s126_s0 + $0x18] sm:$0xff]  ;;  %v38_v11 = vld [vmem:[%s129_s1 + $0x8] sm:$0xff] }
   0x3   :  { %v58_v2 = vld [vmem:[%s128_s3] ss:$0 sm:$0xff]  ;;  %v25_v3 = vmul.f32 %v57_v1, %v17_v0  ;;  %v26_v7 = vmul.f32 %v57_v1, %v18_v4  ;;  %v27_v8 = vmul.f32 %v57_v1, %v19_v5  ;;  %v39_v12 = vld [vmem:[%s129_s1 + $0x10] sm:$0xff]  ;;  %v28_v13 = vmul.f32 %v57_v1, %v20_v9  ;;  %v40_v16 = vld [vmem:[%s129_s1 + $0x18] sm:$0xff] }
   0x4   :  { %v37_v6 = vld [vmem:[%s129_s1] sm:$0xff] }
   0x5   :  { %v33_v10 = vadd.f32 %v58_v2, %v25_v3  ;;  %v34_v14 = vadd.f32 %v58_v2, %v26_v7  ;;  %v35_v15 = vadd.f32 %v58_v2, %v27_v8  ;;  %v36_v18 = vadd.f32 %v58_v2, %v28_v13 }
   0x7   :  { %v41_v17 = vadd.f32 %v37_v6, %v33_v10  ;;  %v42_v19 = vadd.f32 %v38_v11, %v34_v14  ;;  %v43_v20 = vadd.f32 %v39_v12, %v35_v15  ;;  %v44_v22 = vadd.f32 %v40_v16, %v36_v18 }
   0x9   :  { %v45_v21 = vmax.f32 %v41_v17, 0.0  ;;  %v46_v23 = vmax.f32 %v42_v19, 0.0  ;;  %v47_v24 = vmax.f32 %v43_v20, 0.0  ;;  %v48_v25 = vmax.f32 %v44_v22, 0.0 }
   0xb   :  { %49 = vst [vmem:[%s130_s4] sm:$0xff] %v45_v21 }
   0xc   :  { %50 = vst [vmem:[%s130_s4 + $0x8] sm:$0xff] %v46_v23 }
   0xd   :  { %51 = vst [vmem:[%s130_s4 + $0x10] sm:$0xff] %v47_v24 }
   0xe   :  { %52 = vst [vmem:[%s130_s4 + $0x18] sm:$0xff] %v48_v25 }

// kernel: resnet18_forward.76
= control target key start
LH: loop header
LB: loop body
LE: loop exit
PB: predicated region body
PF: predicated region fallthrough
CT: control target
= control target key end

     0   :  { %s733_s12 = smov 0   ;;  %s735_s13 = smov 0   ;;  %s832_s0 = inlined_call_operand.vmem [shape: bf16[32,1152], index: 0, kind: input, shape index: {}]   ;;  %s833_s1 = inlined_call_operand.vmem [shape: bf16[1152,128], index: 1, kind: input, shape index: {}]   ;;  %s834_s2 = inlined_call_operand.vmem [shape: f32[1,128], index: 2, kind: input, shape index: {}]   ;;  %s835_s3 = inlined_call_operand.vmem [shape: f32[32,128], index: 3, kind: output, shape index: {}]  }
   0x1   :  { %s737_s14 = smov 0   ;;  %s739_s15 = smov 0  }
   0x2   :  { %s741_s16 = smov 0  }
   0x3 LB: > { %s25_s17 = sadd.s32 1, %s706_s15  ;;  %p48_p1 = scmp.ne.s32.totalorder %s698_s13, %s694_s12  ;;  %s710_s16 = sphi %s741_s16, %s13_s16   ;;  %s706_s15 = sphi %s739_s15, %s839_s15   ;;  %s702_s14 = sphi %s737_s14, %s838_s14   ;;  %s698_s13 = sphi %s735_s13, %s837_s13   ;;  %s694_s12 = sphi %s733_s12, %s836_s12  }
   0x4   : > { %p26_p0 = scmp.ge.s32.totalorder %s25_s17, 9  ;;  %p49_p2 = scmp.eq.s32.totalorder %s710_s16, 0 }
   0x5   : > { %s41_s19 = sadd.s32 1, %s698_s13  ;;  %p559_p5 = scmp.ge.s32.totalorder %s710_s16, 9 }
   0x6   : > { %s841_s17 = smov (%p26_p0, %s25_s17), 0  ;;  %p50_p3 = por %p49_p2, %p48_p1 }
   0x7   : > { %s37_s18 = ssub.s32 %s706_s15, %s841_s17  ;;  %162 = sbr.rel (%p559_p5) target bundleno = 20 (0x14), region = 20 }
   0x8   : > { %p39_p4 = scmp.eq.s32.totalorder %s37_s18, 0 }
   0xa   : > { %s768_s20 = scalar_select %p39_p4, %s698_s13, %s41_s19  }
   0xc   : > { %165 = sbr.rel (!%p50_p3) target bundleno = 20 (0x14), region = 24  ;;  %s167_s21 = sand.u32 (%p50_p3), 1, %s698_s13  }
   0xd   : > { %s561_s22 = sshll.u32 (%p50_p3), %s706_s15, 2  ;;  %s560_s23 = sshll.u32 (%p50_p3), %s167_s21, 4 }
   0xe   : > { %s174_s26 = scalar_lea.vmem (%p50_p3), %s832_s0, %s561_s22  ;;  %s169_s27 = scalar_lea.vmem (%p50_p3), [#allocation3], %s560_s23 }
   0xf   : > { %v191_v0 = vld [vmem:[%s174_s26] sm:$0xf] (%p50_p3)  ;;  %v193_v1 = vld [vmem:[%s174_s26 + $0x24] sm:$0xf] (%p50_p3)  ;;  %v195_v2 = vld [vmem:[%s174_s26 + $0x48] sm:$0xf] (%p50_p3) }
  0x10   : > { %192 = vst [vmem:[%s169_s27] sm:$0xf] (%p50_p3), %v191_v0  ;;  %v197_v3 = vld [vmem:[%s174_s26 + $0x6c] sm:$0xf] (%p50_p3) }
  0x11   : > { %194 = vst [vmem:[%s169_s27 + $0x4] sm:$0xf] %v193_v1 }
  0x12   : > { %196 = vst [vmem:[%s169_s27 + $0x8] sm:$0xf] %v195_v2 }
  0x13   : > { %198 = vst [vmem:[%s169_s27 + $0xc] sm:$0xf] %v197_v3 }
  0x14 PF: > { %p562_p6 = scmp.ge.s32.totalorder %s710_s16, 1  ;;  %p241_p7 = scmp.lt.s32.totalorder %s710_s16, 10 }
  0x16   : > { %p242_p8 = pnand %p562_p6, %p241_p7 }
  0x17   : > { %s248_s28 = sand.u32 (!%p242_p8), 1, %s694_s12   ;;  %s564_s29 = sshll.u32 (!%p242_p8), %s702_s14, 4 }
  0x18   : > { %245 = sbr.rel (%p242_p8) target bundleno = 219 (0xdb), region = 69  ;;  %s780_s30 = sshll.u32 (!%p242_p8), %s248_s28, 4 }
  0x19   : > { %p287_p9 = scmp.lt.s32.totalorder (!%p242_p8), %s564_s29, 143  ;;  %s250_s8 = scalar_lea.vmem (!%p242_p8), [#allocation3], %s780_s30 }
  0x1a   : > { %p566_p10 = scmp.ne.s32.totalorder (!%p242_p8), %s702_s14, 0 }
  0x1d   : > { %s843_s29 = smov (!%p287_p9, %s564_s29), 143  ;;  %310 = sbr.rel (%p566_p10) target bundleno = 39 (0x27), region = 77 }
  0x1e   : > { %s565_s4 = sshll.u32 %s843_s29, 2 }
  0x1f   : > { %s785_s7 = scalar_lea.vmem %s833_s1, %s565_s4 }
  0x22   : > { %v712_v4 = vmov 0.0  }
  0x23   : > { %311 = vst [vmem:[#allocation2 + $0x10] sm:$0xff] %v712_v4 }
  0x24   : > { %312 = vst [vmem:[#allocation2] sm:$0xff] %v712_v4 }
  0x25   : > { %313 = vst [vmem:[#allocation2 + $0x18] sm:$0xff] %v712_v4 }
  0x26   : > { %314 = vst [vmem:[#allocation2 + $0x8] sm:$0xff] %v712_v4 }
  0x27 PF: > { %v621_v5 = vld [vmem:[%s785_s7 + $0x38] sm:$0xff]  ;;  %v620_v6 = vld [vmem:[%s785_s7 + $0x30] sm:$0xff]  ;;  %v619_v7 = vld [vmem:[%s785_s7 + $0x28] sm:$0xff]  ;;  %p607_p11 = scmp.ne.s32.totalorder %s702_s14, 8 }
  0x28   : > { %399 = vmatpush.bf16.msra.mxu0 %v621_v5  ;;  %622 = vmatpush.bf16.msra.mxu1 %v621_v5  ;;  %v618_v8 = vld [vmem:[%s785_s7 + $0x20] sm:$0xff]  ;;  %v617_v9 = vld [vmem:[%s785_s7 + $0x18] sm:$0xff]  ;;  %v616_v10 = vld [vmem:[%s785_s7 + $0x10] sm:$0xff] }
  0x29   : > { %v615_v11 = vld [vmem:[%s785_s7 + $0x8] sm:$0xff]  ;;  %v614_v12 = vld [vmem:[%s785_s7] sm:$0xff] }
  0x2a   : > { %v612_v13 = vld [vmem:[%s250_s8] sm:$0xff]  ;;  %v613_v14 = vld [vmem:[%s250_s8 + $0x8] sm:$0xff] }
  0x2b   : > { %v315_v15 = vld [vmem:[#allocation2 + $0x10] sm:$0xff]  ;;  %v316_v21 = vld [vmem:[#allocation2] sm:$0xff] }
  0x2c   : > { %400 = vmatpush.bf16.msra.mxu0 %v620_v6  ;;  %623 = vmatpush.bf16.msra.mxu1 %v620_v6  ;;  %v317_v16 = vld [vmem:[#allocation2 + $0x18] sm:$0xff] }
  0x2d   : > { %v318_v22 = vld [vmem:[#allocation2 + $0x8] sm:$0xff] }
  0x30   : > { %401 = vmatpush.bf16.msra.mxu0 %v619_v7  ;;  %624 = vmatpush.bf16.msra.mxu1 %v619_v7 }
  0x34   : > { %402 = vmatpush.bf16.msra.mxu0 %v618_v8  ;;  %625 = vmatpush.bf16.msra.mxu1 %v618_v8 }
  0x38   : > { %403 = vmatpush.bf16.msra.mxu0 %v617_v9  ;;  %626 = vmatpush.bf16.msra.mxu1 %v617_v9 }
  0x3c   : > { %404 = vmatpush.bf16.msra.mxu0 %v616_v10  ;;  %627 = vmatpush.bf16.msra.mxu1 %v616_v10 }
  0x40   : > { %405 = vmatpush.bf16.msra.mxu0 %v615_v11  ;;  %628 = vmatpush.bf16.msra.mxu1 %v615_v11 }
  0x44   : > { %406 = vmatpush.bf16.msra.mxu0 %v614_v12  ;;  %629 = vmatpush.bf16.msra.mxu1 %v614_v12 }
  0x47   : > { %407 = vmatmul.bf16.vlgmr.msra.gmra.mxu0 %v612_v13  ;;  %412 = vmatmul.bf16.vlgmr.msra.gmra.mxu1 %v613_v14 }
  0xc4   : > { %v408_v17 = vpop.f32.mrf.mxu0  ;;  %v413_v18 = vpop.f32.mrf.mxu1 }
  0xc5   : > { %v418_v19 = vadd.f32 %v408_v17, %v315_v15  ;;  %v420_v20 = vadd.f32 %v413_v18, %v317_v16 }
  0xc7   : > { %422 = vst [vmem:[#allocation2 + $0x10] sm:$0xff] %v418_v19 }
  0xc8   : > { %424 = vst [vmem:[#allocation2 + $0x18] sm:$0xff] %v420_v20 }
  0xcc   : > { %v410_v23 = vpop.f32.mrf.mxu0  ;;  %v415_v24 = vpop.f32.mrf.mxu1  ;;  %429 = sbr.rel (%p607_p11) target bundleno = 219 (0xdb), region = 81 }
  0xcd   : > { %v419_v25 = vadd.f32 %v410_v23, %v316_v21  ;;  %v421_v26 = vadd.f32 %v415_v24, %v318_v22 }
  0xcf   : > { %423 = vst [vmem:[#allocation2] sm:$0xff] %v419_v25 }
  0xd0   : > { %425 = vst [vmem:[#allocation2 + $0x8] sm:$0xff] %v421_v26 }
  0xd1   : > { %v430_v27 = vld [vmem:[#allocation2 + $0x10] sm:$0xff]  ;;  %v671_v28 = vld [vmem:[%s834_s2] ss:$0 sm:$0xff]  ;;  %v432_v30 = vld [vmem:[#allocation2 + $0x18] sm:$0xff] }
  0xd2   : > { %v438_v32 = vadd.f32 %v671_v28, %v430_v27  ;;  %v440_v34 = vadd.f32 %v671_v28, %v432_v30 }
  0xd4   : > { %442 = vst [vmem:[%s835_s3] sm:$0xff] %v438_v32 }
  0xd5   : > { %444 = vst [vmem:[%s835_s3 + $0x10] sm:$0xff] %v440_v34 }
  0xd6   : > { %v431_v29 = vld [vmem:[#allocation2] sm:$0xff] }
  0xd7   : > { %v433_v31 = vld [vmem:[#allocation2 + $0x8] sm:$0xff]  ;;  %v439_v33 = vadd.f32 %v671_v28, %v431_v29 }
  0xd8   : > { %v441_v35 = vadd.f32 %v671_v28, %v433_v31 }
  0xd9   : > { %443 = vst [vmem:[%s835_s3 + $0x8] sm:$0xff] %v439_v33 }
  0xda   : > { %445 = vst [vmem:[%s835_s3 + $0x18] sm:$0xff] %v441_v35 }
  0xdb PF: > { %s13_s16 = sadd.s32 1, %s710_s16   ;;  %s836_s12 = smov %s698_s13 }
  0xdc   : > { %p10_p12 = scmp.ge.s32.totalorder %s13_s16, 11   ;;  %s837_s13 = smov %s768_s20 }
  0xdd   : > { %s838_s14 = smov %s706_s15  ;;  %s839_s15 = smov %s841_s17 }
  0xde   :  { %12 = sbr.rel (!%p10_p12) target bundleno = 3 (0x3), region = 122 }

// kernel: resnet18_forward.77
= control target key start
LH: loop header
LB: loop body
LE: loop exit
PB: predicated region body
PF: predicated region fallthrough
CT: control target
= control target key end

     0   :  { %vm73_vm0 = vcmask 523264   ;;  %s220_s1 = inlined_call_operand.vmem [shape: bf16[64,128], index: 1, kind: input, shape index: {}]   ;;  %s221_s2 = inlined_call_operand.vmem [shape: f32[1,128], index: 2, kind: input, shape index: {}]   ;;  %s222_s0 = inlined_call_operand.vmem [shape: bf16[32,64], index: 0, kind: input, shape index: {}]   ;;  %s223_s3 = inlined_call_operand.vmem [shape: f32[32,128], index: 3, kind: output, shape index: {}]  }
   0x1   :  { %v161_v0 = vld [vmem:[%s220_s1 + $0x18] sm:$0xff]  ;;  %v160_v1 = vld [vmem:[%s220_s1 + $0x10] sm:$0xff]  ;;  %v159_v2 = vld [vmem:[%s220_s1 + $0x8] sm:$0xff] }
   0x2   :  { %84 = vmatpush.bf16.msra.mxu0 %v161_v0  ;;  %162 = vmatpush.bf16.msra.mxu1 %v161_v0  ;;  %v158_v3 = vld [vmem:[%s220_s1] sm:$0xff]  ;;  %v157_v5 = vld [vmem:[%s222_s0 + $0x8] sm:$0xff] }
   0x3   :  { %v156_v4 = vld [vmem:[%s222_s0] sm:$0xff] }
   0x4   :  { %v166_v6 = vld [vmem:[%s221_s2] ss:$0 sm:$0xff] }
   0x6   :  { %85 = vmatpush.bf16.msra.mxu0 %v160_v1  ;;  %163 = vmatpush.bf16.msra.mxu1 %v160_v1 }
   0xa   :  { %86 = vmatpush.bf16.msra.mxu0 %v159_v2  ;;  %164 = vmatpush.bf16.msra.mxu1 %v159_v2 }
   0xe   :  { %87 = vmatpush.bf16.msra.mxu0 %v158_v3  ;;  %165 = vmatpush.bf16.msra.mxu1 %v158_v3 }
  0x11   :  { %154 = vmatmul.msk.bf16.vlgmr.msra.gmra.mxu0 %vm73_vm0, %v156_v4  ;;  %155 = vmatmul.msk.bf16.vlgmr.msra.gmra.mxu1 %vm73_vm0, %v157_v5 }
  0x8e   :  { %v89_v7 = vpop.f32.mrf.mxu0  ;;  %v94_v8 = vpop.f32.mrf.mxu1 }
  0x8f   :  { %v118_v9 = vadd.f32 %v166_v6, %v89_v7  ;;  %v120_v10 = vadd.f32 %v166_v6, %v94_v8 }
  0x91   :  { %122 = vst [vmem:[%s223_s3] sm:$0xff] %v118_v9 }
  0x92   :  { %124 = vst [vmem:[%s223_s3 + $0x10] sm:$0xff] %v120_v10 }
  0x96   :  { %v91_v11 = vpop.f32.mrf.mxu0  ;;  %v96_v12 = vpop.f32.mrf.mxu1 }
  0x97   :  { %v119_v13 = vadd.f32 %v166_v6, %v91_v11  ;;  %v121_v14 = vadd.f32 %v166_v6, %v96_v12 }
  0x99   :  { %123 = vst [vmem:[%s223_s3 + $0x8] sm:$0xff] %v119_v13 }
  0x9a   :  { %125 = vst [vmem:[%s223_s3 + $0x18] sm:$0xff] %v121_v14 }

// kernel: resnet18_forward.86
= control target key start
LH: loop header
LB: loop body
LE: loop exit
PB: predicated region body
PF: predicated region fallthrough
CT: control target
= control target key end

     0   :  { %s706_s12 = smov 0   ;;  %s708_s13 = smov 0   ;;  %s792_s0 = inlined_call_operand.vmem [shape: bf16[8,1152], index: 0, kind: input, shape index: {}]   ;;  %s793_s1 = inlined_call_operand.vmem [shape: bf16[1152,256], index: 1, kind: input, shape index: {}]   ;;  %s794_s2 = inlined_call_operand.vmem [shape: f32[1,256], index: 2, kind: input, shape index: {}]   ;;  %s795_s3 = inlined_call_operand.vmem [shape: f32[8,256], index: 3, kind: output, shape index: {}]  }
   0x1   :  { %s710_s14 = smov 0  }
   0x2 LB: > { %s25_s15 = sadd.s32 1, %s679_s13  ;;  %p544_p0 = scmp.ge.s32.totalorder %s683_s14, 1  ;;  %s683_s14 = sphi %s710_s14, %s13_s14   ;;  %s679_s13 = sphi %s708_s13, %s797_s13   ;;  %s675_s12 = sphi %s706_s12, %s796_s12  }
   0x3   : > { %p26_p1 = scmp.ge.s32.totalorder %s25_s15, 9  ;;  %p192_p2 = scmp.lt.s32.totalorder %s683_s14, 10 }
   0x5   : > { %s799_s15 = smov (%p26_p1, %s25_s15), 0  ;;  %p193_p3 = pnand %p544_p0, %p192_p2 }
   0x6   : > { %p239_p4 = scmp.lt.s32.totalorder (!%p193_p3), %s675_s12, 8  ;;  %s546_s16 = sshll.u32 (!%p193_p3), %s675_s12, 4 }
   0x7   : > { %196 = sbr.rel (%p193_p3) target bundleno = 198 (0xc6), region = 32  ;;  %p247_p5 = scmp.lt.s32.totalorder (!%p193_p3), %s546_s16, 143 }
   0x8   : > { %p549_p6 = scmp.ne.s32.totalorder (!%p193_p3), %s675_s12, 0 }
   0xc   : > { %s240_s17 = scalar_select %p239_p4, %s675_s12, 8 }
   0xd   : > { %s801_s16 = smov (!%p247_p5, %s546_s16), 143  ;;  %275 = sbr.rel (%p549_p6) target bundleno = 21 (0x15), region = 36 }
   0xe   : > { %s545_s18 = sshll.u32 %s240_s17, 2  ;;  %s619_s22 = sshll.u32 %s801_s16, 3 }
   0xf   : > { %s732_s21 = scalar_lea.vmem %s792_s0, %s545_s18  ;;  %s737_s25 = scalar_lea.vmem %s793_s1, %s619_s22 }
  0x12   : > { %v685_v0 = vmov 0.0  }
  0x13   : > { %276 = vst [vmem:[#allocation2] sm:$0xff] %v685_v0 }
  0x14   : > { %277 = vst [vmem:[#allocation2 + $0x8] sm:$0xff] %v685_v0 }
  0x15 PF: > { %v608_v1 = vld [vmem:[%s737_s25 + $0x70] sm:$0xf]  ;;  %v635_v2 = vld [vmem:[%s737_s25 + $0x74] sm:$0xf0]  ;;  %v634_v3 = vld [vmem:[%s737_s25 + $0x74] sm:$0xf] }
  0x16   : > { %v609_v4 = vor.u32 %v635_v2, %v608_v1  ;;  %v610_v5 = vld [vmem:[%s737_s25 + $0x78] sm:$0xf0]  ;;  %v600_v6 = vld [vmem:[%s737_s25 + $0x60] sm:$0xf]  ;;  %v633_v7 = vld [vmem:[%s737_s25 + $0x64] sm:$0xf0] }
  0x17   : > { %v613_v8 = vor.u32 %v634_v3, %v610_v5  ;;  %v632_v9 = vld [vmem:[%s737_s25 + $0x64] sm:$0xf]  ;;  %v602_v10 = vld [vmem:[%s737_s25 + $0x68] sm:$0xf0]  ;;  %v601_v11 = vor.u32 %v633_v7, %v600_v6  ;;  %v592_v13 = vld [vmem:[%s737_s25 + $0x50] sm:$0xf] }
  0x18   : > { %377 = vmatpush.bf16.msra.mxu0 %v609_v4  ;;  %v605_v12 = vor.u32 %v632_v9, %v602_v10  ;;  %v631_v14 = vld [vmem:[%s737_s25 + $0x54] sm:$0xf0]  ;;  %v630_v15 = vld [vmem:[%s737_s25 + $0x54] sm:$0xf]  ;;  %v594_v16 = vld [vmem:[%s737_s25 + $0x58] sm:$0xf0] }
  0x19   : > { %390 = vmatpush.bf16.msra.mxu1 %v613_v8  ;;  %v593_v17 = vor.u32 %v631_v14, %v592_v13  ;;  %v597_v18 = vor.u32 %v630_v15, %v594_v16  ;;  %v584_v19 = vld [vmem:[%s737_s25 + $0x40] sm:$0xf]  ;;  %v629_v20 = vld [vmem:[%s737_s25 + $0x44] sm:$0xf0]  ;;  %v628_v21 = vld [vmem:[%s737_s25 + $0x44] sm:$0xf] }
  0x1a   : > { %v586_v22 = vld [vmem:[%s737_s25 + $0x48] sm:$0xf0]  ;;  %v585_v23 = vor.u32 %v629_v20, %v584_v19  ;;  %v576_v25 = vld [vmem:[%s737_s25 + $0x30] sm:$0xf]  ;;  %v627_v26 = vld [vmem:[%s737_s25 + $0x34] sm:$0xf0] }
  0x1b   : > { %v589_v24 = vor.u32 %v628_v21, %v586_v22  ;;  %v626_v27 = vld [vmem:[%s737_s25 + $0x34] sm:$0xf]  ;;  %v578_v28 = vld [vmem:[%s737_s25 + $0x38] sm:$0xf0]  ;;  %v577_v29 = vor.u32 %v627_v26, %v576_v25  ;;  %v568_v31 = vld [vmem:[%s737_s25 + $0x20] sm:$0xf] }
  0x1c   : > { %378 = vmatpush.bf16.msra.mxu0 %v601_v11  ;;  %v581_v30 = vor.u32 %v626_v27, %v578_v28  ;;  %v625_v32 = vld [vmem:[%s737_s25 + $0x24] sm:$0xf0]  ;;  %v624_v33 = vld [vmem:[%s737_s25 + $0x24] sm:$0xf]  ;;  %v570_v34 = vld [vmem:[%s737_s25 + $0x28] sm:$0xf0] }
  0x1d   : > { %391 = vmatpush.bf16.msra.mxu1 %v605_v12  ;;  %v569_v35 = vor.u32 %v625_v32, %v568_v31  ;;  %v573_v36 = vor.u32 %v624_v33, %v570_v34  ;;  %v560_v37 = vld [vmem:[%s737_s25 + $0x10] sm:$0xf]  ;;  %v623_v38 = vld [vmem:[%s737_s25 + $0x14] sm:$0xf0]  ;;  %v622_v39 = vld [vmem:[%s737_s25 + $0x14] sm:$0xf] }
  0x1e   : > { %v562_v40 = vld [vmem:[%s737_s25 + $0x18] sm:$0xf0]  ;;  %v561_v41 = vor.u32 %v623_v38, %v560_v37  ;;  %v552_v43 = vld [vmem:[%s737_s25] sm:$0xf]  ;;  %v621_v44 = vld [vmem:[%s737_s25 + $0x4] sm:$0xf0] }
  0x1f   : > { %v565_v42 = vor.u32 %v622_v39, %v562_v40  ;;  %v620_v45 = vld [vmem:[%s737_s25 + $0x4] sm:$0xf]  ;;  %v554_v46 = vld [vmem:[%s737_s25 + $0x8] sm:$0xf0]  ;;  %v553_v47 = vor.u32 %v621_v44, %v552_v43  ;;  %v280_v49 = vld [vmem:[%s732_s21] sm:$0xf] }
  0x20   : > { %379 = vmatpush.bf16.msra.mxu0 %v593_v17  ;;  %v557_v48 = vor.u32 %v620_v45, %v554_v46  ;;  %v278_v50 = vld [vmem:[#allocation2] sm:$0xff]  ;;  %v279_v51 = vld [vmem:[#allocation2 + $0x8] sm:$0xff]  ;;  %p614_p7 = scmp.ne.s32.totalorder %s675_s12, 8 }
  0x21   : > { %392 = vmatpush.bf16.msra.mxu1 %v597_v18 }
  0x24   : > { %380 = vmatpush.bf16.msra.mxu0 %v585_v23 }
  0x25   : > { %393 = vmatpush.bf16.msra.mxu1 %v589_v24 }
  0x28   : > { %381 = vmatpush.bf16.msra.mxu0 %v577_v29 }
  0x29   : > { %394 = vmatpush.bf16.msra.mxu1 %v581_v30 }
  0x2c   : > { %382 = vmatpush.bf16.msra.mxu0 %v569_v35 }
  0x2d   : > { %395 = vmatpush.bf16.msra.mxu1 %v573_v36 }
  0x30   : > { %383 = vmatpush.bf16.msra.mxu0 %v561_v41 }
  0x31   : > { %396 = vmatpush.bf16.msra.mxu1 %v565_v42 }
  0x34   : > { %384 = vmatpush.bf16.msra.mxu0 %v553_v47 }
  0x35   : > { %397 = vmatpush.bf16.msra.mxu1 %v557_v48 }
  0x37   : > { %385 = vmatmul.bf16.vlgmr.msra.gmra.mxu0 %v280_v49 }
  0x38   : > { %398 = vmatmul.bf16.vlgmr.msra.gmra.mxu1 %v280_v49 }
  0xb4   : > { %v386_v52 = vpop.f32.mrf.mxu0 }
  0xb5   : > { %v403_v53 = vadd.f32 %v386_v52, %v278_v50  ;;  %v399_v54 = vpop.f32.mrf.mxu1 }
  0xb6   : > { %v404_v55 = vadd.f32 %v399_v54, %v279_v51 }
  0xb7   : > { %405 = vst [vmem:[#allocation2] sm:$0xff] %v403_v53 }
  0xb8   : > { %406 = vst [vmem:[#allocation2 + $0x8] sm:$0xff] %v404_v55 }
  0xb9   : > { %410 = sbr.rel (%p614_p7) target bundleno = 198 (0xc6), region = 40 }
  0xbc   : > { %v388_v56 = vpop.f32.mrf.mxu0 }
  0xbd   : > { %v401_v57 = vpop.f32.mrf.mxu1 }
  0xbe   : > { %v411_v58 = vld [vmem:[#allocation2] sm:$0xff] }
  0xbf   : > { %v413_v59 = vld [vmem:[%s794_s2] sm:$0x3]  ;;  %v412_v60 = vld [vmem:[#allocation2 + $0x8] sm:$0xff] }
  0xc0   : > { %v415_v61 = vperm.slane %v413_v59, 0  ;;  %v416_v62 = vperm.slane %v413_v59, 1 }
  0xc2   : > { %v419_v63 = vadd.f32 %v415_v61, %v411_v58  ;;  %v420_v0 = vadd.f32 %v416_v62, %v412_v60 }
  0xc4   : > { %421 = vst [vmem:[%s795_s3] sm:$0xff] %v419_v63 }
  0xc5   : > { %422 = vst [vmem:[%s795_s3 + $0x8] sm:$0xff] %v420_v0 }
  0xc6 PF: > { %s13_s14 = sadd.s32 1, %s683_s14   ;;  %s796_s12 = smov %s679_s13 }
  0xc7   : > { %p10_p8 = scmp.ge.s32.totalorder %s13_s14, 11   ;;  %s797_s13 = smov %s799_s15 }
  0xc9   :  { %12 = sbr.rel (!%p10_p8) target bundleno = 2 (0x2), region = 76 }

// kernel: resnet18_forward.87
= control target key start
LH: loop header
LB: loop body
LE: loop exit
PB: predicated region body
PF: predicated region fallthrough
CT: control target
= control target key end

     0   :  { %v14_v0 = vlaneseq  ;;  %v78_v7 = vmov 0.0   ;;  %vm38_vm1 = vcmask 1040384   ;;  %s130_s0 = inlined_call_operand.vmem [shape: f32[8,256], index: 0, kind: input, shape index: {}]   ;;  %s131_s1 = inlined_call_operand.vmem [shape: f32[1,256], index: 1, kind: output, shape index: {0}]   ;;  %s132_s2 = inlined_call_operand.vmem [shape: f32[1,256], index: 2, kind: output, shape index: {1}]  }
   0x1   :  { %v20_v1 = vld [vmem:[%s130_s0] sm:$0xff]  ;;  %v21_v2 = vld [vmem:[%s130_s0 + $0x8] sm:$0xff] }
   0x2   :  { %vm100_vm0 = vcmp.lt.s32.totalorder %v14_v0, 256  ;;  %v23_v4 = vrot.slane %v20_v1, 4  ;;  %v29_v5 = vrot.slane %v21_v2, 4  ;;  %v48_v6 = vmul.f32 %v20_v1, %v20_v1 }
   0x3   :  { %18 = vst.msk [vmem:[%s131_s1] sm:$0x3] %vm100_vm0, %v78_v7  ;;  %v49_v8 = vmul.f32 %v21_v2, %v21_v2 }
   0x4   :  { %v24_v9 = vadd.f32 %v23_v4, %v20_v1  ;;  %v30_v10 = vadd.f32 %v29_v5, %v21_v2  ;;  %19 = vst.msk [vmem:[%s132_s2] sm:$0x3] %vm100_vm0, %v78_v7  ;;  %v50_v11 = vrot.slane %v48_v6, 4 }
   0x5   :  { %v56_v12 = vrot.slane %v49_v8, 4 }
   0x6   :  { %v25_v13 = vrot.slane %v24_v9, 2  ;;  %v31_v14 = vrot.slane %v30_v10, 2  ;;  %v51_v15 = vadd.f32 %v50_v11, %v48_v6 }
   0x7   :  { %v57_v16 = vadd.f32 %v56_v12, %v49_v8 }
   0x8   :  { %v26_v17 = vadd.f32 %v25_v13, %v24_v9  ;;  %v32_v18 = vadd.f32 %v31_v14, %v30_v10  ;;  %v52_v19 = vrot.slane %v51_v15, 2 }
   0x9   :  { %v58_v20 = vrot.slane %v57_v16, 2 }
   0xa   :  { %v27_v21 = vrot.slane %v26_v17, 1  ;;  %v33_v22 = vrot.slane %v32_v18, 1  ;;  %v53_v23 = vadd.f32 %v52_v19, %v51_v15  ;;  %v22_v29 = vld [vmem:[%s131_s1] sm:$0x3] }
   0xb   :  { %v59_v24 = vadd.f32 %v58_v20, %v57_v16  ;;  %v47_v35 = vld [vmem:[%s132_s2] sm:$0x3] }
   0xc   :  { %v28_v25 = vadd.f32 %v27_v21, %v26_v17  ;;  %v34_v26 = vadd.f32 %v33_v22, %v32_v18  ;;  %v54_v27 = vrot.slane %v53_v23, 1 }
   0xd   :  { %v60_v28 = vrot.slane %v59_v24, 1 }
   0xe   :  { %v37_v30 = vrot.slane %v34_v26, 7  ;;  %v55_v31 = vadd.f32 %v54_v27, %v53_v23 }
   0xf   :  { %v61_v32 = vadd.f32 %v60_v28, %v59_v24 }
  0x10   :  { %v39_v33 = vsel %vm38_vm1, %v28_v25, %v37_v30 }
  0x11   :  { %v41_v34 = vadd.f32 %v39_v33, %v22_v29  ;;  %v64_v36 = vrot.slane %v61_v32, 7 }
  0x13   :  { %46 = vst.msk [vmem:[%s131_s1] sm:$0x3] %vm100_vm0, %v41_v34  ;;  %v65_v37 = vsel %vm38_vm1, %v55_v31, %v64_v36 }
  0x14   :  { %v67_v38 = vadd.f32 %v65_v37, %v47_v35 }
  0x16   :  { %68 = vst.msk [vmem:[%s132_s2] sm:$0x3] %vm100_vm0, %v67_v38 }

// kernel: resnet18_forward.88
= control target key start
LH: loop header
LB: loop body
LE: loop exit
PB: predicated region body
PF: predicated region fallthrough
CT: control target
= control target key end

     0   :  { %s78_s0 = inlined_call_operand.vmem [shape: f32[8,256], index: 0, kind: input, shape index: {}]   ;;  %s79_s1 = inlined_call_operand.vmem [shape: f32[1,256], index: 1, kind: input, shape index: {}]   ;;  %s80_s2 = inlined_call_operand.vmem [shape: f32[1,256], index: 2, kind: input, shape index: {}]   ;;  %s81_s3 = inlined_call_operand.vmem [shape: f32[8,256], index: 3, kind: output, shape index: {}]  }
   0x1   :  { %v14_v0 = vld [vmem:[%s78_s0] sm:$0xff]  ;;  %v15_v5 = vld [vmem:[%s78_s0 + $0x8] sm:$0xff] }
   0x2   :  { %v16_v1 = vld [vmem:[%s79_s1] sm:$0x3] }
   0x3   :  { %v24_v2 = vld [vmem:[%s80_s2] sm:$0x3]  ;;  %v18_v3 = vperm.slane %v16_v1, 0  ;;  %v19_v6 = vperm.slane %v16_v1, 1 }
   0x4   :  { %v26_v4 = vperm.slane %v24_v2, 0  ;;  %v27_v7 = vperm.slane %v24_v2, 1 }
   0x5   :  { %v22_v8 = vmul.f32 %v18_v3, %v14_v0  ;;  %v23_v9 = vmul.f32 %v19_v6, %v15_v5 }
   0x7   :  { %v30_v10 = vadd.f32 %v26_v4, %v22_v8  ;;  %v31_v11 = vadd.f32 %v27_v7, %v23_v9 }
   0x9   :  { %v32_v12 = vmax.f32 %v30_v10, 0.0  ;;  %v33_v13 = vmax.f32 %v31_v11, 0.0 }
   0xb   :  { %34 = vst [vmem:[%s81_s3] sm:$0xff] %v32_v12 }
   0xc   :  { %35 = vst [vmem:[%s81_s3 + $0x8] sm:$0xff] %v33_v13 }

// kernel: resnet18_forward.89
= control target key start
LH: loop header
LB: loop body
LE: loop exit
PB: predicated region body
PF: predicated region fallthrough
CT: control target
= control target key end

     0   :  { %s921_s12 = smov 0   ;;  %s923_s13 = smov 0   ;;  %s1038_s0 = inlined_call_operand.vmem [shape: bf16[8,2304], index: 0, kind: input, shape index: {}]   ;;  %s1039_s1 = inlined_call_operand.vmem [shape: bf16[2304,256], index: 1, kind: input, shape index: {}]   ;;  %s1040_s2 = inlined_call_operand.vmem [shape: f32[1,256], index: 2, kind: input, shape index: {}]   ;;  %s1041_s3 = inlined_call_operand.vmem [shape: f32[8,256], index: 3, kind: output, shape index: {}]  }
   0x1   :  { %s925_s14 = smov 0  }
   0x2 LB: > { %s25_s15 = sadd.s32 1, %s894_s13  ;;  %p678_p0 = scmp.ge.s32.totalorder %s898_s14, 1  ;;  %s898_s14 = sphi %s925_s14, %s13_s14   ;;  %s894_s13 = sphi %s923_s13, %s1043_s13   ;;  %s890_s12 = sphi %s921_s12, %s1042_s12  }
   0x3   : > { %p26_p1 = scmp.ge.s32.totalorder %s25_s15, 9  ;;  %p194_p2 = scmp.lt.s32.totalorder %s898_s14, 10 }
   0x5   : > { %s1045_s15 = smov (%p26_p1, %s25_s15), 0  ;;  %p195_p3 = pnand %p678_p0, %p194_p2 }
   0x6   : > { %s679_s16 = sshll.u32 (!%p195_p3), %s890_s12, 1  ;;  %s681_s17 = sshll.u32 (!%p195_p3), %s890_s12, 5 }
   0x7   : > { %198 = sbr.rel (%p195_p3) target bundleno = 207 (0xcf), region = 32  ;;  %p243_p4 = scmp.lt.s32.totalorder (!%p195_p3), %s679_s16, 17 }
   0x8   : > { %p252_p5 = scmp.lt.s32.totalorder (!%p195_p3), %s681_s17, 287  ;;  %p684_p6 = scmp.ne.s32.totalorder (!%p195_p3), %s890_s12, 0 }
   0xc   : > { %s1047_s16 = smov (!%p243_p4, %s679_s16), 17  ;;  %s1049_s17 = smov (!%p252_p5, %s681_s17), 287 }
   0xd   : > { %s680_s18 = sshll.u32 %s1047_s16, 2  ;;  %s818_s22 = sshll.u32 %s1049_s17, 3 }
   0xe   : > { %s946_s21 = scalar_lea.vmem %s1038_s0, %s680_s18  ;;  %s951_s25 = scalar_lea.vmem %s1039_s1, %s818_s22 }
   0xf   : > { %280 = sbr.rel (%p684_p6) target bundleno = 23 (0x17), region = 36 }
  0x14   : > { %v900_v0 = vmov 0.0  }
  0x15   : > { %281 = vst [vmem:[#allocation2] sm:$0xff] %v900_v0 }
  0x16   : > { %282 = vst [vmem:[#allocation2 + $0x8] sm:$0xff] %v900_v0 }
  0x17 PF: > { %v743_v1 = vld [vmem:[%s951_s25 + $0x70] sm:$0xf]  ;;  %v834_v2 = vld [vmem:[%s951_s25 + $0x74] sm:$0xf0]  ;;  %v833_v6 = vld [vmem:[%s951_s25 + $0x74] sm:$0xf] }
  0x18   : > { %v807_v3 = vld [vmem:[%s951_s25 + $0xf0] sm:$0xf]  ;;  %v744_v4 = vor.u32 %v834_v2, %v743_v1  ;;  %v850_v5 = vld [vmem:[%s951_s25 + $0xf4] sm:$0xf0]  ;;  %v745_v7 = vld [vmem:[%s951_s25 + $0x78] sm:$0xf0] }
  0x19   : > { %v808_v8 = vor.u32 %v850_v5, %v807_v3  ;;  %v748_v9 = vor.u32 %v833_v6, %v745_v7  ;;  %v849_v10 = vld [vmem:[%s951_s25 + $0xf4] sm:$0xf]  ;;  %v809_v11 = vld [vmem:[%s951_s25 + $0xf8] sm:$0xf0]  ;;  %v735_v12 = vld [vmem:[%s951_s25 + $0x60] sm:$0xf] }
  0x1a   : > { %485 = vmatpush.bf16.msra.mxu0 %v744_v4  ;;  %v812_v13 = vor.u32 %v849_v10, %v809_v11  ;;  %v832_v14 = vld [vmem:[%s951_s25 + $0x64] sm:$0xf0]  ;;  %v799_v15 = vld [vmem:[%s951_s25 + $0xe0] sm:$0xf]  ;;  %v831_v19 = vld [vmem:[%s951_s25 + $0x64] sm:$0xf] }
  0x1b   : > { %v848_v16 = vld [vmem:[%s951_s25 + $0xe4] sm:$0xf0]  ;;  %498 = vmatpush.bf16.msra.mxu1 %v808_v8  ;;  %511 = vmatpush.bf16.msra.mxu2 %v748_v9  ;;  %v736_v17 = vor.u32 %v832_v14, %v735_v12  ;;  %v737_v20 = vld [vmem:[%s951_s25 + $0x68] sm:$0xf0]  ;;  %v847_v21 = vld [vmem:[%s951_s25 + $0xe4] sm:$0xf] }
  0x1c   : > { %v800_v18 = vor.u32 %v848_v16, %v799_v15  ;;  %524 = vmatpush.bf16.msra.mxu3 %v812_v13  ;;  %v740_v22 = vor.u32 %v831_v19, %v737_v20  ;;  %v801_v23 = vld [vmem:[%s951_s25 + $0xe8] sm:$0xf0]  ;;  %v727_v24 = vld [vmem:[%s951_s25 + $0x50] sm:$0xf]  ;;  %v830_v25 = vld [vmem:[%s951_s25 + $0x54] sm:$0xf0] }
  0x1d   : > { %v804_v26 = vor.u32 %v847_v21, %v801_v23  ;;  %v791_v27 = vld [vmem:[%s951_s25 + $0xd0] sm:$0xf]  ;;  %v846_v28 = vld [vmem:[%s951_s25 + $0xd4] sm:$0xf0]  ;;  %v829_v29 = vld [vmem:[%s951_s25 + $0x54] sm:$0xf]  ;;  %v728_v30 = vor.u32 %v830_v25, %v727_v24 }
  0x1e   : > { %486 = vmatpush.bf16.msra.mxu0 %v736_v17  ;;  %v729_v31 = vld [vmem:[%s951_s25 + $0x58] sm:$0xf0]  ;;  %v845_v32 = vld [vmem:[%s951_s25 + $0xd4] sm:$0xf]  ;;  %v792_v34 = vor.u32 %v846_v28, %v791_v27  ;;  %v719_v36 = vld [vmem:[%s951_s25 + $0x40] sm:$0xf] }
  0x1f   : > { %v793_v33 = vld [vmem:[%s951_s25 + $0xd8] sm:$0xf0]  ;;  %499 = vmatpush.bf16.msra.mxu1 %v800_v18  ;;  %512 = vmatpush.bf16.msra.mxu2 %v740_v22  ;;  %v732_v35 = vor.u32 %v829_v29, %v729_v31  ;;  %v828_v37 = vld [vmem:[%s951_s25 + $0x44] sm:$0xf0]  ;;  %v783_v38 = vld [vmem:[%s951_s25 + $0xc0] sm:$0xf] }
  0x20   : > { %525 = vmatpush.bf16.msra.mxu3 %v804_v26  ;;  %v796_v39 = vor.u32 %v845_v32, %v793_v33  ;;  %v844_v40 = vld [vmem:[%s951_s25 + $0xc4] sm:$0xf0]  ;;  %v827_v41 = vld [vmem:[%s951_s25 + $0x44] sm:$0xf]  ;;  %v721_v42 = vld [vmem:[%s951_s25 + $0x48] sm:$0xf0]  ;;  %v720_v45 = vor.u32 %v828_v37, %v719_v36 }
  0x21   : > { %v843_v43 = vld [vmem:[%s951_s25 + $0xc4] sm:$0xf]  ;;  %v785_v44 = vld [vmem:[%s951_s25 + $0xc8] sm:$0xf0]  ;;  %v784_v46 = vor.u32 %v844_v40, %v783_v38  ;;  %v724_v47 = vor.u32 %v827_v41, %v721_v42  ;;  %v711_v48 = vld [vmem:[%s951_s25 + $0x30] sm:$0xf] }
  0x22   : > { %487 = vmatpush.bf16.msra.mxu0 %v728_v30  ;;  %v826_v49 = vld [vmem:[%s951_s25 + $0x34] sm:$0xf0]  ;;  %v775_v50 = vld [vmem:[%s951_s25 + $0xb0] sm:$0xf]  ;;  %v788_v51 = vor.u32 %v843_v43, %v785_v44  ;;  %v825_v53 = vld [vmem:[%s951_s25 + $0x34] sm:$0xf] }
  0x23   : > { %500 = vmatpush.bf16.msra.mxu1 %v792_v34  ;;  %513 = vmatpush.bf16.msra.mxu2 %v732_v35  ;;  %v842_v52 = vld [vmem:[%s951_s25 + $0xb4] sm:$0xf0]  ;;  %v713_v54 = vld [vmem:[%s951_s25 + $0x38] sm:$0xf0]  ;;  %v841_v55 = vld [vmem:[%s951_s25 + $0xb4] sm:$0xf]  ;;  %v712_v57 = vor.u32 %v826_v49, %v711_v48 }
  0x24   : > { %526 = vmatpush.bf16.msra.mxu3 %v796_v39  ;;  %v777_v56 = vld [vmem:[%s951_s25 + $0xb8] sm:$0xf0]  ;;  %v776_v58 = vor.u32 %v842_v52, %v775_v50  ;;  %v716_v59 = vor.u32 %v825_v53, %v713_v54  ;;  %v703_v60 = vld [vmem:[%s951_s25 + $0x20] sm:$0xf]  ;;  %v824_v61 = vld [vmem:[%s951_s25 + $0x24] sm:$0xf0] }
  0x25   : > { %v767_v62 = vld [vmem:[%s951_s25 + $0xa0] sm:$0xf]  ;;  %v780_v63 = vor.u32 %v841_v55, %v777_v56  ;;  %v840_v0 = vld [vmem:[%s951_s25 + $0xa4] sm:$0xf0]  ;;  %v823_v1 = vld [vmem:[%s951_s25 + $0x24] sm:$0xf]  ;;  %v704_v5 = vor.u32 %v824_v61, %v703_v60 }
  0x26   : > { %488 = vmatpush.bf16.msra.mxu0 %v720_v45  ;;  %v705_v2 = vld [vmem:[%s951_s25 + $0x28] sm:$0xf0]  ;;  %v839_v3 = vld [vmem:[%s951_s25 + $0xa4] sm:$0xf]  ;;  %v768_v6 = vor.u32 %v840_v0, %v767_v62  ;;  %v695_v8 = vld [vmem:[%s951_s25 + $0x10] sm:$0xf] }
  0x27   : > { %501 = vmatpush.bf16.msra.mxu1 %v784_v46  ;;  %514 = vmatpush.bf16.msra.mxu2 %v724_v47  ;;  %v769_v4 = vld [vmem:[%s951_s25 + $0xa8] sm:$0xf0]  ;;  %v708_v7 = vor.u32 %v823_v1, %v705_v2  ;;  %v822_v9 = vld [vmem:[%s951_s25 + $0x14] sm:$0xf0]  ;;  %v759_v10 = vld [vmem:[%s951_s25 + $0x90] sm:$0xf] }
  0x28   : > { %527 = vmatpush.bf16.msra.mxu3 %v788_v51  ;;  %v772_v11 = vor.u32 %v839_v3, %v769_v4  ;;  %v838_v12 = vld [vmem:[%s951_s25 + $0x94] sm:$0xf0]  ;;  %v821_v13 = vld [vmem:[%s951_s25 + $0x14] sm:$0xf]  ;;  %v697_v14 = vld [vmem:[%s951_s25 + $0x18] sm:$0xf0]  ;;  %v696_v17 = vor.u32 %v822_v9, %v695_v8 }
  0x29   : > { %v837_v15 = vld [vmem:[%s951_s25 + $0x94] sm:$0xf]  ;;  %v761_v16 = vld [vmem:[%s951_s25 + $0x98] sm:$0xf0]  ;;  %v285_v18 = vld [vmem:[%s946_s21] sm:$0xff]  ;;  %v760_v19 = vor.u32 %v838_v12, %v759_v10  ;;  %v700_v20 = vor.u32 %v821_v13, %v697_v14  ;;  %p813_p7 = scmp.ne.s32.totalorder %s890_s12, 8 }
  0x2a   : > { %489 = vmatpush.bf16.msra.mxu0 %v712_v57  ;;  %v687_v21 = vld [vmem:[%s951_s25] sm:$0xf]  ;;  %v820_v22 = vld [vmem:[%s951_s25 + $0x4] sm:$0xf0]  ;;  %v764_v24 = vor.u32 %v837_v15, %v761_v16  ;;  %v819_v26 = vld [vmem:[%s951_s25 + $0x4] sm:$0xf]  ;;  %v319_v30 = vunpack.c.l.b16 %v285_v18  ;;  %v320_v32 = vunpack.c.h.b16 %v285_v18 }
  0x2b   : > { %502 = vmatpush.bf16.msra.mxu1 %v776_v58  ;;  %515 = vmatpush.bf16.msra.mxu2 %v716_v59  ;;  %v751_v23 = vld [vmem:[%s951_s25 + $0x80] sm:$0xf]  ;;  %v836_v25 = vld [vmem:[%s951_s25 + $0x84] sm:$0xf0]  ;;  %v689_v27 = vld [vmem:[%s951_s25 + $0x8] sm:$0xf0]  ;;  %v688_v31 = vor.u32 %v820_v22, %v687_v21 }
  0x2c   : > { %528 = vmatpush.bf16.msra.mxu3 %v780_v63  ;;  %v835_v28 = vld [vmem:[%s951_s25 + $0x84] sm:$0xf]  ;;  %v753_v29 = vld [vmem:[%s951_s25 + $0x88] sm:$0xf0]  ;;  %v752_v33 = vor.u32 %v836_v25, %v751_v23  ;;  %v692_v34 = vor.u32 %v819_v26, %v689_v27  ;;  %v321_v36 = vpack.c.b16 %v319_v30, %v319_v30  ;;  %v322_v37 = vpack.c.b16 %v320_v32, %v320_v32 }
  0x2d   : > { %v756_v35 = vor.u32 %v835_v28, %v753_v29  ;;  %v283_v39 = vld [vmem:[#allocation2] sm:$0xff]  ;;  %v284_v44 = vld [vmem:[#allocation2 + $0x8] sm:$0xff] }
  0x2e   : > { %490 = vmatpush.bf16.msra.mxu0 %v704_v5 }
  0x2f   : > { %503 = vmatpush.bf16.msra.mxu1 %v768_v6  ;;  %516 = vmatpush.bf16.msra.mxu2 %v708_v7 }
  0x30   : > { %529 = vmatpush.bf16.msra.mxu3 %v772_v11 }
  0x32   : > { %491 = vmatpush.bf16.msra.mxu0 %v696_v17 }
  0x33   : > { %504 = vmatpush.bf16.msra.mxu1 %v760_v19  ;;  %517 = vmatpush.bf16.msra.mxu2 %v700_v20 }
  0x34   : > { %530 = vmatpush.bf16.msra.mxu3 %v764_v24 }
  0x36   : > { %492 = vmatpush.bf16.msra.mxu0 %v688_v31 }
  0x37   : > { %505 = vmatpush.bf16.msra.mxu1 %v752_v33  ;;  %518 = vmatpush.bf16.msra.mxu2 %v692_v34 }
  0x38   : > { %531 = vmatpush.bf16.msra.mxu3 %v756_v35 }
  0x39   : > { %493 = vmatmul.bf16.vlgmr.msra.gmra.mxu0 %v321_v36 }
  0x3a   : > { %506 = vmatmul.bf16.vlgmr.msra.gmra.mxu1 %v322_v37  ;;  %519 = vmatmul.bf16.vlgmr.msra.gmra.mxu2 %v321_v36 }
  0x3b   : > { %532 = vmatmul.bf16.vlgmr.msra.gmra.mxu3 %v322_v37 }
  0xb6   : > { %v494_v38 = vpop.f32.mrf.mxu0 }
  0xb7   : > { %v507_v40 = vpop.f32.mrf.mxu1 }
  0xb8   : > { %v508_v41 = vadd.f32 %v507_v40, %v494_v38 }
  0xba   : > { %v537_v42 = vadd.f32 %v508_v41, %v283_v39 }
  0xbc   : > { %539 = vst [vmem:[#allocation2] sm:$0xff] %v537_v42 }
  0xbd   : > { %v520_v43 = vpop.f32.mrf.mxu2 }
  0xbe   : > { %v533_v45 = vpop.f32.mrf.mxu3  ;;  %v496_v46 = vpop.f32.mrf.mxu0 }
  0xbf   : > { %v534_v47 = vadd.f32 %v533_v45, %v520_v43  ;;  %v509_v48 = vpop.f32.mrf.mxu1 }
  0xc1   : > { %v538_v49 = vadd.f32 %v534_v47, %v284_v44 }
  0xc2   : > { %544 = sbr.rel (%p813_p7) target bundleno = 207 (0xcf), region = 40 }
  0xc3   : > { %540 = vst [vmem:[#allocation2 + $0x8] sm:$0xff] %v538_v49 }
  0xc5   : > { %v522_v50 = vpop.f32.mrf.mxu2 }
  0xc6   : > { %v535_v51 = vpop.f32.mrf.mxu3 }
  0xc7   : > { %v545_v52 = vld [vmem:[#allocation2] sm:$0xff] }
  0xc8   : > { %v547_v53 = vld [vmem:[%s1040_s2] sm:$0x3] }
  0xc9   : > { %v549_v55 = vperm.slane %v547_v53, 0  ;;  %v550_v56 = vperm.slane %v547_v53, 1 }
  0xca   : > { %v546_v54 = vld [vmem:[#allocation2 + $0x8] sm:$0xff] }
  0xcb   : > { %v553_v57 = vadd.f32 %v549_v55, %v545_v52  ;;  %v554_v58 = vadd.f32 %v550_v56, %v546_v54 }
  0xcd   : > { %555 = vst [vmem:[%s1041_s3] sm:$0xff] %v553_v57 }
  0xce   : > { %556 = vst [vmem:[%s1041_s3 + $0x8] sm:$0xff] %v554_v58 }
  0xcf PF: > { %s13_s14 = sadd.s32 1, %s898_s14   ;;  %s1042_s12 = smov %s894_s13 }
  0xd0   : > { %p10_p8 = scmp.ge.s32.totalorder %s13_s14, 11   ;;  %s1043_s13 = smov %s1045_s15 }
  0xd2   :  { %12 = sbr.rel (!%p10_p8) target bundleno = 2 (0x2), region = 76 }

// kernel: resnet18_forward.92
= control target key start
LH: loop header
LB: loop body
LE: loop exit
PB: predicated region body
PF: predicated region fallthrough
CT: control target
= control target key end

     0   :  { %s96_s0 = inlined_call_operand.vmem [shape: f32[8,256], index: 0, kind: input, shape index: {}]   ;;  %s97_s2 = inlined_call_operand.vmem [shape: f32[1,256], index: 2, kind: input, shape index: {}]   ;;  %s98_s3 = inlined_call_operand.vmem [shape: f32[1,256], index: 3, kind: input, shape index: {}]   ;;  %s99_s1 = inlined_call_operand.vmem [shape: f32[8,256], index: 1, kind: input, shape index: {}]   ;;  %s100_s4 = inlined_call_operand.vmem [shape: f32[8,256], index: 4, kind: output, shape index: {}]  }
   0x1   :  { %v17_v0 = vld [vmem:[%s96_s0] sm:$0xff]  ;;  %v18_v5 = vld [vmem:[%s96_s0 + $0x8] sm:$0xff] }
   0x2   :  { %v19_v1 = vld [vmem:[%s97_s2] sm:$0x3]  ;;  %v36_v11 = vld [vmem:[%s99_s1 + $0x8] sm:$0xff] }
   0x3   :  { %v27_v2 = vld [vmem:[%s98_s3] sm:$0x3]  ;;  %v21_v3 = vperm.slane %v19_v1, 0  ;;  %v22_v6 = vperm.slane %v19_v1, 1 }
   0x4   :  { %v29_v4 = vperm.slane %v27_v2, 0  ;;  %v30_v7 = vperm.slane %v27_v2, 1  ;;  %v35_v10 = vld [vmem:[%s99_s1] sm:$0xff] }
   0x5   :  { %v25_v8 = vmul.f32 %v21_v3, %v17_v0  ;;  %v26_v9 = vmul.f32 %v22_v6, %v18_v5 }
   0x7   :  { %v33_v12 = vadd.f32 %v29_v4, %v25_v8  ;;  %v34_v13 = vadd.f32 %v30_v7, %v26_v9 }
   0x9   :  { %v37_v14 = vadd.f32 %v35_v10, %v33_v12  ;;  %v38_v15 = vadd.f32 %v36_v11, %v34_v13 }
   0xb   :  { %v39_v16 = vmax.f32 %v37_v14, 0.0  ;;  %v40_v17 = vmax.f32 %v38_v15, 0.0 }
   0xd   :  { %41 = vst [vmem:[%s100_s4] sm:$0xff] %v39_v16 }
   0xe   :  { %42 = vst [vmem:[%s100_s4 + $0x8] sm:$0xff] %v40_v17 }

// kernel: resnet18_forward.90
= control target key start
LH: loop header
LB: loop body
LE: loop exit
PB: predicated region body
PF: predicated region fallthrough
CT: control target
= control target key end

     0   :  { %s376_s1 = inlined_call_operand.vmem [shape: bf16[128,256], index: 1, kind: input, shape index: {}]   ;;  %s377_s0 = inlined_call_operand.vmem [shape: bf16[8,128], index: 0, kind: input, shape index: {}]   ;;  %s378_s2 = inlined_call_operand.vmem [shape: f32[1,256], index: 2, kind: input, shape index: {}]   ;;  %s379_s3 = inlined_call_operand.vmem [shape: f32[8,256], index: 3, kind: output, shape index: {}]  }
   0x1   :  { %v226_v0 = vld [vmem:[%s376_s1 + $0x70] sm:$0xf]  ;;  %v247_v1 = vld [vmem:[%s376_s1 + $0x74] sm:$0xf0]  ;;  %v246_v2 = vld [vmem:[%s376_s1 + $0x74] sm:$0xf] }
   0x2   :  { %v227_v3 = vor.u32 %v247_v1, %v226_v0  ;;  %v228_v4 = vld [vmem:[%s376_s1 + $0x78] sm:$0xf0]  ;;  %v218_v5 = vld [vmem:[%s376_s1 + $0x60] sm:$0xf]  ;;  %v245_v6 = vld [vmem:[%s376_s1 + $0x64] sm:$0xf0] }
   0x3   :  { %v231_v7 = vor.u32 %v246_v2, %v228_v4  ;;  %v244_v8 = vld [vmem:[%s376_s1 + $0x64] sm:$0xf]  ;;  %v220_v9 = vld [vmem:[%s376_s1 + $0x68] sm:$0xf0]  ;;  %v219_v10 = vor.u32 %v245_v6, %v218_v5  ;;  %v210_v12 = vld [vmem:[%s376_s1 + $0x50] sm:$0xf] }
   0x4   :  { %119 = vmatpush.bf16.msra.mxu0 %v227_v3  ;;  %v223_v11 = vor.u32 %v244_v8, %v220_v9  ;;  %v243_v13 = vld [vmem:[%s376_s1 + $0x54] sm:$0xf0]  ;;  %v242_v14 = vld [vmem:[%s376_s1 + $0x54] sm:$0xf]  ;;  %v212_v15 = vld [vmem:[%s376_s1 + $0x58] sm:$0xf0] }
   0x5   :  { %132 = vmatpush.bf16.msra.mxu1 %v231_v7  ;;  %v211_v16 = vor.u32 %v243_v13, %v210_v12  ;;  %v215_v17 = vor.u32 %v242_v14, %v212_v15  ;;  %v202_v18 = vld [vmem:[%s376_s1 + $0x40] sm:$0xf]  ;;  %v241_v19 = vld [vmem:[%s376_s1 + $0x44] sm:$0xf0]  ;;  %v240_v20 = vld [vmem:[%s376_s1 + $0x44] sm:$0xf] }
   0x6   :  { %v204_v21 = vld [vmem:[%s376_s1 + $0x48] sm:$0xf0]  ;;  %v203_v22 = vor.u32 %v241_v19, %v202_v18  ;;  %v194_v24 = vld [vmem:[%s376_s1 + $0x30] sm:$0xf]  ;;  %v239_v25 = vld [vmem:[%s376_s1 + $0x34] sm:$0xf0] }
   0x7   :  { %v207_v23 = vor.u32 %v240_v20, %v204_v21  ;;  %v238_v26 = vld [vmem:[%s376_s1 + $0x34] sm:$0xf]  ;;  %v196_v27 = vld [vmem:[%s376_s1 + $0x38] sm:$0xf0]  ;;  %v195_v28 = vor.u32 %v239_v25, %v194_v24  ;;  %v186_v30 = vld [vmem:[%s376_s1 + $0x20] sm:$0xf] }
   0x8   :  { %120 = vmatpush.bf16.msra.mxu0 %v219_v10  ;;  %v199_v29 = vor.u32 %v238_v26, %v196_v27  ;;  %v237_v31 = vld [vmem:[%s376_s1 + $0x24] sm:$0xf0]  ;;  %v236_v32 = vld [vmem:[%s376_s1 + $0x24] sm:$0xf]  ;;  %v188_v33 = vld [vmem:[%s376_s1 + $0x28] sm:$0xf0] }
   0x9   :  { %133 = vmatpush.bf16.msra.mxu1 %v223_v11  ;;  %v187_v34 = vor.u32 %v237_v31, %v186_v30  ;;  %v191_v35 = vor.u32 %v236_v32, %v188_v33  ;;  %v178_v36 = vld [vmem:[%s376_s1 + $0x10] sm:$0xf]  ;;  %v235_v37 = vld [vmem:[%s376_s1 + $0x14] sm:$0xf0]  ;;  %v234_v38 = vld [vmem:[%s376_s1 + $0x14] sm:$0xf] }
   0xa   :  { %v180_v39 = vld [vmem:[%s376_s1 + $0x18] sm:$0xf0]  ;;  %v179_v40 = vor.u32 %v235_v37, %v178_v36  ;;  %v170_v42 = vld [vmem:[%s376_s1] sm:$0xf]  ;;  %v233_v43 = vld [vmem:[%s376_s1 + $0x4] sm:$0xf0] }
   0xb   :  { %v183_v41 = vor.u32 %v234_v38, %v180_v39  ;;  %v232_v44 = vld [vmem:[%s376_s1 + $0x4] sm:$0xf]  ;;  %v172_v45 = vld [vmem:[%s376_s1 + $0x8] sm:$0xf0]  ;;  %v171_v46 = vor.u32 %v233_v43, %v170_v42  ;;  %v22_v48 = vld [vmem:[%s377_s0] sm:$0xf] }
   0xc   :  { %121 = vmatpush.bf16.msra.mxu0 %v211_v16  ;;  %v175_v47 = vor.u32 %v232_v44, %v172_v45  ;;  %v154_v49 = vld [vmem:[%s378_s2] sm:$0x3] }
   0xd   :  { %134 = vmatpush.bf16.msra.mxu1 %v215_v17  ;;  %v156_v50 = vperm.slane %v154_v49, 0  ;;  %v157_v51 = vperm.slane %v154_v49, 1 }
  0x10   :  { %122 = vmatpush.bf16.msra.mxu0 %v203_v22 }
  0x11   :  { %135 = vmatpush.bf16.msra.mxu1 %v207_v23 }
  0x14   :  { %123 = vmatpush.bf16.msra.mxu0 %v195_v28 }
  0x15   :  { %136 = vmatpush.bf16.msra.mxu1 %v199_v29 }
  0x18   :  { %124 = vmatpush.bf16.msra.mxu0 %v187_v34 }
  0x19   :  { %137 = vmatpush.bf16.msra.mxu1 %v191_v35 }
  0x1c   :  { %125 = vmatpush.bf16.msra.mxu0 %v179_v40 }
  0x1d   :  { %138 = vmatpush.bf16.msra.mxu1 %v183_v41 }
  0x20   :  { %126 = vmatpush.bf16.msra.mxu0 %v171_v46 }
  0x21   :  { %139 = vmatpush.bf16.msra.mxu1 %v175_v47 }
  0x23   :  { %127 = vmatmul.bf16.vlgmr.msra.gmra.mxu0 %v22_v48 }
  0x24   :  { %140 = vmatmul.bf16.vlgmr.msra.gmra.mxu1 %v22_v48 }
  0xa0   :  { %v128_v52 = vpop.f32.mrf.mxu0 }
  0xa1   :  { %v160_v53 = vadd.f32 %v156_v50, %v128_v52  ;;  %v141_v54 = vpop.f32.mrf.mxu1 }
  0xa2   :  { %v161_v55 = vadd.f32 %v157_v51, %v141_v54 }
  0xa3   :  { %162 = vst [vmem:[%s379_s3] sm:$0xff] %v160_v53 }
  0xa4   :  { %163 = vst [vmem:[%s379_s3 + $0x8] sm:$0xff] %v161_v55 }
  0xa8   :  { %v130_v56 = vpop.f32.mrf.mxu0 }
  0xa9   :  { %v143_v57 = vpop.f32.mrf.mxu1 }

// kernel: resnet18_forward.99
= control target key start
LH: loop header
LB: loop body
LE: loop exit
PB: predicated region body
PF: predicated region fallthrough
CT: control target
= control target key end

     0   :  { %s1133_s12 = smov 0   ;;  %s1135_s13 = smov 0   ;;  %s1386_s0 = inlined_call_operand.vmem [shape: bf16[2,2304], index: 0, kind: input, shape index: {}]   ;;  %s1387_s1 = inlined_call_operand.vmem [shape: bf16[2304,512], index: 1, kind: input, shape index: {}]   ;;  %s1388_s2 = inlined_call_operand.vmem [shape: f32[1,512], index: 2, kind: input, shape index: {}]   ;;  %s1389_s3 = inlined_call_operand.vmem [shape: f32[2,512], index: 3, kind: output, shape index: {}]  }
   0x1   :  { %s1137_s14 = smov 0   ;;  %s1139_s15 = smov 0  }
   0x2   :  { %s1141_s16 = smov 0   ;;  %s1143_s17 = smov 0  }
   0x3   :  { %s1145_s18 = smov 0  }
   0x4 LB: > { %s25_s19 = sadd.s32 1, %s1102_s16  ;;  %s28_s20 = sadd.s32 1, %s1106_s17  ;;  %s1110_s18 = sphi %s1145_s18, %s13_s18   ;;  %s1106_s17 = sphi %s1143_s17, %s1395_s17   ;;  %s1102_s16 = sphi %s1141_s16, %s1394_s16   ;;  %s1098_s15 = sphi %s1139_s15, %s1393_s15   ;;  %s1094_s14 = sphi %s1137_s14, %s1392_s14   ;;  %s1090_s13 = sphi %s1135_s13, %s1391_s13   ;;  %s1086_s12 = sphi %s1133_s12, %s1390_s12  }
   0x5   : > { %p26_p0 = scmp.ge.s32.totalorder %s25_s19, 9  ;;  %p76_p1 = scmp.ne.s32.totalorder %s1090_s13, %s1086_s12 }
   0x6   : > { %p77_p2 = scmp.eq.s32.totalorder %s1110_s18, 0  ;;  %s69_s24 = sadd.s32 1, %s1090_s13 }
   0x7   : > { %s1397_s19 = smov (%p26_p0, %s25_s19), 0  ;;  %s1399_s20 = smov (!%p26_p0, %s28_s20), %s1106_s17 }
   0x8   : > { %p78_p3 = por %p77_p2, %p76_p1  ;;  %p30_p4 = scmp.ge.s32.totalorder %s1399_s20, 2 }
   0x9   : > { %s64_s21 = ssub.s32 %s1102_s16, %s1397_s19  ;;  %p822_p6 = scmp.ge.s32.totalorder %s1110_s18, 18 }
   0xa   : > { %s1401_s20 = smov (%p30_p4, %s1399_s20), 0 }
   0xb   : > { %s65_s22 = ssub.s32 %s1106_s17, %s1401_s20  ;;  %156 = sbr.rel (%p822_p6) target bundleno = 55 (0x37), region = 16 }
   0xc   : > { %s66_s23 = sor.u32 %s65_s22, %s64_s21 }
   0xd   : > { %p67_p5 = scmp.eq.s32.totalorder %s66_s23, 0 }
   0xf   : > { %s1184_s25 = scalar_select %p67_p5, %s1090_s13, %s69_s24  }
  0x10   : > { %171 = sbr.rel (!%p78_p3) target bundleno = 55 (0x37), region = 24  ;;  %s173_s26 = sand.u32 (%p78_p3), 1, %s1090_s13  }
  0x11   : > { %s825_s27 = sshll.u32 (%p78_p3), %s1106_s17, 1  ;;  %s823_s28 = sshll.u32 (%p78_p3), %s173_s26, 8 }
  0x12   : > { %s966_s29 = sshll.u32 (%p78_p3), %s1102_s16, 7  ;;  %s1198_s8 = scalar_lea.vmem (%p78_p3), [#allocation3], %s823_s28 }
  0x13   : > { %s179_s30 = sadd.s32 (%p78_p3), %s966_s29, %s825_s27 }
  0x14   : > { %s827_s4 = sshll.u32 (%p78_p3), %s179_s30, 2 }
  0x15   : > { %s1193_s7 = scalar_lea.vmem %s1387_s1, %s827_s4 }
  0x16   : > { %v272_v0 = vld [vmem:[%s1193_s7] sm:$0xff]  ;;  %v274_v1 = vld [vmem:[%s1193_s7 + $0x10] sm:$0xff] }
  0x17   : > { %v276_v2 = vld [vmem:[%s1193_s7 + $0x20] sm:$0xff]  ;;  %273 = vst [vmem:[%s1198_s8] sm:$0xff] %v272_v0  ;;  %v278_v3 = vld [vmem:[%s1193_s7 + $0x30] sm:$0xff] }
  0x18   : > { %275 = vst [vmem:[%s1198_s8 + $0x8] sm:$0xff] %v274_v1  ;;  %v280_v4 = vld [vmem:[%s1193_s7 + $0x40] sm:$0xff]  ;;  %v282_v5 = vld [vmem:[%s1193_s7 + $0x50] sm:$0xff] }
  0x19   : > { %277 = vst [vmem:[%s1198_s8 + $0x10] sm:$0xff] %v276_v2  ;;  %v284_v6 = vld [vmem:[%s1193_s7 + $0x60] sm:$0xff]  ;;  %v286_v7 = vld [vmem:[%s1193_s7 + $0x70] sm:$0xff] }
  0x1a   : > { %279 = vst [vmem:[%s1198_s8 + $0x18] sm:$0xff] %v278_v3  ;;  %v288_v8 = vld [vmem:[%s1193_s7 + $0x80] sm:$0xff]  ;;  %v290_v9 = vld [vmem:[%s1193_s7 + $0x90] sm:$0xff] }
  0x1b   : > { %281 = vst [vmem:[%s1198_s8 + $0x20] sm:$0xff] %v280_v4  ;;  %v292_v10 = vld [vmem:[%s1193_s7 + $0xa0] sm:$0xff]  ;;  %v294_v11 = vld [vmem:[%s1193_s7 + $0xb0] sm:$0xff] }
  0x1c   : > { %283 = vst [vmem:[%s1198_s8 + $0x28] sm:$0xff] %v282_v5  ;;  %v296_v12 = vld [vmem:[%s1193_s7 + $0xc0] sm:$0xff]  ;;  %v298_v13 = vld [vmem:[%s1193_s7 + $0xd0] sm:$0xff] }
  0x1d   : > { %285 = vst [vmem:[%s1198_s8 + $0x30] sm:$0xff] %v284_v6  ;;  %v300_v14 = vld [vmem:[%s1193_s7 + $0xe0] sm:$0xff]  ;;  %v302_v15 = vld [vmem:[%s1193_s7 + $0xf0] sm:$0xff] }
  0x1e   : > { %287 = vst [vmem:[%s1198_s8 + $0x38] sm:$0xff] %v286_v7  ;;  %v304_v16 = vld [vmem:[%s1193_s7 + $0x100] sm:$0xff]  ;;  %v306_v17 = vld [vmem:[%s1193_s7 + $0x110] sm:$0xff] }
  0x1f   : > { %289 = vst [vmem:[%s1198_s8 + $0x40] sm:$0xff] %v288_v8  ;;  %v308_v18 = vld [vmem:[%s1193_s7 + $0x120] sm:$0xff]  ;;  %v310_v19 = vld [vmem:[%s1193_s7 + $0x130] sm:$0xff] }
  0x20   : > { %291 = vst [vmem:[%s1198_s8 + $0x48] sm:$0xff] %v290_v9  ;;  %v312_v20 = vld [vmem:[%s1193_s7 + $0x140] sm:$0xff]  ;;  %v314_v21 = vld [vmem:[%s1193_s7 + $0x150] sm:$0xff] }
  0x21   : > { %293 = vst [vmem:[%s1198_s8 + $0x50] sm:$0xff] %v292_v10  ;;  %v316_v22 = vld [vmem:[%s1193_s7 + $0x160] sm:$0xff]  ;;  %v318_v23 = vld [vmem:[%s1193_s7 + $0x170] sm:$0xff] }
  0x22   : > { %295 = vst [vmem:[%s1198_s8 + $0x58] sm:$0xff] %v294_v11  ;;  %v320_v24 = vld [vmem:[%s1193_s7 + $0x180] sm:$0xff]  ;;  %v322_v25 = vld [vmem:[%s1193_s7 + $0x190] sm:$0xff] }
  0x23   : > { %297 = vst [vmem:[%s1198_s8 + $0x60] sm:$0xff] %v296_v12  ;;  %v324_v26 = vld [vmem:[%s1193_s7 + $0x1a0] sm:$0xff]  ;;  %v326_v27 = vld [vmem:[%s1193_s7 + $0x1b0] sm:$0xff] }
  0x24   : > { %299 = vst [vmem:[%s1198_s8 + $0x68] sm:$0xff] %v298_v13  ;;  %v328_v28 = vld [vmem:[%s1193_s7 + $0x1c0] sm:$0xff]  ;;  %v330_v29 = vld [vmem:[%s1193_s7 + $0x1d0] sm:$0xff] }
  0x25   : > { %301 = vst [vmem:[%s1198_s8 + $0x70] sm:$0xff] %v300_v14  ;;  %v332_v30 = vld [vmem:[%s1193_s7 + $0x1e0] sm:$0xff]  ;;  %v334_v31 = vld [vmem:[%s1193_s7 + $0x1f0] sm:$0xff] }
  0x26   : > { %303 = vst [vmem:[%s1198_s8 + $0x78] sm:$0xff] %v302_v15 }
  0x27   : > { %305 = vst [vmem:[%s1198_s8 + $0x80] sm:$0xff] %v304_v16 }
  0x28   : > { %307 = vst [vmem:[%s1198_s8 + $0x88] sm:$0xff] %v306_v17 }
  0x29   : > { %309 = vst [vmem:[%s1198_s8 + $0x90] sm:$0xff] %v308_v18 }
  0x2a   : > { %311 = vst [vmem:[%s1198_s8 + $0x98] sm:$0xff] %v310_v19 }
  0x2b   : > { %313 = vst [vmem:[%s1198_s8 + $0xa0] sm:$0xff] %v312_v20 }
  0x2c   : > { %315 = vst [vmem:[%s1198_s8 + $0xa8] sm:$0xff] %v314_v21 }
  0x2d   : > { %317 = vst [vmem:[%s1198_s8 + $0xb0] sm:$0xff] %v316_v22 }
  0x2e   : > { %319 = vst [vmem:[%s1198_s8 + $0xb8] sm:$0xff] %v318_v23 }
  0x2f   : > { %321 = vst [vmem:[%s1198_s8 + $0xc0] sm:$0xff] %v320_v24 }
  0x30   : > { %323 = vst [vmem:[%s1198_s8 + $0xc8] sm:$0xff] %v322_v25 }
  0x31   : > { %325 = vst [vmem:[%s1198_s8 + $0xd0] sm:$0xff] %v324_v26 }
  0x32   : > { %327 = vst [vmem:[%s1198_s8 + $0xd8] sm:$0xff] %v326_v27 }
  0x33   : > { %329 = vst [vmem:[%s1198_s8 + $0xe0] sm:$0xff] %v328_v28 }
  0x34   : > { %331 = vst [vmem:[%s1198_s8 + $0xe8] sm:$0xff] %v330_v29 }
  0x35   : > { %333 = vst [vmem:[%s1198_s8 + $0xf0] sm:$0xff] %v332_v30 }
  0x36   : > { %335 = vst [vmem:[%s1198_s8 + $0xf8] sm:$0xff] %v334_v31 }
  0x37 PF: > { %p828_p7 = scmp.ge.s32.totalorder %s1110_s18, 1  ;;  %p348_p8 = scmp.lt.s32.totalorder %s1110_s18, 19 }
  0x39   : > { %p349_p9 = pnand %p828_p7, %p348_p8 }
  0x3a   : > { %s355_s9 = sand.u32 (!%p349_p9), 1, %s1086_s12   ;;  %s830_s10 = sshll.u32 (!%p349_p9), %s1094_s14, 1 }
  0x3b   : > { %352 = sbr.rel (%p349_p9) target bundleno = 259 (0x103), region = 66  ;;  %s829_s11 = sshll.u32 (!%p349_p9), %s355_s9, 8 }
  0x3c   : > { %p397_p10 = scmp.lt.s32.totalorder (!%p349_p9), %s830_s10, 17  ;;  %s831_s21 = sshll.u32 (!%p349_p9), %s1098_s15, 1 }
  0x3d   : > { %p406_p11 = scmp.lt.s32.totalorder (!%p349_p9), %s831_s21, 3  ;;  %s1284_s4 = scalar_lea.vmem (!%p349_p9), [#allocation3], %s829_s11 }
  0x3e   : > { %p834_p12 = scmp.ne.s32.totalorder (!%p349_p9), %s1094_s14, 0 }
  0x40   : > { %s1403_s10 = smov (!%p397_p10, %s830_s10), 17  ;;  %s1405_s21 = smov (!%p406_p11, %s831_s21), 3 }
  0x41   : > { %s401_s24 = scalar_lea.vmem %s1386_s0, %s1403_s10  ;;  %s408_s12 = scalar_lea.vmem %s1388_s2, %s1405_s21 }
  0x42   : > { %s833_s28 = sshll.u32 %s1405_s21, 1  ;;  %423 = sbr.rel (%p834_p12) target bundleno = 73 (0x49), region = 74 }
  0x43   : > { %s1282_s15 = scalar_lea.vmem %s1389_s3, %s833_s28 }
  0x47   : > { %v1112_v32 = vmov 0.0  }
  0x48   : > { %424 = vst [vmem:[#allocation2] sm:$0xf] %v1112_v32 }
  0x49 PF: > { %v893_v33 = vld [vmem:[%s1284_s4 + $0x70] sm:$0xf]  ;;  %v982_v34 = vld [vmem:[%s1284_s4 + $0x74] sm:$0xf0]  ;;  %v981_v38 = vld [vmem:[%s1284_s4 + $0x74] sm:$0xf] }
  0x4a   : > { %v957_v35 = vld [vmem:[%s1284_s4 + $0xf0] sm:$0xf]  ;;  %v894_v36 = vor.u32 %v982_v34, %v893_v33  ;;  %v998_v37 = vld [vmem:[%s1284_s4 + $0xf4] sm:$0xf0]  ;;  %v895_v39 = vld [vmem:[%s1284_s4 + $0x78] sm:$0xf0] }
  0x4b   : > { %v958_v40 = vor.u32 %v998_v37, %v957_v35  ;;  %v898_v41 = vor.u32 %v981_v38, %v895_v39  ;;  %v997_v42 = vld [vmem:[%s1284_s4 + $0xf4] sm:$0xf]  ;;  %v959_v43 = vld [vmem:[%s1284_s4 + $0xf8] sm:$0xf0]  ;;  %v885_v44 = vld [vmem:[%s1284_s4 + $0x60] sm:$0xf] }
  0x4c   : > { %625 = vmatpush.bf16.msra.mxu0 %v894_v36  ;;  %v962_v45 = vor.u32 %v997_v42, %v959_v43  ;;  %v980_v46 = vld [vmem:[%s1284_s4 + $0x64] sm:$0xf0]  ;;  %v949_v47 = vld [vmem:[%s1284_s4 + $0xe0] sm:$0xf]  ;;  %v979_v51 = vld [vmem:[%s1284_s4 + $0x64] sm:$0xf] }
  0x4d   : > { %v996_v48 = vld [vmem:[%s1284_s4 + $0xe4] sm:$0xf0]  ;;  %638 = vmatpush.bf16.msra.mxu1 %v958_v40  ;;  %651 = vmatpush.bf16.msra.mxu2 %v898_v41  ;;  %v886_v49 = vor.u32 %v980_v46, %v885_v44  ;;  %v887_v52 = vld [vmem:[%s1284_s4 + $0x68] sm:$0xf0]  ;;  %v995_v53 = vld [vmem:[%s1284_s4 + $0xe4] sm:$0xf] }
  0x4e   : > { %v950_v50 = vor.u32 %v996_v48, %v949_v47  ;;  %664 = vmatpush.bf16.msra.mxu3 %v962_v45  ;;  %v890_v54 = vor.u32 %v979_v51, %v887_v52  ;;  %v951_v55 = vld [vmem:[%s1284_s4 + $0xe8] sm:$0xf0]  ;;  %v877_v56 = vld [vmem:[%s1284_s4 + $0x50] sm:$0xf]  ;;  %v978_v57 = vld [vmem:[%s1284_s4 + $0x54] sm:$0xf0] }
  0x4f   : > { %v954_v58 = vor.u32 %v995_v53, %v951_v55  ;;  %v941_v59 = vld [vmem:[%s1284_s4 + $0xd0] sm:$0xf]  ;;  %v994_v60 = vld [vmem:[%s1284_s4 + $0xd4] sm:$0xf0]  ;;  %v977_v61 = vld [vmem:[%s1284_s4 + $0x54] sm:$0xf]  ;;  %v878_v62 = vor.u32 %v978_v57, %v877_v56 }
  0x50   : > { %626 = vmatpush.bf16.msra.mxu0 %v886_v49  ;;  %v879_v63 = vld [vmem:[%s1284_s4 + $0x58] sm:$0xf0]  ;;  %v993_v0 = vld [vmem:[%s1284_s4 + $0xd4] sm:$0xf]  ;;  %v942_v2 = vor.u32 %v994_v60, %v941_v59  ;;  %v869_v4 = vld [vmem:[%s1284_s4 + $0x40] sm:$0xf] }
  0x51   : > { %v943_v1 = vld [vmem:[%s1284_s4 + $0xd8] sm:$0xf0]  ;;  %639 = vmatpush.bf16.msra.mxu1 %v950_v50  ;;  %652 = vmatpush.bf16.msra.mxu2 %v890_v54  ;;  %v882_v3 = vor.u32 %v977_v61, %v879_v63  ;;  %v976_v5 = vld [vmem:[%s1284_s4 + $0x44] sm:$0xf0]  ;;  %v933_v6 = vld [vmem:[%s1284_s4 + $0xc0] sm:$0xf] }
  0x52   : > { %665 = vmatpush.bf16.msra.mxu3 %v954_v58  ;;  %v946_v7 = vor.u32 %v993_v0, %v943_v1  ;;  %v992_v8 = vld [vmem:[%s1284_s4 + $0xc4] sm:$0xf0]  ;;  %v975_v9 = vld [vmem:[%s1284_s4 + $0x44] sm:$0xf]  ;;  %v871_v10 = vld [vmem:[%s1284_s4 + $0x48] sm:$0xf0]  ;;  %v870_v13 = vor.u32 %v976_v5, %v869_v4 }
  0x53   : > { %v991_v11 = vld [vmem:[%s1284_s4 + $0xc4] sm:$0xf]  ;;  %v935_v12 = vld [vmem:[%s1284_s4 + $0xc8] sm:$0xf0]  ;;  %v934_v14 = vor.u32 %v992_v8, %v933_v6  ;;  %v874_v15 = vor.u32 %v975_v9, %v871_v10  ;;  %v861_v16 = vld [vmem:[%s1284_s4 + $0x30] sm:$0xf] }
  0x54   : > { %627 = vmatpush.bf16.msra.mxu0 %v878_v62  ;;  %v974_v17 = vld [vmem:[%s1284_s4 + $0x34] sm:$0xf0]  ;;  %v925_v18 = vld [vmem:[%s1284_s4 + $0xb0] sm:$0xf]  ;;  %v938_v19 = vor.u32 %v991_v11, %v935_v12  ;;  %v973_v21 = vld [vmem:[%s1284_s4 + $0x34] sm:$0xf] }
  0x55   : > { %640 = vmatpush.bf16.msra.mxu1 %v942_v2  ;;  %653 = vmatpush.bf16.msra.mxu2 %v882_v3  ;;  %v990_v20 = vld [vmem:[%s1284_s4 + $0xb4] sm:$0xf0]  ;;  %v863_v22 = vld [vmem:[%s1284_s4 + $0x38] sm:$0xf0]  ;;  %v989_v23 = vld [vmem:[%s1284_s4 + $0xb4] sm:$0xf]  ;;  %v862_v25 = vor.u32 %v974_v17, %v861_v16 }
  0x56   : > { %666 = vmatpush.bf16.msra.mxu3 %v946_v7  ;;  %v927_v24 = vld [vmem:[%s1284_s4 + $0xb8] sm:$0xf0]  ;;  %v926_v26 = vor.u32 %v990_v20, %v925_v18  ;;  %v866_v27 = vor.u32 %v973_v21, %v863_v22  ;;  %v853_v28 = vld [vmem:[%s1284_s4 + $0x20] sm:$0xf]  ;;  %v972_v29 = vld [vmem:[%s1284_s4 + $0x24] sm:$0xf0] }
  0x57   : > { %v917_v30 = vld [vmem:[%s1284_s4 + $0xa0] sm:$0xf]  ;;  %v930_v31 = vor.u32 %v989_v23, %v927_v24  ;;  %v988_v32 = vld [vmem:[%s1284_s4 + $0xa4] sm:$0xf0]  ;;  %v971_v33 = vld [vmem:[%s1284_s4 + $0x24] sm:$0xf]  ;;  %v854_v37 = vor.u32 %v972_v29, %v853_v28 }
  0x58   : > { %628 = vmatpush.bf16.msra.mxu0 %v870_v13  ;;  %v855_v34 = vld [vmem:[%s1284_s4 + $0x28] sm:$0xf0]  ;;  %v987_v35 = vld [vmem:[%s1284_s4 + $0xa4] sm:$0xf]  ;;  %v845_v38 = vld [vmem:[%s1284_s4 + $0x10] sm:$0xf]  ;;  %v918_v39 = vor.u32 %v988_v32, %v917_v30 }
  0x59   : > { %641 = vmatpush.bf16.msra.mxu1 %v934_v14  ;;  %654 = vmatpush.bf16.msra.mxu2 %v874_v15  ;;  %v919_v36 = vld [vmem:[%s1284_s4 + $0xa8] sm:$0xf0]  ;;  %v858_v40 = vor.u32 %v971_v33, %v855_v34  ;;  %v970_v41 = vld [vmem:[%s1284_s4 + $0x14] sm:$0xf0]  ;;  %v909_v42 = vld [vmem:[%s1284_s4 + $0x90] sm:$0xf] }
  0x5a   : > { %667 = vmatpush.bf16.msra.mxu3 %v938_v19  ;;  %v986_v43 = vld [vmem:[%s1284_s4 + $0x94] sm:$0xf0]  ;;  %v922_v44 = vor.u32 %v987_v35, %v919_v36  ;;  %v969_v45 = vld [vmem:[%s1284_s4 + $0x14] sm:$0xf]  ;;  %v847_v46 = vld [vmem:[%s1284_s4 + $0x18] sm:$0xf0]  ;;  %v846_v50 = vor.u32 %v970_v41, %v845_v38 }
  0x5b   : > { %v426_v47 = vld [vmem:[%s401_s24] sm:$0x3]  ;;  %v911_v49 = vld [vmem:[%s1284_s4 + $0x98] sm:$0xf0]  ;;  %v910_v51 = vor.u32 %v986_v43, %v909_v42  ;;  %v850_v52 = vor.u32 %v969_v45, %v847_v46  ;;  %v837_v53 = vld [vmem:[%s1284_s4] sm:$0xf] }
  0x5c   : > { %629 = vmatpush.bf16.msra.mxu0 %v862_v25  ;;  %v985_v48 = vld [vmem:[%s1284_s4 + $0x94] sm:$0xf]  ;;  %460 = vst [vmem:[#allocation1] ss:$9 sm:$0xff] %v426_v47  ;;  %v968_v54 = vld [vmem:[%s1284_s4 + $0x4] sm:$0xf0] }
  0x5d   : > { %642 = vmatpush.bf16.msra.mxu1 %v926_v26  ;;  %655 = vmatpush.bf16.msra.mxu2 %v866_v27  ;;  %v901_v55 = vld [vmem:[%s1284_s4 + $0x80] sm:$0xf]  ;;  %v914_v56 = vor.u32 %v985_v48, %v911_v49  ;;  %v984_v57 = vld [vmem:[%s1284_s4 + $0x84] sm:$0xf0]  ;;  %v967_v58 = vld [vmem:[%s1284_s4 + $0x4] sm:$0xf]  ;;  %v838_v62 = vor.u32 %v968_v54, %v837_v53 }
  0x5e   : > { %668 = vmatpush.bf16.msra.mxu3 %v930_v31  ;;  %v839_v59 = vld [vmem:[%s1284_s4 + $0x8] sm:$0xf0]  ;;  %v983_v60 = vld [vmem:[%s1284_s4 + $0x84] sm:$0xf]  ;;  %v902_v63 = vor.u32 %v984_v57, %v901_v55  ;;  %vm680_vm0 = vcmask 1041408   ;;  %p963_p13 = scmp.ne.s32.totalorder %s1094_s14, 8 }
  0x5f   : > { %v903_v61 = vld [vmem:[%s1284_s4 + $0x88] sm:$0xf0]  ;;  %v842_v0 = vor.u32 %v967_v58, %v839_v59  ;;  %v425_v12 = vld [vmem:[#allocation2] sm:$0xf] }
  0x60   : > { %630 = vmatpush.bf16.msra.mxu0 %v854_v37  ;;  %v906_v1 = vor.u32 %v983_v60, %v903_v61 }
  0x61   : > { %643 = vmatpush.bf16.msra.mxu1 %v918_v39  ;;  %656 = vmatpush.bf16.msra.mxu2 %v858_v40 }
  0x62   : > { %669 = vmatpush.bf16.msra.mxu3 %v922_v44 }
  0x63   : > { %v461_v2 = vld [vmem:[#allocation1] sm:$0xff]  ;;  %v462_v3 = vld [vmem:[#allocation1 + $0x9] sm:$0xff] }
  0x64   : > { %631 = vmatpush.bf16.msra.mxu0 %v846_v50 }
  0x65   : > { %644 = vmatpush.bf16.msra.mxu1 %v910_v51  ;;  %657 = vmatpush.bf16.msra.mxu2 %v850_v52 }
  0x66   : > { %670 = vmatpush.bf16.msra.mxu3 %v914_v56 }
  0x68   : > { %632 = vmatpush.bf16.msra.mxu0 %v838_v62 }
  0x69   : > { %645 = vmatpush.bf16.msra.mxu1 %v902_v63  ;;  %658 = vmatpush.bf16.msra.mxu2 %v842_v0 }
  0x6a   : > { %671 = vmatpush.bf16.msra.mxu3 %v906_v1 }
  0x6b   : > { %633 = vmatmul.bf16.vlgmr.msra.gmra.mxu0 %v461_v2 }
  0x6c   : > { %646 = vmatmul.bf16.vlgmr.msra.gmra.mxu1 %v462_v3  ;;  %659 = vmatmul.bf16.vlgmr.msra.gmra.mxu2 %v461_v2 }
  0x6d   : > { %672 = vmatmul.bf16.vlgmr.msra.gmra.mxu3 %v462_v3 }
  0xe8   : > { %v634_v4 = vpop.f32.mrf.mxu0 }
  0xe9   : > { %v647_v5 = vpop.f32.mrf.mxu1 }
  0xea   : > { %v648_v11 = vadd.f32 %v647_v5, %v634_v4 }
  0xef   : > { %v660_v6 = vpop.f32.mrf.mxu2 }
  0xf0   : > { %v673_v7 = vpop.f32.mrf.mxu3  ;;  %v636_v8 = vpop.f32.mrf.mxu0 }
  0xf1   : > { %v674_v9 = vadd.f32 %v673_v7, %v660_v6  ;;  %v649_v10 = vpop.f32.mrf.mxu1 }
  0xf3   : > { %v679_v13 = vrot.slane %v674_v9, 6 }
  0xf4   : > { %688 = sbr.rel (%p963_p13) target bundleno = 259 (0x103), region = 78 }
  0xf5   : > { %v681_v14 = vsel %vm680_vm0, %v648_v11, %v679_v13 }
  0xf6   : > { %v683_v15 = vadd.f32 %v681_v14, %v425_v12 }
  0xf7   : > { %v662_v16 = vpop.f32.mrf.mxu2 }
  0xf8   : > { %684 = vst [vmem:[#allocation2] sm:$0xf] %v683_v15  ;;  %v675_v17 = vpop.f32.mrf.mxu3 }
  0xf9   : > { %v690_v18 = vld [vmem:[%s408_s12] sm:$0x3] }
  0xfa   : > { %v692_v19 = vperm.slane %v690_v18, 0  ;;  %v693_v20 = vperm.slane %v690_v18, 1 }
  0xfc   : > { %v694_v22 = vrot.slane %v693_v20, 6 }
  0xfe   : > { %v695_v23 = vsel %vm680_vm0, %v692_v19, %v694_v22 }
  0xff   : > { %v689_v21 = vld [vmem:[#allocation2] sm:$0xf] }
 0x100   : > { %v697_v24 = vadd.f32 %v695_v23, %v689_v21 }
 0x102   : > { %698 = vst [vmem:[%s1282_s15] sm:$0xf] %v697_v24 }
 0x103 PF: > { %s13_s18 = sadd.s32 1, %s1110_s18   ;;  %s1390_s12 = smov %s1090_s13 }
 0x104   : > { %p10_p0 = scmp.ge.s32.totalorder %s13_s18, 20   ;;  %s1391_s13 = smov %s1184_s25 }
 0x105   : > { %s1392_s14 = smov %s1102_s16  ;;  %s1393_s15 = smov %s1106_s17 }
 0x106   : > { %s1394_s16 = smov %s1397_s19  ;;  %s1395_s17 = smov %s1401_s20 }
 0x107   :  { %12 = sbr.rel (!%p10_p0) target bundleno = 4 (0x4), region = 119 }

// kernel: resnet18_forward.100
= control target key start
LH: loop header
LB: loop body
LE: loop exit
PB: predicated region body
PF: predicated region fallthrough
CT: control target
= control target key end

     0   :  { %v14_v0 = vlaneseq  ;;  %v142_v3 = vmov 0.0   ;;  %vm32_vm1 = vcmask 1041408   ;;  %vm68_vm2 = vcmask 1040384   ;;  %s205_s0 = inlined_call_operand.vmem [shape: f32[2,512], index: 0, kind: input, shape index: {}]   ;;  %s206_s1 = inlined_call_operand.vmem [shape: f32[1,512], index: 1, kind: output, shape index: {0}]   ;;  %s207_s2 = inlined_call_operand.vmem [shape: f32[1,512], index: 2, kind: output, shape index: {1}]  }
   0x1   :  { %v20_v1 = vld [vmem:[%s205_s0] sm:$0xff]  ;;  %vm70_vm3 = vcmask 1042434  }
   0x2   :  { %23 = vst [vmem:[#allocation1] ss:$4 sm:$0xff] %v20_v1  ;;  %vm161_vm0 = vcmp.lt.s32.totalorder %v14_v0, 512  ;;  %v81_v4 = vmul.f32 %v20_v1, %v20_v1 }
   0x3   :  { %18 = vst.msk [vmem:[%s206_s1] sm:$0xf] %vm161_vm0, %v142_v3 }
   0x4   :  { %19 = vst.msk [vmem:[%s207_s2] sm:$0xf] %vm161_vm0, %v142_v3 }
   0x9   :  { %v24_v5 = vld.sshfl [vmem:[#allocation1] sm:$0xff pattern:$0x73625140]  ;;  %v25_v6 = vld.sshfl [vmem:[#allocation1 + $0x8] sm:$0xff pattern:$0x73625140] }
   0xa   :  { %v26_v7 = vld.sshfl [vmem:[#allocation1 + $0x10] sm:$0xff pattern:$0x73625140]  ;;  %v27_v8 = vld.sshfl [vmem:[#allocation1 + $0x18] sm:$0xff pattern:$0x73625140] }
   0xb   :  { %v33_v9 = vsel %vm32_vm1, %v24_v5, 0.0  ;;  %v40_v10 = vsel %vm32_vm1, %v25_v6, 0.0  ;;  %v47_v11 = vsel %vm32_vm1, %v26_v7, 0.0  ;;  %v54_v12 = vsel %vm32_vm1, %v27_v8, 0.0  ;;  %83 = vst [vmem:[#allocation1] ss:$4 sm:$0xff] %v81_v4 }
   0xc   :  { %v34_v13 = vrot.slane %v33_v9, 4  ;;  %v41_v14 = vrot.slane %v40_v10, 4  ;;  %v48_v15 = vrot.slane %v47_v11, 4  ;;  %v55_v16 = vrot.slane %v54_v12, 4  ;;  %v21_v52 = vld [vmem:[%s206_s1] sm:$0xf] }
   0xe   :  { %v35_v17 = vadd.f32 %v34_v13, %v33_v9  ;;  %v42_v18 = vadd.f32 %v41_v14, %v40_v10  ;;  %v49_v19 = vadd.f32 %v48_v15, %v47_v11  ;;  %v56_v20 = vadd.f32 %v55_v16, %v54_v12 }
  0x10   :  { %v36_v21 = vrot.slane %v35_v17, 2  ;;  %v43_v22 = vrot.slane %v42_v18, 2  ;;  %v50_v23 = vrot.slane %v49_v19, 2  ;;  %v57_v24 = vrot.slane %v56_v20, 2 }
  0x12   :  { %v37_v25 = vadd.f32 %v36_v21, %v35_v17  ;;  %v44_v26 = vadd.f32 %v43_v22, %v42_v18  ;;  %v51_v27 = vadd.f32 %v50_v23, %v49_v19  ;;  %v58_v28 = vadd.f32 %v57_v24, %v56_v20  ;;  %v84_v29 = vld.sshfl [vmem:[#allocation1] sm:$0xff pattern:$0x73625140]  ;;  %v85_v30 = vld.sshfl [vmem:[#allocation1 + $0x8] sm:$0xff pattern:$0x73625140] }
  0x13   :  { %v86_v31 = vld.sshfl [vmem:[#allocation1 + $0x10] sm:$0xff pattern:$0x73625140]  ;;  %v87_v32 = vld.sshfl [vmem:[#allocation1 + $0x18] sm:$0xff pattern:$0x73625140] }
  0x14   :  { %v38_v33 = vrot.slane %v37_v25, 1  ;;  %v45_v34 = vrot.slane %v44_v26, 1  ;;  %v52_v35 = vrot.slane %v51_v27, 1  ;;  %v59_v36 = vrot.slane %v58_v28, 1  ;;  %v80_v17 = vld [vmem:[%s207_s2] sm:$0xf] }
  0x15   :  { %v92_v37 = vsel %vm32_vm1, %v84_v29, 0.0  ;;  %v99_v38 = vsel %vm32_vm1, %v85_v30, 0.0  ;;  %v106_v39 = vsel %vm32_vm1, %v86_v31, 0.0  ;;  %v113_v40 = vsel %vm32_vm1, %v87_v32, 0.0 }
  0x16   :  { %v46_v41 = vadd.f32 %v45_v34, %v44_v26  ;;  %v53_v42 = vadd.f32 %v52_v35, %v51_v27  ;;  %v60_v43 = vadd.f32 %v59_v36, %v58_v28  ;;  %v93_v44 = vrot.slane %v92_v37, 4 }
  0x17   :  { %v100_v45 = vrot.slane %v99_v38, 4  ;;  %v107_v46 = vrot.slane %v106_v39, 4  ;;  %v114_v47 = vrot.slane %v113_v40, 4  ;;  %v39_v48 = vadd.f32 %v38_v33, %v37_v25 }
  0x18   :  { %v65_v49 = vrot.slane %v46_v41, 7  ;;  %v66_v50 = vrot.slane %v53_v42, 6  ;;  %v67_v51 = vrot.slane %v60_v43, 5  ;;  %v94_v53 = vadd.f32 %v93_v44, %v92_v37 }
  0x19   :  { %v101_v54 = vadd.f32 %v100_v45, %v99_v38  ;;  %v108_v55 = vadd.f32 %v107_v46, %v106_v39  ;;  %v115_v56 = vadd.f32 %v114_v47, %v113_v40 }
  0x1a   :  { %v69_v57 = vsel %vm68_vm2, %v39_v48, %v65_v49  ;;  %v71_v58 = vsel %vm70_vm3, %v66_v50, %v67_v51  ;;  %v95_v60 = vrot.slane %v94_v53, 2 }
  0x1b   :  { %v72_v59 = vsel %vm32_vm1, %v69_v57, %v71_v58  ;;  %v102_v61 = vrot.slane %v101_v54, 2  ;;  %v109_v62 = vrot.slane %v108_v55, 2  ;;  %v116_v0 = vrot.slane %v115_v56, 2 }
  0x1c   :  { %v74_v63 = vadd.f32 %v72_v59, %v21_v52  ;;  %v96_v1 = vadd.f32 %v95_v60, %v94_v53 }
  0x1d   :  { %v103_v3 = vadd.f32 %v102_v61, %v101_v54  ;;  %v110_v4 = vadd.f32 %v109_v62, %v108_v55  ;;  %v117_v5 = vadd.f32 %v116_v0, %v115_v56 }
  0x1e   :  { %79 = vst.msk [vmem:[%s206_s1] sm:$0xf] %vm161_vm0, %v74_v63  ;;  %v97_v6 = vrot.slane %v96_v1, 1 }
  0x1f   :  { %v104_v7 = vrot.slane %v103_v3, 1  ;;  %v111_v8 = vrot.slane %v110_v4, 1  ;;  %v118_v9 = vrot.slane %v117_v5, 1 }
  0x20   :  { %v98_v13 = vadd.f32 %v97_v6, %v96_v1 }
  0x21   :  { %v105_v10 = vadd.f32 %v104_v7, %v103_v3  ;;  %v112_v11 = vadd.f32 %v111_v8, %v110_v4  ;;  %v119_v12 = vadd.f32 %v118_v9, %v117_v5 }
  0x23   :  { %v124_v14 = vrot.slane %v105_v10, 7  ;;  %v125_v15 = vrot.slane %v112_v11, 6  ;;  %v126_v16 = vrot.slane %v119_v12, 5 }
  0x25   :  { %v127_v18 = vsel %vm68_vm2, %v98_v13, %v124_v14  ;;  %v128_v19 = vsel %vm70_vm3, %v125_v15, %v126_v16 }
  0x26   :  { %v129_v20 = vsel %vm32_vm1, %v127_v18, %v128_v19 }
  0x27   :  { %v131_v21 = vadd.f32 %v129_v20, %v80_v17 }
  0x29   :  { %132 = vst.msk [vmem:[%s207_s2] sm:$0xf] %vm161_vm0, %v131_v21 }

// kernel: resnet18_forward.101
= control target key start
LH: loop header
LB: loop body
LE: loop exit
PB: predicated region body
PF: predicated region fallthrough
CT: control target
= control target key end

     0   :  { %vm24_vm0 = vcmask 1041408   ;;  %vm26_vm1 = vcmask 1045508   ;;  %vm28_vm2 = vcmask 1043456   ;;  %s88_s1 = inlined_call_operand.vmem [shape: f32[1,512], index: 1, kind: input, shape index: {}]   ;;  %s89_s2 = inlined_call_operand.vmem [shape: f32[1,512], index: 2, kind: input, shape index: {}]   ;;  %s90_s0 = inlined_call_operand.vmem [shape: f32[2,512], index: 0, kind: input, shape index: {}]   ;;  %s91_s3 = inlined_call_operand.vmem [shape: f32[2,512], index: 3, kind: output, shape index: {}]  }
   0x1   :  { %v15_v0 = vld [vmem:[%s88_s1] sm:$0xf] }
   0x2   :  { %v32_v1 = vld [vmem:[%s89_s2] sm:$0xf]  ;;  %v17_v2 = vperm.slane %v15_v0, 0  ;;  %v18_v3 = vperm.slane %v15_v0, 1  ;;  %v19_v4 = vperm.slane %v15_v0, 2  ;;  %v20_v5 = vperm.slane %v15_v0, 3 }
   0x3   :  { %v34_v6 = vperm.slane %v32_v1, 0  ;;  %v35_v7 = vperm.slane %v32_v1, 1  ;;  %v36_v8 = vperm.slane %v32_v1, 2  ;;  %v37_v9 = vperm.slane %v32_v1, 3  ;;  %v14_v13 = vld [vmem:[%s90_s0] sm:$0xff] }
   0x4   :  { %v21_v10 = vrot.slane %v18_v3, 6  ;;  %v22_v11 = vrot.slane %v19_v4, 4  ;;  %v23_v12 = vrot.slane %v20_v5, 2 }
   0x5   :  { %v38_v14 = vrot.slane %v35_v7, 6  ;;  %v39_v15 = vrot.slane %v36_v8, 4  ;;  %v40_v16 = vrot.slane %v37_v9, 2 }
   0x6   :  { %v25_v17 = vsel %vm24_vm0, %v17_v2, %v21_v10  ;;  %v27_v18 = vsel %vm26_vm1, %v22_v11, %v23_v12 }
   0x7   :  { %v29_v19 = vsel %vm28_vm2, %v25_v17, %v27_v18  ;;  %v41_v20 = vsel %vm24_vm0, %v34_v6, %v38_v14  ;;  %v42_v21 = vsel %vm26_vm1, %v39_v15, %v40_v16 }
   0x8   :  { %v31_v22 = vmul.f32 %v29_v19, %v14_v13  ;;  %v43_v23 = vsel %vm28_vm2, %v41_v20, %v42_v21 }
   0xa   :  { %v45_v24 = vadd.f32 %v43_v23, %v31_v22 }
   0xc   :  { %v46_v25 = vmax.f32 %v45_v24, 0.0 }
   0xe   :  { %47 = vst [vmem:[%s91_s3] sm:$0xff] %v46_v25 }

// kernel: resnet18_forward.102
= control target key start
LH: loop header
LB: loop body
LE: loop exit
PB: predicated region body
PF: predicated region fallthrough
CT: control target
= control target key end

     0   :  { %s1669_s12 = smov 0   ;;  %s1671_s13 = smov 0   ;;  %s2066_s0 = inlined_call_operand.vmem [shape: bf16[2,4608], index: 0, kind: input, shape index: {}]   ;;  %s2067_s1 = inlined_call_operand.vmem [shape: bf16[4608,512], index: 1, kind: input, shape index: {}]   ;;  %s2068_s2 = inlined_call_operand.vmem [shape: f32[1,512], index: 2, kind: input, shape index: {}]   ;;  %s2069_s3 = inlined_call_operand.vmem [shape: f32[2,512], index: 3, kind: output, shape index: {}]  }
   0x1   :  { %s1673_s14 = smov 0   ;;  %s1675_s15 = smov 0  }
   0x2   :  { %s1677_s16 = smov 0   ;;  %s1679_s17 = smov 0  }
   0x3   :  { %s1681_s18 = smov 0  }
   0x4 LB: > { %s25_s19 = sadd.s32 1, %s1638_s16  ;;  %s28_s20 = sadd.s32 1, %s1642_s17  ;;  %s1646_s18 = sphi %s1681_s18, %s13_s18   ;;  %s1642_s17 = sphi %s1679_s17, %s2075_s17   ;;  %s1638_s16 = sphi %s1677_s16, %s2074_s16   ;;  %s1634_s15 = sphi %s1675_s15, %s2073_s15   ;;  %s1630_s14 = sphi %s1673_s14, %s2072_s14   ;;  %s1626_s13 = sphi %s1671_s13, %s2071_s13   ;;  %s1622_s12 = sphi %s1669_s12, %s2070_s12  }
   0x5   : > { %p26_p0 = scmp.ge.s32.totalorder %s25_s19, 9  ;;  %p76_p1 = scmp.ne.s32.totalorder %s1626_s13, %s1622_s12 }
   0x6   : > { %p77_p2 = scmp.eq.s32.totalorder %s1646_s18, 0  ;;  %s69_s24 = sadd.s32 1, %s1626_s13 }
   0x7   : > { %s2077_s19 = smov (%p26_p0, %s25_s19), 0  ;;  %s2079_s20 = smov (!%p26_p0, %s28_s20), %s1642_s17 }
   0x8   : > { %p78_p3 = por %p77_p2, %p76_p1  ;;  %p30_p4 = scmp.ge.s32.totalorder %s2079_s20, 2 }
   0x9   : > { %s64_s21 = ssub.s32 %s1638_s16, %s2077_s19  ;;  %p1198_p6 = scmp.ge.s32.totalorder %s1646_s18, 18 }
   0xa   : > { %s2081_s20 = smov (%p30_p4, %s2079_s20), 0 }
   0xb   : > { %s65_s22 = ssub.s32 %s1642_s17, %s2081_s20  ;;  %156 = sbr.rel (%p1198_p6) target bundleno = 87 (0x57), region = 16 }
   0xc   : > { %s66_s23 = sor.u32 %s65_s22, %s64_s21 }
   0xd   : > { %p67_p5 = scmp.eq.s32.totalorder %s66_s23, 0 }
   0xf   : > { %s1720_s25 = scalar_select %p67_p5, %s1626_s13, %s69_s24  }
  0x10   : > { %171 = sbr.rel (!%p78_p3) target bundleno = 87 (0x57), region = 24  ;;  %s173_s26 = sand.u32 (%p78_p3), 1, %s1626_s13  }
  0x11   : > { %s1201_s27 = sshll.u32 (%p78_p3), %s1642_s17, 1  ;;  %s1199_s28 = sshll.u32 (%p78_p3), %s173_s26, 9 }
  0x12   : > { %s1470_s29 = sshll.u32 (%p78_p3), %s1638_s16, 8  ;;  %s1734_s8 = scalar_lea.vmem (%p78_p3), [#allocation3], %s1199_s28 }
  0x13   : > { %s179_s30 = sadd.s32 (%p78_p3), %s1470_s29, %s1201_s27 }
  0x14   : > { %s1203_s4 = sshll.u32 (%p78_p3), %s179_s30, 2 }
  0x15   : > { %s1729_s7 = scalar_lea.vmem %s2067_s1, %s1203_s4 }
  0x16   : > { %v336_v0 = vld [vmem:[%s1729_s7] sm:$0xff]  ;;  %v338_v1 = vld [vmem:[%s1729_s7 + $0x10] sm:$0xff] }
  0x17   : > { %v340_v2 = vld [vmem:[%s1729_s7 + $0x20] sm:$0xff]  ;;  %337 = vst [vmem:[%s1734_s8] sm:$0xff] %v336_v0  ;;  %v342_v3 = vld [vmem:[%s1729_s7 + $0x30] sm:$0xff] }
  0x18   : > { %339 = vst [vmem:[%s1734_s8 + $0x8] sm:$0xff] %v338_v1  ;;  %v344_v4 = vld [vmem:[%s1729_s7 + $0x40] sm:$0xff]  ;;  %v346_v5 = vld [vmem:[%s1729_s7 + $0x50] sm:$0xff] }
  0x19   : > { %341 = vst [vmem:[%s1734_s8 + $0x10] sm:$0xff] %v340_v2  ;;  %v348_v6 = vld [vmem:[%s1729_s7 + $0x60] sm:$0xff]  ;;  %v350_v7 = vld [vmem:[%s1729_s7 + $0x70] sm:$0xff] }
  0x1a   : > { %343 = vst [vmem:[%s1734_s8 + $0x18] sm:$0xff] %v342_v3  ;;  %v352_v8 = vld [vmem:[%s1729_s7 + $0x80] sm:$0xff]  ;;  %v354_v9 = vld [vmem:[%s1729_s7 + $0x90] sm:$0xff] }
  0x1b   : > { %345 = vst [vmem:[%s1734_s8 + $0x20] sm:$0xff] %v344_v4  ;;  %v356_v10 = vld [vmem:[%s1729_s7 + $0xa0] sm:$0xff]  ;;  %v358_v11 = vld [vmem:[%s1729_s7 + $0xb0] sm:$0xff] }
  0x1c   : > { %347 = vst [vmem:[%s1734_s8 + $0x28] sm:$0xff] %v346_v5  ;;  %v360_v12 = vld [vmem:[%s1729_s7 + $0xc0] sm:$0xff]  ;;  %v362_v13 = vld [vmem:[%s1729_s7 + $0xd0] sm:$0xff] }
  0x1d   : > { %349 = vst [vmem:[%s1734_s8 + $0x30] sm:$0xff] %v348_v6  ;;  %v364_v14 = vld [vmem:[%s1729_s7 + $0xe0] sm:$0xff]  ;;  %v366_v15 = vld [vmem:[%s1729_s7 + $0xf0] sm:$0xff] }
  0x1e   : > { %351 = vst [vmem:[%s1734_s8 + $0x38] sm:$0xff] %v350_v7  ;;  %v368_v16 = vld [vmem:[%s1729_s7 + $0x100] sm:$0xff]  ;;  %v370_v17 = vld [vmem:[%s1729_s7 + $0x110] sm:$0xff] }
  0x1f   : > { %353 = vst [vmem:[%s1734_s8 + $0x40] sm:$0xff] %v352_v8  ;;  %v372_v18 = vld [vmem:[%s1729_s7 + $0x120] sm:$0xff]  ;;  %v374_v19 = vld [vmem:[%s1729_s7 + $0x130] sm:$0xff] }
  0x20   : > { %355 = vst [vmem:[%s1734_s8 + $0x48] sm:$0xff] %v354_v9  ;;  %v376_v20 = vld [vmem:[%s1729_s7 + $0x140] sm:$0xff]  ;;  %v378_v21 = vld [vmem:[%s1729_s7 + $0x150] sm:$0xff] }
  0x21   : > { %357 = vst [vmem:[%s1734_s8 + $0x50] sm:$0xff] %v356_v10  ;;  %v380_v22 = vld [vmem:[%s1729_s7 + $0x160] sm:$0xff]  ;;  %v382_v23 = vld [vmem:[%s1729_s7 + $0x170] sm:$0xff] }
  0x22   : > { %359 = vst [vmem:[%s1734_s8 + $0x58] sm:$0xff] %v358_v11  ;;  %v384_v24 = vld [vmem:[%s1729_s7 + $0x180] sm:$0xff]  ;;  %v386_v25 = vld [vmem:[%s1729_s7 + $0x190] sm:$0xff] }
  0x23   : > { %361 = vst [vmem:[%s1734_s8 + $0x60] sm:$0xff] %v360_v12  ;;  %v388_v26 = vld [vmem:[%s1729_s7 + $0x1a0] sm:$0xff]  ;;  %v390_v27 = vld [vmem:[%s1729_s7 + $0x1b0] sm:$0xff] }
  0x24   : > { %363 = vst [vmem:[%s1734_s8 + $0x68] sm:$0xff] %v362_v13  ;;  %v392_v28 = vld [vmem:[%s1729_s7 + $0x1c0] sm:$0xff]  ;;  %v394_v29 = vld [vmem:[%s1729_s7 + $0x1d0] sm:$0xff] }
  0x25   : > { %365 = vst [vmem:[%s1734_s8 + $0x70] sm:$0xff] %v364_v14  ;;  %v396_v30 = vld [vmem:[%s1729_s7 + $0x1e0] sm:$0xff]  ;;  %v398_v31 = vld [vmem:[%s1729_s7 + $0x1f0] sm:$0xff] }
  0x26   : > { %367 = vst [vmem:[%s1734_s8 + $0x78] sm:$0xff] %v366_v15  ;;  %v400_v32 = vld [vmem:[%s1729_s7 + $0x200] sm:$0xff]  ;;  %v402_v33 = vld [vmem:[%s1729_s7 + $0x210] sm:$0xff] }
  0x27   : > { %369 = vst [vmem:[%s1734_s8 + $0x80] sm:$0xff] %v368_v16  ;;  %v404_v34 = vld [vmem:[%s1729_s7 + $0x220] sm:$0xff]  ;;  %v406_v35 = vld [vmem:[%s1729_s7 + $0x230] sm:$0xff] }
  0x28   : > { %371 = vst [vmem:[%s1734_s8 + $0x88] sm:$0xff] %v370_v17  ;;  %v408_v36 = vld [vmem:[%s1729_s7 + $0x240] sm:$0xff]  ;;  %v410_v37 = vld [vmem:[%s1729_s7 + $0x250] sm:$0xff] }
  0x29   : > { %373 = vst [vmem:[%s1734_s8 + $0x90] sm:$0xff] %v372_v18  ;;  %v412_v38 = vld [vmem:[%s1729_s7 + $0x260] sm:$0xff]  ;;  %v414_v39 = vld [vmem:[%s1729_s7 + $0x270] sm:$0xff] }
  0x2a   : > { %375 = vst [vmem:[%s1734_s8 + $0x98] sm:$0xff] %v374_v19  ;;  %v416_v40 = vld [vmem:[%s1729_s7 + $0x280] sm:$0xff]  ;;  %v418_v41 = vld [vmem:[%s1729_s7 + $0x290] sm:$0xff] }
  0x2b   : > { %377 = vst [vmem:[%s1734_s8 + $0xa0] sm:$0xff] %v376_v20  ;;  %v420_v42 = vld [vmem:[%s1729_s7 + $0x2a0] sm:$0xff]  ;;  %v422_v43 = vld [vmem:[%s1729_s7 + $0x2b0] sm:$0xff] }
  0x2c   : > { %379 = vst [vmem:[%s1734_s8 + $0xa8] sm:$0xff] %v378_v21  ;;  %v424_v44 = vld [vmem:[%s1729_s7 + $0x2c0] sm:$0xff]  ;;  %v426_v45 = vld [vmem:[%s1729_s7 + $0x2d0] sm:$0xff] }
  0x2d   : > { %381 = vst [vmem:[%s1734_s8 + $0xb0] sm:$0xff] %v380_v22  ;;  %v428_v46 = vld [vmem:[%s1729_s7 + $0x2e0] sm:$0xff]  ;;  %v430_v47 = vld [vmem:[%s1729_s7 + $0x2f0] sm:$0xff] }
  0x2e   : > { %383 = vst [vmem:[%s1734_s8 + $0xb8] sm:$0xff] %v382_v23  ;;  %v432_v48 = vld [vmem:[%s1729_s7 + $0x300] sm:$0xff]  ;;  %v434_v49 = vld [vmem:[%s1729_s7 + $0x310] sm:$0xff] }
  0x2f   : > { %385 = vst [vmem:[%s1734_s8 + $0xc0] sm:$0xff] %v384_v24  ;;  %v436_v50 = vld [vmem:[%s1729_s7 + $0x320] sm:$0xff]  ;;  %v438_v51 = vld [vmem:[%s1729_s7 + $0x330] sm:$0xff] }
  0x30   : > { %387 = vst [vmem:[%s1734_s8 + $0xc8] sm:$0xff] %v386_v25  ;;  %v440_v52 = vld [vmem:[%s1729_s7 + $0x340] sm:$0xff]  ;;  %v442_v53 = vld [vmem:[%s1729_s7 + $0x350] sm:$0xff] }
  0x31   : > { %389 = vst [vmem:[%s1734_s8 + $0xd0] sm:$0xff] %v388_v26  ;;  %v444_v54 = vld [vmem:[%s1729_s7 + $0x360] sm:$0xff]  ;;  %v446_v55 = vld [vmem:[%s1729_s7 + $0x370] sm:$0xff] }
  0x32   : > { %391 = vst [vmem:[%s1734_s8 + $0xd8] sm:$0xff] %v390_v27  ;;  %v448_v56 = vld [vmem:[%s1729_s7 + $0x380] sm:$0xff]  ;;  %v450_v57 = vld [vmem:[%s1729_s7 + $0x390] sm:$0xff] }
  0x33   : > { %393 = vst [vmem:[%s1734_s8 + $0xe0] sm:$0xff] %v392_v28  ;;  %v452_v58 = vld [vmem:[%s1729_s7 + $0x3a0] sm:$0xff]  ;;  %v454_v59 = vld [vmem:[%s1729_s7 + $0x3b0] sm:$0xff] }
  0x34   : > { %395 = vst [vmem:[%s1734_s8 + $0xe8] sm:$0xff] %v394_v29  ;;  %v456_v60 = vld [vmem:[%s1729_s7 + $0x3c0] sm:$0xff]  ;;  %v458_v61 = vld [vmem:[%s1729_s7 + $0x3d0] sm:$0xff] }
  0x35   : > { %397 = vst [vmem:[%s1734_s8 + $0xf0] sm:$0xff] %v396_v30  ;;  %v460_v62 = vld [vmem:[%s1729_s7 + $0x3e0] sm:$0xff]  ;;  %v462_v63 = vld [vmem:[%s1729_s7 + $0x3f0] sm:$0xff] }
  0x36   : > { %399 = vst [vmem:[%s1734_s8 + $0xf8] sm:$0xff] %v398_v31 }
  0x37   : > { %401 = vst [vmem:[%s1734_s8 + $0x100] sm:$0xff] %v400_v32 }
  0x38   : > { %403 = vst [vmem:[%s1734_s8 + $0x108] sm:$0xff] %v402_v33 }
  0x39   : > { %405 = vst [vmem:[%s1734_s8 + $0x110] sm:$0xff] %v404_v34 }
  0x3a   : > { %407 = vst [vmem:[%s1734_s8 + $0x118] sm:$0xff] %v406_v35 }
  0x3b   : > { %409 = vst [vmem:[%s1734_s8 + $0x120] sm:$0xff] %v408_v36 }
  0x3c   : > { %411 = vst [vmem:[%s1734_s8 + $0x128] sm:$0xff] %v410_v37 }
  0x3d   : > { %413 = vst [vmem:[%s1734_s8 + $0x130] sm:$0xff] %v412_v38 }
  0x3e   : > { %415 = vst [vmem:[%s1734_s8 + $0x138] sm:$0xff] %v414_v39 }
  0x3f   : > { %417 = vst [vmem:[%s1734_s8 + $0x140] sm:$0xff] %v416_v40 }
  0x40   : > { %419 = vst [vmem:[%s1734_s8 + $0x148] sm:$0xff] %v418_v41 }
  0x41   : > { %421 = vst [vmem:[%s1734_s8 + $0x150] sm:$0xff] %v420_v42 }
  0x42   : > { %423 = vst [vmem:[%s1734_s8 + $0x158] sm:$0xff] %v422_v43 }
  0x43   : > { %425 = vst [vmem:[%s1734_s8 + $0x160] sm:$0xff] %v424_v44 }
  0x44   : > { %427 = vst [vmem:[%s1734_s8 + $0x168] sm:$0xff] %v426_v45 }
  0x45   : > { %429 = vst [vmem:[%s1734_s8 + $0x170] sm:$0xff] %v428_v46 }
  0x46   : > { %431 = vst [vmem:[%s1734_s8 + $0x178] sm:$0xff] %v430_v47 }
  0x47   : > { %433 = vst [vmem:[%s1734_s8 + $0x180] sm:$0xff] %v432_v48 }
  0x48   : > { %435 = vst [vmem:[%s1734_s8 + $0x188] sm:$0xff] %v434_v49 }
  0x49   : > { %437 = vst [vmem:[%s1734_s8 + $0x190] sm:$0xff] %v436_v50 }
  0x4a   : > { %439 = vst [vmem:[%s1734_s8 + $0x198] sm:$0xff] %v438_v51 }
  0x4b   : > { %441 = vst [vmem:[%s1734_s8 + $0x1a0] sm:$0xff] %v440_v52 }
  0x4c   : > { %443 = vst [vmem:[%s1734_s8 + $0x1a8] sm:$0xff] %v442_v53 }
  0x4d   : > { %445 = vst [vmem:[%s1734_s8 + $0x1b0] sm:$0xff] %v444_v54 }
  0x4e   : > { %447 = vst [vmem:[%s1734_s8 + $0x1b8] sm:$0xff] %v446_v55 }
  0x4f   : > { %449 = vst [vmem:[%s1734_s8 + $0x1c0] sm:$0xff] %v448_v56 }
  0x50   : > { %451 = vst [vmem:[%s1734_s8 + $0x1c8] sm:$0xff] %v450_v57 }
  0x51   : > { %453 = vst [vmem:[%s1734_s8 + $0x1d0] sm:$0xff] %v452_v58 }
  0x52   : > { %455 = vst [vmem:[%s1734_s8 + $0x1d8] sm:$0xff] %v454_v59 }
  0x53   : > { %457 = vst [vmem:[%s1734_s8 + $0x1e0] sm:$0xff] %v456_v60 }
  0x54   : > { %459 = vst [vmem:[%s1734_s8 + $0x1e8] sm:$0xff] %v458_v61 }
  0x55   : > { %461 = vst [vmem:[%s1734_s8 + $0x1f0] sm:$0xff] %v460_v62 }
  0x56   : > { %463 = vst [vmem:[%s1734_s8 + $0x1f8] sm:$0xff] %v462_v63 }
  0x57 PF: > { %p1204_p7 = scmp.ge.s32.totalorder %s1646_s18, 1  ;;  %p476_p8 = scmp.lt.s32.totalorder %s1646_s18, 19 }
  0x59   : > { %p477_p9 = pnand %p1204_p7, %p476_p8 }
  0x5a   : > { %s483_s9 = sand.u32 (!%p477_p9), 1, %s1622_s12   ;;  %s1206_s10 = sshll.u32 (!%p477_p9), %s1630_s14, 2 }
  0x5b   : > { %480 = sbr.rel (%p477_p9) target bundleno = 325 (0x145), region = 66  ;;  %s1205_s11 = sshll.u32 (!%p477_p9), %s483_s9, 9 }
  0x5c   : > { %p525_p10 = scmp.lt.s32.totalorder (!%p477_p9), %s1206_s10, 35  ;;  %s1207_s21 = sshll.u32 (!%p477_p9), %s1634_s15, 1 }
  0x5d   : > { %p534_p11 = scmp.lt.s32.totalorder (!%p477_p9), %s1207_s21, 3  ;;  %s1884_s4 = scalar_lea.vmem (!%p477_p9), [#allocation3], %s1205_s11 }
  0x5e   : > { %p1210_p12 = scmp.ne.s32.totalorder (!%p477_p9), %s1630_s14, 0 }
  0x60   : > { %s2083_s10 = smov (!%p525_p10, %s1206_s10), 35  ;;  %s2085_s21 = smov (!%p534_p11, %s1207_s21), 3 }
  0x61   : > { %s529_s24 = scalar_lea.vmem %s2066_s0, %s2083_s10  ;;  %s536_s12 = scalar_lea.vmem %s2068_s2, %s2085_s21 }
  0x62   : > { %s1209_s28 = sshll.u32 %s2085_s21, 1  ;;  %551 = sbr.rel (%p1210_p12) target bundleno = 105 (0x69), region = 74 }
  0x63   : > { %s1882_s15 = scalar_lea.vmem %s2069_s3, %s1209_s28 }
  0x67   : > { %v1648_v0 = vmov 0.0  }
  0x68   : > { %552 = vst [vmem:[#allocation2] sm:$0xf] %v1648_v0 }
  0x69 PF: > { %v1269_v1 = vld [vmem:[%s1884_s4 + $0x70] sm:$0xf]  ;;  %v1486_v2 = vld [vmem:[%s1884_s4 + $0x74] sm:$0xf0]  ;;  %v1261_v12 = vld [vmem:[%s1884_s4 + $0x60] sm:$0xf] }
  0x6a   : > { %v1333_v3 = vld [vmem:[%s1884_s4 + $0xf0] sm:$0xf]  ;;  %v1270_v4 = vor.u32 %v1486_v2, %v1269_v1  ;;  %v1502_v5 = vld [vmem:[%s1884_s4 + $0xf4] sm:$0xf0]  ;;  %v1484_v14 = vld [vmem:[%s1884_s4 + $0x64] sm:$0xf0] }
  0x6b   : > { %v1397_v6 = vld [vmem:[%s1884_s4 + $0x170] sm:$0xf]  ;;  %v1518_v7 = vld [vmem:[%s1884_s4 + $0x174] sm:$0xf0]  ;;  %v1334_v8 = vor.u32 %v1502_v5, %v1333_v3  ;;  %v1325_v15 = vld [vmem:[%s1884_s4 + $0xe0] sm:$0xf]  ;;  %v1262_v17 = vor.u32 %v1484_v14, %v1261_v12 }
  0x6c   : > { %v1398_v9 = vor.u32 %v1518_v7, %v1397_v6  ;;  %v1461_v10 = vld [vmem:[%s1884_s4 + $0x1f0] sm:$0xf]  ;;  %v1534_v11 = vld [vmem:[%s1884_s4 + $0x1f4] sm:$0xf0]  ;;  %949 = vmatpush.bf16.msra.mxu0 %v1270_v4  ;;  %v1500_v16 = vld [vmem:[%s1884_s4 + $0xe4] sm:$0xf0] }
  0x6d   : > { %v1462_v13 = vor.u32 %v1534_v11, %v1461_v10  ;;  %962 = vmatpush.bf16.msra.mxu1 %v1334_v8  ;;  %v1326_v18 = vor.u32 %v1500_v16, %v1325_v15  ;;  %v1389_v19 = vld [vmem:[%s1884_s4 + $0x160] sm:$0xf]  ;;  %v1516_v20 = vld [vmem:[%s1884_s4 + $0x164] sm:$0xf0]  ;;  %v1253_v24 = vld [vmem:[%s1884_s4 + $0x50] sm:$0xf] }
  0x6e   : > { %975 = vmatpush.bf16.msra.mxu2 %v1398_v9  ;;  %v1453_v21 = vld [vmem:[%s1884_s4 + $0x1e0] sm:$0xf]  ;;  %v1390_v22 = vor.u32 %v1516_v20, %v1389_v19  ;;  %v1532_v23 = vld [vmem:[%s1884_s4 + $0x1e4] sm:$0xf0]  ;;  %v1482_v25 = vld [vmem:[%s1884_s4 + $0x54] sm:$0xf0] }
  0x6f   : > { %988 = vmatpush.bf16.msra.mxu3 %v1462_v13  ;;  %v1454_v26 = vor.u32 %v1532_v23, %v1453_v21  ;;  %v1317_v27 = vld [vmem:[%s1884_s4 + $0xd0] sm:$0xf]  ;;  %v1498_v28 = vld [vmem:[%s1884_s4 + $0xd4] sm:$0xf0]  ;;  %v1254_v30 = vor.u32 %v1482_v25, %v1253_v24  ;;  %v1245_v36 = vld [vmem:[%s1884_s4 + $0x40] sm:$0xf] }
  0x70   : > { %v1381_v29 = vld [vmem:[%s1884_s4 + $0x150] sm:$0xf]  ;;  %950 = vmatpush.bf16.msra.mxu0 %v1262_v17  ;;  %v1514_v31 = vld [vmem:[%s1884_s4 + $0x154] sm:$0xf0]  ;;  %v1318_v34 = vor.u32 %v1498_v28, %v1317_v27  ;;  %v1480_v37 = vld [vmem:[%s1884_s4 + $0x44] sm:$0xf0] }
  0x71   : > { %v1445_v32 = vld [vmem:[%s1884_s4 + $0x1d0] sm:$0xf]  ;;  %v1530_v33 = vld [vmem:[%s1884_s4 + $0x1d4] sm:$0xf0]  ;;  %963 = vmatpush.bf16.msra.mxu1 %v1326_v18  ;;  %v1382_v35 = vor.u32 %v1514_v31, %v1381_v29  ;;  %v1309_v38 = vld [vmem:[%s1884_s4 + $0xc0] sm:$0xf]  ;;  %v1246_v45 = vor.u32 %v1480_v37, %v1245_v36 }
  0x72   : > { %976 = vmatpush.bf16.msra.mxu2 %v1390_v22  ;;  %v1446_v39 = vor.u32 %v1530_v33, %v1445_v32  ;;  %v1496_v40 = vld [vmem:[%s1884_s4 + $0xc4] sm:$0xf0]  ;;  %v1373_v41 = vld [vmem:[%s1884_s4 + $0x140] sm:$0xf]  ;;  %v1237_v48 = vld [vmem:[%s1884_s4 + $0x30] sm:$0xf] }
  0x73   : > { %989 = vmatpush.bf16.msra.mxu3 %v1454_v26  ;;  %v1512_v42 = vld [vmem:[%s1884_s4 + $0x144] sm:$0xf0]  ;;  %v1437_v43 = vld [vmem:[%s1884_s4 + $0x1c0] sm:$0xf]  ;;  %v1310_v46 = vor.u32 %v1496_v40, %v1309_v38  ;;  %v1478_v49 = vld [vmem:[%s1884_s4 + $0x34] sm:$0xf0] }
  0x74   : > { %v1528_v44 = vld [vmem:[%s1884_s4 + $0x1c4] sm:$0xf0]  ;;  %951 = vmatpush.bf16.msra.mxu0 %v1254_v30  ;;  %v1374_v47 = vor.u32 %v1512_v42, %v1373_v41  ;;  %v1301_v50 = vld [vmem:[%s1884_s4 + $0xb0] sm:$0xf]  ;;  %v1494_v52 = vld [vmem:[%s1884_s4 + $0xb4] sm:$0xf0]  ;;  %v1238_v57 = vor.u32 %v1478_v49, %v1237_v48 }
  0x75   : > { %964 = vmatpush.bf16.msra.mxu1 %v1318_v34  ;;  %v1438_v51 = vor.u32 %v1528_v44, %v1437_v43  ;;  %v1365_v53 = vld [vmem:[%s1884_s4 + $0x130] sm:$0xf]  ;;  %v1510_v54 = vld [vmem:[%s1884_s4 + $0x134] sm:$0xf0]  ;;  %v1302_v58 = vor.u32 %v1494_v52, %v1301_v50  ;;  %v1229_v60 = vld [vmem:[%s1884_s4 + $0x20] sm:$0xf] }
  0x76   : > { %977 = vmatpush.bf16.msra.mxu2 %v1382_v35  ;;  %v1429_v55 = vld [vmem:[%s1884_s4 + $0x1b0] sm:$0xf]  ;;  %v1526_v56 = vld [vmem:[%s1884_s4 + $0x1b4] sm:$0xf0]  ;;  %v1366_v59 = vor.u32 %v1510_v54, %v1365_v53  ;;  %v1476_v61 = vld [vmem:[%s1884_s4 + $0x24] sm:$0xf0] }
  0x77   : > { %990 = vmatpush.bf16.msra.mxu3 %v1446_v39  ;;  %v1293_v62 = vld [vmem:[%s1884_s4 + $0xa0] sm:$0xf]  ;;  %v1430_v63 = vor.u32 %v1526_v56, %v1429_v55  ;;  %v1492_v0 = vld [vmem:[%s1884_s4 + $0xa4] sm:$0xf0]  ;;  %v1230_v5 = vor.u32 %v1476_v61, %v1229_v60  ;;  %v1221_v8 = vld [vmem:[%s1884_s4 + $0x10] sm:$0xf] }
  0x78   : > { %952 = vmatpush.bf16.msra.mxu0 %v1246_v45  ;;  %v1357_v1 = vld [vmem:[%s1884_s4 + $0x120] sm:$0xf]  ;;  %v1508_v2 = vld [vmem:[%s1884_s4 + $0x124] sm:$0xf0]  ;;  %v1294_v6 = vor.u32 %v1492_v0, %v1293_v62  ;;  %v1474_v9 = vld [vmem:[%s1884_s4 + $0x14] sm:$0xf0] }
  0x79   : > { %965 = vmatpush.bf16.msra.mxu1 %v1310_v46  ;;  %v1421_v3 = vld [vmem:[%s1884_s4 + $0x1a0] sm:$0xf]  ;;  %v1524_v4 = vld [vmem:[%s1884_s4 + $0x1a4] sm:$0xf0]  ;;  %v1358_v7 = vor.u32 %v1508_v2, %v1357_v1  ;;  %v1285_v10 = vld [vmem:[%s1884_s4 + $0x90] sm:$0xf]  ;;  %v1222_v18 = vor.u32 %v1474_v9, %v1221_v8 }
  0x7a   : > { %978 = vmatpush.bf16.msra.mxu2 %v1374_v47  ;;  %v1422_v11 = vor.u32 %v1524_v4, %v1421_v3  ;;  %v1490_v12 = vld [vmem:[%s1884_s4 + $0x94] sm:$0xf0]  ;;  %v1349_v13 = vld [vmem:[%s1884_s4 + $0x110] sm:$0xf]  ;;  %v1213_v17 = vld [vmem:[%s1884_s4] sm:$0xf] }
  0x7b   : > { %991 = vmatpush.bf16.msra.mxu3 %v1438_v51  ;;  %v1506_v14 = vld [vmem:[%s1884_s4 + $0x114] sm:$0xf0]  ;;  %v1413_v15 = vld [vmem:[%s1884_s4 + $0x190] sm:$0xf]  ;;  %v1472_v19 = vld [vmem:[%s1884_s4 + $0x4] sm:$0xf0]  ;;  %v1286_v22 = vor.u32 %v1490_v12, %v1285_v10 }
  0x7c   : > { %953 = vmatpush.bf16.msra.mxu0 %v1238_v57  ;;  %v1522_v16 = vld [vmem:[%s1884_s4 + $0x194] sm:$0xf0]  ;;  %v1277_v20 = vld [vmem:[%s1884_s4 + $0x80] sm:$0xf]  ;;  %v1488_v21 = vld [vmem:[%s1884_s4 + $0x84] sm:$0xf0]  ;;  %v1350_v23 = vor.u32 %v1506_v14, %v1349_v13  ;;  %v1214_v34 = vor.u32 %v1472_v19, %v1213_v17 }
  0x7d   : > { %966 = vmatpush.bf16.msra.mxu1 %v1302_v58  ;;  %v1341_v24 = vld [vmem:[%s1884_s4 + $0x100] sm:$0xf]  ;;  %v1504_v25 = vld [vmem:[%s1884_s4 + $0x104] sm:$0xf0]  ;;  %v1414_v27 = vor.u32 %v1522_v16, %v1413_v15  ;;  %v1485_v29 = vld [vmem:[%s1884_s4 + $0x74] sm:$0xf]  ;;  %v1278_v37 = vor.u32 %v1488_v21, %v1277_v20 }
  0x7e   : > { %979 = vmatpush.bf16.msra.mxu2 %v1366_v59  ;;  %v1405_v26 = vld [vmem:[%s1884_s4 + $0x180] sm:$0xf]  ;;  %v1520_v28 = vld [vmem:[%s1884_s4 + $0x184] sm:$0xf0]  ;;  %v1271_v30 = vld [vmem:[%s1884_s4 + $0x78] sm:$0xf0]  ;;  %v1342_v38 = vor.u32 %v1504_v25, %v1341_v24 }
  0x7f   : > { %992 = vmatpush.bf16.msra.mxu3 %v1430_v63  ;;  %v1501_v31 = vld [vmem:[%s1884_s4 + $0xf4] sm:$0xf]  ;;  %v1335_v32 = vld [vmem:[%s1884_s4 + $0xf8] sm:$0xf0]  ;;  %v1406_v41 = vor.u32 %v1520_v28, %v1405_v26  ;;  %v1274_v42 = vor.u32 %v1485_v29, %v1271_v30  ;;  %v1483_v45 = vld [vmem:[%s1884_s4 + $0x64] sm:$0xf] }
  0x80   : > { %954 = vmatpush.bf16.msra.mxu0 %v1230_v5  ;;  %v554_v33 = vld [vmem:[%s529_s24] sm:$0xf]  ;;  %v1399_v36 = vld [vmem:[%s1884_s4 + $0x178] sm:$0xf0]  ;;  %v1338_v43 = vor.u32 %v1501_v31, %v1335_v32  ;;  %v1263_v46 = vld [vmem:[%s1884_s4 + $0x68] sm:$0xf0] }
  0x81   : > { %967 = vmatpush.bf16.msra.mxu1 %v1294_v6  ;;  %v1517_v35 = vld [vmem:[%s1884_s4 + $0x174] sm:$0xf]  ;;  %620 = vst [vmem:[#allocation1] ss:$9 sm:$0xff] %v554_v33  ;;  %v1463_v40 = vld [vmem:[%s1884_s4 + $0x1f8] sm:$0xf0]  ;;  %v1266_v55 = vor.u32 %v1483_v45, %v1263_v46 }
  0x82   : > { %980 = vmatpush.bf16.msra.mxu2 %v1358_v7  ;;  %v1533_v39 = vld [vmem:[%s1884_s4 + $0x1f4] sm:$0xf]  ;;  %v1402_v44 = vor.u32 %v1517_v35, %v1399_v36  ;;  %v1499_v47 = vld [vmem:[%s1884_s4 + $0xe4] sm:$0xf]  ;;  %v1327_v49 = vld [vmem:[%s1884_s4 + $0xe8] sm:$0xf0] }
  0x83   : > { %993 = vmatpush.bf16.msra.mxu3 %v1422_v11  ;;  %v1466_v48 = vor.u32 %v1533_v39, %v1463_v40  ;;  %v1515_v50 = vld [vmem:[%s1884_s4 + $0x164] sm:$0xf]  ;;  %v1391_v51 = vld [vmem:[%s1884_s4 + $0x168] sm:$0xf0]  ;;  %v1481_v54 = vld [vmem:[%s1884_s4 + $0x54] sm:$0xf]  ;;  %v1330_v59 = vor.u32 %v1499_v47, %v1327_v49 }
  0x84   : > { %955 = vmatpush.bf16.msra.mxu0 %v1222_v18  ;;  %v1531_v52 = vld [vmem:[%s1884_s4 + $0x1e4] sm:$0xf]  ;;  %v1455_v53 = vld [vmem:[%s1884_s4 + $0x1e8] sm:$0xf0]  ;;  %v1255_v56 = vld [vmem:[%s1884_s4 + $0x58] sm:$0xf0]  ;;  %v1394_v60 = vor.u32 %v1515_v50, %v1391_v51 }
  0x85   : > { %968 = vmatpush.bf16.msra.mxu1 %v1286_v22  ;;  %v1497_v57 = vld [vmem:[%s1884_s4 + $0xd4] sm:$0xf]  ;;  %v1319_v58 = vld [vmem:[%s1884_s4 + $0xd8] sm:$0xf0]  ;;  %v1458_v0 = vor.u32 %v1531_v52, %v1455_v53  ;;  %v1258_v6 = vor.u32 %v1481_v54, %v1255_v56  ;;  %v1479_v9 = vld [vmem:[%s1884_s4 + $0x44] sm:$0xf] }
  0x86   : > { %981 = vmatpush.bf16.msra.mxu2 %v1350_v23  ;;  %v1513_v1 = vld [vmem:[%s1884_s4 + $0x154] sm:$0xf]  ;;  %v1383_v2 = vld [vmem:[%s1884_s4 + $0x158] sm:$0xf0]  ;;  %v1322_v7 = vor.u32 %v1497_v57, %v1319_v58  ;;  %v1247_v10 = vld [vmem:[%s1884_s4 + $0x48] sm:$0xf0] }
  0x87   : > { %994 = vmatpush.bf16.msra.mxu3 %v1414_v27  ;;  %v1529_v4 = vld [vmem:[%s1884_s4 + $0x1d4] sm:$0xf]  ;;  %v1447_v5 = vld [vmem:[%s1884_s4 + $0x1d8] sm:$0xf0]  ;;  %v1386_v8 = vor.u32 %v1513_v1, %v1383_v2  ;;  %v1495_v11 = vld [vmem:[%s1884_s4 + $0xc4] sm:$0xf]  ;;  %v1250_v18 = vor.u32 %v1479_v9, %v1247_v10 }
  0x88   : > { %956 = vmatpush.bf16.msra.mxu0 %v1214_v34  ;;  %v1976_v61 = vld [vmem:[#allocation1 + $0x12] sm:$0xff]  ;;  %v1978_v62 = vld [vmem:[#allocation1 + $0x1b] sm:$0xff]  ;;  %v1985_v3 = vld [vmem:[#allocation1 + $0x9] sm:$0xff]  ;;  %v1450_v12 = vor.u32 %v1529_v4, %v1447_v5  ;;  %vm1056_vm0 = vcmask 1041408   ;;  %p1467_p13 = scmp.ne.s32.totalorder %s1630_s14, 8 }
  0x89   : > { %969 = vmatpush.bf16.msra.mxu1 %v1278_v37  ;;  %v1980_v63 = vld [vmem:[#allocation1] sm:$0xff]  ;;  %v1311_v13 = vld [vmem:[%s1884_s4 + $0xc8] sm:$0xf0]  ;;  %v1511_v14 = vld [vmem:[%s1884_s4 + $0x144] sm:$0xf] }
  0x8a   : > { %982 = vmatpush.bf16.msra.mxu2 %v1342_v38  ;;  %v1375_v15 = vld [vmem:[%s1884_s4 + $0x148] sm:$0xf0]  ;;  %v1527_v16 = vld [vmem:[%s1884_s4 + $0x1c4] sm:$0xf]  ;;  %v1314_v19 = vor.u32 %v1495_v11, %v1311_v13  ;;  %v1477_v21 = vld [vmem:[%s1884_s4 + $0x34] sm:$0xf] }
  0x8b   : > { %995 = vmatpush.bf16.msra.mxu3 %v1406_v41  ;;  %957 = vmatmul.bf16.vlgmr.msra.gmra.mxu0 %v1980_v63  ;;  %v1439_v17 = vld [vmem:[%s1884_s4 + $0x1c8] sm:$0xf0]  ;;  %v1378_v20 = vor.u32 %v1511_v14, %v1375_v15  ;;  %v1239_v22 = vld [vmem:[%s1884_s4 + $0x38] sm:$0xf0]  ;;  %v1493_v23 = vld [vmem:[%s1884_s4 + $0xb4] sm:$0xf] }
  0x8c   : > { %1001 = vmatpush.bf16.msrb.mxu0 %v1274_v42  ;;  %970 = vmatmul.bf16.vlgmr.msra.gmra.mxu1 %v1985_v3  ;;  %v1442_v24 = vor.u32 %v1527_v16, %v1439_v17  ;;  %v1303_v25 = vld [vmem:[%s1884_s4 + $0xb8] sm:$0xf0]  ;;  %v1509_v26 = vld [vmem:[%s1884_s4 + $0x134] sm:$0xf]  ;;  %v1242_v30 = vor.u32 %v1477_v21, %v1239_v22  ;;  %v1475_v33 = vld [vmem:[%s1884_s4 + $0x24] sm:$0xf] }
  0x8d   : > { %1014 = vmatpush.bf16.msrb.mxu1 %v1338_v43  ;;  %983 = vmatmul.bf16.vlgmr.msra.gmra.mxu2 %v1976_v61  ;;  %v1367_v27 = vld [vmem:[%s1884_s4 + $0x138] sm:$0xf0]  ;;  %v1525_v28 = vld [vmem:[%s1884_s4 + $0x1b4] sm:$0xf]  ;;  %v1306_v31 = vor.u32 %v1493_v23, %v1303_v25  ;;  %v1231_v34 = vld [vmem:[%s1884_s4 + $0x28] sm:$0xf0] }
  0x8e   : > { %1027 = vmatpush.bf16.msrb.mxu2 %v1402_v44  ;;  %996 = vmatmul.bf16.vlgmr.msra.gmra.mxu3 %v1978_v62  ;;  %v1431_v29 = vld [vmem:[%s1884_s4 + $0x1b8] sm:$0xf0]  ;;  %v1370_v32 = vor.u32 %v1509_v26, %v1367_v27  ;;  %v1491_v35 = vld [vmem:[%s1884_s4 + $0xa4] sm:$0xf]  ;;  %v1295_v37 = vld [vmem:[%s1884_s4 + $0xa8] sm:$0xf0]  ;;  %v1234_v42 = vor.u32 %v1475_v33, %v1231_v34 }
  0x8f   : > { %1040 = vmatpush.bf16.msrb.mxu3 %v1466_v48  ;;  %v1434_v36 = vor.u32 %v1525_v28, %v1431_v29  ;;  %v1507_v38 = vld [vmem:[%s1884_s4 + $0x124] sm:$0xf]  ;;  %v1359_v39 = vld [vmem:[%s1884_s4 + $0x128] sm:$0xf0]  ;;  %v1298_v43 = vor.u32 %v1491_v35, %v1295_v37  ;;  %v1473_v45 = vld [vmem:[%s1884_s4 + $0x14] sm:$0xf] }
  0x90   : > { %1002 = vmatpush.bf16.msrb.mxu0 %v1266_v55  ;;  %v1523_v40 = vld [vmem:[%s1884_s4 + $0x1a4] sm:$0xf]  ;;  %v1423_v41 = vld [vmem:[%s1884_s4 + $0x1a8] sm:$0xf0]  ;;  %v1362_v44 = vor.u32 %v1507_v38, %v1359_v39  ;;  %v1223_v46 = vld [vmem:[%s1884_s4 + $0x18] sm:$0xf0] }
  0x91   : > { %1015 = vmatpush.bf16.msrb.mxu1 %v1330_v59  ;;  %v1489_v47 = vld [vmem:[%s1884_s4 + $0x94] sm:$0xf]  ;;  %v1426_v48 = vor.u32 %v1523_v40, %v1423_v41  ;;  %v1287_v49 = vld [vmem:[%s1884_s4 + $0x98] sm:$0xf0]  ;;  %v1226_v54 = vor.u32 %v1473_v45, %v1223_v46  ;;  %v1471_v57 = vld [vmem:[%s1884_s4 + $0x4] sm:$0xf] }
  0x92   : > { %1028 = vmatpush.bf16.msrb.mxu2 %v1394_v60  ;;  %v1505_v50 = vld [vmem:[%s1884_s4 + $0x114] sm:$0xf]  ;;  %v1351_v51 = vld [vmem:[%s1884_s4 + $0x118] sm:$0xf0]  ;;  %v1290_v55 = vor.u32 %v1489_v47, %v1287_v49  ;;  %v1215_v58 = vld [vmem:[%s1884_s4 + $0x8] sm:$0xf0] }
  0x93   : > { %1041 = vmatpush.bf16.msrb.mxu3 %v1458_v0  ;;  %v1521_v52 = vld [vmem:[%s1884_s4 + $0x194] sm:$0xf]  ;;  %v1415_v53 = vld [vmem:[%s1884_s4 + $0x198] sm:$0xf0]  ;;  %v1354_v56 = vor.u32 %v1505_v50, %v1351_v51  ;;  %v1487_v59 = vld [vmem:[%s1884_s4 + $0x84] sm:$0xf] }
  0x94   : > { %1003 = vmatpush.bf16.msrb.mxu0 %v1258_v6  ;;  %v1418_v60 = vor.u32 %v1521_v52, %v1415_v53  ;;  %v1279_v0 = vld [vmem:[%s1884_s4 + $0x88] sm:$0xf0]  ;;  %v1503_v1 = vld [vmem:[%s1884_s4 + $0x104] sm:$0xf]  ;;  %v1218_v6 = vor.u32 %v1471_v57, %v1215_v58  ;;  %v553_v26 = vld [vmem:[#allocation2] sm:$0xf] }
  0x95   : > { %1016 = vmatpush.bf16.msrb.mxu1 %v1322_v7  ;;  %v1343_v2 = vld [vmem:[%s1884_s4 + $0x108] sm:$0xf0]  ;;  %v1519_v4 = vld [vmem:[%s1884_s4 + $0x184] sm:$0xf]  ;;  %v1282_v7 = vor.u32 %v1487_v59, %v1279_v0 }
  0x96   : > { %1029 = vmatpush.bf16.msrb.mxu2 %v1386_v8  ;;  %v1407_v5 = vld [vmem:[%s1884_s4 + $0x188] sm:$0xf0]  ;;  %v1346_v8 = vor.u32 %v1503_v1, %v1343_v2 }
  0x97   : > { %1042 = vmatpush.bf16.msrb.mxu3 %v1450_v12  ;;  %v1410_v9 = vor.u32 %v1519_v4, %v1407_v5 }
  0x98   : > { %1004 = vmatpush.bf16.msrb.mxu0 %v1250_v18 }
  0x99   : > { %1017 = vmatpush.bf16.msrb.mxu1 %v1314_v19 }
  0x9a   : > { %1030 = vmatpush.bf16.msrb.mxu2 %v1378_v20 }
  0x9b   : > { %1043 = vmatpush.bf16.msrb.mxu3 %v1442_v24 }
  0x9c   : > { %1005 = vmatpush.bf16.msrb.mxu0 %v1242_v30 }
  0x9d   : > { %1018 = vmatpush.bf16.msrb.mxu1 %v1306_v31 }
  0x9e   : > { %1031 = vmatpush.bf16.msrb.mxu2 %v1370_v32 }
  0x9f   : > { %1044 = vmatpush.bf16.msrb.mxu3 %v1434_v36 }
  0xa0   : > { %1006 = vmatpush.bf16.msrb.mxu0 %v1234_v42 }
  0xa1   : > { %1019 = vmatpush.bf16.msrb.mxu1 %v1298_v43 }
  0xa2   : > { %1032 = vmatpush.bf16.msrb.mxu2 %v1362_v44 }
  0xa3   : > { %1045 = vmatpush.bf16.msrb.mxu3 %v1426_v48 }
  0xa4   : > { %1007 = vmatpush.bf16.msrb.mxu0 %v1226_v54 }
  0xa5   : > { %1020 = vmatpush.bf16.msrb.mxu1 %v1290_v55 }
  0xa6   : > { %1033 = vmatpush.bf16.msrb.mxu2 %v1354_v56 }
  0xa7   : > { %1046 = vmatpush.bf16.msrb.mxu3 %v1418_v60 }
  0xa8   : > { %1008 = vmatpush.bf16.msrb.mxu0 %v1218_v6 }
  0xa9   : > { %1021 = vmatpush.bf16.msrb.mxu1 %v1282_v7 }
  0xaa   : > { %1034 = vmatpush.bf16.msrb.mxu2 %v1346_v8 }
  0xab   : > { %1047 = vmatpush.bf16.msrb.mxu3 %v1410_v9  ;;  %1009 = vmatmul.bf16.vlgmr.msrb.gmra.mxu0 %v1980_v63 }
  0xac   : > { %1022 = vmatmul.bf16.vlgmr.msrb.gmra.mxu1 %v1985_v3 }
  0xad   : > { %1035 = vmatmul.bf16.vlgmr.msrb.gmra.mxu2 %v1976_v61 }
  0xae   : > { %1048 = vmatmul.bf16.vlgmr.msrb.gmra.mxu3 %v1978_v62 }
 0x108   : > { %v958_v10 = vpop.f32.mrf.mxu0 }
 0x109   : > { %v971_v11 = vpop.f32.mrf.mxu1 }
 0x10a   : > { %v972_v20 = vadd.f32 %v971_v11, %v958_v10 }
 0x110   : > { %v984_v12 = vpop.f32.mrf.mxu2  ;;  %v960_v14 = vpop.f32.mrf.mxu0 }
 0x111   : > { %v997_v13 = vpop.f32.mrf.mxu3  ;;  %v973_v15 = vpop.f32.mrf.mxu1  ;;  %v985_v63 = vadd.f32 %v984_v12, %v972_v20 }
 0x113   : > { %v998_v62 = vadd.f32 %v997_v13, %v985_v63 }
 0x118   : > { %v986_v16 = vpop.f32.mrf.mxu2 }
 0x119   : > { %v999_v17 = vpop.f32.mrf.mxu3 }
 0x128   : > { %v1010_v18 = vpop.f32.mrf.mxu0 }
 0x129   : > { %v1023_v19 = vpop.f32.mrf.mxu1 }
 0x12a   : > { %v1024_v21 = vadd.f32 %v1023_v19, %v1010_v18 }
 0x130   : > { %v1036_v22 = vpop.f32.mrf.mxu2  ;;  %v1012_v24 = vpop.f32.mrf.mxu0 }
 0x131   : > { %v1037_v23 = vadd.f32 %v1036_v22, %v1024_v21  ;;  %v1049_v3 = vpop.f32.mrf.mxu3  ;;  %v1025_v61 = vpop.f32.mrf.mxu1 }
 0x133   : > { %v1050_v25 = vadd.f32 %v1049_v3, %v1037_v23 }
 0x135   : > { %v1055_v27 = vrot.slane %v1050_v25, 6 }
 0x136   : > { %1064 = sbr.rel (%p1467_p13) target bundleno = 325 (0x145), region = 78 }
 0x137   : > { %v1057_v28 = vsel %vm1056_vm0, %v998_v62, %v1055_v27 }
 0x138   : > { %v1059_v29 = vadd.f32 %v1057_v28, %v553_v26  ;;  %v1038_v30 = vpop.f32.mrf.mxu2 }
 0x139   : > { %v1051_v31 = vpop.f32.mrf.mxu3 }
 0x13a   : > { %1060 = vst [vmem:[#allocation2] sm:$0xf] %v1059_v29 }
 0x13b   : > { %v1066_v32 = vld [vmem:[%s536_s12] sm:$0x3] }
 0x13c   : > { %v1068_v33 = vperm.slane %v1066_v32, 0  ;;  %v1069_v34 = vperm.slane %v1066_v32, 1 }
 0x13e   : > { %v1070_v36 = vrot.slane %v1069_v34, 6 }
 0x140   : > { %v1071_v37 = vsel %vm1056_vm0, %v1068_v33, %v1070_v36 }
 0x141   : > { %v1065_v35 = vld [vmem:[#allocation2] sm:$0xf] }
 0x142   : > { %v1073_v38 = vadd.f32 %v1071_v37, %v1065_v35 }
 0x144   : > { %1074 = vst [vmem:[%s1882_s15] sm:$0xf] %v1073_v38 }
 0x145 PF: > { %s13_s18 = sadd.s32 1, %s1646_s18   ;;  %s2070_s12 = smov %s1626_s13 }
 0x146   : > { %p10_p0 = scmp.ge.s32.totalorder %s13_s18, 20   ;;  %s2071_s13 = smov %s1720_s25 }
 0x147   : > { %s2072_s14 = smov %s1638_s16  ;;  %s2073_s15 = smov %s1642_s17 }
 0x148   : > { %s2074_s16 = smov %s2077_s19  ;;  %s2075_s17 = smov %s2081_s20 }
 0x149   :  { %12 = sbr.rel (!%p10_p0) target bundleno = 4 (0x4), region = 119 }

// kernel: resnet18_forward.103
= control target key start
LH: loop header
LB: loop body
LE: loop exit
PB: predicated region body
PF: predicated region fallthrough
CT: control target
= control target key end

     0   :  { %s1096_s12 = smov 0   ;;  %s1098_s13 = smov 0   ;;  %s1301_s0 = inlined_call_operand.vmem [shape: bf16[2,256], index: 0, kind: input, shape index: {}]   ;;  %s1302_s1 = inlined_call_operand.vmem [shape: bf16[256,512], index: 1, kind: input, shape index: {}]   ;;  %s1303_s2 = inlined_call_operand.vmem [shape: f32[1,512], index: 2, kind: input, shape index: {}]   ;;  %s1304_s3 = inlined_call_operand.vmem [shape: f32[2,512], index: 3, kind: output, shape index: {}]  }
   0x1   :  { %s1100_s14 = smov 0   ;;  %s1102_s15 = smov 0  }
   0x2   :  { %s1104_s16 = smov 0  }
   0x3 LB: > { %s28_s17 = sadd.s32 1, %s1069_s15  ;;  %p76_p1 = scmp.ne.s32.totalorder %s1061_s13, %s1057_s12  ;;  %s1073_s16 = sphi %s1104_s16, %s13_s16   ;;  %s1069_s15 = sphi %s1102_s15, %s1308_s15   ;;  %s1065_s14 = sphi %s1100_s14, %s1307_s14   ;;  %s1061_s13 = sphi %s1098_s13, %s1306_s13   ;;  %s1057_s12 = sphi %s1096_s12, %s1305_s12  }
   0x4   : > { %p30_p0 = scmp.ge.s32.totalorder %s28_s17, 2  ;;  %p77_p2 = scmp.eq.s32.totalorder %s1073_s16, 0 }
   0x5   : > { %s69_s19 = sadd.s32 1, %s1061_s13  ;;  %p822_p5 = scmp.ge.s32.totalorder %s1073_s16, 2 }
   0x6   : > { %s1310_s17 = smov (%p30_p0, %s28_s17), 0  ;;  %p78_p3 = por %p77_p2, %p76_p1 }
   0x7   : > { %s65_s18 = ssub.s32 %s1069_s15, %s1310_s17  ;;  %168 = sbr.rel (%p822_p5) target bundleno = 48 (0x30), region = 20 }
   0x8   : > { %p67_p4 = scmp.eq.s32.totalorder %s65_s18, 0 }
   0xa   : > { %s1131_s20 = scalar_select %p67_p4, %s1061_s13, %s69_s19  }
   0xc   : > { %171 = sbr.rel (!%p78_p3) target bundleno = 48 (0x30), region = 24  ;;  %s173_s21 = sand.u32 (%p78_p3), 1, %s1061_s13  }
   0xd   : > { %s961_s22 = sshll.u32 (%p78_p3), %s1069_s15, 3  ;;  %s823_s23 = sshll.u32 (%p78_p3), %s173_s21, 8 }
   0xe   : > { %s1139_s26 = scalar_lea.vmem (%p78_p3), %s1302_s1, %s961_s22  ;;  %s1144_s27 = scalar_lea.vmem (%p78_p3), [#allocation3], %s823_s23 }
   0xf   : > { %v272_v0 = vld [vmem:[%s1139_s26] sm:$0xff] (%p78_p3)  ;;  %v274_v1 = vld [vmem:[%s1139_s26 + $0x10] sm:$0xff] (%p78_p3) }
  0x10   : > { %v276_v2 = vld [vmem:[%s1139_s26 + $0x20] sm:$0xff] (%p78_p3)  ;;  %273 = vst [vmem:[%s1144_s27] sm:$0xff] (%p78_p3), %v272_v0  ;;  %v278_v3 = vld [vmem:[%s1139_s26 + $0x30] sm:$0xff] (%p78_p3) }
  0x11   : > { %275 = vst [vmem:[%s1144_s27 + $0x8] sm:$0xff] %v274_v1  ;;  %v280_v4 = vld [vmem:[%s1139_s26 + $0x40] sm:$0xff]  ;;  %v282_v5 = vld [vmem:[%s1139_s26 + $0x50] sm:$0xff] }
  0x12   : > { %277 = vst [vmem:[%s1144_s27 + $0x10] sm:$0xff] %v276_v2  ;;  %v284_v6 = vld [vmem:[%s1139_s26 + $0x60] sm:$0xff]  ;;  %v286_v7 = vld [vmem:[%s1139_s26 + $0x70] sm:$0xff] }
  0x13   : > { %279 = vst [vmem:[%s1144_s27 + $0x18] sm:$0xff] %v278_v3  ;;  %v288_v8 = vld [vmem:[%s1139_s26 + $0x80] sm:$0xff]  ;;  %v290_v9 = vld [vmem:[%s1139_s26 + $0x90] sm:$0xff] }
  0x14   : > { %281 = vst [vmem:[%s1144_s27 + $0x20] sm:$0xff] %v280_v4  ;;  %v292_v10 = vld [vmem:[%s1139_s26 + $0xa0] sm:$0xff]  ;;  %v294_v11 = vld [vmem:[%s1139_s26 + $0xb0] sm:$0xff] }
  0x15   : > { %283 = vst [vmem:[%s1144_s27 + $0x28] sm:$0xff] %v282_v5  ;;  %v296_v12 = vld [vmem:[%s1139_s26 + $0xc0] sm:$0xff]  ;;  %v298_v13 = vld [vmem:[%s1139_s26 + $0xd0] sm:$0xff] }
  0x16   : > { %285 = vst [vmem:[%s1144_s27 + $0x30] sm:$0xff] %v284_v6  ;;  %v300_v14 = vld [vmem:[%s1139_s26 + $0xe0] sm:$0xff]  ;;  %v302_v15 = vld [vmem:[%s1139_s26 + $0xf0] sm:$0xff] }
  0x17   : > { %287 = vst [vmem:[%s1144_s27 + $0x38] sm:$0xff] %v286_v7  ;;  %v304_v16 = vld [vmem:[%s1139_s26 + $0x100] sm:$0xff]  ;;  %v306_v17 = vld [vmem:[%s1139_s26 + $0x110] sm:$0xff] }
  0x18   : > { %289 = vst [vmem:[%s1144_s27 + $0x40] sm:$0xff] %v288_v8  ;;  %v308_v18 = vld [vmem:[%s1139_s26 + $0x120] sm:$0xff]  ;;  %v310_v19 = vld [vmem:[%s1139_s26 + $0x130] sm:$0xff] }
  0x19   : > { %291 = vst [vmem:[%s1144_s27 + $0x48] sm:$0xff] %v290_v9  ;;  %v312_v20 = vld [vmem:[%s1139_s26 + $0x140] sm:$0xff]  ;;  %v314_v21 = vld [vmem:[%s1139_s26 + $0x150] sm:$0xff] }
  0x1a   : > { %293 = vst [vmem:[%s1144_s27 + $0x50] sm:$0xff] %v292_v10  ;;  %v316_v22 = vld [vmem:[%s1139_s26 + $0x160] sm:$0xff]  ;;  %v318_v23 = vld [vmem:[%s1139_s26 + $0x170] sm:$0xff] }
  0x1b   : > { %295 = vst [vmem:[%s1144_s27 + $0x58] sm:$0xff] %v294_v11  ;;  %v320_v24 = vld [vmem:[%s1139_s26 + $0x180] sm:$0xff]  ;;  %v322_v25 = vld [vmem:[%s1139_s26 + $0x190] sm:$0xff] }
  0x1c   : > { %297 = vst [vmem:[%s1144_s27 + $0x60] sm:$0xff] %v296_v12  ;;  %v324_v26 = vld [vmem:[%s1139_s26 + $0x1a0] sm:$0xff]  ;;  %v326_v27 = vld [vmem:[%s1139_s26 + $0x1b0] sm:$0xff] }
  0x1d   : > { %299 = vst [vmem:[%s1144_s27 + $0x68] sm:$0xff] %v298_v13  ;;  %v328_v28 = vld [vmem:[%s1139_s26 + $0x1c0] sm:$0xff]  ;;  %v330_v29 = vld [vmem:[%s1139_s26 + $0x1d0] sm:$0xff] }
  0x1e   : > { %301 = vst [vmem:[%s1144_s27 + $0x70] sm:$0xff] %v300_v14  ;;  %v332_v30 = vld [vmem:[%s1139_s26 + $0x1e0] sm:$0xff]  ;;  %v334_v31 = vld [vmem:[%s1139_s26 + $0x1f0] sm:$0xff] }
  0x1f   : > { %303 = vst [vmem:[%s1144_s27 + $0x78] sm:$0xff] %v302_v15 }
  0x20   : > { %305 = vst [vmem:[%s1144_s27 + $0x80] sm:$0xff] %v304_v16 }
  0x21   : > { %307 = vst [vmem:[%s1144_s27 + $0x88] sm:$0xff] %v306_v17 }
  0x22   : > { %309 = vst [vmem:[%s1144_s27 + $0x90] sm:$0xff] %v308_v18 }
  0x23   : > { %311 = vst [vmem:[%s1144_s27 + $0x98] sm:$0xff] %v310_v19 }
  0x24   : > { %313 = vst [vmem:[%s1144_s27 + $0xa0] sm:$0xff] %v312_v20 }
  0x25   : > { %315 = vst [vmem:[%s1144_s27 + $0xa8] sm:$0xff] %v314_v21 }
  0x26   : > { %317 = vst [vmem:[%s1144_s27 + $0xb0] sm:$0xff] %v316_v22 }
  0x27   : > { %319 = vst [vmem:[%s1144_s27 + $0xb8] sm:$0xff] %v318_v23 }
  0x28   : > { %321 = vst [vmem:[%s1144_s27 + $0xc0] sm:$0xff] %v320_v24 }
  0x29   : > { %323 = vst [vmem:[%s1144_s27 + $0xc8] sm:$0xff] %v322_v25 }
  0x2a   : > { %325 = vst [vmem:[%s1144_s27 + $0xd0] sm:$0xff] %v324_v26 }
  0x2b   : > { %327 = vst [vmem:[%s1144_s27 + $0xd8] sm:$0xff] %v326_v27 }
  0x2c   : > { %329 = vst [vmem:[%s1144_s27 + $0xe0] sm:$0xff] %v328_v28 }
  0x2d   : > { %331 = vst [vmem:[%s1144_s27 + $0xe8] sm:$0xff] %v330_v29 }
  0x2e   : > { %333 = vst [vmem:[%s1144_s27 + $0xf0] sm:$0xff] %v332_v30 }
  0x2f   : > { %335 = vst [vmem:[%s1144_s27 + $0xf8] sm:$0xff] %v334_v31 }
  0x30 PF: > { %p826_p6 = scmp.ge.s32.totalorder %s1073_s16, 1  ;;  %p348_p7 = scmp.lt.s32.totalorder %s1073_s16, 3 }
  0x32   : > { %p349_p8 = pnand %p826_p6, %p348_p7 }
  0x33   : > { %s355_s28 = sand.u32 (!%p349_p8), 1, %s1057_s12   ;;  %s828_s6 = sshll.u32 (!%p349_p8), %s1065_s14, 1 }
  0x34   : > { %352 = sbr.rel (%p349_p8) target bundleno = 244 (0xf4), region = 66  ;;  %s827_s4 = sshll.u32 (!%p349_p8), %s355_s28, 8 }
  0x35   : > { %s1213_s5 = scalar_lea.vmem (!%p349_p8), [#allocation3], %s827_s4  ;;  %p406_p9 = scmp.lt.s32.totalorder (!%p349_p8), %s828_s6, 3 }
  0x39   : > { %v426_v32 = vld [vmem:[%s1301_s0] sm:$0x3]  ;;  %v889_v33 = vld [vmem:[%s1213_s5 + $0x70] sm:$0xf]  ;;  %v977_v34 = vld [vmem:[%s1213_s5 + $0x74] sm:$0xf0] }
  0x3a   : > { %460 = vst [vmem:[#allocation1] ss:$9 sm:$0xff] %v426_v32  ;;  %v953_v35 = vld [vmem:[%s1213_s5 + $0xf0] sm:$0xf]  ;;  %v890_v36 = vor.u32 %v977_v34, %v889_v33  ;;  %v993_v37 = vld [vmem:[%s1213_s5 + $0xf4] sm:$0xf0] }
  0x3b   : > { %v976_v38 = vld [vmem:[%s1213_s5 + $0x74] sm:$0xf]  ;;  %v891_v39 = vld [vmem:[%s1213_s5 + $0x78] sm:$0xf0]  ;;  %v954_v40 = vor.u32 %v993_v37, %v953_v35  ;;  %v881_v44 = vld [vmem:[%s1213_s5 + $0x60] sm:$0xf] }
  0x3c   : > { %v894_v41 = vor.u32 %v976_v38, %v891_v39  ;;  %v992_v42 = vld [vmem:[%s1213_s5 + $0xf4] sm:$0xf]  ;;  %v955_v43 = vld [vmem:[%s1213_s5 + $0xf8] sm:$0xf0]  ;;  %625 = vmatpush.bf16.msra.mxu0 %v890_v36  ;;  %v975_v46 = vld [vmem:[%s1213_s5 + $0x64] sm:$0xf0] }
  0x3d   : > { %v958_v45 = vor.u32 %v992_v42, %v955_v43  ;;  %v945_v47 = vld [vmem:[%s1213_s5 + $0xe0] sm:$0xf]  ;;  %v991_v48 = vld [vmem:[%s1213_s5 + $0xe4] sm:$0xf0]  ;;  %638 = vmatpush.bf16.msra.mxu1 %v954_v40  ;;  %v882_v49 = vor.u32 %v975_v46, %v881_v44  ;;  %v974_v51 = vld [vmem:[%s1213_s5 + $0x64] sm:$0xf] }
  0x3e   : > { %651 = vmatpush.bf16.msra.mxu2 %v894_v41  ;;  %v946_v50 = vor.u32 %v991_v48, %v945_v47  ;;  %v883_v52 = vld [vmem:[%s1213_s5 + $0x68] sm:$0xf0]  ;;  %v990_v53 = vld [vmem:[%s1213_s5 + $0xe4] sm:$0xf]  ;;  %v873_v56 = vld [vmem:[%s1213_s5 + $0x50] sm:$0xf] }
  0x3f   : > { %664 = vmatpush.bf16.msra.mxu3 %v958_v45  ;;  %v886_v54 = vor.u32 %v974_v51, %v883_v52  ;;  %v947_v55 = vld [vmem:[%s1213_s5 + $0xe8] sm:$0xf0]  ;;  %v973_v57 = vld [vmem:[%s1213_s5 + $0x54] sm:$0xf0]  ;;  %v937_v59 = vld [vmem:[%s1213_s5 + $0xd0] sm:$0xf] }
  0x40   : > { %v950_v58 = vor.u32 %v990_v53, %v947_v55  ;;  %v989_v60 = vld [vmem:[%s1213_s5 + $0xd4] sm:$0xf0]  ;;  %v972_v61 = vld [vmem:[%s1213_s5 + $0x54] sm:$0xf]  ;;  %626 = vmatpush.bf16.msra.mxu0 %v882_v49  ;;  %v874_v62 = vor.u32 %v973_v57, %v873_v56  ;;  %v875_v63 = vld [vmem:[%s1213_s5 + $0x58] sm:$0xf0] }
  0x41   : > { %v988_v0 = vld [vmem:[%s1213_s5 + $0xd4] sm:$0xf]  ;;  %v939_v1 = vld [vmem:[%s1213_s5 + $0xd8] sm:$0xf0]  ;;  %639 = vmatpush.bf16.msra.mxu1 %v946_v50  ;;  %v938_v2 = vor.u32 %v989_v60, %v937_v59  ;;  %v878_v3 = vor.u32 %v972_v61, %v875_v63  ;;  %v865_v4 = vld [vmem:[%s1213_s5 + $0x40] sm:$0xf] }
  0x42   : > { %652 = vmatpush.bf16.msra.mxu2 %v886_v54  ;;  %v971_v5 = vld [vmem:[%s1213_s5 + $0x44] sm:$0xf0]  ;;  %v929_v6 = vld [vmem:[%s1213_s5 + $0xc0] sm:$0xf]  ;;  %v942_v7 = vor.u32 %v988_v0, %v939_v1  ;;  %v970_v9 = vld [vmem:[%s1213_s5 + $0x44] sm:$0xf] }
  0x43   : > { %665 = vmatpush.bf16.msra.mxu3 %v950_v58  ;;  %v987_v8 = vld [vmem:[%s1213_s5 + $0xc4] sm:$0xf0]  ;;  %v867_v10 = vld [vmem:[%s1213_s5 + $0x48] sm:$0xf0]  ;;  %v986_v11 = vld [vmem:[%s1213_s5 + $0xc4] sm:$0xf]  ;;  %v866_v13 = vor.u32 %v971_v5, %v865_v4 }
  0x44   : > { %v931_v12 = vld [vmem:[%s1213_s5 + $0xc8] sm:$0xf0]  ;;  %627 = vmatpush.bf16.msra.mxu0 %v874_v62  ;;  %v930_v14 = vor.u32 %v987_v8, %v929_v6  ;;  %v870_v15 = vor.u32 %v970_v9, %v867_v10  ;;  %v857_v16 = vld [vmem:[%s1213_s5 + $0x30] sm:$0xf]  ;;  %v969_v17 = vld [vmem:[%s1213_s5 + $0x34] sm:$0xf0] }
  0x45   : > { %640 = vmatpush.bf16.msra.mxu1 %v938_v2  ;;  %v921_v18 = vld [vmem:[%s1213_s5 + $0xb0] sm:$0xf]  ;;  %v934_v19 = vor.u32 %v986_v11, %v931_v12  ;;  %v985_v20 = vld [vmem:[%s1213_s5 + $0xb4] sm:$0xf0]  ;;  %v968_v21 = vld [vmem:[%s1213_s5 + $0x34] sm:$0xf]  ;;  %v858_v25 = vor.u32 %v969_v17, %v857_v16 }
  0x46   : > { %653 = vmatpush.bf16.msra.mxu2 %v878_v3  ;;  %v859_v22 = vld [vmem:[%s1213_s5 + $0x38] sm:$0xf0]  ;;  %v984_v23 = vld [vmem:[%s1213_s5 + $0xb4] sm:$0xf]  ;;  %v922_v26 = vor.u32 %v985_v20, %v921_v18  ;;  %v849_v28 = vld [vmem:[%s1213_s5 + $0x20] sm:$0xf] }
  0x47   : > { %666 = vmatpush.bf16.msra.mxu3 %v942_v7  ;;  %v923_v24 = vld [vmem:[%s1213_s5 + $0xb8] sm:$0xf0]  ;;  %v862_v27 = vor.u32 %v968_v21, %v859_v22  ;;  %v967_v29 = vld [vmem:[%s1213_s5 + $0x24] sm:$0xf0]  ;;  %v913_v30 = vld [vmem:[%s1213_s5 + $0xa0] sm:$0xf] }
  0x48   : > { %628 = vmatpush.bf16.msra.mxu0 %v866_v13  ;;  %v926_v31 = vor.u32 %v984_v23, %v923_v24  ;;  %v983_v32 = vld [vmem:[%s1213_s5 + $0xa4] sm:$0xf0]  ;;  %v966_v33 = vld [vmem:[%s1213_s5 + $0x24] sm:$0xf]  ;;  %v851_v34 = vld [vmem:[%s1213_s5 + $0x28] sm:$0xf0]  ;;  %v850_v37 = vor.u32 %v967_v29, %v849_v28 }
  0x49   : > { %641 = vmatpush.bf16.msra.mxu1 %v930_v14  ;;  %v982_v35 = vld [vmem:[%s1213_s5 + $0xa4] sm:$0xf]  ;;  %v915_v36 = vld [vmem:[%s1213_s5 + $0xa8] sm:$0xf0]  ;;  %v914_v38 = vor.u32 %v983_v32, %v913_v30  ;;  %v854_v39 = vor.u32 %v966_v33, %v851_v34  ;;  %v841_v40 = vld [vmem:[%s1213_s5 + $0x10] sm:$0xf] }
  0x4a   : > { %654 = vmatpush.bf16.msra.mxu2 %v870_v15  ;;  %v965_v41 = vld [vmem:[%s1213_s5 + $0x14] sm:$0xf0]  ;;  %v905_v42 = vld [vmem:[%s1213_s5 + $0x90] sm:$0xf]  ;;  %v918_v43 = vor.u32 %v982_v35, %v915_v36  ;;  %v964_v45 = vld [vmem:[%s1213_s5 + $0x14] sm:$0xf] }
  0x4b   : > { %667 = vmatpush.bf16.msra.mxu3 %v934_v19  ;;  %v981_v44 = vld [vmem:[%s1213_s5 + $0x94] sm:$0xf0]  ;;  %v843_v46 = vld [vmem:[%s1213_s5 + $0x18] sm:$0xf0]  ;;  %v980_v47 = vld [vmem:[%s1213_s5 + $0x94] sm:$0xf]  ;;  %v842_v49 = vor.u32 %v965_v41, %v841_v40 }
  0x4c   : > { %629 = vmatpush.bf16.msra.mxu0 %v858_v25  ;;  %v907_v48 = vld [vmem:[%s1213_s5 + $0x98] sm:$0xf0]  ;;  %v906_v50 = vor.u32 %v981_v44, %v905_v42  ;;  %v846_v51 = vor.u32 %v964_v45, %v843_v46  ;;  %v833_v52 = vld [vmem:[%s1213_s5] sm:$0xf]  ;;  %v963_v53 = vld [vmem:[%s1213_s5 + $0x4] sm:$0xf0] }
  0x4d   : > { %642 = vmatpush.bf16.msra.mxu1 %v922_v26  ;;  %v897_v54 = vld [vmem:[%s1213_s5 + $0x80] sm:$0xf]  ;;  %v910_v55 = vor.u32 %v980_v47, %v907_v48  ;;  %v979_v56 = vld [vmem:[%s1213_s5 + $0x84] sm:$0xf0]  ;;  %v962_v57 = vld [vmem:[%s1213_s5 + $0x4] sm:$0xf]  ;;  %v834_v61 = vor.u32 %v963_v53, %v833_v52 }
  0x4e   : > { %655 = vmatpush.bf16.msra.mxu2 %v862_v27  ;;  %v835_v58 = vld [vmem:[%s1213_s5 + $0x8] sm:$0xf0]  ;;  %v978_v59 = vld [vmem:[%s1213_s5 + $0x84] sm:$0xf]  ;;  %v898_v62 = vor.u32 %v979_v56, %v897_v54  ;;  %v461_v1 = vld [vmem:[#allocation1] sm:$0xff]  ;;  %v1075_v3 = vmov 0.0  }
  0x4f   : > { %668 = vmatpush.bf16.msra.mxu3 %v926_v31  ;;  %v899_v60 = vld [vmem:[%s1213_s5 + $0x88] sm:$0xf0]  ;;  %v838_v63 = vor.u32 %v962_v57, %v835_v58  ;;  %v462_v2 = vld [vmem:[#allocation1 + $0x9] sm:$0xff]  ;;  %424 = vst [vmem:[#allocation2] sm:$0xf] %v1075_v3  ;;  %s1312_s6 = smov (!%p406_p9, %s828_s6), 3 }
  0x50   : > { %630 = vmatpush.bf16.msra.mxu0 %v850_v37  ;;  %v902_v0 = vor.u32 %v978_v59, %v899_v60  ;;  %s408_s9 = scalar_lea.vmem %s1303_s2, %s1312_s6  ;;  %vm680_vm0 = vcmask 1041408   ;;  %s830_s10 = sshll.u32 %s1312_s6, 1 }
  0x51   : > { %643 = vmatpush.bf16.msra.mxu1 %v914_v38  ;;  %v689_v12 = vld [vmem:[%s408_s9] sm:$0x3]  ;;  %s418_s14 = scalar_lea.vmem %s1304_s3, %s830_s10 }
  0x52   : > { %656 = vmatpush.bf16.msra.mxu2 %v854_v39  ;;  %v692_v16 = vperm.slane %v689_v12, 1  ;;  %v691_v20 = vperm.slane %v689_v12, 0 }
  0x53   : > { %669 = vmatpush.bf16.msra.mxu3 %v918_v43 }
  0x54   : > { %631 = vmatpush.bf16.msra.mxu0 %v842_v49  ;;  %v693_v21 = vrot.slane %v692_v16, 6 }
  0x55   : > { %644 = vmatpush.bf16.msra.mxu1 %v906_v50 }
  0x56   : > { %657 = vmatpush.bf16.msra.mxu2 %v846_v51  ;;  %v425_v13 = vld [vmem:[#allocation2] sm:$0xf]  ;;  %v694_v22 = vsel %vm680_vm0, %v691_v20, %v693_v21 }
  0x57   : > { %670 = vmatpush.bf16.msra.mxu3 %v910_v55 }
  0x58   : > { %632 = vmatpush.bf16.msra.mxu0 %v834_v61 }
  0x59   : > { %645 = vmatpush.bf16.msra.mxu1 %v898_v62 }
  0x5a   : > { %658 = vmatpush.bf16.msra.mxu2 %v838_v63 }
  0x5b   : > { %671 = vmatpush.bf16.msra.mxu3 %v902_v0  ;;  %633 = vmatmul.bf16.vlgmr.msra.gmra.mxu0 %v461_v1 }
  0x5c   : > { %646 = vmatmul.bf16.vlgmr.msra.gmra.mxu1 %v462_v2 }
  0x5d   : > { %659 = vmatmul.bf16.vlgmr.msra.gmra.mxu2 %v461_v1 }
  0x5e   : > { %672 = vmatmul.bf16.vlgmr.msra.gmra.mxu3 %v462_v2 }
  0xd8   : > { %v634_v4 = vpop.f32.mrf.mxu0 }
  0xd9   : > { %v647_v5 = vpop.f32.mrf.mxu1 }
  0xda   : > { %v648_v9 = vadd.f32 %v647_v5, %v634_v4 }
  0xe0   : > { %v660_v6 = vpop.f32.mrf.mxu2  ;;  %v636_v8 = vpop.f32.mrf.mxu0 }
  0xe1   : > { %v673_v7 = vpop.f32.mrf.mxu3  ;;  %v649_v11 = vpop.f32.mrf.mxu1 }
  0xe2   : > { %v674_v10 = vadd.f32 %v673_v7, %v660_v6 }
  0xe4   : > { %v679_v14 = vrot.slane %v674_v10, 6 }
  0xe6   : > { %v681_v15 = vsel %vm680_vm0, %v648_v9, %v679_v14 }
  0xe7   : > { %v683_v17 = vadd.f32 %v681_v15, %v425_v13 }
  0xe8   : > { %v662_v18 = vpop.f32.mrf.mxu2 }
  0xe9   : > { %684 = vst [vmem:[#allocation2] sm:$0xf] %v683_v17  ;;  %v675_v19 = vpop.f32.mrf.mxu3 }
  0xf0   : > { %v688_v23 = vld [vmem:[#allocation2] sm:$0xf] }
  0xf1   : > { %v696_v24 = vadd.f32 %v694_v22, %v688_v23 }
  0xf3   : > { %697 = vst [vmem:[%s418_s14] sm:$0xf] %v696_v24 }
  0xf4 PF: > { %s13_s16 = sadd.s32 1, %s1073_s16   ;;  %s1305_s12 = smov %s1061_s13 }
  0xf5   : > { %p10_p10 = scmp.ge.s32.totalorder %s13_s16, 4   ;;  %s1306_s13 = smov %s1131_s20 }
  0xf6   : > { %s1307_s14 = smov %s1069_s15  ;;  %s1308_s15 = smov %s1310_s17 }
  0xf7   :  { %12 = sbr.rel (!%p10_p10) target bundleno = 3 (0x3), region = 119 }

// kernel: resnet18_forward.105
= control target key start
LH: loop header
LB: loop body
LE: loop exit
PB: predicated region body
PF: predicated region fallthrough
CT: control target
= control target key end

     0   :  { %vm27_vm0 = vcmask 1041408   ;;  %vm29_vm1 = vcmask 1045508   ;;  %vm31_vm2 = vcmask 1043456   ;;  %s101_s2 = inlined_call_operand.vmem [shape: f32[1,512], index: 2, kind: input, shape index: {}]   ;;  %s102_s3 = inlined_call_operand.vmem [shape: f32[1,512], index: 3, kind: input, shape index: {}]   ;;  %s103_s0 = inlined_call_operand.vmem [shape: f32[2,512], index: 0, kind: input, shape index: {}]   ;;  %s104_s1 = inlined_call_operand.vmem [shape: f32[2,512], index: 1, kind: input, shape index: {}]   ;;  %s105_s4 = inlined_call_operand.vmem [shape: f32[2,512], index: 4, kind: output, shape index: {}]  }
   0x1   :  { %v18_v0 = vld [vmem:[%s101_s2] sm:$0xf] }
   0x2   :  { %v35_v1 = vld [vmem:[%s102_s3] sm:$0xf]  ;;  %v20_v2 = vperm.slane %v18_v0, 0  ;;  %v21_v3 = vperm.slane %v18_v0, 1  ;;  %v22_v4 = vperm.slane %v18_v0, 2  ;;  %v23_v5 = vperm.slane %v18_v0, 3 }
   0x3   :  { %v37_v6 = vperm.slane %v35_v1, 0  ;;  %v38_v7 = vperm.slane %v35_v1, 1  ;;  %v39_v8 = vperm.slane %v35_v1, 2  ;;  %v40_v9 = vperm.slane %v35_v1, 3  ;;  %v17_v13 = vld [vmem:[%s103_s0] sm:$0xff] }
   0x4   :  { %v24_v10 = vrot.slane %v21_v3, 6  ;;  %v25_v11 = vrot.slane %v22_v4, 4  ;;  %v26_v12 = vrot.slane %v23_v5, 2  ;;  %v49_v24 = vld [vmem:[%s104_s1] sm:$0xff] }
   0x5   :  { %v41_v14 = vrot.slane %v38_v7, 6  ;;  %v42_v15 = vrot.slane %v39_v8, 4  ;;  %v43_v16 = vrot.slane %v40_v9, 2 }
   0x6   :  { %v28_v17 = vsel %vm27_vm0, %v20_v2, %v24_v10  ;;  %v30_v18 = vsel %vm29_vm1, %v25_v11, %v26_v12 }
   0x7   :  { %v32_v19 = vsel %vm31_vm2, %v28_v17, %v30_v18  ;;  %v44_v20 = vsel %vm27_vm0, %v37_v6, %v41_v14  ;;  %v45_v21 = vsel %vm29_vm1, %v42_v15, %v43_v16 }
   0x8   :  { %v34_v22 = vmul.f32 %v32_v19, %v17_v13  ;;  %v46_v23 = vsel %vm31_vm2, %v44_v20, %v45_v21 }
   0xa   :  { %v48_v25 = vadd.f32 %v46_v23, %v34_v22 }
   0xc   :  { %v50_v26 = vadd.f32 %v49_v24, %v48_v25 }
   0xe   :  { %v51_v27 = vmax.f32 %v50_v26, 0.0 }
  0x10   :  { %52 = vst [vmem:[%s105_s4] sm:$0xff] %v51_v27 }

// kernel: resnet18_forward.112
= control target key start
LH: loop header
LB: loop body
LE: loop exit
PB: predicated region body
PF: predicated region fallthrough
CT: control target
= control target key end

     0   :  { %s43_s0 = inlined_call_operand.vmem [shape: f32[2,1,512], index: 0, kind: input, shape index: {}]   ;;  %s44_s1 = inlined_call_operand.vmem [shape: f32[2,512], index: 1, kind: output, shape index: {}]  }
   0x1   :  { %v8_v0 = vld [vmem:[%s43_s0] sm:$0xf]  ;;  %v9_v1 = vld [vmem:[%s43_s0 + $0x4] sm:$0xf] }
   0x2   :  { %14 = vst [vmem:[#allocation1] ss:$2 sm:$0xff] %v8_v0 }
   0x3   :  { %16 = vst [vmem:[#allocation1 + $0x1] ss:$2 sm:$0xff] %v9_v1 }
   0xa   :  { %v17_v2 = vld [vmem:[#allocation1] sm:$0xff] }
   0xb   :  { %19 = vst [vmem:[%s44_s1] sm:$0xff] %v17_v2 }

// kernel: resnet18_forward.113
= control target key start
LH: loop header
LB: loop body
LE: loop exit
PB: predicated region body
PF: predicated region fallthrough
CT: control target
= control target key end

     0   :  { %s689_s0 = inlined_call_operand.vmem [shape: bf16[2,512], index: 0, kind: input, shape index: {}]   ;;  %s690_s1 = inlined_call_operand.vmem [shape: bf16[512,10], index: 1, kind: input, shape index: {}]   ;;  %s691_s2 = inlined_call_operand.vmem [shape: f32[1,10], index: 2, kind: input, shape index: {}]   ;;  %s692_s3 = inlined_call_operand.hbm [shape: f32[2,10], index: 3, kind: output, shape index: {}]  }
   0x1   :  { %v505_v0 = vld [vmem:[%s690_s1 + $0x38] sm:$0xff]  ;;  %v504_v4 = vld [vmem:[%s690_s1 + $0x30] sm:$0xff]  ;;  %v503_v8 = vld [vmem:[%s690_s1 + $0x28] sm:$0xff] }
   0x2   :  { %v513_v1 = vld [vmem:[%s690_s1 + $0x78] sm:$0xff]  ;;  %289 = vmatpush.bf16.msra.mxu0 %v505_v0  ;;  %v512_v5 = vld [vmem:[%s690_s1 + $0x70] sm:$0xff]  ;;  %v511_v9 = vld [vmem:[%s690_s1 + $0x68] sm:$0xff] }
   0x3   :  { %v521_v2 = vld [vmem:[%s690_s1 + $0xb8] sm:$0xff]  ;;  %302 = vmatpush.bf16.msra.mxu1 %v513_v1  ;;  %v520_v6 = vld [vmem:[%s690_s1 + $0xb0] sm:$0xff]  ;;  %v519_v10 = vld [vmem:[%s690_s1 + $0xa8] sm:$0xff] }
   0x4   :  { %v529_v3 = vld [vmem:[%s690_s1 + $0xf8] sm:$0xff]  ;;  %315 = vmatpush.bf16.msra.mxu2 %v521_v2  ;;  %v528_v7 = vld [vmem:[%s690_s1 + $0xf0] sm:$0xff]  ;;  %v527_v11 = vld [vmem:[%s690_s1 + $0xe8] sm:$0xff] }
   0x5   :  { %328 = vmatpush.bf16.msra.mxu3 %v529_v3  ;;  %v502_v12 = vld [vmem:[%s690_s1 + $0x20] sm:$0xff] }
   0x6   :  { %290 = vmatpush.bf16.msra.mxu0 %v504_v4  ;;  %v510_v13 = vld [vmem:[%s690_s1 + $0x60] sm:$0xff] }
   0x7   :  { %303 = vmatpush.bf16.msra.mxu1 %v512_v5  ;;  %v518_v14 = vld [vmem:[%s690_s1 + $0xa0] sm:$0xff] }
   0x8   :  { %316 = vmatpush.bf16.msra.mxu2 %v520_v6  ;;  %v526_v15 = vld [vmem:[%s690_s1 + $0xe0] sm:$0xff] }
   0x9   :  { %329 = vmatpush.bf16.msra.mxu3 %v528_v7  ;;  %v22_v16 = vld [vmem:[%s689_s0] sm:$0xf] }
   0xa   :  { %291 = vmatpush.bf16.msra.mxu0 %v503_v8  ;;  %88 = vst [vmem:[#allocation1] ss:$9 sm:$0xff] %v22_v16 }
   0xb   :  { %304 = vmatpush.bf16.msra.mxu1 %v511_v9 }
   0xc   :  { %317 = vmatpush.bf16.msra.mxu2 %v519_v10 }
   0xd   :  { %330 = vmatpush.bf16.msra.mxu3 %v527_v11 }
   0xe   :  { %8 = vsyncpa [#allocation4], 0  ;;  %292 = vmatpush.bf16.msra.mxu0 %v502_v12  ;;  %v501_v17 = vld [vmem:[%s690_s1 + $0x18] sm:$0xff]  ;;  %v500_v21 = vld [vmem:[%s690_s1 + $0x10] sm:$0xff]  ;;  %vm19_vm0 = vcmask 74752   ;;  %v559_v37 = vmov 0.0  }
   0xf   :  { %305 = vmatpush.bf16.msra.mxu1 %v510_v13  ;;  %v509_v18 = vld [vmem:[%s690_s1 + $0x58] sm:$0xff]  ;;  %v508_v22 = vld [vmem:[%s690_s1 + $0x50] sm:$0xff]  ;;  %v499_v25 = vld [vmem:[%s690_s1 + $0x8] sm:$0xff]  ;;  %20 = vst.msk [vmem:[#allocation2] sm:$0x3] %vm19_vm0, %v559_v37  ;;  %s560_s24 = smov [#allocation3]  }
  0x10   :  { %318 = vmatpush.bf16.msra.mxu2 %v518_v14  ;;  %v517_v19 = vld [vmem:[%s690_s1 + $0x98] sm:$0xff]  ;;  %v516_v23 = vld [vmem:[%s690_s1 + $0x90] sm:$0xff]  ;;  %v507_v26 = vld [vmem:[%s690_s1 + $0x48] sm:$0xff]  ;;  %s359_s0 = sshll.u32 %s560_s24, 4  ;;  %s361_s27 = sshll.u32 %s692_s3, 4  ;;  %s360_s0 = int_to_ptr.vmem [resolvable:$true] %s359_s0  ;;  %s362_s27 = int_to_ptr.hbm [resolvable:$true] %s361_s27 }
  0x11   :  { %331 = vmatpush.bf16.msra.mxu3 %v526_v15  ;;  %v525_v20 = vld [vmem:[%s690_s1 + $0xd8] sm:$0xff]  ;;  %v524_v24 = vld [vmem:[%s690_s1 + $0xd0] sm:$0xff]  ;;  %v515_v27 = vld [vmem:[%s690_s1 + $0x88] sm:$0xff] }
  0x12   :  { %293 = vmatpush.bf16.msra.mxu0 %v501_v17  ;;  %v523_v28 = vld [vmem:[%s690_s1 + $0xc8] sm:$0xff]  ;;  %v498_v29 = vld [vmem:[%s690_s1] sm:$0xff]  ;;  %v91_v35 = vld [vmem:[#allocation1 + $0x12] sm:$0xff] }
  0x13   :  { %306 = vmatpush.bf16.msra.mxu1 %v509_v18  ;;  %v506_v30 = vld [vmem:[%s690_s1 + $0x40] sm:$0xff]  ;;  %v90_v34 = vld [vmem:[#allocation1 + $0x9] sm:$0xff] }
  0x14   :  { %319 = vmatpush.bf16.msra.mxu2 %v517_v19  ;;  %v514_v31 = vld [vmem:[%s690_s1 + $0x80] sm:$0xff] }
  0x15   :  { %332 = vmatpush.bf16.msra.mxu3 %v525_v20  ;;  %v522_v32 = vld [vmem:[%s690_s1 + $0xc0] sm:$0xff] }
  0x16   :  { %294 = vmatpush.bf16.msra.mxu0 %v500_v21  ;;  %v89_v33 = vld [vmem:[#allocation1] sm:$0xff]  ;;  %v21_v46 = vld [vmem:[#allocation2] sm:$0x3] }
  0x17   :  { %307 = vmatpush.bf16.msra.mxu1 %v508_v22  ;;  %v92_v36 = vld [vmem:[#allocation1 + $0x1b] sm:$0xff] }
  0x18   :  { %320 = vmatpush.bf16.msra.mxu2 %v516_v23  ;;  %v532_v51 = vld [vmem:[%s691_s2] ss:$0 sm:$0xff] }
  0x19   :  { %333 = vmatpush.bf16.msra.mxu3 %v524_v24 }
  0x1a   :  { %295 = vmatpush.bf16.msra.mxu0 %v499_v25 }
  0x1b   :  { %308 = vmatpush.bf16.msra.mxu1 %v507_v26 }
  0x1c   :  { %321 = vmatpush.bf16.msra.mxu2 %v515_v27 }
  0x1d   :  { %334 = vmatpush.bf16.msra.mxu3 %v523_v28 }
  0x1e   :  { %296 = vmatpush.bf16.msra.mxu0 %v498_v29 }
  0x1f   :  { %309 = vmatpush.bf16.msra.mxu1 %v506_v30 }
  0x20   :  { %322 = vmatpush.bf16.msra.mxu2 %v514_v31 }
  0x21   :  { %335 = vmatpush.bf16.msra.mxu3 %v522_v32  ;;  %297 = vmatmul.bf16.vlgmr.msra.gmra.mxu0 %v89_v33 }
  0x22   :  { %310 = vmatmul.bf16.vlgmr.msra.gmra.mxu1 %v90_v34 }
  0x23   :  { %323 = vmatmul.bf16.vlgmr.msra.gmra.mxu2 %v91_v35 }
  0x24   :  { %336 = vmatmul.bf16.vlgmr.msra.gmra.mxu3 %v92_v36 }
  0x9e   :  { %v298_v38 = vpop.f32.mrf.mxu0 }
  0x9f   :  { %v311_v39 = vpop.f32.mrf.mxu1 }
  0xa0   :  { %v312_v40 = vadd.f32 %v311_v39, %v298_v38 }
  0xa6   :  { %v324_v41 = vpop.f32.mrf.mxu2  ;;  %v300_v44 = vpop.f32.mrf.mxu0 }
  0xa7   :  { %v337_v42 = vpop.f32.mrf.mxu3  ;;  %v325_v43 = vadd.f32 %v324_v41, %v312_v40  ;;  %v313_v45 = vpop.f32.mrf.mxu1 }
  0xa9   :  { %v338_v47 = vadd.f32 %v337_v42, %v325_v43 }
  0xab   :  { %v341_v48 = vadd.f32 %v338_v47, %v21_v46 }
  0xad   :  { %343 = vst.msk [vmem:[#allocation2] sm:$0x3] %vm19_vm0, %v341_v48 }
  0xae   :  { %v326_v49 = vpop.f32.mrf.mxu2 }
  0xaf   :  { %v339_v50 = vpop.f32.mrf.mxu3 }
  0xb4   :  { %v347_v52 = vld [vmem:[#allocation2] sm:$0x3] }
  0xb5   :  { %v352_v53 = vadd.f32 %v532_v51, %v347_v52 }
  0xb7   :  { %353 = vst.msk [vmem:[#allocation3] sm:$0x3] %vm19_vm0, %v352_v53 }
  0xb8   :  { %364 = dma.vmem_to_hbm [thread:$0]  %s360_s0, 32, %s362_s27, [#allocation4]  }
  0xb9   :  { %557 = dma.done.wait [#allocation4], 32  }
  0xba   :  { %558 = vsyncadd [#allocation4], 4294967264 }
  0xbb   :  { %369 = vsyncpa [#allocation4], 1 }

</bundles_post_ra>
